<compile_context>
chip_gen: v7x
topology: tpu7x:2x2x1
jax: 0.10.0
libtpu: 0.0.40
codegen_flags: <defaults>
</compile_context>

<pallas_src>
import functools

import jax
import jax.numpy as jnp
from jax.experimental import pallas as pl
from jax.experimental.pallas import tpu as pltpu

NEG_SLOPE = 0.2
BN_EPS = 1e-5
LANES = 128
# Max bytes of f32 pre-BN scratch we keep resident in VMEM for the fused path.
FUSED_SCRATCH_BUDGET = 8 * 1024 * 1024


# ----------------------------- Pallas kernels -----------------------------
def _conv_leaky_kernel(a_ref, b_ref, o_ref):
    """Conv-as-GEMM with fused LeakyReLU(0.2) epilogue (layer 1, no BN)."""
    y = jnp.dot(a_ref[...], b_ref[...], preferred_element_type=jnp.float32)
    y = jnp.where(y >= 0, y, NEG_SLOPE * y)
    o_ref[...] = y.astype(o_ref.dtype)


def _conv_bn_leaky_kernel(total_rows, a_ref, b_ref, gamma_ref, beta_ref,
                          o_ref, y_scr, sum_scr, ssq_scr):
    """Fused Conv-GEMM + BatchNorm(batch stats) + LeakyReLU, two-pass grid.

    grid = (2, n_tiles).  Phase 0: GEMM each row tile into the VMEM scratch
    and accumulate per-channel sum / sum-of-squares.  Phase 1: compute the BN
    affine from the (now complete) stats and write the LeakyReLU'd result.
    The pre-BN activation never leaves VMEM.
    """
    phase = pl.program_id(0)
    i = pl.program_id(1)

    @pl.when(phase == 0)
    def _gemm_and_stats():
        @pl.when(i == 0)
        def _init():
            sum_scr[...] = jnp.zeros_like(sum_scr)
            ssq_scr[...] = jnp.zeros_like(ssq_scr)

        y = jnp.dot(a_ref[...], b_ref[...], preferred_element_type=jnp.float32)
        y_scr[i] = y
        sum_scr[...] += jnp.sum(y, axis=0, keepdims=True)
        ssq_scr[...] += jnp.sum(y * y, axis=0, keepdims=True)

    @pl.when(phase == 1)
    def _bn_leaky():
        inv_n = 1.0 / total_rows
        mean = sum_scr[...] * inv_n
        var = jnp.maximum(ssq_scr[...] * inv_n - mean * mean, 0.0)
        scale = gamma_ref[...] * jax.lax.rsqrt(var + BN_EPS)
        shift = beta_ref[...] - mean * scale
        z = y_scr[i] * scale + shift
        o_ref[...] = jnp.where(z >= 0, z, NEG_SLOPE * z).astype(o_ref.dtype)


def _conv_stats_kernel(a_ref, b_ref, y_ref, psum_ref, pssq_ref):
    """Fallback (large M): GEMM, bf16 y, per-tile partial stats ("parallel")."""
    y = jnp.dot(a_ref[...], b_ref[...], preferred_element_type=jnp.float32)
    y_ref[...] = y.astype(y_ref.dtype)
    s = jnp.sum(y, axis=0, keepdims=True)
    q = jnp.sum(y * y, axis=0, keepdims=True)
    psum_ref[...] = jnp.broadcast_to(s, psum_ref.shape)
    pssq_ref[...] = jnp.broadcast_to(q, pssq_ref.shape)


def _affine_leaky_kernel(x_ref, scale_ref, shift_ref, o_ref):
    """Fallback: BatchNorm affine (precomputed scale/shift) + LeakyReLU(0.2)."""
    y = x_ref[...].astype(jnp.float32) * scale_ref[...] + shift_ref[...]
    o_ref[...] = jnp.where(y >= 0, y, NEG_SLOPE * y).astype(o_ref.dtype)


def _final_reduce_kernel(x_ref, w_ref, o_ref):
    """Layer 5: (N, K) x (1, K) dot-reduce on the VPU/XLU + sigmoid."""
    x = x_ref[...].astype(jnp.float32)
    w = w_ref[...].astype(jnp.float32)
    s = jnp.sum(x * w, axis=1, keepdims=True)
    o_ref[...] = jax.nn.sigmoid(s)


# ------------------------------ call wrappers ------------------------------
def _pick_tm(m, row_bytes, cap_bytes=2 * 1024 * 1024, cap_rows=2048):
    """Largest row tile (divisor of m, multiple of 8) within a VMEM byte cap.

    2 MiB/block keeps double-buffered blocks well under every chip's default
    scoped-VMEM limit (16 MiB v5e, 32 MiB v6e/v7x)."""
    cap = min(cap_rows, max(8, cap_bytes // max(row_bytes, 1)))
    if m <= cap:
        return m
    best = 0
    t = 8
    while t <= cap:
        if m % t == 0:
            best = t
        t += 8
    if best:
        return best
    # TODO(synk): pad M to a tile multiple (zero rows are stats-neutral)
    # instead of falling back to the full panel for pathological row counts.
    return m


def conv_leaky(cols, w_kc):
    """cols (M, K) bf16, w_kc (K, Cp) bf16 -> LeakyReLU(cols @ w) bf16 (M, Cp)."""
    M, K = cols.shape
    Cp = w_kc.shape[1]
    tm = _pick_tm(M, K * 2)
    return pl.pallas_call(
        _conv_leaky_kernel,
        out_shape=jax.ShapeDtypeStruct((M, Cp), jnp.bfloat16),
        grid=(M // tm,),
        in_specs=[
            pl.BlockSpec((tm, K), lambda i: (i, 0)),
            pl.BlockSpec((K, Cp), lambda i: (0, 0)),
        ],
        out_specs=pl.BlockSpec((tm, Cp), lambda i: (i, 0)),
        compiler_params=pltpu.CompilerParams(dimension_semantics=("parallel",)),
        cost_estimate=pl.CostEstimate(
            flops=2 * M * K * Cp,
            transcendentals=0,
            bytes_accessed=2 * (M * K + K * Cp + M * Cp)),
    )(cols, w_kc)


def _conv_bn_leaky_fused(cols, w_kc, gamma, beta, *, tm):
    """Single-call fused Conv+BN+LeakyReLU (pre-BN activation VMEM-resident)."""
    M, K = cols.shape
    Cp = w_kc.shape[1]
    n_tiles = M // tm
    kernel = functools.partial(_conv_bn_leaky_kernel, float(M))
    return pl.pallas_call(
        kernel,
        out_shape=jax.ShapeDtypeStruct((M, Cp), jnp.bfloat16),
        grid=(2, n_tiles),
        in_specs=[
            # phase 0 walks the row tiles; phase 1 pins the last tile (no
            # re-fetch, the kernel does not read cols in phase 1).
            pl.BlockSpec((tm, K),
                         lambda p, i: (i * (1 - p) + (n_tiles - 1) * p, 0)),
            pl.BlockSpec((K, Cp), lambda p, i: (0, 0)),
            pl.BlockSpec((1, Cp), lambda p, i: (0, 0)),
            pl.BlockSpec((1, Cp), lambda p, i: (0, 0)),
        ],
        # phase 0 parks on block 0 (never written); phase 1 writes tile i.
        out_specs=pl.BlockSpec((tm, Cp), lambda p, i: (p * i, 0)),
        scratch_shapes=[
            pltpu.VMEM((n_tiles, tm, Cp), jnp.float32),   # pre-BN activation
            pltpu.VMEM((1, Cp), jnp.float32),             # per-channel sum
            pltpu.VMEM((1, Cp), jnp.float32),             # per-channel sum-sq
        ],
        compiler_params=pltpu.CompilerParams(
            dimension_semantics=("arbitrary", "arbitrary")),
        cost_estimate=pl.CostEstimate(
            flops=2 * M * K * Cp + 8 * M * Cp,
            transcendentals=0,
            bytes_accessed=2 * (M * K + K * Cp) + 2 * M * Cp + 8 * Cp),
    )(cols, w_kc, gamma, beta)


def conv_stats(cols, w_kc, *, tm):
    """Fallback: bf16 pre-BN y + per-tile partial stats ('parallel' grid)."""
    M, K = cols.shape
    Cp = w_kc.shape[1]
    n_tiles = M // tm
    return pl.pallas_call(
        _conv_stats_kernel,
        out_shape=(
            jax.ShapeDtypeStruct((M, Cp), jnp.bfloat16),
            jax.ShapeDtypeStruct((n_tiles, 8, Cp), jnp.float32),
            jax.ShapeDtypeStruct((n_tiles, 8, Cp), jnp.float32),
        ),
        grid=(n_tiles,),
        in_specs=[
            pl.BlockSpec((tm, K), lambda i: (i, 0)),
            pl.BlockSpec((K, Cp), lambda i: (0, 0)),
        ],
        out_specs=(
            pl.BlockSpec((tm, Cp), lambda i: (i, 0)),
            pl.BlockSpec((1, 8, Cp), lambda i: (i, 0, 0)),
            pl.BlockSpec((1, 8, Cp), lambda i: (i, 0, 0)),
        ),
        compiler_params=pltpu.CompilerParams(dimension_semantics=("parallel",)),
        cost_estimate=pl.CostEstimate(
            flops=2 * M * K * Cp + 3 * M * Cp,
            transcendentals=0,
            bytes_accessed=2 * (M * K + K * Cp) + 2 * M * Cp + 64 * n_tiles * Cp),
    )(cols, w_kc)


def affine_leaky(y, scale, shift):
    """Fallback: y (M, Cp) bf16, per-channel scale/shift -> bf16 (M, Cp)."""
    M, Cp = y.shape
    tm = _pick_tm(M, Cp * 2)
    return pl.pallas_call(
        _affine_leaky_kernel,
        out_shape=jax.ShapeDtypeStruct((M, Cp), jnp.bfloat16),
        grid=(M // tm,),
        in_specs=[
            pl.BlockSpec((tm, Cp), lambda i: (i, 0)),
            pl.BlockSpec((1, Cp), lambda i: (0, 0)),
            pl.BlockSpec((1, Cp), lambda i: (0, 0)),
        ],
        out_specs=pl.BlockSpec((tm, Cp), lambda i: (i, 0)),
        compiler_params=pltpu.CompilerParams(dimension_semantics=("parallel",)),
        cost_estimate=pl.CostEstimate(
            flops=4 * M * Cp,
            transcendentals=0,
            bytes_accessed=4 * M * Cp + 8 * Cp),
    )(y, scale.reshape(1, Cp).astype(jnp.float32),
      shift.reshape(1, Cp).astype(jnp.float32))


def conv_bn_leaky(cols, w_kc, gamma, beta):
    """Conv(k=4,s=2,p=1) + BatchNorm2d(batch stats) + LeakyReLU(0.2)."""
    M, K = cols.shape
    Cp = w_kc.shape[1]
    tm = _pick_tm(M, K * 2)
    if M * Cp * 4 <= FUSED_SCRATCH_BUDGET:
        return _conv_bn_leaky_fused(cols, w_kc, gamma, beta, tm=tm)
    # Large-M fallback: bf16 HBM round trip for y, tiny stats reduction in JAX.
    y, psum, pssq = conv_stats(cols, w_kc, tm=tm)
    ysum = psum[:, 0, :].sum(axis=0)
    yssq = pssq[:, 0, :].sum(axis=0)
    mean = ysum / M
    var = jnp.maximum(yssq / M - mean * mean, 0.0)   # biased (training-mode BN)
    scale = gamma[0] * jax.lax.rsqrt(var + BN_EPS)
    shift = beta[0] - mean * scale
    return affine_leaky(y, scale, shift)


def final_reduce(x, w):
    """x (N, K) bf16, w (1, K) bf16 -> sigmoid(sum(x * w, axis=1)) f32 (N, 1)."""
    N, K = x.shape
    return pl.pallas_call(
        _final_reduce_kernel,
        out_shape=jax.ShapeDtypeStruct((N, 1), jnp.float32),
        grid=(1,),
        in_specs=[
            pl.BlockSpec((N, K), lambda i: (0, 0)),
            pl.BlockSpec((1, K), lambda i: (0, 0)),
        ],
        out_specs=pl.BlockSpec((N, 1), lambda i: (0, 0)),
        cost_estimate=pl.CostEstimate(
            flops=2 * N * K,
            transcendentals=N,
            bytes_accessed=2 * (N * K + K) + 4 * N),
    )(x, w)


# ------------------------------- JAX glue ----------------------------------
def _pad_to(n, mult=LANES):
    return ((n + mult - 1) // mult) * mult


def im2col_nhwc(x, k, s, p):
    """x: (N, H, W, C) -> cols (N*Ho*Wo, k*k*C) with K order (kh, kw, Cin)."""
    N, H, W, C = x.shape
    if p:
        x = jnp.pad(x, ((0, 0), (p, p), (p, p), (0, 0)))
    Ho = (H + 2 * p - k) // s + 1
    Wo = (W + 2 * p - k) // s + 1
    patches = [x[:, i:i + s * Ho:s, j:j + s * Wo:s, :]
               for i in range(k) for j in range(k)]          # each (N,Ho,Wo,C)
    cols = jnp.stack(patches, axis=3)                        # (N,Ho,Wo,k*k,C)
    return cols.reshape(N * Ho * Wo, k * k * C), (N, Ho, Wo)


def _prep_weight(w, cout_pad):
    """PyTorch (Cout,Cin,kh,kw) -> bf16 (kh*kw*Cin, Cout_pad); real Cin kept."""
    cout, cin, kh, kw = w.shape
    w = jnp.pad(w, ((0, cout_pad - cout), (0, 0), (0, 0), (0, 0)))
    return (w.transpose(2, 3, 1, 0)
             .reshape(kh * kw * cin, cout_pad)
             .astype(jnp.bfloat16))


def prepare_params(params, feature_maps):
    """One-time weight packing (hoisted out of the per-forward path)."""
    fm = feature_maps
    couts = (fm, fm * 2, fm * 4, fm * 8)
    cps = tuple(_pad_to(c) for c in couts)
    packed = {"wk1": _prep_weight(params["w1"], cout_pad=cps[0])}
    for li, cout, cp in zip((2, 3, 4), couts[1:], cps[1:]):
        packed[f"wk{li}"] = _prep_weight(params[f"w{li}"], cout_pad=cp)
        packed[f"gamma{li}"] = jnp.pad(params[f"gamma{li}"], (0, cp - cout)
                                       ).reshape(1, cp).astype(jnp.float32)
        packed[f"beta{li}"] = jnp.pad(params[f"beta{li}"], (0, cp - cout)
                                      ).reshape(1, cp).astype(jnp.float32)
    # layer 5: (1, Cin4, 4, 4) -> (1, 4*4*Cin4), K order (kh, kw, cin).
    packed["wk5"] = (params["w5"].transpose(0, 2, 3, 1)
                     .reshape(1, -1).astype(jnp.bfloat16))
    return packed


def discriminator_forward(img, packed, *, feature_maps):
    fm = feature_maps
    couts = (fm, fm * 2, fm * 4, fm * 8)
    cps = tuple(_pad_to(c) for c in couts)

    # Single NCHW -> NHWC transpose at the module boundary; bf16 activations.
    x = jnp.transpose(img, (0, 2, 3, 1)).astype(jnp.bfloat16)

    # block 1: Conv(k=4,s=2,p=1) + LeakyReLU(0.2) fused in the GEMM epilogue.
    cols, nhw = im2col_nhwc(x, 4, 2, 1)
    x = conv_leaky(cols, packed["wk1"]).reshape(*nhw, cps[0])

    # blocks 2-4: fused Conv + BatchNorm2d(batch stats) + LeakyReLU.
    # Only the REAL channels feed the next contraction (padding not carried).
    for li, cin_real, cp_out in zip((2, 3, 4), couts[:3], cps[1:]):
        cols, nhw = im2col_nhwc(x[..., :cin_real], 4, 2, 1)
        x = conv_bn_leaky(cols, packed[f"wk{li}"], packed[f"gamma{li}"],
                          packed[f"beta{li}"]).reshape(*nhw, cp_out)

    # block 5: Conv(k=4,s=1,p=0) over the 4x4 map == dot-reduce + Sigmoid.
    n = x.shape[0]
    x5 = x[..., :couts[3]].reshape(n, -1)       # (N, 4*4*Cin4), real channels
    out = final_reduce(x5, packed["wk5"])
    return out                                  # == validity.view(-1, 1)


def init_params(key, img_channels, feature_maps):
    fm = feature_maps
    conv_shapes = {
        "w1": (fm, img_channels, 4, 4),
        "w2": (fm * 2, fm, 4, 4),
        "w3": (fm * 4, fm * 2, 4, 4),
        "w4": (fm * 8, fm * 4, 4, 4),
        "w5": (1, fm * 8, 4, 4),
    }
    params = {}
    for k_, (name, shp) in zip(jax.random.split(key, len(conv_shapes)),
                               conv_shapes.items()):
        # DCGAN-style init N(0, 0.02); conv layers have bias=False.
        params[name] = 0.02 * jax.random.normal(k_, shp, jnp.float32)
    for li, mult in zip((2, 3, 4), (2, 4, 8)):
        params[f"gamma{li}"] = jnp.ones((fm * mult,), jnp.float32)   # BN weight
        params[f"beta{li}"] = jnp.zeros((fm * mult,), jnp.float32)   # BN bias
    return params


if __name__ == "__main__":
    key = jax.random.PRNGKey(0)
    k_img, k_par = jax.random.split(key)

    # DCGAN discriminator geometry requires 64x64 input; batch/channels/fm small.
    batch, img_channels, feature_maps, spatial = 2, 3, 16, 64
    img = jax.random.normal(k_img, (batch, img_channels, spatial, spatial),
                            jnp.float32)
    params = init_params(k_par, img_channels, feature_maps)
    packed = prepare_params(params, feature_maps)     # one-time weight packing

    fwd = jax.jit(functools.partial(discriminator_forward,
                                    feature_maps=feature_maps))
    out = jax.block_until_ready(fwd(img, packed))

    assert out.shape == (batch, 1), out.shape
    assert bool(jnp.all((out >= 0.0) & (out <= 1.0)))  # sigmoid output range
    print("KERNEL_OK")
</pallas_src>

<mosaic_0001>
module attributes {stable_mosaic.version = 11 : i64} {
  func.func @_conv_leaky_kernel(%arg0: i32, %arg1: memref<2048x48xbf16, #tpu.memory_space<vmem>>, %arg2: memref<48x128xbf16, #tpu.memory_space<vmem>>, %arg3: memref<2048x128xbf16, #tpu.memory_space<vmem>>) attributes {dimension_semantics = [#tpu.dimension_semantics<parallel>], iteration_bounds = array<i64: 1>, scalar_prefetch = 0 : i64, scratch_operands = 0 : i64, tpu.core_type = #tpu.core_type<tc>, window_params = [{transform_indices = @transform_0, window_bounds = array<i64: 2048, 48>}, {pipeline_mode = #tpu.pipeline_mode<synchronous>, transform_indices = @transform_1, window_bounds = array<i64: 48, 128>}, {transform_indices = @transform_2, window_bounds = array<i64: 2048, 128>}]} {
    %c0 = arith.constant 0 : index
    %c0_0 = arith.constant 0 : index
    %0 = vector.load %arg1[%c0, %c0_0] : memref<2048x48xbf16, #tpu.memory_space<vmem>>, vector<2048x48xbf16>
    %c0_1 = arith.constant 0 : index
    %c0_2 = arith.constant 0 : index
    %1 = vector.load %arg2[%c0_1, %c0_2] : memref<48x128xbf16, #tpu.memory_space<vmem>>, vector<48x128xbf16>
    %cst = arith.constant dense<0.000000e+00> : vector<2048x128xf32>
    %2 = tpu.matmul %0, %1, %cst {dimension_numbers = #tpu.dot_dimension_numbers<[1], [0], [0], [1], [0, 0, 1, 1], [], []>} : vector<2048x48xbf16>, vector<48x128xbf16>, vector<2048x128xf32> -> vector<2048x128xf32>
    %cst_3 = arith.constant 0.000000e+00 : f32
    %3 = vector.broadcast %cst_3 : f32 to vector<2048x128xf32>
    %4 = arith.cmpf oge, %2, %3 : vector<2048x128xf32>
    %cst_4 = arith.constant 2.000000e-01 : f32
    %5 = vector.broadcast %cst_4 : f32 to vector<2048x128xf32>
    %6 = arith.mulf %5, %2 : vector<2048x128xf32>
    %7 = arith.select %4, %2, %6 : vector<2048x128xi1>, vector<2048x128xf32>
    %8 = arith.truncf %7 : vector<2048x128xf32> to vector<2048x128xbf16>
    %c0_5 = arith.constant 0 : index
    %c0_6 = arith.constant 0 : index
    %9 = vector.load %arg3[%c0_5, %c0_6] : memref<2048x128xbf16, #tpu.memory_space<vmem>>, vector<2048x128xbf16>
    tpu.vector_store %arg3[%c0_5, %c0_6], %8 {strides = array<i32>} : memref<2048x128xbf16, #tpu.memory_space<vmem>>, vector<2048x128xbf16>,
    return
  }
  func.func @transform_0(%arg0: i32) -> (i32, i32) {
    %c0_i32 = arith.constant 0 : i32
    %c0_i32_0 = arith.constant 0 : i32
    return %arg0, %c0_i32 : i32, i32
  }
  func.func @transform_1(%arg0: i32) -> (i32, i32) {
    %c0_i32 = arith.constant 0 : i32
    %c0_i32_0 = arith.constant 0 : i32
    %c0_i32_1 = arith.constant 0 : i32
    return %c0_i32, %c0_i32_0 : i32, i32
  }
  func.func @transform_2(%arg0: i32) -> (i32, i32) {
    %c0_i32 = arith.constant 0 : i32
    %c0_i32_0 = arith.constant 0 : i32
    return %arg0, %c0_i32 : i32, i32
  }
}

module attributes {stable_mosaic.version = 11 : i64} {
  func.func @_conv_bn_leaky_kernel(%arg0: i32, %arg1: i32, %arg2: memref<512x256xbf16, #tpu.memory_space<vmem>>, %arg3: memref<256x128xbf16, #tpu.memory_space<vmem>>, %arg4: memref<1x128xf32, #tpu.memory_space<vmem>>, %arg5: memref<1x128xf32, #tpu.memory_space<vmem>>, %arg6: memref<512x128xbf16, #tpu.memory_space<vmem>>, %arg7: memref<1x512x128xf32, #tpu.memory_space<vmem>>, %arg8: memref<1x128xf32, #tpu.memory_space<vmem>>, %arg9: memref<1x128xf32, #tpu.memory_space<vmem>>) attributes {dimension_semantics = [#tpu.dimension_semantics<arbitrary>, #tpu.dimension_semantics<arbitrary>], iteration_bounds = array<i64: 2, 1>, scalar_prefetch = 0 : i64, scratch_operands = 3 : i64, tpu.core_type = #tpu.core_type<tc>, window_params = [{transform_indices = @transform_0, window_bounds = array<i64: 512, 256>}, {pipeline_mode = #tpu.pipeline_mode<synchronous>, transform_indices = @transform_1, window_bounds = array<i64: 256, 128>}, {pipeline_mode = #tpu.pipeline_mode<synchronous>, transform_indices = @transform_2, window_bounds = array<i64: 1, 128>}, {pipeline_mode = #tpu.pipeline_mode<synchronous>, transform_indices = @transform_3, window_bounds = array<i64: 1, 128>}, {transform_indices = @transform_4, window_bounds = array<i64: 512, 128>}]} {
    %c0_i32 = arith.constant 0 : i32
    %0 = arith.cmpi eq, %arg0, %c0_i32 : i32
    %1 = arith.extui %0 : i1 to i32
    %c0_i32_0 = arith.constant 0 : i32
    %2 = arith.cmpi ne, %1, %c0_i32_0 : i32
    scf.if %2 {
      %c0_i32_2 = arith.constant 0 : i32
      %6 = arith.cmpi eq, %arg1, %c0_i32_2 : i32
      %7 = arith.extui %6 : i1 to i32
      %c0_i32_3 = arith.constant 0 : i32
      %8 = arith.cmpi ne, %7, %c0_i32_3 : i32
      scf.if %8 {
        %cst_19 = arith.constant 0.000000e+00 : f32
        %27 = vector.broadcast %cst_19 : f32 to vector<1x128xf32>
        %c0_20 = arith.constant 0 : index
        %c0_21 = arith.constant 0 : index
        %28 = vector.load %arg8[%c0_20, %c0_21] : memref<1x128xf32, #tpu.memory_space<vmem>>, vector<1x128xf32>
        tpu.vector_store %arg8[%c0_20, %c0_21], %27 {strides = array<i32>} : memref<1x128xf32, #tpu.memory_space<vmem>>, vector<1x128xf32>,
        %cst_22 = arith.constant 0.000000e+00 : f32
        %29 = vector.broadcast %cst_22 : f32 to vector<1x128xf32>
        %c0_23 = arith.constant 0 : index
        %c0_24 = arith.constant 0 : index
        %30 = vector.load %arg9[%c0_23, %c0_24] : memref<1x128xf32, #tpu.memory_space<vmem>>, vector<1x128xf32>
        tpu.vector_store %arg9[%c0_23, %c0_24], %29 {strides = array<i32>} : memref<1x128xf32, #tpu.memory_space<vmem>>, vector<1x128xf32>,
      } else {
      }
      %c0 = arith.constant 0 : index
      %c0_4 = arith.constant 0 : index
      %9 = vector.load %arg2[%c0, %c0_4] : memref<512x256xbf16, #tpu.memory_space<vmem>>, vector<512x256xbf16>
      %c0_5 = arith.constant 0 : index
      %c0_6 = arith.constant 0 : index
      %10 = vector.load %arg3[%c0_5, %c0_6] : memref<256x128xbf16, #tpu.memory_space<vmem>>, vector<256x128xbf16>
      %cst = arith.constant dense<0.000000e+00> : vector<512x128xf32>
      %11 = tpu.matmul %9, %10, %cst {dimension_numbers = #tpu.dot_dimension_numbers<[1], [0], [0], [1], [0, 0, 1, 1], [], []>} : vector<512x256xbf16>, vector<256x128xbf16>, vector<512x128xf32> -> vector<512x128xf32>
      %12 = arith.index_cast %arg1 : i32 to index
      %c0_7 = arith.constant 0 : index
      %c0_8 = arith.constant 0 : index
      %13 = vector.load %arg7[%12, %c0_7, %c0_8] : memref<1x512x128xf32, #tpu.memory_space<vmem>>, vector<1x512x128xf32>
      %14 = vector.shape_cast %13 : vector<1x512x128xf32> to vector<512x128xf32>
      %15 = vector.shape_cast %11 : vector<512x128xf32> to vector<1x512x128xf32>
      tpu.vector_store %arg7[%12, %c0_7, %c0_8], %15 {strides = array<i32>} : memref<1x512x128xf32, #tpu.memory_space<vmem>>, vector<1x512x128xf32>,
      %c0_9 = arith.constant 0 : index
      %c0_10 = arith.constant 0 : index
      %16 = vector.load %arg8[%c0_9, %c0_10] : memref<1x128xf32, #tpu.memory_space<vmem>>, vector<1x128xf32>
      %cst_11 = arith.constant dense<0.000000e+00> : vector<128xf32>
      %17 = vector.multi_reduction <add>, %11, %cst_11 [0] : vector<512x128xf32> to vector<128xf32>
      %18 = vector.shape_cast %17 : vector<128xf32> to vector<1x128xf32>
      %19 = arith.addf %16, %18 : vector<1x128xf32>
      %c0_12 = arith.constant 0 : index
      %c0_13 = arith.constant 0 : index
      %20 = vector.load %arg8[%c0_12, %c0_13] : memref<1x128xf32, #tpu.memory_space<vmem>>, vector<1x128xf32>
      tpu.vector_store %arg8[%c0_12, %c0_13], %19 {strides = array<i32>} : memref<1x128xf32, #tpu.memory_space<vmem>>, vector<1x128xf32>,
      %c0_14 = arith.constant 0 : index
      %c0_15 = arith.constant 0 : index
      %21 = vector.load %arg9[%c0_14, %c0_15] : memref<1x128xf32, #tpu.memory_space<vmem>>, vector<1x128xf32>
      %22 = arith.mulf %11, %11 : vector<512x128xf32>
      %cst_16 = arith.constant dense<0.000000e+00> : vector<128xf32>
      %23 = vector.multi_reduction <add>, %22, %cst_16 [0] : vector<512x128xf32> to vector<128xf32>
      %24 = vector.shape_cast %23 : vector<128xf32> to vector<1x128xf32>
      %25 = arith.addf %21, %24 : vector<1x128xf32>
      %c0_17 = arith.constant 0 : index
      %c0_18 = arith.constant 0 : index
      %26 = vector.load %arg9[%c0_17, %c0_18] : memref<1x128xf32, #tpu.memory_space<vmem>>, vector<1x128xf32>
      tpu.vector_store %arg9[%c0_17, %c0_18], %25 {strides = array<i32>} : memref<1x128xf32, #tpu.memory_space<vmem>>, vector<1x128xf32>,
    } else {
    }
    %c1_i32 = arith.constant 1 : i32
    %3 = arith.cmpi eq, %arg0, %c1_i32 : i32
    %4 = arith.extui %3 : i1 to i32
    %c0_i32_1 = arith.constant 0 : i32
    %5 = arith.cmpi ne, %4, %c0_i32_1 : i32
    scf.if %5 {
      %c0 = arith.constant 0 : index
      %c0_2 = arith.constant 0 : index
      %6 = vector.load %arg8[%c0, %c0_2] : memref<1x128xf32, #tpu.memory_space<vmem>>, vector<1x128xf32>
      %cst = arith.constant 0.001953125 : f32
      %7 = vector.broadcast %cst : f32 to vector<1x128xf32>
      %8 = arith.mulf %6, %7 : vector<1x128xf32>
      %c0_3 = arith.constant 0 : index
      %c0_4 = arith.constant 0 : index
      %9 = vector.load %arg9[%c0_3, %c0_4] : memref<1x128xf32, #tpu.memory_space<vmem>>, vector<1x128xf32>
      %cst_5 = arith.constant 0.001953125 : f32
      %10 = vector.broadcast %cst_5 : f32 to vector<1x128xf32>
      %11 = arith.mulf %9, %10 : vector<1x128xf32>
      %12 = arith.mulf %8, %8 : vector<1x128xf32>
      %13 = arith.subf %11, %12 : vector<1x128xf32>
      %cst_6 = arith.constant 0.000000e+00 : f32
      %14 = vector.broadcast %cst_6 : f32 to vector<1x128xf32>
      %15 = arith.maximumf %13, %14 : vector<1x128xf32>
      %c0_7 = arith.constant 0 : index
      %c0_8 = arith.constant 0 : index
      %16 = vector.load %arg4[%c0_7, %c0_8] : memref<1x128xf32, #tpu.memory_space<vmem>>, vector<1x128xf32>
      %cst_9 = arith.constant 9.99999974E-6 : f32
      %17 = vector.broadcast %cst_9 : f32 to vector<1x128xf32>
      %18 = arith.addf %15, %17 : vector<1x128xf32>
      %19 = math.rsqrt %18 : vector<1x128xf32>
      %20 = arith.mulf %16, %19 : vector<1x128xf32>
      %c0_10 = arith.constant 0 : index
      %c0_11 = arith.constant 0 : index
      %21 = vector.load %arg5[%c0_10, %c0_11] : memref<1x128xf32, #tpu.memory_space<vmem>>, vector<1x128xf32>
      %22 = arith.mulf %8, %20 : vector<1x128xf32>
      %23 = arith.subf %21, %22 : vector<1x128xf32>
      %24 = arith.index_cast %arg1 : i32 to index
      %c0_12 = arith.constant 0 : index
      %c0_13 = arith.constant 0 : index
      %25 = vector.load %arg7[%24, %c0_12, %c0_13] : memref<1x512x128xf32, #tpu.memory_space<vmem>>, vector<1x512x128xf32>
      %26 = vector.shape_cast %25 : vector<1x512x128xf32> to vector<512x128xf32>
      %27 = vector.broadcast %20 : vector<1x128xf32> to vector<512x128xf32>
      %28 = arith.mulf %26, %27 : vector<512x128xf32>
      %29 = vector.broadcast %23 : vector<1x128xf32> to vector<512x128xf32>
      %30 = arith.addf %28, %29 : vector<512x128xf32>
      %cst_14 = arith.constant 0.000000e+00 : f32
      %31 = vector.broadcast %cst_14 : f32 to vector<512x128xf32>
      %32 = arith.cmpf oge, %30, %31 : vector<512x128xf32>
      %cst_15 = arith.constant 2.000000e-01 : f32
      %33 = vector.broadcast %cst_15 : f32 to vector<512x128xf32>
      %34 = arith.mulf %33, %30 : vector<512x128xf32>
      %35 = arith.select %32, %30, %34 : vector<512x128xi1>, vector<512x128xf32>
      %36 = arith.truncf %35 : vector<512x128xf32> to vector<512x128xbf16>
      %c0_16 = arith.constant 0 : index
      %c0_17 = arith.constant 0 : index
      %37 = vector.load %arg6[%c0_16, %c0_17] : memref<512x128xbf16, #tpu.memory_space<vmem>>, vector<512x128xbf16>
      tpu.vector_store %arg6[%c0_16, %c0_17], %36 {strides = array<i32>} : memref<512x128xbf16, #tpu.memory_space<vmem>>, vector<512x128xbf16>,
    } else {
    }
    return
  }
  func.func @transform_0(%arg0: i32, %arg1: i32) -> (i32, i32) {
    %c1_i32 = arith.constant 1 : i32
    %0 = arith.subi %c1_i32, %arg0 : i32
    %1 = arith.muli %arg1, %0 : i32
    %c0_i32 = arith.constant 0 : i32
    %2 = arith.muli %c0_i32, %arg0 : i32
    %3 = arith.addi %1, %2 : i32
    %c0_i32_0 = arith.constant 0 : i32
    %c0_i32_1 = arith.constant 0 : i32
    return %3, %c0_i32_0 : i32, i32
  }
  func.func @transform_1(%arg0: i32, %arg1: i32) -> (i32, i32) {
    %c0_i32 = arith.constant 0 : i32
    %c0_i32_0 = arith.constant 0 : i32
    %c0_i32_1 = arith.constant 0 : i32
    return %c0_i32, %c0_i32_0 : i32, i32
  }
  func.func @transform_2(%arg0: i32, %arg1: i32) -> (i32, i32) {
    %c0_i32 = arith.constant 0 : i32
    %c0_i32_0 = arith.constant 0 : i32
    %c0_i32_1 = arith.constant 0 : i32
    return %c0_i32, %c0_i32_0 : i32, i32
  }
  func.func @transform_3(%arg0: i32, %arg1: i32) -> (i32, i32) {
    %c0_i32 = arith.constant 0 : i32
    %c0_i32_0 = arith.constant 0 : i32
    %c0_i32_1 = arith.constant 0 : i32
    return %c0_i32, %c0_i32_0 : i32, i32
  }
  func.func @transform_4(%arg0: i32, %arg1: i32) -> (i32, i32) {
    %0 = arith.muli %arg0, %arg1 : i32
    %c0_i32 = arith.constant 0 : i32
    %c0_i32_0 = arith.constant 0 : i32
    return %0, %c0_i32 : i32, i32
  }
}

module attributes {stable_mosaic.version = 11 : i64} {
  func.func @_conv_bn_leaky_kernel(%arg0: i32, %arg1: i32, %arg2: memref<128x512xbf16, #tpu.memory_space<vmem>>, %arg3: memref<512x128xbf16, #tpu.memory_space<vmem>>, %arg4: memref<1x128xf32, #tpu.memory_space<vmem>>, %arg5: memref<1x128xf32, #tpu.memory_space<vmem>>, %arg6: memref<128x128xbf16, #tpu.memory_space<vmem>>, %arg7: memref<1x128x128xf32, #tpu.memory_space<vmem>>, %arg8: memref<1x128xf32, #tpu.memory_space<vmem>>, %arg9: memref<1x128xf32, #tpu.memory_space<vmem>>) attributes {dimension_semantics = [#tpu.dimension_semantics<arbitrary>, #tpu.dimension_semantics<arbitrary>], iteration_bounds = array<i64: 2, 1>, scalar_prefetch = 0 : i64, scratch_operands = 3 : i64, tpu.core_type = #tpu.core_type<tc>, window_params = [{transform_indices = @transform_0, window_bounds = array<i64: 128, 512>}, {pipeline_mode = #tpu.pipeline_mode<synchronous>, transform_indices = @transform_1, window_bounds = array<i64: 512, 128>}, {pipeline_mode = #tpu.pipeline_mode<synchronous>, transform_indices = @transform_2, window_bounds = array<i64: 1, 128>}, {pipeline_mode = #tpu.pipeline_mode<synchronous>, transform_indices = @transform_3, window_bounds = array<i64: 1, 128>}, {transform_indices = @transform_4, window_bounds = array<i64: 128, 128>}]} {
    %c0_i32 = arith.constant 0 : i32
    %0 = arith.cmpi eq, %arg0, %c0_i32 : i32
    %1 = arith.extui %0 : i1 to i32
    %c0_i32_0 = arith.constant 0 : i32
    %2 = arith.cmpi ne, %1, %c0_i32_0 : i32
    scf.if %2 {
      %c0_i32_2 = arith.constant 0 : i32
      %6 = arith.cmpi eq, %arg1, %c0_i32_2 : i32
      %7 = arith.extui %6 : i1 to i32
      %c0_i32_3 = arith.constant 0 : i32
      %8 = arith.cmpi ne, %7, %c0_i32_3 : i32
      scf.if %8 {
        %cst_19 = arith.constant 0.000000e+00 : f32
        %27 = vector.broadcast %cst_19 : f32 to vector<1x128xf32>
        %c0_20 = arith.constant 0 : index
        %c0_21 = arith.constant 0 : index
        %28 = vector.load %arg8[%c0_20, %c0_21] : memref<1x128xf32, #tpu.memory_space<vmem>>, vector<1x128xf32>
        tpu.vector_store %arg8[%c0_20, %c0_21], %27 {strides = array<i32>} : memref<1x128xf32, #tpu.memory_space<vmem>>, vector<1x128xf32>,
        %cst_22 = arith.constant 0.000000e+00 : f32
        %29 = vector.broadcast %cst_22 : f32 to vector<1x128xf32>
        %c0_23 = arith.constant 0 : index
        %c0_24 = arith.constant 0 : index
        %30 = vector.load %arg9[%c0_23, %c0_24] : memref<1x128xf32, #tpu.memory_space<vmem>>, vector<1x128xf32>
        tpu.vector_store %arg9[%c0_23, %c0_24], %29 {strides = array<i32>} : memref<1x128xf32, #tpu.memory_space<vmem>>, vector<1x128xf32>,
      } else {
      }
      %c0 = arith.constant 0 : index
      %c0_4 = arith.constant 0 : index
      %9 = vector.load %arg2[%c0, %c0_4] : memref<128x512xbf16, #tpu.memory_space<vmem>>, vector<128x512xbf16>
      %c0_5 = arith.constant 0 : index
      %c0_6 = arith.constant 0 : index
      %10 = vector.load %arg3[%c0_5, %c0_6] : memref<512x128xbf16, #tpu.memory_space<vmem>>, vector<512x128xbf16>
      %cst = arith.constant dense<0.000000e+00> : vector<128x128xf32>
      %11 = tpu.matmul %9, %10, %cst {dimension_numbers = #tpu.dot_dimension_numbers<[1], [0], [0], [1], [0, 0, 1, 1], [], []>} : vector<128x512xbf16>, vector<512x128xbf16>, vector<128x128xf32> -> vector<128x128xf32>
      %12 = arith.index_cast %arg1 : i32 to index
      %c0_7 = arith.constant 0 : index
      %c0_8 = arith.constant 0 : index
      %13 = vector.load %arg7[%12, %c0_7, %c0_8] : memref<1x128x128xf32, #tpu.memory_space<vmem>>, vector<1x128x128xf32>
      %14 = vector.shape_cast %13 : vector<1x128x128xf32> to vector<128x128xf32>
      %15 = vector.shape_cast %11 : vector<128x128xf32> to vector<1x128x128xf32>
      tpu.vector_store %arg7[%12, %c0_7, %c0_8], %15 {strides = array<i32>} : memref<1x128x128xf32, #tpu.memory_space<vmem>>, vector<1x128x128xf32>,
      %c0_9 = arith.constant 0 : index
      %c0_10 = arith.constant 0 : index
      %16 = vector.load %arg8[%c0_9, %c0_10] : memref<1x128xf32, #tpu.memory_space<vmem>>, vector<1x128xf32>
      %cst_11 = arith.constant dense<0.000000e+00> : vector<128xf32>
      %17 = vector.multi_reduction <add>, %11, %cst_11 [0] : vector<128x128xf32> to vector<128xf32>
      %18 = vector.shape_cast %17 : vector<128xf32> to vector<1x128xf32>
      %19 = arith.addf %16, %18 : vector<1x128xf32>
      %c0_12 = arith.constant 0 : index
      %c0_13 = arith.constant 0 : index
      %20 = vector.load %arg8[%c0_12, %c0_13] : memref<1x128xf32, #tpu.memory_space<vmem>>, vector<1x128xf32>
      tpu.vector_store %arg8[%c0_12, %c0_13], %19 {strides = array<i32>} : memref<1x128xf32, #tpu.memory_space<vmem>>, vector<1x128xf32>,
      %c0_14 = arith.constant 0 : index
      %c0_15 = arith.constant 0 : index
      %21 = vector.load %arg9[%c0_14, %c0_15] : memref<1x128xf32, #tpu.memory_space<vmem>>, vector<1x128xf32>
      %22 = arith.mulf %11, %11 : vector<128x128xf32>
      %cst_16 = arith.constant dense<0.000000e+00> : vector<128xf32>
      %23 = vector.multi_reduction <add>, %22, %cst_16 [0] : vector<128x128xf32> to vector<128xf32>
      %24 = vector.shape_cast %23 : vector<128xf32> to vector<1x128xf32>
      %25 = arith.addf %21, %24 : vector<1x128xf32>
      %c0_17 = arith.constant 0 : index
      %c0_18 = arith.constant 0 : index
      %26 = vector.load %arg9[%c0_17, %c0_18] : memref<1x128xf32, #tpu.memory_space<vmem>>, vector<1x128xf32>
      tpu.vector_store %arg9[%c0_17, %c0_18], %25 {strides = array<i32>} : memref<1x128xf32, #tpu.memory_space<vmem>>, vector<1x128xf32>,
    } else {
    }
    %c1_i32 = arith.constant 1 : i32
    %3 = arith.cmpi eq, %arg0, %c1_i32 : i32
    %4 = arith.extui %3 : i1 to i32
    %c0_i32_1 = arith.constant 0 : i32
    %5 = arith.cmpi ne, %4, %c0_i32_1 : i32
    scf.if %5 {
      %c0 = arith.constant 0 : index
      %c0_2 = arith.constant 0 : index
      %6 = vector.load %arg8[%c0, %c0_2] : memref<1x128xf32, #tpu.memory_space<vmem>>, vector<1x128xf32>
      %cst = arith.constant 7.812500e-03 : f32
      %7 = vector.broadcast %cst : f32 to vector<1x128xf32>
      %8 = arith.mulf %6, %7 : vector<1x128xf32>
      %c0_3 = arith.constant 0 : index
      %c0_4 = arith.constant 0 : index
      %9 = vector.load %arg9[%c0_3, %c0_4] : memref<1x128xf32, #tpu.memory_space<vmem>>, vector<1x128xf32>
      %cst_5 = arith.constant 7.812500e-03 : f32
      %10 = vector.broadcast %cst_5 : f32 to vector<1x128xf32>
      %11 = arith.mulf %9, %10 : vector<1x128xf32>
      %12 = arith.mulf %8, %8 : vector<1x128xf32>
      %13 = arith.subf %11, %12 : vector<1x128xf32>
      %cst_6 = arith.constant 0.000000e+00 : f32
      %14 = vector.broadcast %cst_6 : f32 to vector<1x128xf32>
      %15 = arith.maximumf %13, %14 : vector<1x128xf32>
      %c0_7 = arith.constant 0 : index
      %c0_8 = arith.constant 0 : index
      %16 = vector.load %arg4[%c0_7, %c0_8] : memref<1x128xf32, #tpu.memory_space<vmem>>, vector<1x128xf32>
      %cst_9 = arith.constant 9.99999974E-6 : f32
      %17 = vector.broadcast %cst_9 : f32 to vector<1x128xf32>
      %18 = arith.addf %15, %17 : vector<1x128xf32>
      %19 = math.rsqrt %18 : vector<1x128xf32>
      %20 = arith.mulf %16, %19 : vector<1x128xf32>
      %c0_10 = arith.constant 0 : index
      %c0_11 = arith.constant 0 : index
      %21 = vector.load %arg5[%c0_10, %c0_11] : memref<1x128xf32, #tpu.memory_space<vmem>>, vector<1x128xf32>
      %22 = arith.mulf %8, %20 : vector<1x128xf32>
      %23 = arith.subf %21, %22 : vector<1x128xf32>
      %24 = arith.index_cast %arg1 : i32 to index
      %c0_12 = arith.constant 0 : index
      %c0_13 = arith.constant 0 : index
      %25 = vector.load %arg7[%24, %c0_12, %c0_13] : memref<1x128x128xf32, #tpu.memory_space<vmem>>, vector<1x128x128xf32>
      %26 = vector.shape_cast %25 : vector<1x128x128xf32> to vector<128x128xf32>
      %27 = vector.broadcast %20 : vector<1x128xf32> to vector<128x128xf32>
      %28 = arith.mulf %26, %27 : vector<128x128xf32>
      %29 = vector.broadcast %23 : vector<1x128xf32> to vector<128x128xf32>
      %30 = arith.addf %28, %29 : vector<128x128xf32>
      %cst_14 = arith.constant 0.000000e+00 : f32
      %31 = vector.broadcast %cst_14 : f32 to vector<128x128xf32>
      %32 = arith.cmpf oge, %30, %31 : vector<128x128xf32>
      %cst_15 = arith.constant 2.000000e-01 : f32
      %33 = vector.broadcast %cst_15 : f32 to vector<128x128xf32>
      %34 = arith.mulf %33, %30 : vector<128x128xf32>
      %35 = arith.select %32, %30, %34 : vector<128x128xi1>, vector<128x128xf32>
      %36 = arith.truncf %35 : vector<128x128xf32> to vector<128x128xbf16>
      %c0_16 = arith.constant 0 : index
      %c0_17 = arith.constant 0 : index
      %37 = vector.load %arg6[%c0_16, %c0_17] : memref<128x128xbf16, #tpu.memory_space<vmem>>, vector<128x128xbf16>
      tpu.vector_store %arg6[%c0_16, %c0_17], %36 {strides = array<i32>} : memref<128x128xbf16, #tpu.memory_space<vmem>>, vector<128x128xbf16>,
    } else {
    }
    return
  }
  func.func @transform_0(%arg0: i32, %arg1: i32) -> (i32, i32) {
    %c1_i32 = arith.constant 1 : i32
    %0 = arith.subi %c1_i32, %arg0 : i32
    %1 = arith.muli %arg1, %0 : i32
    %c0_i32 = arith.constant 0 : i32
    %2 = arith.muli %c0_i32, %arg0 : i32
    %3 = arith.addi %1, %2 : i32
    %c0_i32_0 = arith.constant 0 : i32
    %c0_i32_1 = arith.constant 0 : i32
    return %3, %c0_i32_0 : i32, i32
  }
  func.func @transform_1(%arg0: i32, %arg1: i32) -> (i32, i32) {
    %c0_i32 = arith.constant 0 : i32
    %c0_i32_0 = arith.constant 0 : i32
    %c0_i32_1 = arith.constant 0 : i32
    return %c0_i32, %c0_i32_0 : i32, i32
  }
  func.func @transform_2(%arg0: i32, %arg1: i32) -> (i32, i32) {
    %c0_i32 = arith.constant 0 : i32
    %c0_i32_0 = arith.constant 0 : i32
    %c0_i32_1 = arith.constant 0 : i32
    return %c0_i32, %c0_i32_0 : i32, i32
  }
  func.func @transform_3(%arg0: i32, %arg1: i32) -> (i32, i32) {
    %c0_i32 = arith.constant 0 : i32
    %c0_i32_0 = arith.constant 0 : i32
    %c0_i32_1 = arith.constant 0 : i32
    return %c0_i32, %c0_i32_0 : i32, i32
  }
  func.func @transform_4(%arg0: i32, %arg1: i32) -> (i32, i32) {
    %0 = arith.muli %arg0, %arg1 : i32
    %c0_i32 = arith.constant 0 : i32
    %c0_i32_0 = arith.constant 0 : i32
    return %0, %c0_i32 : i32, i32
  }
}

module attributes {stable_mosaic.version = 11 : i64} {
  func.func @_conv_bn_leaky_kernel(%arg0: i32, %arg1: i32, %arg2: memref<32x1024xbf16, #tpu.memory_space<vmem>>, %arg3: memref<1024x128xbf16, #tpu.memory_space<vmem>>, %arg4: memref<1x128xf32, #tpu.memory_space<vmem>>, %arg5: memref<1x128xf32, #tpu.memory_space<vmem>>, %arg6: memref<32x128xbf16, #tpu.memory_space<vmem>>, %arg7: memref<1x32x128xf32, #tpu.memory_space<vmem>>, %arg8: memref<1x128xf32, #tpu.memory_space<vmem>>, %arg9: memref<1x128xf32, #tpu.memory_space<vmem>>) attributes {dimension_semantics = [#tpu.dimension_semantics<arbitrary>, #tpu.dimension_semantics<arbitrary>], iteration_bounds = array<i64: 2, 1>, scalar_prefetch = 0 : i64, scratch_operands = 3 : i64, tpu.core_type = #tpu.core_type<tc>, window_params = [{transform_indices = @transform_0, window_bounds = array<i64: 32, 1024>}, {pipeline_mode = #tpu.pipeline_mode<synchronous>, transform_indices = @transform_1, window_bounds = array<i64: 1024, 128>}, {pipeline_mode = #tpu.pipeline_mode<synchronous>, transform_indices = @transform_2, window_bounds = array<i64: 1, 128>}, {pipeline_mode = #tpu.pipeline_mode<synchronous>, transform_indices = @transform_3, window_bounds = array<i64: 1, 128>}, {transform_indices = @transform_4, window_bounds = array<i64: 32, 128>}]} {
    %c0_i32 = arith.constant 0 : i32
    %0 = arith.cmpi eq, %arg0, %c0_i32 : i32
    %1 = arith.extui %0 : i1 to i32
    %c0_i32_0 = arith.constant 0 : i32
    %2 = arith.cmpi ne, %1, %c0_i32_0 : i32
    scf.if %2 {
      %c0_i32_2 = arith.constant 0 : i32
      %6 = arith.cmpi eq, %arg1, %c0_i32_2 : i32
      %7 = arith.extui %6 : i1 to i32
      %c0_i32_3 = arith.constant 0 : i32
      %8 = arith.cmpi ne, %7, %c0_i32_3 : i32
      scf.if %8 {
        %cst_19 = arith.constant 0.000000e+00 : f32
        %27 = vector.broadcast %cst_19 : f32 to vector<1x128xf32>
        %c0_20 = arith.constant 0 : index
        %c0_21 = arith.constant 0 : index
        %28 = vector.load %arg8[%c0_20, %c0_21] : memref<1x128xf32, #tpu.memory_space<vmem>>, vector<1x128xf32>
        tpu.vector_store %arg8[%c0_20, %c0_21], %27 {strides = array<i32>} : memref<1x128xf32, #tpu.memory_space<vmem>>, vector<1x128xf32>,
        %cst_22 = arith.constant 0.000000e+00 : f32
        %29 = vector.broadcast %cst_22 : f32 to vector<1x128xf32>
        %c0_23 = arith.constant 0 : index
        %c0_24 = arith.constant 0 : index
        %30 = vector.load %arg9[%c0_23, %c0_24] : memref<1x128xf32, #tpu.memory_space<vmem>>, vector<1x128xf32>
        tpu.vector_store %arg9[%c0_23, %c0_24], %29 {strides = array<i32>} : memref<1x128xf32, #tpu.memory_space<vmem>>, vector<1x128xf32>,
      } else {
      }
      %c0 = arith.constant 0 : index
      %c0_4 = arith.constant 0 : index
      %9 = vector.load %arg2[%c0, %c0_4] : memref<32x1024xbf16, #tpu.memory_space<vmem>>, vector<32x1024xbf16>
      %c0_5 = arith.constant 0 : index
      %c0_6 = arith.constant 0 : index
      %10 = vector.load %arg3[%c0_5, %c0_6] : memref<1024x128xbf16, #tpu.memory_space<vmem>>, vector<1024x128xbf16>
      %cst = arith.constant dense<0.000000e+00> : vector<32x128xf32>
      %11 = tpu.matmul %9, %10, %cst {dimension_numbers = #tpu.dot_dimension_numbers<[1], [0], [0], [1], [0, 0, 1, 1], [], []>} : vector<32x1024xbf16>, vector<1024x128xbf16>, vector<32x128xf32> -> vector<32x128xf32>
      %12 = arith.index_cast %arg1 : i32 to index
      %c0_7 = arith.constant 0 : index
      %c0_8 = arith.constant 0 : index
      %13 = vector.load %arg7[%12, %c0_7, %c0_8] : memref<1x32x128xf32, #tpu.memory_space<vmem>>, vector<1x32x128xf32>
      %14 = vector.shape_cast %13 : vector<1x32x128xf32> to vector<32x128xf32>
      %15 = vector.shape_cast %11 : vector<32x128xf32> to vector<1x32x128xf32>
      tpu.vector_store %arg7[%12, %c0_7, %c0_8], %15 {strides = array<i32>} : memref<1x32x128xf32, #tpu.memory_space<vmem>>, vector<1x32x128xf32>,
      %c0_9 = arith.constant 0 : index
      %c0_10 = arith.constant 0 : index
      %16 = vector.load %arg8[%c0_9, %c0_10] : memref<1x128xf32, #tpu.memory_space<vmem>>, vector<1x128xf32>
      %cst_11 = arith.constant dense<0.000000e+00> : vector<128xf32>
      %17 = vector.multi_reduction <add>, %11, %cst_11 [0] : vector<32x128xf32> to vector<128xf32>
      %18 = vector.shape_cast %17 : vector<128xf32> to vector<1x128xf32>
      %19 = arith.addf %16, %18 : vector<1x128xf32>
      %c0_12 = arith.constant 0 : index
      %c0_13 = arith.constant 0 : index
      %20 = vector.load %arg8[%c0_12, %c0_13] : memref<1x128xf32, #tpu.memory_space<vmem>>, vector<1x128xf32>
      tpu.vector_store %arg8[%c0_12, %c0_13], %19 {strides = array<i32>} : memref<1x128xf32, #tpu.memory_space<vmem>>, vector<1x128xf32>,
      %c0_14 = arith.constant 0 : index
      %c0_15 = arith.constant 0 : index
      %21 = vector.load %arg9[%c0_14, %c0_15] : memref<1x128xf32, #tpu.memory_space<vmem>>, vector<1x128xf32>
      %22 = arith.mulf %11, %11 : vector<32x128xf32>
      %cst_16 = arith.constant dense<0.000000e+00> : vector<128xf32>
      %23 = vector.multi_reduction <add>, %22, %cst_16 [0] : vector<32x128xf32> to vector<128xf32>
      %24 = vector.shape_cast %23 : vector<128xf32> to vector<1x128xf32>
      %25 = arith.addf %21, %24 : vector<1x128xf32>
      %c0_17 = arith.constant 0 : index
      %c0_18 = arith.constant 0 : index
      %26 = vector.load %arg9[%c0_17, %c0_18] : memref<1x128xf32, #tpu.memory_space<vmem>>, vector<1x128xf32>
      tpu.vector_store %arg9[%c0_17, %c0_18], %25 {strides = array<i32>} : memref<1x128xf32, #tpu.memory_space<vmem>>, vector<1x128xf32>,
    } else {
    }
    %c1_i32 = arith.constant 1 : i32
    %3 = arith.cmpi eq, %arg0, %c1_i32 : i32
    %4 = arith.extui %3 : i1 to i32
    %c0_i32_1 = arith.constant 0 : i32
    %5 = arith.cmpi ne, %4, %c0_i32_1 : i32
    scf.if %5 {
      %c0 = arith.constant 0 : index
      %c0_2 = arith.constant 0 : index
      %6 = vector.load %arg8[%c0, %c0_2] : memref<1x128xf32, #tpu.memory_space<vmem>>, vector<1x128xf32>
      %cst = arith.constant 3.125000e-02 : f32
      %7 = vector.broadcast %cst : f32 to vector<1x128xf32>
      %8 = arith.mulf %6, %7 : vector<1x128xf32>
      %c0_3 = arith.constant 0 : index
      %c0_4 = arith.constant 0 : index
      %9 = vector.load %arg9[%c0_3, %c0_4] : memref<1x128xf32, #tpu.memory_space<vmem>>, vector<1x128xf32>
      %cst_5 = arith.constant 3.125000e-02 : f32
      %10 = vector.broadcast %cst_5 : f32 to vector<1x128xf32>
      %11 = arith.mulf %9, %10 : vector<1x128xf32>
      %12 = arith.mulf %8, %8 : vector<1x128xf32>
      %13 = arith.subf %11, %12 : vector<1x128xf32>
      %cst_6 = arith.constant 0.000000e+00 : f32
      %14 = vector.broadcast %cst_6 : f32 to vector<1x128xf32>
      %15 = arith.maximumf %13, %14 : vector<1x128xf32>
      %c0_7 = arith.constant 0 : index
      %c0_8 = arith.constant 0 : index
      %16 = vector.load %arg4[%c0_7, %c0_8] : memref<1x128xf32, #tpu.memory_space<vmem>>, vector<1x128xf32>
      %cst_9 = arith.constant 9.99999974E-6 : f32
      %17 = vector.broadcast %cst_9 : f32 to vector<1x128xf32>
      %18 = arith.addf %15, %17 : vector<1x128xf32>
      %19 = math.rsqrt %18 : vector<1x128xf32>
      %20 = arith.mulf %16, %19 : vector<1x128xf32>
      %c0_10 = arith.constant 0 : index
      %c0_11 = arith.constant 0 : index
      %21 = vector.load %arg5[%c0_10, %c0_11] : memref<1x128xf32, #tpu.memory_space<vmem>>, vector<1x128xf32>
      %22 = arith.mulf %8, %20 : vector<1x128xf32>
      %23 = arith.subf %21, %22 : vector<1x128xf32>
      %24 = arith.index_cast %arg1 : i32 to index
      %c0_12 = arith.constant 0 : index
      %c0_13 = arith.constant 0 : index
      %25 = vector.load %arg7[%24, %c0_12, %c0_13] : memref<1x32x128xf32, #tpu.memory_space<vmem>>, vector<1x32x128xf32>
      %26 = vector.shape_cast %25 : vector<1x32x128xf32> to vector<32x128xf32>
      %27 = vector.broadcast %20 : vector<1x128xf32> to vector<32x128xf32>
      %28 = arith.mulf %26, %27 : vector<32x128xf32>
      %29 = vector.broadcast %23 : vector<1x128xf32> to vector<32x128xf32>
      %30 = arith.addf %28, %29 : vector<32x128xf32>
      %cst_14 = arith.constant 0.000000e+00 : f32
      %31 = vector.broadcast %cst_14 : f32 to vector<32x128xf32>
      %32 = arith.cmpf oge, %30, %31 : vector<32x128xf32>
      %cst_15 = arith.constant 2.000000e-01 : f32
      %33 = vector.broadcast %cst_15 : f32 to vector<32x128xf32>
      %34 = arith.mulf %33, %30 : vector<32x128xf32>
      %35 = arith.select %32, %30, %34 : vector<32x128xi1>, vector<32x128xf32>
      %36 = arith.truncf %35 : vector<32x128xf32> to vector<32x128xbf16>
      %c0_16 = arith.constant 0 : index
      %c0_17 = arith.constant 0 : index
      %37 = vector.load %arg6[%c0_16, %c0_17] : memref<32x128xbf16, #tpu.memory_space<vmem>>, vector<32x128xbf16>
      tpu.vector_store %arg6[%c0_16, %c0_17], %36 {strides = array<i32>} : memref<32x128xbf16, #tpu.memory_space<vmem>>, vector<32x128xbf16>,
    } else {
    }
    return
  }
  func.func @transform_0(%arg0: i32, %arg1: i32) -> (i32, i32) {
    %c1_i32 = arith.constant 1 : i32
    %0 = arith.subi %c1_i32, %arg0 : i32
    %1 = arith.muli %arg1, %0 : i32
    %c0_i32 = arith.constant 0 : i32
    %2 = arith.muli %c0_i32, %arg0 : i32
    %3 = arith.addi %1, %2 : i32
    %c0_i32_0 = arith.constant 0 : i32
    %c0_i32_1 = arith.constant 0 : i32
    return %3, %c0_i32_0 : i32, i32
  }
  func.func @transform_1(%arg0: i32, %arg1: i32) -> (i32, i32) {
    %c0_i32 = arith.constant 0 : i32
    %c0_i32_0 = arith.constant 0 : i32
    %c0_i32_1 = arith.constant 0 : i32
    return %c0_i32, %c0_i32_0 : i32, i32
  }
  func.func @transform_2(%arg0: i32, %arg1: i32) -> (i32, i32) {
    %c0_i32 = arith.constant 0 : i32
    %c0_i32_0 = arith.constant 0 : i32
    %c0_i32_1 = arith.constant 0 : i32
    return %c0_i32, %c0_i32_0 : i32, i32
  }
  func.func @transform_3(%arg0: i32, %arg1: i32) -> (i32, i32) {
    %c0_i32 = arith.constant 0 : i32
    %c0_i32_0 = arith.constant 0 : i32
    %c0_i32_1 = arith.constant 0 : i32
    return %c0_i32, %c0_i32_0 : i32, i32
  }
  func.func @transform_4(%arg0: i32, %arg1: i32) -> (i32, i32) {
    %0 = arith.muli %arg0, %arg1 : i32
    %c0_i32 = arith.constant 0 : i32
    %c0_i32_0 = arith.constant 0 : i32
    return %0, %c0_i32 : i32, i32
  }
}

module attributes {stable_mosaic.version = 11 : i64} {
  func.func @_final_reduce_kernel(%arg0: i32, %arg1: memref<2x2048xbf16, #tpu.memory_space<vmem>>, %arg2: memref<1x2048xbf16, #tpu.memory_space<vmem>>, %arg3: memref<2x1xf32, #tpu.memory_space<vmem>>) attributes {dimension_semantics = [#tpu.dimension_semantics<arbitrary>], iteration_bounds = array<i64: 1>, scalar_prefetch = 0 : i64, scratch_operands = 0 : i64, tpu.core_type = #tpu.core_type<tc>, window_params = [{pipeline_mode = #tpu.pipeline_mode<synchronous>, transform_indices = @transform_0, window_bounds = array<i64: 2, 2048>}, {pipeline_mode = #tpu.pipeline_mode<synchronous>, transform_indices = @transform_1, window_bounds = array<i64: 1, 2048>}, {pipeline_mode = #tpu.pipeline_mode<synchronous>, transform_indices = @transform_2, window_bounds = array<i64: 2, 1>}]} {
    %c0 = arith.constant 0 : index
    %c0_0 = arith.constant 0 : index
    %0 = vector.load %arg1[%c0, %c0_0] : memref<2x2048xbf16, #tpu.memory_space<vmem>>, vector<2x2048xbf16>
    %1 = arith.extf %0 : vector<2x2048xbf16> to vector<2x2048xf32>
    %c0_1 = arith.constant 0 : index
    %c0_2 = arith.constant 0 : index
    %2 = vector.load %arg2[%c0_1, %c0_2] : memref<1x2048xbf16, #tpu.memory_space<vmem>>, vector<1x2048xbf16>
    %3 = arith.extf %2 : vector<1x2048xbf16> to vector<1x2048xf32>
    %4 = vector.broadcast %3 : vector<1x2048xf32> to vector<2x2048xf32>
    %5 = arith.mulf %1, %4 : vector<2x2048xf32>
    %cst = arith.constant dense<0.000000e+00> : vector<2xf32>
    %6 = vector.multi_reduction <add>, %5, %cst [1] : vector<2x2048xf32> to vector<2xf32>
    %7 = vector.shape_cast %6 : vector<2xf32> to vector<2x1xf32>
    %8 = arith.negf %7 : vector<2x1xf32>
    %9 = math.exp %8 : vector<2x1xf32>
    %cst_3 = arith.constant 1.000000e+00 : f32
    %10 = vector.broadcast %cst_3 : f32 to vector<2x1xf32>
    %11 = arith.addf %10, %9 : vector<2x1xf32>
    %12 = arith.divf %10, %11 : vector<2x1xf32>
    %c0_4 = arith.constant 0 : index
    %c0_5 = arith.constant 0 : index
    %13 = vector.load %arg3[%c0_4, %c0_5] : memref<2x1xf32, #tpu.memory_space<vmem>>, vector<2x1xf32>
    tpu.vector_store %arg3[%c0_4, %c0_5], %12 {strides = array<i32>} : memref<2x1xf32, #tpu.memory_space<vmem>>, vector<2x1xf32>,
    return
  }
  func.func @transform_0(%arg0: i32) -> (i32, i32) {
    %c0_i32 = arith.constant 0 : i32
    %c0_i32_0 = arith.constant 0 : i32
    %c0_i32_1 = arith.constant 0 : i32
    return %c0_i32, %c0_i32_0 : i32, i32
  }
  func.func @transform_1(%arg0: i32) -> (i32, i32) {
    %c0_i32 = arith.constant 0 : i32
    %c0_i32_0 = arith.constant 0 : i32
    %c0_i32_1 = arith.constant 0 : i32
    return %c0_i32, %c0_i32_0 : i32, i32
  }
  func.func @transform_2(%arg0: i32) -> (i32, i32) {
    %c0_i32 = arith.constant 0 : i32
    %c0_i32_0 = arith.constant 0 : i32
    %c0_i32_1 = arith.constant 0 : i32
    return %c0_i32, %c0_i32_0 : i32, i32
  }
}

</mosaic_0001>

<bundles_post_ra>
// kernel: discriminator_forward.5
= control target key start
LH: loop header
LB: loop body
LE: loop exit
PB: predicated region body
PF: predicated region fallthrough
CT: control target
= control target key end

     0   :  { %vm932_vm0 = vcmask 392192   ;;  %s7457_s1 = inlined_call_operand.vmem [shape: bf16[48,128], index: 1, kind: input, shape index: {}]   ;;  %s7458_s0 = inlined_call_operand.vmem [shape: bf16[2048,48], index: 0, kind: input, shape index: {}]   ;;  %s7459_s2 = inlined_call_operand.vmem [shape: bf16[2048,128], index: 2, kind: output, shape index: {}]  }
   0x1   :  { %v6363_v0 = vld [vmem:[%s7457_s1] sm:$0xff]   ;;  %v6364_v1 = vld [vmem:[%s7457_s1 + $0x8] sm:$0xff]   ;;  %v6365_v2 = vld [vmem:[%s7457_s1 + $0x10] sm:$0xff]  }
   0x2   :  { %6095 = vmatprep.subr.bf16.mxu0 %v6363_v0  ;;  %6357 = vmatprep.subr.bf16.mxu1 %v6363_v0  ;;  %v6366_v3 = vld [vmem:[%s7458_s0] sm:$0xff]   ;;  %v6368_v5 = vld [vmem:[%s7458_s0 + $0x8] sm:$0xff]   ;;  %v6370_v7 = vld [vmem:[%s7458_s0 + $0x10] sm:$0xff]  }
   0x3   :  { %6096 = vmatpush3.bf16.msra.mxu0 %v6363_v0  ;;  %6360 = vmatpush3.bf16.msra.mxu1 %v6363_v0  ;;  %v6367_v4 = vld [vmem:[%s7458_s0 + $0x200] sm:$0xff]   ;;  %v6369_v6 = vld [vmem:[%s7458_s0 + $0x208] sm:$0xff]   ;;  %v6371_v8 = vld [vmem:[%s7458_s0 + $0x210] sm:$0xff]  }
   0x4   :  { %6097 = vmatprep.subr.bf16.mxu0 %v6364_v1  ;;  %6358 = vmatprep.subr.bf16.mxu1 %v6364_v1  ;;  %v6372_v9 = vld [vmem:[%s7458_s0 + $0x18] sm:$0xff]   ;;  %v6374_v11 = vld [vmem:[%s7458_s0 + $0x20] sm:$0xff]   ;;  %v6376_v13 = vld [vmem:[%s7458_s0 + $0x28] sm:$0xff]  }
   0x5   :  { %6101 = vmatprep.mubr.msk.bf16.mxu0 %vm932_vm0, %v6366_v3  ;;  %6229 = vmatprep.mubr.msk.bf16.mxu1 %vm932_vm0, %v6367_v4  ;;  %v6373_v10 = vld [vmem:[%s7458_s0 + $0x218] sm:$0xff]   ;;  %v6375_v12 = vld [vmem:[%s7458_s0 + $0x220] sm:$0xff]   ;;  %v6377_v14 = vld [vmem:[%s7458_s0 + $0x228] sm:$0xff]  }
   0x6   :  { %v6378_v15 = vld [vmem:[%s7458_s0 + $0x30] sm:$0xff]   ;;  %v6380_v17 = vld [vmem:[%s7458_s0 + $0x38] sm:$0xff]   ;;  %v6382_v19 = vld [vmem:[%s7458_s0 + $0x40] sm:$0xff]  }
   0x7   :  { %6098 = vmatpush3.bf16.msra.mxu0 %v6364_v1  ;;  %6361 = vmatpush3.bf16.msra.mxu1 %v6364_v1  ;;  %v6379_v16 = vld [vmem:[%s7458_s0 + $0x230] sm:$0xff]   ;;  %v6381_v18 = vld [vmem:[%s7458_s0 + $0x238] sm:$0xff]   ;;  %v6383_v20 = vld [vmem:[%s7458_s0 + $0x240] sm:$0xff]  }
   0x8   :  { %6099 = vmatprep.subr.bf16.mxu0 %v6365_v2  ;;  %6359 = vmatprep.subr.bf16.mxu1 %v6365_v2  ;;  %v6384_v21 = vld [vmem:[%s7458_s0 + $0x48] sm:$0xff]   ;;  %v6386_v23 = vld [vmem:[%s7458_s0 + $0x50] sm:$0xff]   ;;  %v6388_v25 = vld [vmem:[%s7458_s0 + $0x58] sm:$0xff]  }
   0x9   :  { %v6385_v22 = vld [vmem:[%s7458_s0 + $0x248] sm:$0xff]   ;;  %v6387_v24 = vld [vmem:[%s7458_s0 + $0x250] sm:$0xff]   ;;  %v6389_v26 = vld [vmem:[%s7458_s0 + $0x258] sm:$0xff]  }
   0xa   :  { %v6390_v27 = vld [vmem:[%s7458_s0 + $0x60] sm:$0xff]   ;;  %v6392_v29 = vld [vmem:[%s7458_s0 + $0x68] sm:$0xff]   ;;  %v6394_v31 = vld [vmem:[%s7458_s0 + $0x70] sm:$0xff]  }
   0xb   :  { %6100 = vmatpush3.bf16.msra.mxu0 %v6365_v2  ;;  %6362 = vmatpush3.bf16.msra.mxu1 %v6365_v2  ;;  %v6391_v28 = vld [vmem:[%s7458_s0 + $0x260] sm:$0xff]   ;;  %v6393_v30 = vld [vmem:[%s7458_s0 + $0x268] sm:$0xff]   ;;  %v6395_v32 = vld [vmem:[%s7458_s0 + $0x270] sm:$0xff]  }
   0xc   :  { %v6396_v33 = vld [vmem:[%s7458_s0 + $0x78] sm:$0xff]   ;;  %v6398_v35 = vld [vmem:[%s7458_s0 + $0x80] sm:$0xff]   ;;  %v6400_v37 = vld [vmem:[%s7458_s0 + $0x88] sm:$0xff]  }
   0xd   :  { %v6397_v34 = vld [vmem:[%s7458_s0 + $0x278] sm:$0xff]   ;;  %v6399_v36 = vld [vmem:[%s7458_s0 + $0x280] sm:$0xff]   ;;  %v6401_v38 = vld [vmem:[%s7458_s0 + $0x288] sm:$0xff]  }
   0xe   :  { %6102 = vmatmul.mubr.msk.bf16.vlgmr.msra.gmra.mrb[0].mxu0 %vm932_vm0, %v6368_v5  ;;  %6230 = vmatmul.mubr.msk.bf16.vlgmr.msra.gmra.mrb[0].mxu1 %vm932_vm0, %v6369_v6  ;;  %v6402_v39 = vld [vmem:[%s7458_s0 + $0x90] sm:$0xff]   ;;  %v6404_v41 = vld [vmem:[%s7458_s0 + $0x98] sm:$0xff]   ;;  %v6406_v43 = vld [vmem:[%s7458_s0 + $0xa0] sm:$0xff]  }
   0xf   :  { %6105 = vmatprep.mubr.msk.bf16.mxu0 %vm932_vm0, %v6370_v7  ;;  %6233 = vmatprep.mubr.msk.bf16.mxu1 %vm932_vm0, %v6371_v8  ;;  %v6403_v40 = vld [vmem:[%s7458_s0 + $0x290] sm:$0xff]   ;;  %v6405_v42 = vld [vmem:[%s7458_s0 + $0x298] sm:$0xff]   ;;  %v6407_v44 = vld [vmem:[%s7458_s0 + $0x2a0] sm:$0xff]  }
  0x10   :  { %v6408_v45 = vld [vmem:[%s7458_s0 + $0xa8] sm:$0xff]   ;;  %v6410_v47 = vld [vmem:[%s7458_s0 + $0xb0] sm:$0xff]   ;;  %v6412_v49 = vld [vmem:[%s7458_s0 + $0xb8] sm:$0xff]  }
  0x11   :  { %v6409_v46 = vld [vmem:[%s7458_s0 + $0x2a8] sm:$0xff]   ;;  %v6411_v48 = vld [vmem:[%s7458_s0 + $0x2b0] sm:$0xff]   ;;  %v6413_v50 = vld [vmem:[%s7458_s0 + $0x2b8] sm:$0xff]  }
  0x12   :  { %v6414_v51 = vld [vmem:[%s7458_s0 + $0xc0] sm:$0xff]   ;;  %v6416_v53 = vld [vmem:[%s7458_s0 + $0xc8] sm:$0xff]   ;;  %v6418_v55 = vld [vmem:[%s7458_s0 + $0xd0] sm:$0xff]  }
  0x13   :  { %v6415_v52 = vld [vmem:[%s7458_s0 + $0x2c0] sm:$0xff]   ;;  %v6417_v54 = vld [vmem:[%s7458_s0 + $0x2c8] sm:$0xff]   ;;  %v6419_v56 = vld [vmem:[%s7458_s0 + $0x2d0] sm:$0xff]  }
  0x14   :  { %v6420_v57 = vld [vmem:[%s7458_s0 + $0xd8] sm:$0xff]   ;;  %v6422_v59 = vld [vmem:[%s7458_s0 + $0xe0] sm:$0xff]   ;;  %v6424_v61 = vld [vmem:[%s7458_s0 + $0xe8] sm:$0xff]  }
  0x15   :  { %v6421_v58 = vld [vmem:[%s7458_s0 + $0x2d8] sm:$0xff]   ;;  %v6423_v60 = vld [vmem:[%s7458_s0 + $0x2e0] sm:$0xff]   ;;  %v6425_v62 = vld [vmem:[%s7458_s0 + $0x2e8] sm:$0xff]  }
  0x16   :  { %6106 = vmatmul.mubr.msk.bf16.gmra.mrb[4].mxu0 %vm932_vm0, %v6372_v9  ;;  %6234 = vmatmul.mubr.msk.bf16.gmra.mrb[4].mxu1 %vm932_vm0, %v6373_v10  ;;  %v6426_v63 = vld [vmem:[%s7458_s0 + $0xf0] sm:$0xff]   ;;  %v6428_v1 = vld [vmem:[%s7458_s0 + $0xf8] sm:$0xff]   ;;  %v6430_v3 = vld [vmem:[%s7458_s0 + $0x100] sm:$0xff]  }
  0x17   :  { %6109 = vmatprep.mubr.msk.bf16.mxu0 %vm932_vm0, %v6374_v11  ;;  %6237 = vmatprep.mubr.msk.bf16.mxu1 %vm932_vm0, %v6375_v12  ;;  %v6427_v0 = vld [vmem:[%s7458_s0 + $0x2f0] sm:$0xff]   ;;  %v6429_v2 = vld [vmem:[%s7458_s0 + $0x2f8] sm:$0xff]   ;;  %v6431_v4 = vld [vmem:[%s7458_s0 + $0x300] sm:$0xff]  }
  0x18   :  { %v6432_v5 = vld [vmem:[%s7458_s0 + $0x108] sm:$0xff]   ;;  %v6434_v7 = vld [vmem:[%s7458_s0 + $0x110] sm:$0xff]   ;;  %v6436_v9 = vld [vmem:[%s7458_s0 + $0x118] sm:$0xff]  }
  0x19   :  { %v6433_v6 = vld [vmem:[%s7458_s0 + $0x308] sm:$0xff]   ;;  %v6435_v8 = vld [vmem:[%s7458_s0 + $0x310] sm:$0xff]   ;;  %v6437_v10 = vld [vmem:[%s7458_s0 + $0x318] sm:$0xff]  }
  0x1a   :  { %v6438_v11 = vld [vmem:[%s7458_s0 + $0x120] sm:$0xff]  }
  0x1b   :  { %v6439_v12 = vld [vmem:[%s7458_s0 + $0x320] sm:$0xff]  }
  0x1e   :  { %6110 = vmatmul.mubr.msk.bf16.gmra.mrb[8].mxu0 %vm932_vm0, %v6376_v13  ;;  %6238 = vmatmul.mubr.msk.bf16.gmra.mrb[8].mxu1 %vm932_vm0, %v6377_v14  ;;  %v6440_v13 = vld [vmem:[%s7458_s0 + $0x128] sm:$0xff]  }
  0x1f   :  { %6113 = vmatprep.mubr.msk.bf16.mxu0 %vm932_vm0, %v6378_v15  ;;  %6241 = vmatprep.mubr.msk.bf16.mxu1 %vm932_vm0, %v6379_v16  ;;  %v6441_v14 = vld [vmem:[%s7458_s0 + $0x328] sm:$0xff]   ;;  %v6442_v15 = vld [vmem:[%s7458_s0 + $0x130] sm:$0xff]  }
  0x20   :  { %v6443_v16 = vld [vmem:[%s7458_s0 + $0x330] sm:$0xff]  }
  0x26   :  { %6114 = vmatmul.mubr.msk.bf16.gmra.mrb[12].mxu0 %vm932_vm0, %v6380_v17  ;;  %6242 = vmatmul.mubr.msk.bf16.gmra.mrb[12].mxu1 %vm932_vm0, %v6381_v18  ;;  %v6444_v17 = vld [vmem:[%s7458_s0 + $0x138] sm:$0xff]  }
  0x27   :  { %6117 = vmatprep.mubr.msk.bf16.mxu0 %vm932_vm0, %v6382_v19  ;;  %6245 = vmatprep.mubr.msk.bf16.mxu1 %vm932_vm0, %v6383_v20  ;;  %v6445_v18 = vld [vmem:[%s7458_s0 + $0x338] sm:$0xff]   ;;  %v6446_v19 = vld [vmem:[%s7458_s0 + $0x140] sm:$0xff]  }
  0x28   :  { %v6447_v20 = vld [vmem:[%s7458_s0 + $0x340] sm:$0xff]  }
  0x2e   :  { %6118 = vmatmul.mubr.msk.bf16.gmra.mrb[16].mxu0 %vm932_vm0, %v6384_v21  ;;  %6246 = vmatmul.mubr.msk.bf16.gmra.mrb[16].mxu1 %vm932_vm0, %v6385_v22  ;;  %v6448_v21 = vld [vmem:[%s7458_s0 + $0x148] sm:$0xff]  }
  0x2f   :  { %6121 = vmatprep.mubr.msk.bf16.mxu0 %vm932_vm0, %v6386_v23  ;;  %6249 = vmatprep.mubr.msk.bf16.mxu1 %vm932_vm0, %v6387_v24  ;;  %v6449_v22 = vld [vmem:[%s7458_s0 + $0x348] sm:$0xff]   ;;  %v6450_v23 = vld [vmem:[%s7458_s0 + $0x150] sm:$0xff]  }
  0x30   :  { %v6451_v24 = vld [vmem:[%s7458_s0 + $0x350] sm:$0xff]  }
  0x36   :  { %6122 = vmatmul.mubr.msk.bf16.gmra.mrb[20].mxu0 %vm932_vm0, %v6388_v25  ;;  %6250 = vmatmul.mubr.msk.bf16.gmra.mrb[20].mxu1 %vm932_vm0, %v6389_v26  ;;  %v6452_v25 = vld [vmem:[%s7458_s0 + $0x158] sm:$0xff]  }
  0x37   :  { %6125 = vmatprep.mubr.msk.bf16.mxu0 %vm932_vm0, %v6390_v27  ;;  %6253 = vmatprep.mubr.msk.bf16.mxu1 %vm932_vm0, %v6391_v28  ;;  %v6453_v26 = vld [vmem:[%s7458_s0 + $0x358] sm:$0xff]   ;;  %v6454_v27 = vld [vmem:[%s7458_s0 + $0x160] sm:$0xff]  }
  0x38   :  { %v6455_v28 = vld [vmem:[%s7458_s0 + $0x360] sm:$0xff]  }
  0x3e   :  { %6126 = vmatmul.mubr.msk.bf16.gmra.mrb[24].mxu0 %vm932_vm0, %v6392_v29  ;;  %6254 = vmatmul.mubr.msk.bf16.gmra.mrb[24].mxu1 %vm932_vm0, %v6393_v30  ;;  %v6456_v29 = vld [vmem:[%s7458_s0 + $0x168] sm:$0xff]  }
  0x3f   :  { %6129 = vmatprep.mubr.msk.bf16.mxu0 %vm932_vm0, %v6394_v31  ;;  %6257 = vmatprep.mubr.msk.bf16.mxu1 %vm932_vm0, %v6395_v32  ;;  %v6457_v30 = vld [vmem:[%s7458_s0 + $0x368] sm:$0xff]   ;;  %v6458_v31 = vld [vmem:[%s7458_s0 + $0x170] sm:$0xff]  }
  0x40   :  { %v6459_v32 = vld [vmem:[%s7458_s0 + $0x370] sm:$0xff]  }
  0x46   :  { %6130 = vmatmul.mubr.msk.bf16.gmra.mrb[28].mxu0 %vm932_vm0, %v6396_v33  ;;  %6258 = vmatmul.mubr.msk.bf16.gmra.mrb[28].mxu1 %vm932_vm0, %v6397_v34  ;;  %v6460_v33 = vld [vmem:[%s7458_s0 + $0x178] sm:$0xff]  }
  0x47   :  { %6133 = vmatprep.mubr.msk.bf16.mxu0 %vm932_vm0, %v6398_v35  ;;  %6261 = vmatprep.mubr.msk.bf16.mxu1 %vm932_vm0, %v6399_v36  ;;  %v6461_v34 = vld [vmem:[%s7458_s0 + $0x378] sm:$0xff]   ;;  %v6462_v35 = vld [vmem:[%s7458_s0 + $0x180] sm:$0xff]  }
  0x48   :  { %v6463_v36 = vld [vmem:[%s7458_s0 + $0x380] sm:$0xff]  }
  0x4e   :  { %6134 = vmatmul.mubr.msk.bf16.gmra.mrb[32].mxu0 %vm932_vm0, %v6400_v37  ;;  %6262 = vmatmul.mubr.msk.bf16.gmra.mrb[32].mxu1 %vm932_vm0, %v6401_v38  ;;  %v6464_v37 = vld [vmem:[%s7458_s0 + $0x188] sm:$0xff]  }
  0x4f   :  { %6137 = vmatprep.mubr.msk.bf16.mxu0 %vm932_vm0, %v6402_v39  ;;  %6265 = vmatprep.mubr.msk.bf16.mxu1 %vm932_vm0, %v6403_v40  ;;  %v6465_v38 = vld [vmem:[%s7458_s0 + $0x388] sm:$0xff]   ;;  %v6466_v39 = vld [vmem:[%s7458_s0 + $0x190] sm:$0xff]  }
  0x50   :  { %v6467_v40 = vld [vmem:[%s7458_s0 + $0x390] sm:$0xff]  }
  0x56   :  { %6138 = vmatmul.mubr.msk.bf16.gmra.mrb[36].mxu0 %vm932_vm0, %v6404_v41  ;;  %6266 = vmatmul.mubr.msk.bf16.gmra.mrb[36].mxu1 %vm932_vm0, %v6405_v42  ;;  %v6468_v41 = vld [vmem:[%s7458_s0 + $0x198] sm:$0xff]  }
  0x57   :  { %6141 = vmatprep.mubr.msk.bf16.mxu0 %vm932_vm0, %v6406_v43  ;;  %6269 = vmatprep.mubr.msk.bf16.mxu1 %vm932_vm0, %v6407_v44  ;;  %v6469_v42 = vld [vmem:[%s7458_s0 + $0x398] sm:$0xff]   ;;  %v6470_v43 = vld [vmem:[%s7458_s0 + $0x1a0] sm:$0xff]  }
  0x58   :  { %v6471_v44 = vld [vmem:[%s7458_s0 + $0x3a0] sm:$0xff]  }
  0x5e   :  { %6142 = vmatmul.mubr.msk.bf16.gmra.mrb[40].mxu0 %vm932_vm0, %v6408_v45  ;;  %6270 = vmatmul.mubr.msk.bf16.gmra.mrb[40].mxu1 %vm932_vm0, %v6409_v46  ;;  %v6472_v45 = vld [vmem:[%s7458_s0 + $0x1a8] sm:$0xff]  }
  0x5f   :  { %6145 = vmatprep.mubr.msk.bf16.mxu0 %vm932_vm0, %v6410_v47  ;;  %6273 = vmatprep.mubr.msk.bf16.mxu1 %vm932_vm0, %v6411_v48  ;;  %v6473_v46 = vld [vmem:[%s7458_s0 + $0x3a8] sm:$0xff]   ;;  %v6474_v47 = vld [vmem:[%s7458_s0 + $0x1b0] sm:$0xff]  }
  0x60   :  { %v6475_v48 = vld [vmem:[%s7458_s0 + $0x3b0] sm:$0xff]  }
  0x66   :  { %6146 = vmatmul.mubr.msk.bf16.gmra.mrb[44].mxu0 %vm932_vm0, %v6412_v49  ;;  %6274 = vmatmul.mubr.msk.bf16.gmra.mrb[44].mxu1 %vm932_vm0, %v6413_v50 }
  0x67   :  { %6149 = vmatprep.mubr.msk.bf16.mxu0 %vm932_vm0, %v6414_v51  ;;  %6277 = vmatprep.mubr.msk.bf16.mxu1 %vm932_vm0, %v6415_v52  ;;  %v6476_v51 = vld [vmem:[%s7458_s0 + $0x1b8] sm:$0xff]  }
  0x6e   :  { %6150 = vmatmul.mubr.msk.bf16.gmra.mrb[48].mxu0 %vm932_vm0, %v6416_v53  ;;  %6278 = vmatmul.mubr.msk.bf16.gmra.mrb[48].mxu1 %vm932_vm0, %v6417_v54  ;;  %v6477_v54 = vld [vmem:[%s7458_s0 + $0x3b8] sm:$0xff]  }
  0x6f   :  { %6153 = vmatprep.mubr.msk.bf16.mxu0 %vm932_vm0, %v6418_v55  ;;  %6281 = vmatprep.mubr.msk.bf16.mxu1 %vm932_vm0, %v6419_v56 }
  0x76   :  { %6154 = vmatmul.mubr.msk.bf16.gmra.mrb[52].mxu0 %vm932_vm0, %v6420_v57  ;;  %6282 = vmatmul.mubr.msk.bf16.gmra.mrb[52].mxu1 %vm932_vm0, %v6421_v58  ;;  %v6478_v57 = vld [vmem:[%s7458_s0 + $0x1c0] sm:$0xff]  }
  0x77   :  { %6157 = vmatprep.mubr.msk.bf16.mxu0 %vm932_vm0, %v6422_v59  ;;  %6285 = vmatprep.mubr.msk.bf16.mxu1 %vm932_vm0, %v6423_v60  ;;  %v6479_v58 = vld [vmem:[%s7458_s0 + $0x3c0] sm:$0xff]  }
  0x7e   :  { %6158 = vmatmul.mubr.msk.bf16.gmra.mrb[56].mxu0 %vm932_vm0, %v6424_v61  ;;  %6286 = vmatmul.mubr.msk.bf16.gmra.mrb[56].mxu1 %vm932_vm0, %v6425_v62 }
  0x7f   :  { %6161 = vmatprep.mubr.msk.bf16.mxu0 %vm932_vm0, %v6426_v63  ;;  %6289 = vmatprep.mubr.msk.bf16.mxu1 %vm932_vm0, %v6427_v0 }
  0x86   :  { %6162 = vmatmul.mubr.msk.bf16.gmra.mrb[60].mxu0 %vm932_vm0, %v6428_v1  ;;  %6290 = vmatmul.mubr.msk.bf16.gmra.mrb[60].mxu1 %vm932_vm0, %v6429_v2 }
  0x87   :  { %6165 = vmatprep.mubr.msk.bf16.mxu0 %vm932_vm0, %v6430_v3  ;;  %6293 = vmatprep.mubr.msk.bf16.mxu1 %vm932_vm0, %v6431_v4 }
  0x8e   :  { %6166 = vmatmul.mubr.msk.bf16.gmra.mrb[64].mxu0 %vm932_vm0, %v6432_v5  ;;  %6294 = vmatmul.mubr.msk.bf16.gmra.mrb[64].mxu1 %vm932_vm0, %v6433_v6 }
  0x8f   :  { %6169 = vmatprep.mubr.msk.bf16.mxu0 %vm932_vm0, %v6434_v7  ;;  %6297 = vmatprep.mubr.msk.bf16.mxu1 %vm932_vm0, %v6435_v8 }
  0x96   :  { %6170 = vmatmul.mubr.msk.bf16.gmra.mrb[68].mxu0 %vm932_vm0, %v6436_v9  ;;  %6298 = vmatmul.mubr.msk.bf16.gmra.mrb[68].mxu1 %vm932_vm0, %v6437_v10 }
  0x97   :  { %6173 = vmatprep.mubr.msk.bf16.mxu0 %vm932_vm0, %v6438_v11  ;;  %6301 = vmatprep.mubr.msk.bf16.mxu1 %vm932_vm0, %v6439_v12 }
  0x9e   :  { %6174 = vmatmul.mubr.msk.bf16.gmra.mrb[72].mxu0 %vm932_vm0, %v6440_v13  ;;  %6302 = vmatmul.mubr.msk.bf16.gmra.mrb[72].mxu1 %vm932_vm0, %v6441_v14 }
  0x9f   :  { %6177 = vmatprep.mubr.msk.bf16.mxu0 %vm932_vm0, %v6442_v15  ;;  %6305 = vmatprep.mubr.msk.bf16.mxu1 %vm932_vm0, %v6443_v16  ;;  %v6480_v15 = vld [vmem:[%s7458_s0 + $0x1c8] sm:$0xff]  }
  0xa6   :  { %6178 = vmatmul.mubr.msk.bf16.gmra.mrb[76].mxu0 %vm932_vm0, %v6444_v17  ;;  %6306 = vmatmul.mubr.msk.bf16.gmra.mrb[76].mxu1 %vm932_vm0, %v6445_v18 }
  0xa7   :  { %6181 = vmatprep.mubr.msk.bf16.mxu0 %vm932_vm0, %v6446_v19  ;;  %6309 = vmatprep.mubr.msk.bf16.mxu1 %vm932_vm0, %v6447_v20 }
  0xae   :  { %6182 = vmatmul.mubr.msk.bf16.gmra.mrb[80].mxu0 %vm932_vm0, %v6448_v21  ;;  %6310 = vmatmul.mubr.msk.bf16.gmra.mrb[80].mxu1 %vm932_vm0, %v6449_v22  ;;  %v6481_v22 = vld [vmem:[%s7458_s0 + $0x3c8] sm:$0xff]  }
  0xaf   :  { %6185 = vmatprep.mubr.msk.bf16.mxu0 %vm932_vm0, %v6450_v23  ;;  %6313 = vmatprep.mubr.msk.bf16.mxu1 %vm932_vm0, %v6451_v24  ;;  %v6482_v23 = vld [vmem:[%s7458_s0 + $0x1d0] sm:$0xff]  }
  0xb6   :  { %6186 = vmatmul.mubr.msk.bf16.gmra.mrb[84].mxu0 %vm932_vm0, %v6452_v25  ;;  %6314 = vmatmul.mubr.msk.bf16.gmra.mrb[84].mxu1 %vm932_vm0, %v6453_v26 }
  0xb7   :  { %6189 = vmatprep.mubr.msk.bf16.mxu0 %vm932_vm0, %v6454_v27  ;;  %6317 = vmatprep.mubr.msk.bf16.mxu1 %vm932_vm0, %v6455_v28  ;;  %v6483_v28 = vld [vmem:[%s7458_s0 + $0x3d0] sm:$0xff]  }
  0xbe   :  { %6190 = vmatmul.mubr.msk.bf16.gmra.mrb[88].mxu0 %vm932_vm0, %v6456_v29  ;;  %6318 = vmatmul.mubr.msk.bf16.gmra.mrb[88].mxu1 %vm932_vm0, %v6457_v30 }
  0xbf   :  { %6193 = vmatprep.mubr.msk.bf16.mxu0 %vm932_vm0, %v6458_v31  ;;  %6321 = vmatprep.mubr.msk.bf16.mxu1 %vm932_vm0, %v6459_v32 }
  0xc6   :  { %6194 = vmatmul.mubr.msk.bf16.gmra.mrb[92].mxu0 %vm932_vm0, %v6460_v33  ;;  %6322 = vmatmul.mubr.msk.bf16.gmra.mrb[92].mxu1 %vm932_vm0, %v6461_v34 }
  0xc7   :  { %6197 = vmatprep.mubr.msk.bf16.mxu0 %vm932_vm0, %v6462_v35  ;;  %6325 = vmatprep.mubr.msk.bf16.mxu1 %vm932_vm0, %v6463_v36 }
  0xce   :  { %6198 = vmatmul.mubr.msk.bf16.gmra.mrb[96].mxu0 %vm932_vm0, %v6464_v37  ;;  %6326 = vmatmul.mubr.msk.bf16.gmra.mrb[96].mxu1 %vm932_vm0, %v6465_v38 }
  0xcf   :  { %6201 = vmatprep.mubr.msk.bf16.mxu0 %vm932_vm0, %v6466_v39  ;;  %6329 = vmatprep.mubr.msk.bf16.mxu1 %vm932_vm0, %v6467_v40 }
  0xd6   :  { %6202 = vmatmul.mubr.msk.bf16.gmra.mrb[100].mxu0 %vm932_vm0, %v6468_v41  ;;  %6330 = vmatmul.mubr.msk.bf16.gmra.mrb[100].mxu1 %vm932_vm0, %v6469_v42 }
  0xd7   :  { %6205 = vmatprep.mubr.msk.bf16.mxu0 %vm932_vm0, %v6470_v43  ;;  %6333 = vmatprep.mubr.msk.bf16.mxu1 %vm932_vm0, %v6471_v44 }
  0xde   :  { %6206 = vmatmul.mubr.msk.bf16.gmra.mrb[104].mxu0 %vm932_vm0, %v6472_v45  ;;  %6334 = vmatmul.mubr.msk.bf16.gmra.mrb[104].mxu1 %vm932_vm0, %v6473_v46 }
  0xdf   :  { %6209 = vmatprep.mubr.msk.bf16.mxu0 %vm932_vm0, %v6474_v47  ;;  %6337 = vmatprep.mubr.msk.bf16.mxu1 %vm932_vm0, %v6475_v48 }
  0xe1   :  { %v6103_v49 = vpop.f32.mrb[0].mxu0  ;;  %v6231_v50 = vpop.f32.mrb[0].mxu1 }
  0xe2   :  { %vm2376_vm1 = vcmp.ge.f32.partialorder %v6103_v49, 0.0  ;;  %v2632_v52 = vmul.f32 0.2, %v6103_v49  ;;  %v2760_v53 = vmul.f32 0.2, %v6231_v50  ;;  %vm2504_vm2 = vcmp.ge.f32.partialorder %v6231_v50, 0.0 }
  0xe3   :  { %v1351_v55 = vpop.f32.mrb[1].mxu0  ;;  %v1863_v56 = vpop.f32.mrb[1].mxu1 }
  0xe4   :  { %v2630_v59 = vmul.f32 0.2, %v1351_v55  ;;  %v6104_v60 = vpop.f32.mrb[2].mxu0  ;;  %v6232_v61 = vpop.f32.mrb[2].mxu1  ;;  %v2888_v62 = vsel %vm2376_vm1, %v6103_v49, %v2632_v52  ;;  %v2758_v63 = vmul.f32 0.2, %v1863_v56  ;;  %v3016_v1 = vsel %vm2504_vm2, %v6231_v50, %v2760_v53 }
  0xe5   :  { %vm2377_vm3 = vcmp.ge.f32.partialorder %v6104_v60, 0.0  ;;  %v2633_v0 = vmul.f32 0.2, %v6104_v60  ;;  %vm2374_vm4 = vcmp.ge.f32.partialorder %v1351_v55, 0.0  ;;  %vm2505_vm5 = vcmp.ge.f32.partialorder %v6232_v61, 0.0  ;;  %v1354_v3 = vpop.f32.mrb[3].mxu0 }
  0xe6   :  { %v2761_v2 = vmul.f32 0.2, %v6232_v61  ;;  %v1866_v4 = vpop.f32.mrb[3].mxu1  ;;  %6210 = vmatmul.mubr.msk.bf16.gmra.mrb[108].mxu0 %vm932_vm0, %v6476_v51  ;;  %6338 = vmatmul.mubr.msk.bf16.gmra.mrb[108].mxu1 %vm932_vm0, %v6477_v54  ;;  %vm2502_vm6 = vcmp.ge.f32.partialorder %v1863_v56, 0.0  ;;  %vm2375_vm7 = vcmp.ge.f32.partialorder %v1354_v3, 0.0  ;;  %v2886_v10 = vsel %vm2374_vm4, %v1351_v55, %v2630_v59  ;;  %v6484_v49 = vld [vmem:[%s7458_s0 + $0x1d8] sm:$0xff]  }
  0xe7   :  { %v2889_v5 = vsel %vm2377_vm3, %v6104_v60, %v2633_v0  ;;  %v2631_v6 = vmul.f32 0.2, %v1354_v3  ;;  %6213 = vmatprep.mubr.msk.bf16.mxu0 %vm932_vm0, %v6478_v57  ;;  %6341 = vmatprep.mubr.msk.bf16.mxu1 %vm932_vm0, %v6479_v58  ;;  %vm2503_vm8 = vcmp.ge.f32.partialorder %v1866_v4, 0.0  ;;  %v2759_v9 = vmul.f32 0.2, %v1866_v4  ;;  %v6485_v55 = vld [vmem:[%s7458_s0 + $0x3d8] sm:$0xff]  }
  0xe8   :  { %v5205_v7 = vpack.c.bf16 %v2889_v5, %v2888_v62  ;;  %v3017_v8 = vsel %vm2505_vm5, %v6232_v61, %v2761_v2  ;;  %v3014_v16 = vsel %vm2502_vm6, %v1863_v56, %v2758_v63  ;;  %v6486_v57 = vld [vmem:[%s7458_s0 + $0x1e0] sm:$0xff]  }
  0xe9   :  { %v5525_v11 = vpack.c.bf16 %v3017_v8, %v3016_v1  ;;  %v2887_v12 = vsel %vm2375_vm7, %v1354_v3, %v2631_v6  ;;  %v6107_v13 = vpop.f32.mrb[4].mxu0  ;;  %v6235_v14 = vpop.f32.mrb[4].mxu1  ;;  %v3015_v18 = vsel %vm2503_vm8, %v1866_v4, %v2759_v9  ;;  %v6487_v58 = vld [vmem:[%s7458_s0 + $0x3e0] sm:$0xff]  }
  0xea   :  { %5837 = vst [vmem:[%s7459_s2 + $0x8] sm:$0xff] %v5205_v7   ;;  %v5200_v17 = vpack.c.bf16 %v2887_v12, %v2886_v10  ;;  %v2636_v19 = vmul.f32 0.2, %v6107_v13  ;;  %v1367_v20 = vpop.f32.mrb[5].mxu0  ;;  %v1879_v21 = vpop.f32.mrb[5].mxu1  ;;  %v5520_v24 = vpack.c.bf16 %v3015_v18, %v3014_v16  ;;  %vm2380_vm9 = vcmp.ge.f32.partialorder %v6107_v13, 0.0 }
  0xeb   :  { %5901 = vst [vmem:[%s7459_s2 + $0x208] sm:$0xff] %v5525_v11   ;;  %v2764_v25 = vmul.f32 0.2, %v6235_v14  ;;  %v6108_v26 = vpop.f32.mrb[6].mxu0  ;;  %v6236_v27 = vpop.f32.mrb[6].mxu1  ;;  %vm2508_vm10 = vcmp.ge.f32.partialorder %v6235_v14, 0.0 }
  0xec   :  { %5201 = vst [vmem:[%s7459_s2] sm:$0xff] %v5200_v17   ;;  %v2634_v29 = vmul.f32 0.2, %v1367_v20  ;;  %v2762_v30 = vmul.f32 0.2, %v1879_v21  ;;  %v1370_v31 = vpop.f32.mrb[7].mxu0  ;;  %5900 = vst [vmem:[%s7459_s2 + $0x200] sm:$0xff] %v5520_v24   ;;  %v2892_v34 = vsel %vm2380_vm9, %v6107_v13, %v2636_v19 }
  0xed   :  { %vm2378_vm11 = vcmp.ge.f32.partialorder %v1367_v20, 0.0  ;;  %vm2381_vm12 = vcmp.ge.f32.partialorder %v6108_v26, 0.0  ;;  %v2637_v32 = vmul.f32 0.2, %v6108_v26  ;;  %vm2509_vm13 = vcmp.ge.f32.partialorder %v6236_v27, 0.0  ;;  %v1882_v33 = vpop.f32.mrb[7].mxu1 }
  0xee   :  { %vm2506_vm14 = vcmp.ge.f32.partialorder %v1879_v21, 0.0  ;;  %v2765_v35 = vmul.f32 0.2, %v6236_v27  ;;  %vm2379_vm15 = vcmp.ge.f32.partialorder %v1370_v31, 0.0  ;;  %6214 = vmatmul.mubr.msk.bf16.gmra.mrb[112].mxu0 %vm932_vm0, %v6480_v15  ;;  %6342 = vmatmul.mubr.msk.bf16.gmra.mrb[112].mxu1 %vm932_vm0, %v6481_v22  ;;  %v2635_v37 = vmul.f32 0.2, %v1370_v31 }
  0xef   :  { %v2893_v36 = vsel %vm2381_vm12, %v6108_v26, %v2637_v32  ;;  %vm2507_vm1 = vcmp.ge.f32.partialorder %v1882_v33, 0.0  ;;  %v2763_v38 = vmul.f32 0.2, %v1882_v33  ;;  %6217 = vmatprep.mubr.msk.bf16.mxu0 %vm932_vm0, %v6482_v23  ;;  %6345 = vmatprep.mubr.msk.bf16.mxu1 %vm932_vm0, %v6483_v28  ;;  %v3020_v39 = vsel %vm2508_vm10, %v6235_v14, %v2764_v25  ;;  %v6488_v17 = vld [vmem:[%s7458_s0 + $0x1e8] sm:$0xff]   ;;  %v6490_v25 = vld [vmem:[%s7458_s0 + $0x1f0] sm:$0xff]  }
  0xf0   :  { %v2890_v40 = vsel %vm2378_vm11, %v1367_v20, %v2634_v29  ;;  %v5215_v41 = vpack.c.bf16 %v2893_v36, %v2892_v34  ;;  %v3021_v42 = vsel %vm2509_vm13, %v6236_v27, %v2765_v35  ;;  %v3018_v43 = vsel %vm2506_vm14, %v1879_v21, %v2762_v30  ;;  %v6489_v23 = vld [vmem:[%s7458_s0 + $0x3e8] sm:$0xff]   ;;  %v6491_v26 = vld [vmem:[%s7458_s0 + $0x3f0] sm:$0xff]  }
  0xf1   :  { %v5535_v44 = vpack.c.bf16 %v3021_v42, %v3020_v39  ;;  %v2891_v45 = vsel %vm2379_vm15, %v1370_v31, %v2635_v37  ;;  %v3019_v46 = vsel %vm2507_vm1, %v1882_v33, %v2763_v38  ;;  %v6111_v47 = vpop.f32.mrb[8].mxu0  ;;  %v6239_v48 = vpop.f32.mrb[8].mxu1 }
  0xf2   :  { %5839 = vst [vmem:[%s7459_s2 + $0x18] sm:$0xff] %v5215_v41   ;;  %v5210_v50 = vpack.c.bf16 %v2891_v45, %v2890_v40  ;;  %v5530_v51 = vpack.c.bf16 %v3019_v46, %v3018_v43  ;;  %vm2384_vm2 = vcmp.ge.f32.partialorder %v6111_v47, 0.0  ;;  %v2640_v52 = vmul.f32 0.2, %v6111_v47  ;;  %v1383_v53 = vpop.f32.mrb[9].mxu0  ;;  %v1895_v54 = vpop.f32.mrb[9].mxu1 }
  0xf3   :  { %5903 = vst [vmem:[%s7459_s2 + $0x218] sm:$0xff] %v5535_v44   ;;  %vm2512_vm3 = vcmp.ge.f32.partialorder %v6239_v48, 0.0  ;;  %v2768_v56 = vmul.f32 0.2, %v6239_v48  ;;  %v2638_v59 = vmul.f32 0.2, %v1383_v53 }
  0xf4   :  { %5838 = vst [vmem:[%s7459_s2 + $0x10] sm:$0xff] %v5210_v50   ;;  %5902 = vst [vmem:[%s7459_s2 + $0x210] sm:$0xff] %v5530_v51   ;;  %v2766_v60 = vmul.f32 0.2, %v1895_v54  ;;  %v6112_v61 = vpop.f32.mrb[10].mxu0  ;;  %v6240_v62 = vpop.f32.mrb[10].mxu1  ;;  %v2896_v63 = vsel %vm2384_vm2, %v6111_v47, %v2640_v52 }
  0xf5   :  { %vm2382_vm4 = vcmp.ge.f32.partialorder %v1383_v53, 0.0  ;;  %vm2385_vm5 = vcmp.ge.f32.partialorder %v6112_v61, 0.0  ;;  %v2641_v0 = vmul.f32 0.2, %v6112_v61  ;;  %v1386_v1 = vpop.f32.mrb[11].mxu0  ;;  %v1898_v2 = vpop.f32.mrb[11].mxu1  ;;  %v3024_v7 = vsel %vm2512_vm3, %v6239_v48, %v2768_v56 }
  0xf6   :  { %vm2510_vm6 = vcmp.ge.f32.partialorder %v1895_v54, 0.0  ;;  %vm2513_vm7 = vcmp.ge.f32.partialorder %v6240_v62, 0.0  ;;  %v2769_v3 = vmul.f32 0.2, %v6240_v62  ;;  %vm2383_vm8 = vcmp.ge.f32.partialorder %v1386_v1, 0.0  ;;  %6218 = vmatmul.mubr.msk.bf16.gmra.mrb[116].mxu0 %vm932_vm0, %v6484_v49  ;;  %6346 = vmatmul.mubr.msk.bf16.gmra.mrb[116].mxu1 %vm932_vm0, %v6485_v55  ;;  %v6492_v49 = vld [vmem:[%s7458_s0 + $0x1f8] sm:$0xff]  }
  0xf7   :  { %v2897_v4 = vsel %vm2385_vm5, %v6112_v61, %v2641_v0  ;;  %v2639_v5 = vmul.f32 0.2, %v1386_v1  ;;  %vm2511_vm9 = vcmp.ge.f32.partialorder %v1898_v2, 0.0  ;;  %v2767_v6 = vmul.f32 0.2, %v1898_v2  ;;  %6221 = vmatprep.mubr.msk.bf16.mxu0 %vm932_vm0, %v6486_v57  ;;  %6349 = vmatprep.mubr.msk.bf16.mxu1 %vm932_vm0, %v6487_v58  ;;  %v6493_v55 = vld [vmem:[%s7458_s0 + $0x3f8] sm:$0xff]  }
  0xf8   :  { %v2894_v8 = vsel %vm2382_vm4, %v1383_v53, %v2638_v59  ;;  %v5225_v9 = vpack.c.bf16 %v2897_v4, %v2896_v63  ;;  %v3025_v10 = vsel %vm2513_vm7, %v6240_v62, %v2769_v3  ;;  %v3022_v11 = vsel %vm2510_vm6, %v1895_v54, %v2766_v60 }
  0xf9   :  { %v5545_v12 = vpack.c.bf16 %v3025_v10, %v3024_v7  ;;  %v2895_v13 = vsel %vm2383_vm8, %v1386_v1, %v2639_v5  ;;  %v3023_v14 = vsel %vm2511_vm9, %v1898_v2, %v2767_v6  ;;  %v6115_v15 = vpop.f32.mrb[12].mxu0  ;;  %v6243_v16 = vpop.f32.mrb[12].mxu1 }
  0xfa   :  { %5841 = vst [vmem:[%s7459_s2 + $0x28] sm:$0xff] %v5225_v9   ;;  %v5220_v18 = vpack.c.bf16 %v2895_v13, %v2894_v8  ;;  %v5540_v19 = vpack.c.bf16 %v3023_v14, %v3022_v11  ;;  %vm2388_vm10 = vcmp.ge.f32.partialorder %v6115_v15, 0.0  ;;  %v2644_v20 = vmul.f32 0.2, %v6115_v15  ;;  %v1399_v21 = vpop.f32.mrb[13].mxu0  ;;  %v1911_v22 = vpop.f32.mrb[13].mxu1 }
  0xfb   :  { %5905 = vst [vmem:[%s7459_s2 + $0x228] sm:$0xff] %v5545_v12   ;;  %vm2516_vm11 = vcmp.ge.f32.partialorder %v6243_v16, 0.0  ;;  %v2772_v24 = vmul.f32 0.2, %v6243_v16  ;;  %v2642_v27 = vmul.f32 0.2, %v1399_v21 }
  0xfc   :  { %5840 = vst [vmem:[%s7459_s2 + $0x20] sm:$0xff] %v5220_v18   ;;  %5904 = vst [vmem:[%s7459_s2 + $0x220] sm:$0xff] %v5540_v19   ;;  %v2770_v28 = vmul.f32 0.2, %v1911_v22  ;;  %v6116_v29 = vpop.f32.mrb[14].mxu0  ;;  %v6244_v30 = vpop.f32.mrb[14].mxu1  ;;  %v2900_v31 = vsel %vm2388_vm10, %v6115_v15, %v2644_v20 }
  0xfd   :  { %vm2386_vm12 = vcmp.ge.f32.partialorder %v1399_v21, 0.0  ;;  %vm2389_vm13 = vcmp.ge.f32.partialorder %v6116_v29, 0.0  ;;  %v2645_v32 = vmul.f32 0.2, %v6116_v29  ;;  %v1402_v33 = vpop.f32.mrb[15].mxu0  ;;  %v1914_v34 = vpop.f32.mrb[15].mxu1  ;;  %v3028_v39 = vsel %vm2516_vm11, %v6243_v16, %v2772_v24 }
  0xfe   :  { %vm2514_vm14 = vcmp.ge.f32.partialorder %v1911_v22, 0.0  ;;  %vm2517_vm15 = vcmp.ge.f32.partialorder %v6244_v30, 0.0  ;;  %v2773_v35 = vmul.f32 0.2, %v6244_v30  ;;  %vm2387_vm1 = vcmp.ge.f32.partialorder %v1402_v33, 0.0  ;;  %6222 = vmatmul.mubr.msk.bf16.gmra.mrb[120].mxu0 %vm932_vm0, %v6488_v17  ;;  %6350 = vmatmul.mubr.msk.bf16.gmra.mrb[120].mxu1 %vm932_vm0, %v6489_v23 }
  0xff   :  { %v2901_v36 = vsel %vm2389_vm13, %v6116_v29, %v2645_v32  ;;  %v2643_v37 = vmul.f32 0.2, %v1402_v33  ;;  %vm2515_vm2 = vcmp.ge.f32.partialorder %v1914_v34, 0.0  ;;  %v2771_v38 = vmul.f32 0.2, %v1914_v34  ;;  %6225 = vmatprep.mubr.msk.bf16.mxu0 %vm932_vm0, %v6490_v25  ;;  %6353 = vmatprep.mubr.msk.bf16.mxu1 %vm932_vm0, %v6491_v26 }
 0x100   :  { %v2898_v40 = vsel %vm2386_vm12, %v1399_v21, %v2642_v27  ;;  %v5235_v41 = vpack.c.bf16 %v2901_v36, %v2900_v31  ;;  %v3029_v42 = vsel %vm2517_vm15, %v6244_v30, %v2773_v35  ;;  %v3026_v43 = vsel %vm2514_vm14, %v1911_v22, %v2770_v28 }
 0x101   :  { %v5555_v44 = vpack.c.bf16 %v3029_v42, %v3028_v39  ;;  %v2899_v45 = vsel %vm2387_vm1, %v1402_v33, %v2643_v37  ;;  %v3027_v46 = vsel %vm2515_vm2, %v1914_v34, %v2771_v38  ;;  %v6119_v47 = vpop.f32.mrb[16].mxu0  ;;  %v6247_v48 = vpop.f32.mrb[16].mxu1 }
 0x102   :  { %5843 = vst [vmem:[%s7459_s2 + $0x38] sm:$0xff] %v5235_v41   ;;  %v5230_v50 = vpack.c.bf16 %v2899_v45, %v2898_v40  ;;  %v5550_v51 = vpack.c.bf16 %v3027_v46, %v3026_v43  ;;  %vm2392_vm3 = vcmp.ge.f32.partialorder %v6119_v47, 0.0  ;;  %v2648_v52 = vmul.f32 0.2, %v6119_v47  ;;  %v1415_v53 = vpop.f32.mrb[17].mxu0  ;;  %v1927_v54 = vpop.f32.mrb[17].mxu1 }
 0x103   :  { %5907 = vst [vmem:[%s7459_s2 + $0x238] sm:$0xff] %v5555_v44   ;;  %vm2520_vm4 = vcmp.ge.f32.partialorder %v6247_v48, 0.0  ;;  %v2776_v56 = vmul.f32 0.2, %v6247_v48  ;;  %v2646_v57 = vmul.f32 0.2, %v1415_v53 }
 0x104   :  { %5842 = vst [vmem:[%s7459_s2 + $0x30] sm:$0xff] %v5230_v50   ;;  %5906 = vst [vmem:[%s7459_s2 + $0x230] sm:$0xff] %v5550_v51   ;;  %v2774_v58 = vmul.f32 0.2, %v1927_v54  ;;  %v6120_v59 = vpop.f32.mrb[18].mxu0  ;;  %v6248_v60 = vpop.f32.mrb[18].mxu1  ;;  %v2904_v61 = vsel %vm2392_vm3, %v6119_v47, %v2648_v52 }
 0x105   :  { %vm2390_vm5 = vcmp.ge.f32.partialorder %v1415_v53, 0.0  ;;  %vm2393_vm6 = vcmp.ge.f32.partialorder %v6120_v59, 0.0  ;;  %v2649_v62 = vmul.f32 0.2, %v6120_v59  ;;  %v1418_v63 = vpop.f32.mrb[19].mxu0  ;;  %v1930_v0 = vpop.f32.mrb[19].mxu1  ;;  %v3032_v5 = vsel %vm2520_vm4, %v6247_v48, %v2776_v56 }
 0x106   :  { %vm2518_vm7 = vcmp.ge.f32.partialorder %v1927_v54, 0.0  ;;  %vm2521_vm8 = vcmp.ge.f32.partialorder %v6248_v60, 0.0  ;;  %v2777_v1 = vmul.f32 0.2, %v6248_v60  ;;  %vm2391_vm9 = vcmp.ge.f32.partialorder %v1418_v63, 0.0  ;;  %6226 = vmatmul.mubr.msk.bf16.gmra.mrb[124].mxu0 %vm932_vm0, %v6492_v49  ;;  %6354 = vmatmul.mubr.msk.bf16.gmra.mrb[124].mxu1 %vm932_vm0, %v6493_v55 }
 0x107   :  { %v2905_v2 = vsel %vm2393_vm6, %v6120_v59, %v2649_v62  ;;  %v2647_v3 = vmul.f32 0.2, %v1418_v63  ;;  %vm2519_vm10 = vcmp.ge.f32.partialorder %v1930_v0, 0.0  ;;  %v2775_v4 = vmul.f32 0.2, %v1930_v0 }
 0x108   :  { %v2902_v6 = vsel %vm2390_vm5, %v1415_v53, %v2646_v57  ;;  %v5245_v7 = vpack.c.bf16 %v2905_v2, %v2904_v61  ;;  %v3033_v8 = vsel %vm2521_vm8, %v6248_v60, %v2777_v1  ;;  %v3030_v9 = vsel %vm2518_vm7, %v1927_v54, %v2774_v58 }
 0x109   :  { %v5565_v10 = vpack.c.bf16 %v3033_v8, %v3032_v5  ;;  %v2903_v11 = vsel %vm2391_vm9, %v1418_v63, %v2647_v3  ;;  %v3031_v12 = vsel %vm2519_vm10, %v1930_v0, %v2775_v4  ;;  %v6123_v13 = vpop.f32.mrb[20].mxu0  ;;  %v6251_v14 = vpop.f32.mrb[20].mxu1 }
 0x10a   :  { %5845 = vst [vmem:[%s7459_s2 + $0x48] sm:$0xff] %v5245_v7   ;;  %v5240_v15 = vpack.c.bf16 %v2903_v11, %v2902_v6  ;;  %v5560_v16 = vpack.c.bf16 %v3031_v12, %v3030_v9  ;;  %vm2396_vm0 = vcmp.ge.f32.partialorder %v6123_v13, 0.0  ;;  %v2652_v17 = vmul.f32 0.2, %v6123_v13  ;;  %v1431_v18 = vpop.f32.mrb[21].mxu0  ;;  %v1943_v19 = vpop.f32.mrb[21].mxu1 }
 0x10b   :  { %5909 = vst [vmem:[%s7459_s2 + $0x248] sm:$0xff] %v5565_v10   ;;  %vm2524_vm11 = vcmp.ge.f32.partialorder %v6251_v14, 0.0  ;;  %v2780_v20 = vmul.f32 0.2, %v6251_v14  ;;  %v2650_v21 = vmul.f32 0.2, %v1431_v18 }
 0x10c   :  { %5844 = vst [vmem:[%s7459_s2 + $0x40] sm:$0xff] %v5240_v15   ;;  %5908 = vst [vmem:[%s7459_s2 + $0x240] sm:$0xff] %v5560_v16   ;;  %v2778_v22 = vmul.f32 0.2, %v1943_v19  ;;  %v6124_v23 = vpop.f32.mrb[22].mxu0  ;;  %v6252_v24 = vpop.f32.mrb[22].mxu1  ;;  %v2908_v25 = vsel %vm2396_vm0, %v6123_v13, %v2652_v17 }
 0x10d   :  { %vm2394_vm12 = vcmp.ge.f32.partialorder %v1431_v18, 0.0  ;;  %vm2397_vm13 = vcmp.ge.f32.partialorder %v6124_v23, 0.0  ;;  %v2653_v26 = vmul.f32 0.2, %v6124_v23  ;;  %v1434_v27 = vpop.f32.mrb[23].mxu0  ;;  %v1946_v28 = vpop.f32.mrb[23].mxu1  ;;  %v3036_v33 = vsel %vm2524_vm11, %v6251_v14, %v2780_v20 }
 0x10e   :  { %vm2522_vm14 = vcmp.ge.f32.partialorder %v1943_v19, 0.0  ;;  %vm2525_vm15 = vcmp.ge.f32.partialorder %v6252_v24, 0.0  ;;  %v2781_v29 = vmul.f32 0.2, %v6252_v24  ;;  %vm2395_vm1 = vcmp.ge.f32.partialorder %v1434_v27, 0.0 }
 0x10f   :  { %v2909_v30 = vsel %vm2397_vm13, %v6124_v23, %v2653_v26  ;;  %v2651_v31 = vmul.f32 0.2, %v1434_v27  ;;  %vm2523_vm2 = vcmp.ge.f32.partialorder %v1946_v28, 0.0  ;;  %v2779_v32 = vmul.f32 0.2, %v1946_v28 }
 0x110   :  { %v2906_v34 = vsel %vm2394_vm12, %v1431_v18, %v2650_v21  ;;  %v5255_v35 = vpack.c.bf16 %v2909_v30, %v2908_v25  ;;  %v3037_v36 = vsel %vm2525_vm15, %v6252_v24, %v2781_v29  ;;  %v3034_v37 = vsel %vm2522_vm14, %v1943_v19, %v2778_v22 }
 0x111   :  { %v5575_v38 = vpack.c.bf16 %v3037_v36, %v3036_v33  ;;  %v2907_v39 = vsel %vm2395_vm1, %v1434_v27, %v2651_v31  ;;  %v3035_v40 = vsel %vm2523_vm2, %v1946_v28, %v2779_v32  ;;  %v6127_v41 = vpop.f32.mrb[24].mxu0  ;;  %v6255_v42 = vpop.f32.mrb[24].mxu1 }
 0x112   :  { %5847 = vst [vmem:[%s7459_s2 + $0x58] sm:$0xff] %v5255_v35   ;;  %v5250_v43 = vpack.c.bf16 %v2907_v39, %v2906_v34  ;;  %v5570_v44 = vpack.c.bf16 %v3035_v40, %v3034_v37  ;;  %vm2400_vm3 = vcmp.ge.f32.partialorder %v6127_v41, 0.0  ;;  %v2656_v45 = vmul.f32 0.2, %v6127_v41  ;;  %v1447_v46 = vpop.f32.mrb[25].mxu0  ;;  %v1959_v47 = vpop.f32.mrb[25].mxu1 }
 0x113   :  { %5911 = vst [vmem:[%s7459_s2 + $0x258] sm:$0xff] %v5575_v38   ;;  %vm2528_vm4 = vcmp.ge.f32.partialorder %v6255_v42, 0.0  ;;  %v2784_v48 = vmul.f32 0.2, %v6255_v42  ;;  %v2654_v49 = vmul.f32 0.2, %v1447_v46 }
 0x114   :  { %5846 = vst [vmem:[%s7459_s2 + $0x50] sm:$0xff] %v5250_v43   ;;  %5910 = vst [vmem:[%s7459_s2 + $0x250] sm:$0xff] %v5570_v44   ;;  %v2782_v50 = vmul.f32 0.2, %v1959_v47  ;;  %v6128_v51 = vpop.f32.mrb[26].mxu0  ;;  %v6256_v52 = vpop.f32.mrb[26].mxu1  ;;  %v2912_v53 = vsel %vm2400_vm3, %v6127_v41, %v2656_v45 }
 0x115   :  { %vm2398_vm5 = vcmp.ge.f32.partialorder %v1447_v46, 0.0  ;;  %vm2401_vm6 = vcmp.ge.f32.partialorder %v6128_v51, 0.0  ;;  %v2657_v54 = vmul.f32 0.2, %v6128_v51  ;;  %v1450_v55 = vpop.f32.mrb[27].mxu0  ;;  %v1962_v56 = vpop.f32.mrb[27].mxu1  ;;  %v3040_v61 = vsel %vm2528_vm4, %v6255_v42, %v2784_v48 }
 0x116   :  { %vm2526_vm7 = vcmp.ge.f32.partialorder %v1959_v47, 0.0  ;;  %vm2529_vm8 = vcmp.ge.f32.partialorder %v6256_v52, 0.0  ;;  %v2785_v57 = vmul.f32 0.2, %v6256_v52  ;;  %vm2399_vm9 = vcmp.ge.f32.partialorder %v1450_v55, 0.0 }
 0x117   :  { %v2913_v58 = vsel %vm2401_vm6, %v6128_v51, %v2657_v54  ;;  %v2655_v59 = vmul.f32 0.2, %v1450_v55  ;;  %vm2527_vm10 = vcmp.ge.f32.partialorder %v1962_v56, 0.0  ;;  %v2783_v60 = vmul.f32 0.2, %v1962_v56 }
 0x118   :  { %v2910_v62 = vsel %vm2398_vm5, %v1447_v46, %v2654_v49  ;;  %v5265_v63 = vpack.c.bf16 %v2913_v58, %v2912_v53  ;;  %v3041_v0 = vsel %vm2529_vm8, %v6256_v52, %v2785_v57  ;;  %v3038_v1 = vsel %vm2526_vm7, %v1959_v47, %v2782_v50 }
 0x119   :  { %v5585_v2 = vpack.c.bf16 %v3041_v0, %v3040_v61  ;;  %v2911_v3 = vsel %vm2399_vm9, %v1450_v55, %v2655_v59  ;;  %v3039_v4 = vsel %vm2527_vm10, %v1962_v56, %v2783_v60  ;;  %v6131_v5 = vpop.f32.mrb[28].mxu0  ;;  %v6259_v6 = vpop.f32.mrb[28].mxu1 }
 0x11a   :  { %5849 = vst [vmem:[%s7459_s2 + $0x68] sm:$0xff] %v5265_v63   ;;  %v5260_v7 = vpack.c.bf16 %v2911_v3, %v2910_v62  ;;  %v5580_v8 = vpack.c.bf16 %v3039_v4, %v3038_v1  ;;  %vm2404_vm0 = vcmp.ge.f32.partialorder %v6131_v5, 0.0  ;;  %v2660_v9 = vmul.f32 0.2, %v6131_v5  ;;  %v1463_v10 = vpop.f32.mrb[29].mxu0  ;;  %v1975_v11 = vpop.f32.mrb[29].mxu1 }
 0x11b   :  { %5913 = vst [vmem:[%s7459_s2 + $0x268] sm:$0xff] %v5585_v2   ;;  %vm2532_vm11 = vcmp.ge.f32.partialorder %v6259_v6, 0.0  ;;  %v2788_v12 = vmul.f32 0.2, %v6259_v6  ;;  %v2658_v13 = vmul.f32 0.2, %v1463_v10 }
 0x11c   :  { %5848 = vst [vmem:[%s7459_s2 + $0x60] sm:$0xff] %v5260_v7   ;;  %5912 = vst [vmem:[%s7459_s2 + $0x260] sm:$0xff] %v5580_v8   ;;  %v2786_v14 = vmul.f32 0.2, %v1975_v11  ;;  %v6132_v15 = vpop.f32.mrb[30].mxu0  ;;  %v6260_v16 = vpop.f32.mrb[30].mxu1  ;;  %v2916_v17 = vsel %vm2404_vm0, %v6131_v5, %v2660_v9 }
 0x11d   :  { %vm2402_vm12 = vcmp.ge.f32.partialorder %v1463_v10, 0.0  ;;  %vm2405_vm13 = vcmp.ge.f32.partialorder %v6132_v15, 0.0  ;;  %v2661_v18 = vmul.f32 0.2, %v6132_v15  ;;  %v1466_v19 = vpop.f32.mrb[31].mxu0  ;;  %v1978_v20 = vpop.f32.mrb[31].mxu1  ;;  %v3044_v25 = vsel %vm2532_vm11, %v6259_v6, %v2788_v12 }
 0x11e   :  { %vm2530_vm14 = vcmp.ge.f32.partialorder %v1975_v11, 0.0  ;;  %vm2533_vm15 = vcmp.ge.f32.partialorder %v6260_v16, 0.0  ;;  %v2789_v21 = vmul.f32 0.2, %v6260_v16  ;;  %vm2403_vm1 = vcmp.ge.f32.partialorder %v1466_v19, 0.0 }
 0x11f   :  { %v2917_v22 = vsel %vm2405_vm13, %v6132_v15, %v2661_v18  ;;  %v2659_v23 = vmul.f32 0.2, %v1466_v19  ;;  %vm2531_vm2 = vcmp.ge.f32.partialorder %v1978_v20, 0.0  ;;  %v2787_v24 = vmul.f32 0.2, %v1978_v20 }
 0x120   :  { %v2914_v26 = vsel %vm2402_vm12, %v1463_v10, %v2658_v13  ;;  %v5275_v27 = vpack.c.bf16 %v2917_v22, %v2916_v17  ;;  %v3045_v28 = vsel %vm2533_vm15, %v6260_v16, %v2789_v21  ;;  %v3042_v29 = vsel %vm2530_vm14, %v1975_v11, %v2786_v14 }
 0x121   :  { %v5595_v30 = vpack.c.bf16 %v3045_v28, %v3044_v25  ;;  %v2915_v31 = vsel %vm2403_vm1, %v1466_v19, %v2659_v23  ;;  %v3043_v32 = vsel %vm2531_vm2, %v1978_v20, %v2787_v24  ;;  %v6135_v33 = vpop.f32.mrb[32].mxu0  ;;  %v6263_v34 = vpop.f32.mrb[32].mxu1 }
 0x122   :  { %5851 = vst [vmem:[%s7459_s2 + $0x78] sm:$0xff] %v5275_v27   ;;  %v5270_v35 = vpack.c.bf16 %v2915_v31, %v2914_v26  ;;  %v5590_v36 = vpack.c.bf16 %v3043_v32, %v3042_v29  ;;  %vm2408_vm3 = vcmp.ge.f32.partialorder %v6135_v33, 0.0  ;;  %v2664_v37 = vmul.f32 0.2, %v6135_v33  ;;  %v1479_v38 = vpop.f32.mrb[33].mxu0  ;;  %v1991_v39 = vpop.f32.mrb[33].mxu1 }
 0x123   :  { %5915 = vst [vmem:[%s7459_s2 + $0x278] sm:$0xff] %v5595_v30   ;;  %vm2536_vm4 = vcmp.ge.f32.partialorder %v6263_v34, 0.0  ;;  %v2792_v40 = vmul.f32 0.2, %v6263_v34  ;;  %v2662_v41 = vmul.f32 0.2, %v1479_v38 }
 0x124   :  { %5850 = vst [vmem:[%s7459_s2 + $0x70] sm:$0xff] %v5270_v35   ;;  %5914 = vst [vmem:[%s7459_s2 + $0x270] sm:$0xff] %v5590_v36   ;;  %v2790_v42 = vmul.f32 0.2, %v1991_v39  ;;  %v6136_v43 = vpop.f32.mrb[34].mxu0  ;;  %v6264_v44 = vpop.f32.mrb[34].mxu1  ;;  %v2920_v45 = vsel %vm2408_vm3, %v6135_v33, %v2664_v37 }
 0x125   :  { %vm2406_vm5 = vcmp.ge.f32.partialorder %v1479_v38, 0.0  ;;  %vm2409_vm6 = vcmp.ge.f32.partialorder %v6136_v43, 0.0  ;;  %v2665_v46 = vmul.f32 0.2, %v6136_v43  ;;  %v1482_v47 = vpop.f32.mrb[35].mxu0  ;;  %v1994_v48 = vpop.f32.mrb[35].mxu1  ;;  %v3048_v53 = vsel %vm2536_vm4, %v6263_v34, %v2792_v40 }
 0x126   :  { %vm2534_vm7 = vcmp.ge.f32.partialorder %v1991_v39, 0.0  ;;  %vm2537_vm8 = vcmp.ge.f32.partialorder %v6264_v44, 0.0  ;;  %v2793_v49 = vmul.f32 0.2, %v6264_v44  ;;  %vm2407_vm9 = vcmp.ge.f32.partialorder %v1482_v47, 0.0 }
 0x127   :  { %v2921_v50 = vsel %vm2409_vm6, %v6136_v43, %v2665_v46  ;;  %v2663_v51 = vmul.f32 0.2, %v1482_v47  ;;  %vm2535_vm10 = vcmp.ge.f32.partialorder %v1994_v48, 0.0  ;;  %v2791_v52 = vmul.f32 0.2, %v1994_v48 }
 0x128   :  { %v2918_v54 = vsel %vm2406_vm5, %v1479_v38, %v2662_v41  ;;  %v5285_v55 = vpack.c.bf16 %v2921_v50, %v2920_v45  ;;  %v3049_v56 = vsel %vm2537_vm8, %v6264_v44, %v2793_v49  ;;  %v3046_v57 = vsel %vm2534_vm7, %v1991_v39, %v2790_v42 }
 0x129   :  { %v5605_v58 = vpack.c.bf16 %v3049_v56, %v3048_v53  ;;  %v2919_v59 = vsel %vm2407_vm9, %v1482_v47, %v2663_v51  ;;  %v3047_v60 = vsel %vm2535_vm10, %v1994_v48, %v2791_v52  ;;  %v6139_v61 = vpop.f32.mrb[36].mxu0  ;;  %v6267_v62 = vpop.f32.mrb[36].mxu1 }
 0x12a   :  { %5853 = vst [vmem:[%s7459_s2 + $0x88] sm:$0xff] %v5285_v55   ;;  %v5280_v63 = vpack.c.bf16 %v2919_v59, %v2918_v54  ;;  %v5600_v0 = vpack.c.bf16 %v3047_v60, %v3046_v57  ;;  %vm2412_vm0 = vcmp.ge.f32.partialorder %v6139_v61, 0.0  ;;  %v2668_v1 = vmul.f32 0.2, %v6139_v61  ;;  %v1495_v2 = vpop.f32.mrb[37].mxu0  ;;  %v2007_v3 = vpop.f32.mrb[37].mxu1 }
 0x12b   :  { %5917 = vst [vmem:[%s7459_s2 + $0x288] sm:$0xff] %v5605_v58   ;;  %vm2540_vm11 = vcmp.ge.f32.partialorder %v6267_v62, 0.0  ;;  %v2796_v4 = vmul.f32 0.2, %v6267_v62  ;;  %v2666_v5 = vmul.f32 0.2, %v1495_v2 }
 0x12c   :  { %5852 = vst [vmem:[%s7459_s2 + $0x80] sm:$0xff] %v5280_v63   ;;  %5916 = vst [vmem:[%s7459_s2 + $0x280] sm:$0xff] %v5600_v0   ;;  %v2794_v6 = vmul.f32 0.2, %v2007_v3  ;;  %v6140_v7 = vpop.f32.mrb[38].mxu0  ;;  %v6268_v8 = vpop.f32.mrb[38].mxu1  ;;  %v2924_v9 = vsel %vm2412_vm0, %v6139_v61, %v2668_v1 }
 0x12d   :  { %vm2410_vm12 = vcmp.ge.f32.partialorder %v1495_v2, 0.0  ;;  %vm2413_vm13 = vcmp.ge.f32.partialorder %v6140_v7, 0.0  ;;  %v2669_v10 = vmul.f32 0.2, %v6140_v7  ;;  %v1498_v11 = vpop.f32.mrb[39].mxu0  ;;  %v2010_v12 = vpop.f32.mrb[39].mxu1  ;;  %v3052_v17 = vsel %vm2540_vm11, %v6267_v62, %v2796_v4 }
 0x12e   :  { %vm2538_vm14 = vcmp.ge.f32.partialorder %v2007_v3, 0.0  ;;  %vm2541_vm15 = vcmp.ge.f32.partialorder %v6268_v8, 0.0  ;;  %v2797_v13 = vmul.f32 0.2, %v6268_v8  ;;  %vm2411_vm1 = vcmp.ge.f32.partialorder %v1498_v11, 0.0 }
 0x12f   :  { %v2925_v14 = vsel %vm2413_vm13, %v6140_v7, %v2669_v10  ;;  %v2667_v15 = vmul.f32 0.2, %v1498_v11  ;;  %vm2539_vm2 = vcmp.ge.f32.partialorder %v2010_v12, 0.0  ;;  %v2795_v16 = vmul.f32 0.2, %v2010_v12 }
 0x130   :  { %v2922_v18 = vsel %vm2410_vm12, %v1495_v2, %v2666_v5  ;;  %v5295_v19 = vpack.c.bf16 %v2925_v14, %v2924_v9  ;;  %v3053_v20 = vsel %vm2541_vm15, %v6268_v8, %v2797_v13  ;;  %v3050_v21 = vsel %vm2538_vm14, %v2007_v3, %v2794_v6 }
 0x131   :  { %v5615_v22 = vpack.c.bf16 %v3053_v20, %v3052_v17  ;;  %v2923_v23 = vsel %vm2411_vm1, %v1498_v11, %v2667_v15  ;;  %v3051_v24 = vsel %vm2539_vm2, %v2010_v12, %v2795_v16  ;;  %v6143_v25 = vpop.f32.mrb[40].mxu0  ;;  %v6271_v26 = vpop.f32.mrb[40].mxu1 }
 0x132   :  { %5855 = vst [vmem:[%s7459_s2 + $0x98] sm:$0xff] %v5295_v19   ;;  %v5290_v27 = vpack.c.bf16 %v2923_v23, %v2922_v18  ;;  %v5610_v28 = vpack.c.bf16 %v3051_v24, %v3050_v21  ;;  %vm2416_vm3 = vcmp.ge.f32.partialorder %v6143_v25, 0.0  ;;  %v2672_v29 = vmul.f32 0.2, %v6143_v25  ;;  %v1511_v30 = vpop.f32.mrb[41].mxu0  ;;  %v2023_v31 = vpop.f32.mrb[41].mxu1 }
 0x133   :  { %5919 = vst [vmem:[%s7459_s2 + $0x298] sm:$0xff] %v5615_v22   ;;  %vm2544_vm4 = vcmp.ge.f32.partialorder %v6271_v26, 0.0  ;;  %v2800_v32 = vmul.f32 0.2, %v6271_v26  ;;  %v2670_v33 = vmul.f32 0.2, %v1511_v30 }
 0x134   :  { %5854 = vst [vmem:[%s7459_s2 + $0x90] sm:$0xff] %v5290_v27   ;;  %5918 = vst [vmem:[%s7459_s2 + $0x290] sm:$0xff] %v5610_v28   ;;  %v2798_v34 = vmul.f32 0.2, %v2023_v31  ;;  %v6144_v35 = vpop.f32.mrb[42].mxu0  ;;  %v6272_v36 = vpop.f32.mrb[42].mxu1  ;;  %v2928_v37 = vsel %vm2416_vm3, %v6143_v25, %v2672_v29 }
 0x135   :  { %vm2414_vm5 = vcmp.ge.f32.partialorder %v1511_v30, 0.0  ;;  %vm2417_vm6 = vcmp.ge.f32.partialorder %v6144_v35, 0.0  ;;  %v2673_v38 = vmul.f32 0.2, %v6144_v35  ;;  %v1514_v39 = vpop.f32.mrb[43].mxu0  ;;  %v2026_v40 = vpop.f32.mrb[43].mxu1  ;;  %v3056_v45 = vsel %vm2544_vm4, %v6271_v26, %v2800_v32 }
 0x136   :  { %vm2542_vm7 = vcmp.ge.f32.partialorder %v2023_v31, 0.0  ;;  %vm2545_vm8 = vcmp.ge.f32.partialorder %v6272_v36, 0.0  ;;  %v2801_v41 = vmul.f32 0.2, %v6272_v36  ;;  %vm2415_vm9 = vcmp.ge.f32.partialorder %v1514_v39, 0.0 }
 0x137   :  { %v2929_v42 = vsel %vm2417_vm6, %v6144_v35, %v2673_v38  ;;  %v2671_v43 = vmul.f32 0.2, %v1514_v39  ;;  %vm2543_vm10 = vcmp.ge.f32.partialorder %v2026_v40, 0.0  ;;  %v2799_v44 = vmul.f32 0.2, %v2026_v40 }
 0x138   :  { %v2926_v46 = vsel %vm2414_vm5, %v1511_v30, %v2670_v33  ;;  %v5305_v47 = vpack.c.bf16 %v2929_v42, %v2928_v37  ;;  %v3057_v48 = vsel %vm2545_vm8, %v6272_v36, %v2801_v41  ;;  %v3054_v49 = vsel %vm2542_vm7, %v2023_v31, %v2798_v34 }
 0x139   :  { %v5625_v50 = vpack.c.bf16 %v3057_v48, %v3056_v45  ;;  %v2927_v51 = vsel %vm2415_vm9, %v1514_v39, %v2671_v43  ;;  %v3055_v52 = vsel %vm2543_vm10, %v2026_v40, %v2799_v44  ;;  %v6147_v53 = vpop.f32.mrb[44].mxu0  ;;  %v6275_v54 = vpop.f32.mrb[44].mxu1 }
 0x13a   :  { %5857 = vst [vmem:[%s7459_s2 + $0xa8] sm:$0xff] %v5305_v47   ;;  %v5300_v55 = vpack.c.bf16 %v2927_v51, %v2926_v46  ;;  %v5620_v56 = vpack.c.bf16 %v3055_v52, %v3054_v49  ;;  %vm2420_vm0 = vcmp.ge.f32.partialorder %v6147_v53, 0.0  ;;  %v2676_v57 = vmul.f32 0.2, %v6147_v53  ;;  %v1527_v58 = vpop.f32.mrb[45].mxu0  ;;  %v2039_v59 = vpop.f32.mrb[45].mxu1 }
 0x13b   :  { %5921 = vst [vmem:[%s7459_s2 + $0x2a8] sm:$0xff] %v5625_v50   ;;  %vm2548_vm11 = vcmp.ge.f32.partialorder %v6275_v54, 0.0  ;;  %v2804_v60 = vmul.f32 0.2, %v6275_v54  ;;  %v2674_v61 = vmul.f32 0.2, %v1527_v58 }
 0x13c   :  { %5856 = vst [vmem:[%s7459_s2 + $0xa0] sm:$0xff] %v5300_v55   ;;  %5920 = vst [vmem:[%s7459_s2 + $0x2a0] sm:$0xff] %v5620_v56   ;;  %v2802_v62 = vmul.f32 0.2, %v2039_v59  ;;  %v6148_v63 = vpop.f32.mrb[46].mxu0  ;;  %v6276_v0 = vpop.f32.mrb[46].mxu1  ;;  %v2932_v1 = vsel %vm2420_vm0, %v6147_v53, %v2676_v57 }
 0x13d   :  { %vm2418_vm12 = vcmp.ge.f32.partialorder %v1527_v58, 0.0  ;;  %vm2421_vm13 = vcmp.ge.f32.partialorder %v6148_v63, 0.0  ;;  %v2677_v2 = vmul.f32 0.2, %v6148_v63  ;;  %v1530_v3 = vpop.f32.mrb[47].mxu0  ;;  %v2042_v4 = vpop.f32.mrb[47].mxu1  ;;  %v3060_v9 = vsel %vm2548_vm11, %v6275_v54, %v2804_v60 }
 0x13e   :  { %vm2546_vm14 = vcmp.ge.f32.partialorder %v2039_v59, 0.0  ;;  %vm2549_vm15 = vcmp.ge.f32.partialorder %v6276_v0, 0.0  ;;  %v2805_v5 = vmul.f32 0.2, %v6276_v0  ;;  %vm2419_vm1 = vcmp.ge.f32.partialorder %v1530_v3, 0.0 }
 0x13f   :  { %v2933_v6 = vsel %vm2421_vm13, %v6148_v63, %v2677_v2  ;;  %v2675_v7 = vmul.f32 0.2, %v1530_v3  ;;  %vm2547_vm2 = vcmp.ge.f32.partialorder %v2042_v4, 0.0  ;;  %v2803_v8 = vmul.f32 0.2, %v2042_v4 }
 0x140   :  { %v2930_v10 = vsel %vm2418_vm12, %v1527_v58, %v2674_v61  ;;  %v5315_v11 = vpack.c.bf16 %v2933_v6, %v2932_v1  ;;  %v3061_v12 = vsel %vm2549_vm15, %v6276_v0, %v2805_v5  ;;  %v3058_v13 = vsel %vm2546_vm14, %v2039_v59, %v2802_v62 }
 0x141   :  { %v5635_v14 = vpack.c.bf16 %v3061_v12, %v3060_v9  ;;  %v2931_v15 = vsel %vm2419_vm1, %v1530_v3, %v2675_v7  ;;  %v3059_v16 = vsel %vm2547_vm2, %v2042_v4, %v2803_v8  ;;  %v6151_v17 = vpop.f32.mrb[48].mxu0  ;;  %v6279_v18 = vpop.f32.mrb[48].mxu1 }
 0x142   :  { %5859 = vst [vmem:[%s7459_s2 + $0xb8] sm:$0xff] %v5315_v11   ;;  %v5310_v19 = vpack.c.bf16 %v2931_v15, %v2930_v10  ;;  %v5630_v20 = vpack.c.bf16 %v3059_v16, %v3058_v13  ;;  %vm2424_vm3 = vcmp.ge.f32.partialorder %v6151_v17, 0.0  ;;  %v2680_v21 = vmul.f32 0.2, %v6151_v17  ;;  %v1543_v22 = vpop.f32.mrb[49].mxu0  ;;  %v2055_v23 = vpop.f32.mrb[49].mxu1 }
 0x143   :  { %5923 = vst [vmem:[%s7459_s2 + $0x2b8] sm:$0xff] %v5635_v14   ;;  %vm2552_vm4 = vcmp.ge.f32.partialorder %v6279_v18, 0.0  ;;  %v2808_v24 = vmul.f32 0.2, %v6279_v18  ;;  %v2678_v25 = vmul.f32 0.2, %v1543_v22 }
 0x144   :  { %5858 = vst [vmem:[%s7459_s2 + $0xb0] sm:$0xff] %v5310_v19   ;;  %5922 = vst [vmem:[%s7459_s2 + $0x2b0] sm:$0xff] %v5630_v20   ;;  %v2806_v26 = vmul.f32 0.2, %v2055_v23  ;;  %v6152_v27 = vpop.f32.mrb[50].mxu0  ;;  %v6280_v28 = vpop.f32.mrb[50].mxu1  ;;  %v2936_v29 = vsel %vm2424_vm3, %v6151_v17, %v2680_v21 }
 0x145   :  { %vm2422_vm5 = vcmp.ge.f32.partialorder %v1543_v22, 0.0  ;;  %vm2425_vm6 = vcmp.ge.f32.partialorder %v6152_v27, 0.0  ;;  %v2681_v30 = vmul.f32 0.2, %v6152_v27  ;;  %v1546_v31 = vpop.f32.mrb[51].mxu0  ;;  %v2058_v32 = vpop.f32.mrb[51].mxu1  ;;  %v3064_v37 = vsel %vm2552_vm4, %v6279_v18, %v2808_v24 }
 0x146   :  { %vm2550_vm7 = vcmp.ge.f32.partialorder %v2055_v23, 0.0  ;;  %vm2553_vm8 = vcmp.ge.f32.partialorder %v6280_v28, 0.0  ;;  %v2809_v33 = vmul.f32 0.2, %v6280_v28  ;;  %vm2423_vm9 = vcmp.ge.f32.partialorder %v1546_v31, 0.0 }
 0x147   :  { %v2937_v34 = vsel %vm2425_vm6, %v6152_v27, %v2681_v30  ;;  %v2679_v35 = vmul.f32 0.2, %v1546_v31  ;;  %vm2551_vm10 = vcmp.ge.f32.partialorder %v2058_v32, 0.0  ;;  %v2807_v36 = vmul.f32 0.2, %v2058_v32 }
 0x148   :  { %v2934_v38 = vsel %vm2422_vm5, %v1543_v22, %v2678_v25  ;;  %v5325_v39 = vpack.c.bf16 %v2937_v34, %v2936_v29  ;;  %v3065_v40 = vsel %vm2553_vm8, %v6280_v28, %v2809_v33  ;;  %v3062_v41 = vsel %vm2550_vm7, %v2055_v23, %v2806_v26 }
 0x149   :  { %v5645_v42 = vpack.c.bf16 %v3065_v40, %v3064_v37  ;;  %v2935_v43 = vsel %vm2423_vm9, %v1546_v31, %v2679_v35  ;;  %v3063_v44 = vsel %vm2551_vm10, %v2058_v32, %v2807_v36  ;;  %v6155_v45 = vpop.f32.mrb[52].mxu0  ;;  %v6283_v46 = vpop.f32.mrb[52].mxu1 }
 0x14a   :  { %5861 = vst [vmem:[%s7459_s2 + $0xc8] sm:$0xff] %v5325_v39   ;;  %v5320_v47 = vpack.c.bf16 %v2935_v43, %v2934_v38  ;;  %v5640_v48 = vpack.c.bf16 %v3063_v44, %v3062_v41  ;;  %vm2428_vm0 = vcmp.ge.f32.partialorder %v6155_v45, 0.0  ;;  %v2684_v49 = vmul.f32 0.2, %v6155_v45  ;;  %v1559_v50 = vpop.f32.mrb[53].mxu0  ;;  %v2071_v51 = vpop.f32.mrb[53].mxu1 }
 0x14b   :  { %5925 = vst [vmem:[%s7459_s2 + $0x2c8] sm:$0xff] %v5645_v42   ;;  %vm2556_vm11 = vcmp.ge.f32.partialorder %v6283_v46, 0.0  ;;  %v2812_v52 = vmul.f32 0.2, %v6283_v46  ;;  %v2682_v53 = vmul.f32 0.2, %v1559_v50 }
 0x14c   :  { %5860 = vst [vmem:[%s7459_s2 + $0xc0] sm:$0xff] %v5320_v47   ;;  %5924 = vst [vmem:[%s7459_s2 + $0x2c0] sm:$0xff] %v5640_v48   ;;  %v2810_v54 = vmul.f32 0.2, %v2071_v51  ;;  %v6156_v55 = vpop.f32.mrb[54].mxu0  ;;  %v6284_v56 = vpop.f32.mrb[54].mxu1  ;;  %v2940_v57 = vsel %vm2428_vm0, %v6155_v45, %v2684_v49 }
 0x14d   :  { %vm2426_vm12 = vcmp.ge.f32.partialorder %v1559_v50, 0.0  ;;  %vm2429_vm13 = vcmp.ge.f32.partialorder %v6156_v55, 0.0  ;;  %v2685_v58 = vmul.f32 0.2, %v6156_v55  ;;  %v1562_v59 = vpop.f32.mrb[55].mxu0  ;;  %v2074_v60 = vpop.f32.mrb[55].mxu1  ;;  %v3068_v1 = vsel %vm2556_vm11, %v6283_v46, %v2812_v52 }
 0x14e   :  { %vm2554_vm14 = vcmp.ge.f32.partialorder %v2071_v51, 0.0  ;;  %vm2557_vm15 = vcmp.ge.f32.partialorder %v6284_v56, 0.0  ;;  %v2813_v61 = vmul.f32 0.2, %v6284_v56  ;;  %vm2427_vm1 = vcmp.ge.f32.partialorder %v1562_v59, 0.0 }
 0x14f   :  { %v2941_v62 = vsel %vm2429_vm13, %v6156_v55, %v2685_v58  ;;  %v2683_v63 = vmul.f32 0.2, %v1562_v59  ;;  %vm2555_vm2 = vcmp.ge.f32.partialorder %v2074_v60, 0.0  ;;  %v2811_v0 = vmul.f32 0.2, %v2074_v60 }
 0x150   :  { %v2938_v2 = vsel %vm2426_vm12, %v1559_v50, %v2682_v53  ;;  %v5335_v3 = vpack.c.bf16 %v2941_v62, %v2940_v57  ;;  %v3069_v4 = vsel %vm2557_vm15, %v6284_v56, %v2813_v61  ;;  %v3066_v5 = vsel %vm2554_vm14, %v2071_v51, %v2810_v54 }
 0x151   :  { %v5655_v6 = vpack.c.bf16 %v3069_v4, %v3068_v1  ;;  %v2939_v7 = vsel %vm2427_vm1, %v1562_v59, %v2683_v63  ;;  %v3067_v8 = vsel %vm2555_vm2, %v2074_v60, %v2811_v0  ;;  %v6159_v9 = vpop.f32.mrb[56].mxu0  ;;  %v6287_v10 = vpop.f32.mrb[56].mxu1 }
 0x152   :  { %5863 = vst [vmem:[%s7459_s2 + $0xd8] sm:$0xff] %v5335_v3   ;;  %v5330_v11 = vpack.c.bf16 %v2939_v7, %v2938_v2  ;;  %v5650_v12 = vpack.c.bf16 %v3067_v8, %v3066_v5  ;;  %vm2432_vm3 = vcmp.ge.f32.partialorder %v6159_v9, 0.0  ;;  %v2688_v13 = vmul.f32 0.2, %v6159_v9  ;;  %v1575_v14 = vpop.f32.mrb[57].mxu0  ;;  %v2087_v15 = vpop.f32.mrb[57].mxu1 }
 0x153   :  { %5927 = vst [vmem:[%s7459_s2 + $0x2d8] sm:$0xff] %v5655_v6   ;;  %vm2560_vm4 = vcmp.ge.f32.partialorder %v6287_v10, 0.0  ;;  %v2816_v16 = vmul.f32 0.2, %v6287_v10  ;;  %v2686_v17 = vmul.f32 0.2, %v1575_v14 }
 0x154   :  { %5862 = vst [vmem:[%s7459_s2 + $0xd0] sm:$0xff] %v5330_v11   ;;  %5926 = vst [vmem:[%s7459_s2 + $0x2d0] sm:$0xff] %v5650_v12   ;;  %v2814_v18 = vmul.f32 0.2, %v2087_v15  ;;  %v6160_v19 = vpop.f32.mrb[58].mxu0  ;;  %v6288_v20 = vpop.f32.mrb[58].mxu1  ;;  %v2944_v21 = vsel %vm2432_vm3, %v6159_v9, %v2688_v13 }
 0x155   :  { %vm2430_vm5 = vcmp.ge.f32.partialorder %v1575_v14, 0.0  ;;  %vm2433_vm6 = vcmp.ge.f32.partialorder %v6160_v19, 0.0  ;;  %v2689_v22 = vmul.f32 0.2, %v6160_v19  ;;  %v1578_v23 = vpop.f32.mrb[59].mxu0  ;;  %v2090_v24 = vpop.f32.mrb[59].mxu1  ;;  %v3072_v29 = vsel %vm2560_vm4, %v6287_v10, %v2816_v16 }
 0x156   :  { %vm2558_vm7 = vcmp.ge.f32.partialorder %v2087_v15, 0.0  ;;  %vm2561_vm8 = vcmp.ge.f32.partialorder %v6288_v20, 0.0  ;;  %v2817_v25 = vmul.f32 0.2, %v6288_v20  ;;  %vm2431_vm9 = vcmp.ge.f32.partialorder %v1578_v23, 0.0 }
 0x157   :  { %v2945_v26 = vsel %vm2433_vm6, %v6160_v19, %v2689_v22  ;;  %v2687_v27 = vmul.f32 0.2, %v1578_v23  ;;  %vm2559_vm10 = vcmp.ge.f32.partialorder %v2090_v24, 0.0  ;;  %v2815_v28 = vmul.f32 0.2, %v2090_v24 }
 0x158   :  { %v2942_v30 = vsel %vm2430_vm5, %v1575_v14, %v2686_v17  ;;  %v5345_v31 = vpack.c.bf16 %v2945_v26, %v2944_v21  ;;  %v3073_v32 = vsel %vm2561_vm8, %v6288_v20, %v2817_v25  ;;  %v3070_v33 = vsel %vm2558_vm7, %v2087_v15, %v2814_v18 }
 0x159   :  { %v5665_v34 = vpack.c.bf16 %v3073_v32, %v3072_v29  ;;  %v2943_v35 = vsel %vm2431_vm9, %v1578_v23, %v2687_v27  ;;  %v3071_v36 = vsel %vm2559_vm10, %v2090_v24, %v2815_v28  ;;  %v6163_v37 = vpop.f32.mrb[60].mxu0  ;;  %v6291_v38 = vpop.f32.mrb[60].mxu1 }
 0x15a   :  { %5865 = vst [vmem:[%s7459_s2 + $0xe8] sm:$0xff] %v5345_v31   ;;  %v5340_v39 = vpack.c.bf16 %v2943_v35, %v2942_v30  ;;  %v5660_v40 = vpack.c.bf16 %v3071_v36, %v3070_v33  ;;  %vm2436_vm0 = vcmp.ge.f32.partialorder %v6163_v37, 0.0  ;;  %v2692_v41 = vmul.f32 0.2, %v6163_v37  ;;  %v1591_v42 = vpop.f32.mrb[61].mxu0  ;;  %v2103_v43 = vpop.f32.mrb[61].mxu1 }
 0x15b   :  { %5929 = vst [vmem:[%s7459_s2 + $0x2e8] sm:$0xff] %v5665_v34   ;;  %vm2564_vm11 = vcmp.ge.f32.partialorder %v6291_v38, 0.0  ;;  %v2820_v44 = vmul.f32 0.2, %v6291_v38  ;;  %v2690_v45 = vmul.f32 0.2, %v1591_v42 }
 0x15c   :  { %5864 = vst [vmem:[%s7459_s2 + $0xe0] sm:$0xff] %v5340_v39   ;;  %5928 = vst [vmem:[%s7459_s2 + $0x2e0] sm:$0xff] %v5660_v40   ;;  %v2818_v46 = vmul.f32 0.2, %v2103_v43  ;;  %v6164_v47 = vpop.f32.mrb[62].mxu0  ;;  %v6292_v48 = vpop.f32.mrb[62].mxu1  ;;  %v2948_v49 = vsel %vm2436_vm0, %v6163_v37, %v2692_v41 }
 0x15d   :  { %vm2434_vm12 = vcmp.ge.f32.partialorder %v1591_v42, 0.0  ;;  %vm2437_vm13 = vcmp.ge.f32.partialorder %v6164_v47, 0.0  ;;  %v2693_v50 = vmul.f32 0.2, %v6164_v47  ;;  %v1594_v51 = vpop.f32.mrb[63].mxu0  ;;  %v2106_v52 = vpop.f32.mrb[63].mxu1  ;;  %v3076_v57 = vsel %vm2564_vm11, %v6291_v38, %v2820_v44 }
 0x15e   :  { %vm2562_vm14 = vcmp.ge.f32.partialorder %v2103_v43, 0.0  ;;  %vm2565_vm15 = vcmp.ge.f32.partialorder %v6292_v48, 0.0  ;;  %v2821_v53 = vmul.f32 0.2, %v6292_v48  ;;  %vm2435_vm1 = vcmp.ge.f32.partialorder %v1594_v51, 0.0 }
 0x15f   :  { %v2949_v54 = vsel %vm2437_vm13, %v6164_v47, %v2693_v50  ;;  %v2691_v55 = vmul.f32 0.2, %v1594_v51  ;;  %vm2563_vm2 = vcmp.ge.f32.partialorder %v2106_v52, 0.0  ;;  %v2819_v56 = vmul.f32 0.2, %v2106_v52 }
 0x160   :  { %v2946_v58 = vsel %vm2434_vm12, %v1591_v42, %v2690_v45  ;;  %v5355_v59 = vpack.c.bf16 %v2949_v54, %v2948_v49  ;;  %v3077_v60 = vsel %vm2565_vm15, %v6292_v48, %v2821_v53  ;;  %v3074_v61 = vsel %vm2562_vm14, %v2103_v43, %v2818_v46 }
 0x161   :  { %v5675_v62 = vpack.c.bf16 %v3077_v60, %v3076_v57  ;;  %v2947_v63 = vsel %vm2435_vm1, %v1594_v51, %v2691_v55  ;;  %v3075_v0 = vsel %vm2563_vm2, %v2106_v52, %v2819_v56  ;;  %v6167_v1 = vpop.f32.mrb[64].mxu0  ;;  %v6295_v2 = vpop.f32.mrb[64].mxu1 }
 0x162   :  { %5867 = vst [vmem:[%s7459_s2 + $0xf8] sm:$0xff] %v5355_v59   ;;  %v5350_v3 = vpack.c.bf16 %v2947_v63, %v2946_v58  ;;  %v5670_v4 = vpack.c.bf16 %v3075_v0, %v3074_v61  ;;  %vm2440_vm3 = vcmp.ge.f32.partialorder %v6167_v1, 0.0  ;;  %v2696_v5 = vmul.f32 0.2, %v6167_v1  ;;  %v1607_v6 = vpop.f32.mrb[65].mxu0  ;;  %v2119_v7 = vpop.f32.mrb[65].mxu1 }
 0x163   :  { %5931 = vst [vmem:[%s7459_s2 + $0x2f8] sm:$0xff] %v5675_v62   ;;  %vm2568_vm4 = vcmp.ge.f32.partialorder %v6295_v2, 0.0  ;;  %v2824_v8 = vmul.f32 0.2, %v6295_v2  ;;  %v2694_v9 = vmul.f32 0.2, %v1607_v6 }
 0x164   :  { %5866 = vst [vmem:[%s7459_s2 + $0xf0] sm:$0xff] %v5350_v3   ;;  %5930 = vst [vmem:[%s7459_s2 + $0x2f0] sm:$0xff] %v5670_v4   ;;  %v2822_v10 = vmul.f32 0.2, %v2119_v7  ;;  %v6168_v11 = vpop.f32.mrb[66].mxu0  ;;  %v6296_v12 = vpop.f32.mrb[66].mxu1  ;;  %v2952_v13 = vsel %vm2440_vm3, %v6167_v1, %v2696_v5 }
 0x165   :  { %vm2438_vm5 = vcmp.ge.f32.partialorder %v1607_v6, 0.0  ;;  %vm2441_vm6 = vcmp.ge.f32.partialorder %v6168_v11, 0.0  ;;  %v2697_v14 = vmul.f32 0.2, %v6168_v11  ;;  %v1610_v15 = vpop.f32.mrb[67].mxu0  ;;  %v2122_v16 = vpop.f32.mrb[67].mxu1  ;;  %v3080_v21 = vsel %vm2568_vm4, %v6295_v2, %v2824_v8 }
 0x166   :  { %vm2566_vm7 = vcmp.ge.f32.partialorder %v2119_v7, 0.0  ;;  %vm2569_vm8 = vcmp.ge.f32.partialorder %v6296_v12, 0.0  ;;  %v2825_v17 = vmul.f32 0.2, %v6296_v12  ;;  %vm2439_vm9 = vcmp.ge.f32.partialorder %v1610_v15, 0.0 }
 0x167   :  { %v2953_v18 = vsel %vm2441_vm6, %v6168_v11, %v2697_v14  ;;  %v2695_v19 = vmul.f32 0.2, %v1610_v15  ;;  %vm2567_vm10 = vcmp.ge.f32.partialorder %v2122_v16, 0.0  ;;  %v2823_v20 = vmul.f32 0.2, %v2122_v16 }
 0x168   :  { %v2950_v22 = vsel %vm2438_vm5, %v1607_v6, %v2694_v9  ;;  %v5365_v23 = vpack.c.bf16 %v2953_v18, %v2952_v13  ;;  %v3081_v24 = vsel %vm2569_vm8, %v6296_v12, %v2825_v17  ;;  %v3078_v25 = vsel %vm2566_vm7, %v2119_v7, %v2822_v10 }
 0x169   :  { %v5685_v26 = vpack.c.bf16 %v3081_v24, %v3080_v21  ;;  %v2951_v27 = vsel %vm2439_vm9, %v1610_v15, %v2695_v19  ;;  %v3079_v28 = vsel %vm2567_vm10, %v2122_v16, %v2823_v20  ;;  %v6171_v29 = vpop.f32.mrb[68].mxu0  ;;  %v6299_v30 = vpop.f32.mrb[68].mxu1 }
 0x16a   :  { %5869 = vst [vmem:[%s7459_s2 + $0x108] sm:$0xff] %v5365_v23   ;;  %v5360_v31 = vpack.c.bf16 %v2951_v27, %v2950_v22  ;;  %v5680_v32 = vpack.c.bf16 %v3079_v28, %v3078_v25  ;;  %vm2444_vm0 = vcmp.ge.f32.partialorder %v6171_v29, 0.0  ;;  %v2700_v33 = vmul.f32 0.2, %v6171_v29  ;;  %v1623_v34 = vpop.f32.mrb[69].mxu0  ;;  %v2135_v35 = vpop.f32.mrb[69].mxu1 }
 0x16b   :  { %5933 = vst [vmem:[%s7459_s2 + $0x308] sm:$0xff] %v5685_v26   ;;  %vm2572_vm11 = vcmp.ge.f32.partialorder %v6299_v30, 0.0  ;;  %v2828_v36 = vmul.f32 0.2, %v6299_v30  ;;  %v2698_v37 = vmul.f32 0.2, %v1623_v34 }
 0x16c   :  { %5868 = vst [vmem:[%s7459_s2 + $0x100] sm:$0xff] %v5360_v31   ;;  %5932 = vst [vmem:[%s7459_s2 + $0x300] sm:$0xff] %v5680_v32   ;;  %v2826_v38 = vmul.f32 0.2, %v2135_v35  ;;  %v6172_v39 = vpop.f32.mrb[70].mxu0  ;;  %v6300_v40 = vpop.f32.mrb[70].mxu1  ;;  %v2956_v41 = vsel %vm2444_vm0, %v6171_v29, %v2700_v33 }
 0x16d   :  { %vm2442_vm12 = vcmp.ge.f32.partialorder %v1623_v34, 0.0  ;;  %vm2445_vm13 = vcmp.ge.f32.partialorder %v6172_v39, 0.0  ;;  %v2701_v42 = vmul.f32 0.2, %v6172_v39  ;;  %v1626_v43 = vpop.f32.mrb[71].mxu0  ;;  %v2138_v44 = vpop.f32.mrb[71].mxu1  ;;  %v3084_v49 = vsel %vm2572_vm11, %v6299_v30, %v2828_v36 }
 0x16e   :  { %vm2570_vm14 = vcmp.ge.f32.partialorder %v2135_v35, 0.0  ;;  %vm2573_vm15 = vcmp.ge.f32.partialorder %v6300_v40, 0.0  ;;  %v2829_v45 = vmul.f32 0.2, %v6300_v40  ;;  %vm2443_vm1 = vcmp.ge.f32.partialorder %v1626_v43, 0.0 }
 0x16f   :  { %v2957_v46 = vsel %vm2445_vm13, %v6172_v39, %v2701_v42  ;;  %v2699_v47 = vmul.f32 0.2, %v1626_v43  ;;  %vm2571_vm2 = vcmp.ge.f32.partialorder %v2138_v44, 0.0  ;;  %v2827_v48 = vmul.f32 0.2, %v2138_v44 }
 0x170   :  { %v2954_v50 = vsel %vm2442_vm12, %v1623_v34, %v2698_v37  ;;  %v5375_v51 = vpack.c.bf16 %v2957_v46, %v2956_v41  ;;  %v3085_v52 = vsel %vm2573_vm15, %v6300_v40, %v2829_v45  ;;  %v3082_v53 = vsel %vm2570_vm14, %v2135_v35, %v2826_v38 }
 0x171   :  { %v5695_v54 = vpack.c.bf16 %v3085_v52, %v3084_v49  ;;  %v2955_v55 = vsel %vm2443_vm1, %v1626_v43, %v2699_v47  ;;  %v3083_v56 = vsel %vm2571_vm2, %v2138_v44, %v2827_v48  ;;  %v6175_v57 = vpop.f32.mrb[72].mxu0  ;;  %v6303_v58 = vpop.f32.mrb[72].mxu1 }
 0x172   :  { %5871 = vst [vmem:[%s7459_s2 + $0x118] sm:$0xff] %v5375_v51   ;;  %v5370_v59 = vpack.c.bf16 %v2955_v55, %v2954_v50  ;;  %v5690_v60 = vpack.c.bf16 %v3083_v56, %v3082_v53  ;;  %vm2448_vm3 = vcmp.ge.f32.partialorder %v6175_v57, 0.0  ;;  %v2704_v61 = vmul.f32 0.2, %v6175_v57  ;;  %v1639_v62 = vpop.f32.mrb[73].mxu0  ;;  %v2151_v63 = vpop.f32.mrb[73].mxu1 }
 0x173   :  { %5935 = vst [vmem:[%s7459_s2 + $0x318] sm:$0xff] %v5695_v54   ;;  %vm2576_vm4 = vcmp.ge.f32.partialorder %v6303_v58, 0.0  ;;  %v2832_v0 = vmul.f32 0.2, %v6303_v58  ;;  %v2702_v1 = vmul.f32 0.2, %v1639_v62 }
 0x174   :  { %5870 = vst [vmem:[%s7459_s2 + $0x110] sm:$0xff] %v5370_v59   ;;  %5934 = vst [vmem:[%s7459_s2 + $0x310] sm:$0xff] %v5690_v60   ;;  %v2830_v2 = vmul.f32 0.2, %v2151_v63  ;;  %v6176_v3 = vpop.f32.mrb[74].mxu0  ;;  %v6304_v4 = vpop.f32.mrb[74].mxu1  ;;  %v2960_v5 = vsel %vm2448_vm3, %v6175_v57, %v2704_v61 }
 0x175   :  { %vm2446_vm5 = vcmp.ge.f32.partialorder %v1639_v62, 0.0  ;;  %vm2449_vm6 = vcmp.ge.f32.partialorder %v6176_v3, 0.0  ;;  %v2705_v6 = vmul.f32 0.2, %v6176_v3  ;;  %v1642_v7 = vpop.f32.mrb[75].mxu0  ;;  %v2154_v8 = vpop.f32.mrb[75].mxu1  ;;  %v3088_v13 = vsel %vm2576_vm4, %v6303_v58, %v2832_v0 }
 0x176   :  { %vm2574_vm7 = vcmp.ge.f32.partialorder %v2151_v63, 0.0  ;;  %vm2577_vm8 = vcmp.ge.f32.partialorder %v6304_v4, 0.0  ;;  %v2833_v9 = vmul.f32 0.2, %v6304_v4  ;;  %vm2447_vm9 = vcmp.ge.f32.partialorder %v1642_v7, 0.0 }
 0x177   :  { %v2961_v10 = vsel %vm2449_vm6, %v6176_v3, %v2705_v6  ;;  %v2703_v11 = vmul.f32 0.2, %v1642_v7  ;;  %vm2575_vm10 = vcmp.ge.f32.partialorder %v2154_v8, 0.0  ;;  %v2831_v12 = vmul.f32 0.2, %v2154_v8 }
 0x178   :  { %v2958_v14 = vsel %vm2446_vm5, %v1639_v62, %v2702_v1  ;;  %v5385_v15 = vpack.c.bf16 %v2961_v10, %v2960_v5  ;;  %v3089_v16 = vsel %vm2577_vm8, %v6304_v4, %v2833_v9  ;;  %v3086_v17 = vsel %vm2574_vm7, %v2151_v63, %v2830_v2 }
 0x179   :  { %v5705_v18 = vpack.c.bf16 %v3089_v16, %v3088_v13  ;;  %v2959_v19 = vsel %vm2447_vm9, %v1642_v7, %v2703_v11  ;;  %v3087_v20 = vsel %vm2575_vm10, %v2154_v8, %v2831_v12  ;;  %v6179_v21 = vpop.f32.mrb[76].mxu0  ;;  %v6307_v22 = vpop.f32.mrb[76].mxu1 }
 0x17a   :  { %5873 = vst [vmem:[%s7459_s2 + $0x128] sm:$0xff] %v5385_v15   ;;  %v5380_v23 = vpack.c.bf16 %v2959_v19, %v2958_v14  ;;  %v5700_v24 = vpack.c.bf16 %v3087_v20, %v3086_v17  ;;  %vm2452_vm0 = vcmp.ge.f32.partialorder %v6179_v21, 0.0  ;;  %v2708_v25 = vmul.f32 0.2, %v6179_v21  ;;  %v1655_v26 = vpop.f32.mrb[77].mxu0  ;;  %v2167_v27 = vpop.f32.mrb[77].mxu1 }
 0x17b   :  { %5937 = vst [vmem:[%s7459_s2 + $0x328] sm:$0xff] %v5705_v18   ;;  %vm2580_vm11 = vcmp.ge.f32.partialorder %v6307_v22, 0.0  ;;  %v2836_v28 = vmul.f32 0.2, %v6307_v22  ;;  %v2706_v29 = vmul.f32 0.2, %v1655_v26 }
 0x17c   :  { %5872 = vst [vmem:[%s7459_s2 + $0x120] sm:$0xff] %v5380_v23   ;;  %5936 = vst [vmem:[%s7459_s2 + $0x320] sm:$0xff] %v5700_v24   ;;  %v2834_v30 = vmul.f32 0.2, %v2167_v27  ;;  %v6180_v31 = vpop.f32.mrb[78].mxu0  ;;  %v6308_v32 = vpop.f32.mrb[78].mxu1  ;;  %v2964_v33 = vsel %vm2452_vm0, %v6179_v21, %v2708_v25 }
 0x17d   :  { %vm2450_vm12 = vcmp.ge.f32.partialorder %v1655_v26, 0.0  ;;  %vm2453_vm13 = vcmp.ge.f32.partialorder %v6180_v31, 0.0  ;;  %v2709_v34 = vmul.f32 0.2, %v6180_v31  ;;  %v1658_v35 = vpop.f32.mrb[79].mxu0  ;;  %v2170_v36 = vpop.f32.mrb[79].mxu1  ;;  %v3092_v41 = vsel %vm2580_vm11, %v6307_v22, %v2836_v28 }
 0x17e   :  { %vm2578_vm14 = vcmp.ge.f32.partialorder %v2167_v27, 0.0  ;;  %vm2581_vm15 = vcmp.ge.f32.partialorder %v6308_v32, 0.0  ;;  %v2837_v37 = vmul.f32 0.2, %v6308_v32  ;;  %vm2451_vm1 = vcmp.ge.f32.partialorder %v1658_v35, 0.0 }
 0x17f   :  { %v2965_v38 = vsel %vm2453_vm13, %v6180_v31, %v2709_v34  ;;  %v2707_v39 = vmul.f32 0.2, %v1658_v35  ;;  %vm2579_vm2 = vcmp.ge.f32.partialorder %v2170_v36, 0.0  ;;  %v2835_v40 = vmul.f32 0.2, %v2170_v36 }
 0x180   :  { %v2962_v42 = vsel %vm2450_vm12, %v1655_v26, %v2706_v29  ;;  %v5395_v43 = vpack.c.bf16 %v2965_v38, %v2964_v33  ;;  %v3093_v44 = vsel %vm2581_vm15, %v6308_v32, %v2837_v37  ;;  %v3090_v45 = vsel %vm2578_vm14, %v2167_v27, %v2834_v30 }
 0x181   :  { %v5715_v46 = vpack.c.bf16 %v3093_v44, %v3092_v41  ;;  %v2963_v47 = vsel %vm2451_vm1, %v1658_v35, %v2707_v39  ;;  %v3091_v48 = vsel %vm2579_vm2, %v2170_v36, %v2835_v40  ;;  %v6183_v49 = vpop.f32.mrb[80].mxu0  ;;  %v6311_v50 = vpop.f32.mrb[80].mxu1 }
 0x182   :  { %5875 = vst [vmem:[%s7459_s2 + $0x138] sm:$0xff] %v5395_v43   ;;  %v5390_v51 = vpack.c.bf16 %v2963_v47, %v2962_v42  ;;  %v5710_v52 = vpack.c.bf16 %v3091_v48, %v3090_v45  ;;  %vm2456_vm3 = vcmp.ge.f32.partialorder %v6183_v49, 0.0  ;;  %v2712_v53 = vmul.f32 0.2, %v6183_v49  ;;  %v1671_v54 = vpop.f32.mrb[81].mxu0  ;;  %v2183_v55 = vpop.f32.mrb[81].mxu1 }
 0x183   :  { %5939 = vst [vmem:[%s7459_s2 + $0x338] sm:$0xff] %v5715_v46   ;;  %vm2584_vm4 = vcmp.ge.f32.partialorder %v6311_v50, 0.0  ;;  %v2840_v56 = vmul.f32 0.2, %v6311_v50  ;;  %v2710_v57 = vmul.f32 0.2, %v1671_v54 }
 0x184   :  { %5874 = vst [vmem:[%s7459_s2 + $0x130] sm:$0xff] %v5390_v51   ;;  %5938 = vst [vmem:[%s7459_s2 + $0x330] sm:$0xff] %v5710_v52   ;;  %v2838_v58 = vmul.f32 0.2, %v2183_v55  ;;  %v6184_v59 = vpop.f32.mrb[82].mxu0  ;;  %v6312_v60 = vpop.f32.mrb[82].mxu1  ;;  %v2968_v61 = vsel %vm2456_vm3, %v6183_v49, %v2712_v53 }
 0x185   :  { %vm2454_vm5 = vcmp.ge.f32.partialorder %v1671_v54, 0.0  ;;  %vm2457_vm6 = vcmp.ge.f32.partialorder %v6184_v59, 0.0  ;;  %v2713_v62 = vmul.f32 0.2, %v6184_v59  ;;  %v1674_v63 = vpop.f32.mrb[83].mxu0  ;;  %v2186_v0 = vpop.f32.mrb[83].mxu1  ;;  %v3096_v5 = vsel %vm2584_vm4, %v6311_v50, %v2840_v56 }
 0x186   :  { %vm2582_vm7 = vcmp.ge.f32.partialorder %v2183_v55, 0.0  ;;  %vm2585_vm8 = vcmp.ge.f32.partialorder %v6312_v60, 0.0  ;;  %v2841_v1 = vmul.f32 0.2, %v6312_v60  ;;  %vm2455_vm9 = vcmp.ge.f32.partialorder %v1674_v63, 0.0 }
 0x187   :  { %v2969_v2 = vsel %vm2457_vm6, %v6184_v59, %v2713_v62  ;;  %v2711_v3 = vmul.f32 0.2, %v1674_v63  ;;  %vm2583_vm10 = vcmp.ge.f32.partialorder %v2186_v0, 0.0  ;;  %v2839_v4 = vmul.f32 0.2, %v2186_v0 }
 0x188   :  { %v2966_v6 = vsel %vm2454_vm5, %v1671_v54, %v2710_v57  ;;  %v5405_v7 = vpack.c.bf16 %v2969_v2, %v2968_v61  ;;  %v3097_v8 = vsel %vm2585_vm8, %v6312_v60, %v2841_v1  ;;  %v3094_v9 = vsel %vm2582_vm7, %v2183_v55, %v2838_v58 }
 0x189   :  { %v5725_v10 = vpack.c.bf16 %v3097_v8, %v3096_v5  ;;  %v2967_v11 = vsel %vm2455_vm9, %v1674_v63, %v2711_v3  ;;  %v3095_v12 = vsel %vm2583_vm10, %v2186_v0, %v2839_v4  ;;  %v6187_v13 = vpop.f32.mrb[84].mxu0  ;;  %v6315_v14 = vpop.f32.mrb[84].mxu1 }
 0x18a   :  { %5877 = vst [vmem:[%s7459_s2 + $0x148] sm:$0xff] %v5405_v7   ;;  %v5400_v15 = vpack.c.bf16 %v2967_v11, %v2966_v6  ;;  %v5720_v16 = vpack.c.bf16 %v3095_v12, %v3094_v9  ;;  %vm2460_vm0 = vcmp.ge.f32.partialorder %v6187_v13, 0.0  ;;  %v2716_v17 = vmul.f32 0.2, %v6187_v13  ;;  %v1687_v18 = vpop.f32.mrb[85].mxu0  ;;  %v2199_v19 = vpop.f32.mrb[85].mxu1 }
 0x18b   :  { %5941 = vst [vmem:[%s7459_s2 + $0x348] sm:$0xff] %v5725_v10   ;;  %vm2588_vm11 = vcmp.ge.f32.partialorder %v6315_v14, 0.0  ;;  %v2844_v20 = vmul.f32 0.2, %v6315_v14  ;;  %v2714_v21 = vmul.f32 0.2, %v1687_v18 }
 0x18c   :  { %5876 = vst [vmem:[%s7459_s2 + $0x140] sm:$0xff] %v5400_v15   ;;  %5940 = vst [vmem:[%s7459_s2 + $0x340] sm:$0xff] %v5720_v16   ;;  %v2842_v22 = vmul.f32 0.2, %v2199_v19  ;;  %v6188_v23 = vpop.f32.mrb[86].mxu0  ;;  %v6316_v24 = vpop.f32.mrb[86].mxu1  ;;  %v2972_v25 = vsel %vm2460_vm0, %v6187_v13, %v2716_v17 }
 0x18d   :  { %vm2458_vm12 = vcmp.ge.f32.partialorder %v1687_v18, 0.0  ;;  %vm2461_vm13 = vcmp.ge.f32.partialorder %v6188_v23, 0.0  ;;  %v2717_v26 = vmul.f32 0.2, %v6188_v23  ;;  %v1690_v27 = vpop.f32.mrb[87].mxu0  ;;  %v2202_v28 = vpop.f32.mrb[87].mxu1  ;;  %v3100_v33 = vsel %vm2588_vm11, %v6315_v14, %v2844_v20 }
 0x18e   :  { %vm2586_vm14 = vcmp.ge.f32.partialorder %v2199_v19, 0.0  ;;  %vm2589_vm15 = vcmp.ge.f32.partialorder %v6316_v24, 0.0  ;;  %v2845_v29 = vmul.f32 0.2, %v6316_v24  ;;  %vm2459_vm1 = vcmp.ge.f32.partialorder %v1690_v27, 0.0 }
 0x18f   :  { %v2973_v30 = vsel %vm2461_vm13, %v6188_v23, %v2717_v26  ;;  %v2715_v31 = vmul.f32 0.2, %v1690_v27  ;;  %vm2587_vm2 = vcmp.ge.f32.partialorder %v2202_v28, 0.0  ;;  %v2843_v32 = vmul.f32 0.2, %v2202_v28 }
 0x190   :  { %v2970_v34 = vsel %vm2458_vm12, %v1687_v18, %v2714_v21  ;;  %v5415_v35 = vpack.c.bf16 %v2973_v30, %v2972_v25  ;;  %v3101_v36 = vsel %vm2589_vm15, %v6316_v24, %v2845_v29  ;;  %v3098_v37 = vsel %vm2586_vm14, %v2199_v19, %v2842_v22 }
 0x191   :  { %v5735_v38 = vpack.c.bf16 %v3101_v36, %v3100_v33  ;;  %v2971_v39 = vsel %vm2459_vm1, %v1690_v27, %v2715_v31  ;;  %v3099_v40 = vsel %vm2587_vm2, %v2202_v28, %v2843_v32  ;;  %v6191_v41 = vpop.f32.mrb[88].mxu0  ;;  %v6319_v42 = vpop.f32.mrb[88].mxu1 }
 0x192   :  { %5879 = vst [vmem:[%s7459_s2 + $0x158] sm:$0xff] %v5415_v35   ;;  %v5410_v43 = vpack.c.bf16 %v2971_v39, %v2970_v34  ;;  %v5730_v44 = vpack.c.bf16 %v3099_v40, %v3098_v37  ;;  %vm2464_vm3 = vcmp.ge.f32.partialorder %v6191_v41, 0.0  ;;  %v2720_v45 = vmul.f32 0.2, %v6191_v41  ;;  %v1703_v46 = vpop.f32.mrb[89].mxu0  ;;  %v2215_v47 = vpop.f32.mrb[89].mxu1 }
 0x193   :  { %5943 = vst [vmem:[%s7459_s2 + $0x358] sm:$0xff] %v5735_v38   ;;  %vm2592_vm4 = vcmp.ge.f32.partialorder %v6319_v42, 0.0  ;;  %v2848_v48 = vmul.f32 0.2, %v6319_v42  ;;  %v2718_v49 = vmul.f32 0.2, %v1703_v46 }
 0x194   :  { %5878 = vst [vmem:[%s7459_s2 + $0x150] sm:$0xff] %v5410_v43   ;;  %5942 = vst [vmem:[%s7459_s2 + $0x350] sm:$0xff] %v5730_v44   ;;  %v2846_v50 = vmul.f32 0.2, %v2215_v47  ;;  %v6192_v51 = vpop.f32.mrb[90].mxu0  ;;  %v6320_v52 = vpop.f32.mrb[90].mxu1  ;;  %v2976_v53 = vsel %vm2464_vm3, %v6191_v41, %v2720_v45 }
 0x195   :  { %vm2462_vm5 = vcmp.ge.f32.partialorder %v1703_v46, 0.0  ;;  %vm2465_vm6 = vcmp.ge.f32.partialorder %v6192_v51, 0.0  ;;  %v2721_v54 = vmul.f32 0.2, %v6192_v51  ;;  %v1706_v55 = vpop.f32.mrb[91].mxu0  ;;  %v2218_v56 = vpop.f32.mrb[91].mxu1  ;;  %v3104_v61 = vsel %vm2592_vm4, %v6319_v42, %v2848_v48 }
 0x196   :  { %vm2590_vm7 = vcmp.ge.f32.partialorder %v2215_v47, 0.0  ;;  %vm2593_vm8 = vcmp.ge.f32.partialorder %v6320_v52, 0.0  ;;  %v2849_v57 = vmul.f32 0.2, %v6320_v52  ;;  %vm2463_vm9 = vcmp.ge.f32.partialorder %v1706_v55, 0.0 }
 0x197   :  { %v2977_v58 = vsel %vm2465_vm6, %v6192_v51, %v2721_v54  ;;  %v2719_v59 = vmul.f32 0.2, %v1706_v55  ;;  %vm2591_vm10 = vcmp.ge.f32.partialorder %v2218_v56, 0.0  ;;  %v2847_v60 = vmul.f32 0.2, %v2218_v56 }
 0x198   :  { %v2974_v62 = vsel %vm2462_vm5, %v1703_v46, %v2718_v49  ;;  %v5425_v63 = vpack.c.bf16 %v2977_v58, %v2976_v53  ;;  %v3105_v0 = vsel %vm2593_vm8, %v6320_v52, %v2849_v57  ;;  %v3102_v1 = vsel %vm2590_vm7, %v2215_v47, %v2846_v50 }
 0x199   :  { %v5745_v2 = vpack.c.bf16 %v3105_v0, %v3104_v61  ;;  %v2975_v3 = vsel %vm2463_vm9, %v1706_v55, %v2719_v59  ;;  %v3103_v4 = vsel %vm2591_vm10, %v2218_v56, %v2847_v60  ;;  %v6195_v5 = vpop.f32.mrb[92].mxu0  ;;  %v6323_v6 = vpop.f32.mrb[92].mxu1 }
 0x19a   :  { %5881 = vst [vmem:[%s7459_s2 + $0x168] sm:$0xff] %v5425_v63   ;;  %v5420_v7 = vpack.c.bf16 %v2975_v3, %v2974_v62  ;;  %v5740_v8 = vpack.c.bf16 %v3103_v4, %v3102_v1  ;;  %vm2468_vm0 = vcmp.ge.f32.partialorder %v6195_v5, 0.0  ;;  %v2724_v9 = vmul.f32 0.2, %v6195_v5  ;;  %v1719_v10 = vpop.f32.mrb[93].mxu0  ;;  %v2231_v11 = vpop.f32.mrb[93].mxu1 }
 0x19b   :  { %5945 = vst [vmem:[%s7459_s2 + $0x368] sm:$0xff] %v5745_v2   ;;  %vm2596_vm11 = vcmp.ge.f32.partialorder %v6323_v6, 0.0  ;;  %v2852_v12 = vmul.f32 0.2, %v6323_v6  ;;  %v2722_v13 = vmul.f32 0.2, %v1719_v10 }
 0x19c   :  { %5880 = vst [vmem:[%s7459_s2 + $0x160] sm:$0xff] %v5420_v7   ;;  %5944 = vst [vmem:[%s7459_s2 + $0x360] sm:$0xff] %v5740_v8   ;;  %v2850_v14 = vmul.f32 0.2, %v2231_v11  ;;  %v6196_v15 = vpop.f32.mrb[94].mxu0  ;;  %v6324_v16 = vpop.f32.mrb[94].mxu1  ;;  %v2980_v17 = vsel %vm2468_vm0, %v6195_v5, %v2724_v9 }
 0x19d   :  { %vm2466_vm12 = vcmp.ge.f32.partialorder %v1719_v10, 0.0  ;;  %vm2469_vm13 = vcmp.ge.f32.partialorder %v6196_v15, 0.0  ;;  %v2725_v18 = vmul.f32 0.2, %v6196_v15  ;;  %v1722_v19 = vpop.f32.mrb[95].mxu0  ;;  %v2234_v20 = vpop.f32.mrb[95].mxu1  ;;  %v3108_v25 = vsel %vm2596_vm11, %v6323_v6, %v2852_v12 }
 0x19e   :  { %vm2594_vm14 = vcmp.ge.f32.partialorder %v2231_v11, 0.0  ;;  %vm2597_vm15 = vcmp.ge.f32.partialorder %v6324_v16, 0.0  ;;  %v2853_v21 = vmul.f32 0.2, %v6324_v16  ;;  %vm2467_vm1 = vcmp.ge.f32.partialorder %v1722_v19, 0.0 }
 0x19f   :  { %v2981_v22 = vsel %vm2469_vm13, %v6196_v15, %v2725_v18  ;;  %v2723_v23 = vmul.f32 0.2, %v1722_v19  ;;  %vm2595_vm2 = vcmp.ge.f32.partialorder %v2234_v20, 0.0  ;;  %v2851_v24 = vmul.f32 0.2, %v2234_v20 }
 0x1a0   :  { %v2978_v26 = vsel %vm2466_vm12, %v1719_v10, %v2722_v13  ;;  %v5435_v27 = vpack.c.bf16 %v2981_v22, %v2980_v17  ;;  %v3109_v28 = vsel %vm2597_vm15, %v6324_v16, %v2853_v21  ;;  %v3106_v29 = vsel %vm2594_vm14, %v2231_v11, %v2850_v14 }
 0x1a1   :  { %v5755_v30 = vpack.c.bf16 %v3109_v28, %v3108_v25  ;;  %v2979_v31 = vsel %vm2467_vm1, %v1722_v19, %v2723_v23  ;;  %v3107_v32 = vsel %vm2595_vm2, %v2234_v20, %v2851_v24  ;;  %v6199_v33 = vpop.f32.mrb[96].mxu0  ;;  %v6327_v34 = vpop.f32.mrb[96].mxu1 }
 0x1a2   :  { %5883 = vst [vmem:[%s7459_s2 + $0x178] sm:$0xff] %v5435_v27   ;;  %v5430_v35 = vpack.c.bf16 %v2979_v31, %v2978_v26  ;;  %v5750_v36 = vpack.c.bf16 %v3107_v32, %v3106_v29  ;;  %vm2472_vm3 = vcmp.ge.f32.partialorder %v6199_v33, 0.0  ;;  %v2728_v37 = vmul.f32 0.2, %v6199_v33  ;;  %v1735_v38 = vpop.f32.mrb[97].mxu0  ;;  %v2247_v39 = vpop.f32.mrb[97].mxu1 }
 0x1a3   :  { %5947 = vst [vmem:[%s7459_s2 + $0x378] sm:$0xff] %v5755_v30   ;;  %vm2600_vm4 = vcmp.ge.f32.partialorder %v6327_v34, 0.0  ;;  %v2856_v40 = vmul.f32 0.2, %v6327_v34  ;;  %v2726_v41 = vmul.f32 0.2, %v1735_v38 }
 0x1a4   :  { %5882 = vst [vmem:[%s7459_s2 + $0x170] sm:$0xff] %v5430_v35   ;;  %5946 = vst [vmem:[%s7459_s2 + $0x370] sm:$0xff] %v5750_v36   ;;  %v2854_v42 = vmul.f32 0.2, %v2247_v39  ;;  %v6200_v43 = vpop.f32.mrb[98].mxu0  ;;  %v6328_v44 = vpop.f32.mrb[98].mxu1  ;;  %v2984_v45 = vsel %vm2472_vm3, %v6199_v33, %v2728_v37 }
 0x1a5   :  { %vm2470_vm5 = vcmp.ge.f32.partialorder %v1735_v38, 0.0  ;;  %vm2473_vm6 = vcmp.ge.f32.partialorder %v6200_v43, 0.0  ;;  %v2729_v46 = vmul.f32 0.2, %v6200_v43  ;;  %v1738_v47 = vpop.f32.mrb[99].mxu0  ;;  %v2250_v48 = vpop.f32.mrb[99].mxu1  ;;  %v3112_v53 = vsel %vm2600_vm4, %v6327_v34, %v2856_v40 }
 0x1a6   :  { %vm2598_vm7 = vcmp.ge.f32.partialorder %v2247_v39, 0.0  ;;  %vm2601_vm8 = vcmp.ge.f32.partialorder %v6328_v44, 0.0  ;;  %v2857_v49 = vmul.f32 0.2, %v6328_v44  ;;  %vm2471_vm9 = vcmp.ge.f32.partialorder %v1738_v47, 0.0 }
 0x1a7   :  { %v2985_v50 = vsel %vm2473_vm6, %v6200_v43, %v2729_v46  ;;  %v2727_v51 = vmul.f32 0.2, %v1738_v47  ;;  %vm2599_vm10 = vcmp.ge.f32.partialorder %v2250_v48, 0.0  ;;  %v2855_v52 = vmul.f32 0.2, %v2250_v48 }
 0x1a8   :  { %v2982_v54 = vsel %vm2470_vm5, %v1735_v38, %v2726_v41  ;;  %v5445_v55 = vpack.c.bf16 %v2985_v50, %v2984_v45  ;;  %v3113_v56 = vsel %vm2601_vm8, %v6328_v44, %v2857_v49  ;;  %v3110_v57 = vsel %vm2598_vm7, %v2247_v39, %v2854_v42 }
 0x1a9   :  { %v5765_v58 = vpack.c.bf16 %v3113_v56, %v3112_v53  ;;  %v2983_v59 = vsel %vm2471_vm9, %v1738_v47, %v2727_v51  ;;  %v3111_v60 = vsel %vm2599_vm10, %v2250_v48, %v2855_v52  ;;  %v6203_v61 = vpop.f32.mrb[100].mxu0  ;;  %v6331_v62 = vpop.f32.mrb[100].mxu1 }
 0x1aa   :  { %5885 = vst [vmem:[%s7459_s2 + $0x188] sm:$0xff] %v5445_v55   ;;  %v5440_v63 = vpack.c.bf16 %v2983_v59, %v2982_v54  ;;  %v5760_v0 = vpack.c.bf16 %v3111_v60, %v3110_v57  ;;  %vm2476_vm0 = vcmp.ge.f32.partialorder %v6203_v61, 0.0  ;;  %v2732_v1 = vmul.f32 0.2, %v6203_v61  ;;  %v1751_v2 = vpop.f32.mrb[101].mxu0  ;;  %v2263_v3 = vpop.f32.mrb[101].mxu1 }
 0x1ab   :  { %5949 = vst [vmem:[%s7459_s2 + $0x388] sm:$0xff] %v5765_v58   ;;  %vm2604_vm11 = vcmp.ge.f32.partialorder %v6331_v62, 0.0  ;;  %v2860_v4 = vmul.f32 0.2, %v6331_v62  ;;  %v2730_v5 = vmul.f32 0.2, %v1751_v2 }
 0x1ac   :  { %5884 = vst [vmem:[%s7459_s2 + $0x180] sm:$0xff] %v5440_v63   ;;  %5948 = vst [vmem:[%s7459_s2 + $0x380] sm:$0xff] %v5760_v0   ;;  %v2858_v6 = vmul.f32 0.2, %v2263_v3  ;;  %v6204_v7 = vpop.f32.mrb[102].mxu0  ;;  %v6332_v8 = vpop.f32.mrb[102].mxu1  ;;  %v2988_v9 = vsel %vm2476_vm0, %v6203_v61, %v2732_v1 }
 0x1ad   :  { %vm2474_vm12 = vcmp.ge.f32.partialorder %v1751_v2, 0.0  ;;  %vm2477_vm13 = vcmp.ge.f32.partialorder %v6204_v7, 0.0  ;;  %v2733_v10 = vmul.f32 0.2, %v6204_v7  ;;  %v1754_v11 = vpop.f32.mrb[103].mxu0  ;;  %v2266_v12 = vpop.f32.mrb[103].mxu1  ;;  %v3116_v17 = vsel %vm2604_vm11, %v6331_v62, %v2860_v4 }
 0x1ae   :  { %vm2602_vm14 = vcmp.ge.f32.partialorder %v2263_v3, 0.0  ;;  %vm2605_vm15 = vcmp.ge.f32.partialorder %v6332_v8, 0.0  ;;  %v2861_v13 = vmul.f32 0.2, %v6332_v8  ;;  %vm2475_vm1 = vcmp.ge.f32.partialorder %v1754_v11, 0.0 }
 0x1af   :  { %v2989_v14 = vsel %vm2477_vm13, %v6204_v7, %v2733_v10  ;;  %v2731_v15 = vmul.f32 0.2, %v1754_v11  ;;  %vm2603_vm2 = vcmp.ge.f32.partialorder %v2266_v12, 0.0  ;;  %v2859_v16 = vmul.f32 0.2, %v2266_v12 }
 0x1b0   :  { %v2986_v18 = vsel %vm2474_vm12, %v1751_v2, %v2730_v5  ;;  %v5455_v19 = vpack.c.bf16 %v2989_v14, %v2988_v9  ;;  %v3117_v20 = vsel %vm2605_vm15, %v6332_v8, %v2861_v13  ;;  %v3114_v21 = vsel %vm2602_vm14, %v2263_v3, %v2858_v6 }
 0x1b1   :  { %v5775_v22 = vpack.c.bf16 %v3117_v20, %v3116_v17  ;;  %v2987_v23 = vsel %vm2475_vm1, %v1754_v11, %v2731_v15  ;;  %v3115_v24 = vsel %vm2603_vm2, %v2266_v12, %v2859_v16  ;;  %v6207_v25 = vpop.f32.mrb[104].mxu0  ;;  %v6335_v26 = vpop.f32.mrb[104].mxu1 }
 0x1b2   :  { %5887 = vst [vmem:[%s7459_s2 + $0x198] sm:$0xff] %v5455_v19   ;;  %v5450_v27 = vpack.c.bf16 %v2987_v23, %v2986_v18  ;;  %v5770_v28 = vpack.c.bf16 %v3115_v24, %v3114_v21  ;;  %vm2480_vm3 = vcmp.ge.f32.partialorder %v6207_v25, 0.0  ;;  %v2736_v29 = vmul.f32 0.2, %v6207_v25  ;;  %v1767_v30 = vpop.f32.mrb[105].mxu0  ;;  %v2279_v31 = vpop.f32.mrb[105].mxu1 }
 0x1b3   :  { %5951 = vst [vmem:[%s7459_s2 + $0x398] sm:$0xff] %v5775_v22   ;;  %vm2608_vm4 = vcmp.ge.f32.partialorder %v6335_v26, 0.0  ;;  %v2864_v32 = vmul.f32 0.2, %v6335_v26  ;;  %v2734_v33 = vmul.f32 0.2, %v1767_v30 }
 0x1b4   :  { %5886 = vst [vmem:[%s7459_s2 + $0x190] sm:$0xff] %v5450_v27   ;;  %5950 = vst [vmem:[%s7459_s2 + $0x390] sm:$0xff] %v5770_v28   ;;  %v2862_v34 = vmul.f32 0.2, %v2279_v31  ;;  %v6208_v35 = vpop.f32.mrb[106].mxu0  ;;  %v6336_v36 = vpop.f32.mrb[106].mxu1  ;;  %v2992_v37 = vsel %vm2480_vm3, %v6207_v25, %v2736_v29 }
 0x1b5   :  { %vm2478_vm5 = vcmp.ge.f32.partialorder %v1767_v30, 0.0  ;;  %vm2481_vm6 = vcmp.ge.f32.partialorder %v6208_v35, 0.0  ;;  %v2737_v38 = vmul.f32 0.2, %v6208_v35  ;;  %v1770_v39 = vpop.f32.mrb[107].mxu0  ;;  %v2282_v40 = vpop.f32.mrb[107].mxu1  ;;  %v3120_v45 = vsel %vm2608_vm4, %v6335_v26, %v2864_v32 }
 0x1b6   :  { %vm2606_vm7 = vcmp.ge.f32.partialorder %v2279_v31, 0.0  ;;  %vm2609_vm8 = vcmp.ge.f32.partialorder %v6336_v36, 0.0  ;;  %v2865_v41 = vmul.f32 0.2, %v6336_v36  ;;  %vm2479_vm9 = vcmp.ge.f32.partialorder %v1770_v39, 0.0 }
 0x1b7   :  { %v2993_v42 = vsel %vm2481_vm6, %v6208_v35, %v2737_v38  ;;  %v2735_v43 = vmul.f32 0.2, %v1770_v39  ;;  %vm2607_vm10 = vcmp.ge.f32.partialorder %v2282_v40, 0.0  ;;  %v2863_v44 = vmul.f32 0.2, %v2282_v40 }
 0x1b8   :  { %v2990_v46 = vsel %vm2478_vm5, %v1767_v30, %v2734_v33  ;;  %v5465_v47 = vpack.c.bf16 %v2993_v42, %v2992_v37  ;;  %v3121_v48 = vsel %vm2609_vm8, %v6336_v36, %v2865_v41  ;;  %v3118_v49 = vsel %vm2606_vm7, %v2279_v31, %v2862_v34 }
 0x1b9   :  { %v5785_v50 = vpack.c.bf16 %v3121_v48, %v3120_v45  ;;  %v2991_v51 = vsel %vm2479_vm9, %v1770_v39, %v2735_v43  ;;  %v3119_v52 = vsel %vm2607_vm10, %v2282_v40, %v2863_v44  ;;  %v6211_v53 = vpop.f32.mrb[108].mxu0  ;;  %v6339_v54 = vpop.f32.mrb[108].mxu1 }
 0x1ba   :  { %5889 = vst [vmem:[%s7459_s2 + $0x1a8] sm:$0xff] %v5465_v47   ;;  %v5460_v55 = vpack.c.bf16 %v2991_v51, %v2990_v46  ;;  %v5780_v56 = vpack.c.bf16 %v3119_v52, %v3118_v49  ;;  %vm2484_vm0 = vcmp.ge.f32.partialorder %v6211_v53, 0.0  ;;  %v2740_v57 = vmul.f32 0.2, %v6211_v53  ;;  %v1783_v58 = vpop.f32.mrb[109].mxu0  ;;  %v2295_v59 = vpop.f32.mrb[109].mxu1 }
 0x1bb   :  { %5953 = vst [vmem:[%s7459_s2 + $0x3a8] sm:$0xff] %v5785_v50   ;;  %vm2612_vm11 = vcmp.ge.f32.partialorder %v6339_v54, 0.0  ;;  %v2868_v60 = vmul.f32 0.2, %v6339_v54  ;;  %v2738_v61 = vmul.f32 0.2, %v1783_v58 }
 0x1bc   :  { %5888 = vst [vmem:[%s7459_s2 + $0x1a0] sm:$0xff] %v5460_v55   ;;  %5952 = vst [vmem:[%s7459_s2 + $0x3a0] sm:$0xff] %v5780_v56   ;;  %v2866_v62 = vmul.f32 0.2, %v2295_v59  ;;  %v6212_v63 = vpop.f32.mrb[110].mxu0  ;;  %v6340_v0 = vpop.f32.mrb[110].mxu1  ;;  %v2996_v1 = vsel %vm2484_vm0, %v6211_v53, %v2740_v57 }
 0x1bd   :  { %vm2482_vm12 = vcmp.ge.f32.partialorder %v1783_v58, 0.0  ;;  %vm2485_vm13 = vcmp.ge.f32.partialorder %v6212_v63, 0.0  ;;  %v2741_v2 = vmul.f32 0.2, %v6212_v63  ;;  %v1786_v3 = vpop.f32.mrb[111].mxu0  ;;  %v2298_v4 = vpop.f32.mrb[111].mxu1  ;;  %v3124_v9 = vsel %vm2612_vm11, %v6339_v54, %v2868_v60 }
 0x1be   :  { %vm2610_vm14 = vcmp.ge.f32.partialorder %v2295_v59, 0.0  ;;  %vm2613_vm15 = vcmp.ge.f32.partialorder %v6340_v0, 0.0  ;;  %v2869_v5 = vmul.f32 0.2, %v6340_v0  ;;  %vm2483_vm1 = vcmp.ge.f32.partialorder %v1786_v3, 0.0 }
 0x1bf   :  { %v2997_v6 = vsel %vm2485_vm13, %v6212_v63, %v2741_v2  ;;  %v2739_v7 = vmul.f32 0.2, %v1786_v3  ;;  %vm2611_vm2 = vcmp.ge.f32.partialorder %v2298_v4, 0.0  ;;  %v2867_v8 = vmul.f32 0.2, %v2298_v4 }
 0x1c0   :  { %v2994_v10 = vsel %vm2482_vm12, %v1783_v58, %v2738_v61  ;;  %v5475_v11 = vpack.c.bf16 %v2997_v6, %v2996_v1  ;;  %v3125_v12 = vsel %vm2613_vm15, %v6340_v0, %v2869_v5  ;;  %v3122_v13 = vsel %vm2610_vm14, %v2295_v59, %v2866_v62 }
 0x1c1   :  { %v5795_v14 = vpack.c.bf16 %v3125_v12, %v3124_v9  ;;  %v2995_v15 = vsel %vm2483_vm1, %v1786_v3, %v2739_v7  ;;  %v3123_v16 = vsel %vm2611_vm2, %v2298_v4, %v2867_v8  ;;  %v6215_v17 = vpop.f32.mrb[112].mxu0  ;;  %v6343_v18 = vpop.f32.mrb[112].mxu1 }
 0x1c2   :  { %5891 = vst [vmem:[%s7459_s2 + $0x1b8] sm:$0xff] %v5475_v11   ;;  %v5470_v19 = vpack.c.bf16 %v2995_v15, %v2994_v10  ;;  %v5790_v20 = vpack.c.bf16 %v3123_v16, %v3122_v13  ;;  %vm2488_vm3 = vcmp.ge.f32.partialorder %v6215_v17, 0.0  ;;  %v2744_v21 = vmul.f32 0.2, %v6215_v17  ;;  %v1799_v22 = vpop.f32.mrb[113].mxu0  ;;  %v2311_v23 = vpop.f32.mrb[113].mxu1 }
 0x1c3   :  { %5955 = vst [vmem:[%s7459_s2 + $0x3b8] sm:$0xff] %v5795_v14   ;;  %vm2616_vm4 = vcmp.ge.f32.partialorder %v6343_v18, 0.0  ;;  %v2872_v24 = vmul.f32 0.2, %v6343_v18  ;;  %v2742_v25 = vmul.f32 0.2, %v1799_v22 }
 0x1c4   :  { %5890 = vst [vmem:[%s7459_s2 + $0x1b0] sm:$0xff] %v5470_v19   ;;  %5954 = vst [vmem:[%s7459_s2 + $0x3b0] sm:$0xff] %v5790_v20   ;;  %v2870_v26 = vmul.f32 0.2, %v2311_v23  ;;  %v6216_v27 = vpop.f32.mrb[114].mxu0  ;;  %v6344_v28 = vpop.f32.mrb[114].mxu1  ;;  %v3000_v29 = vsel %vm2488_vm3, %v6215_v17, %v2744_v21 }
 0x1c5   :  { %vm2486_vm5 = vcmp.ge.f32.partialorder %v1799_v22, 0.0  ;;  %vm2489_vm6 = vcmp.ge.f32.partialorder %v6216_v27, 0.0  ;;  %v2745_v30 = vmul.f32 0.2, %v6216_v27  ;;  %v1802_v31 = vpop.f32.mrb[115].mxu0  ;;  %v2314_v32 = vpop.f32.mrb[115].mxu1  ;;  %v3128_v37 = vsel %vm2616_vm4, %v6343_v18, %v2872_v24 }
 0x1c6   :  { %vm2614_vm7 = vcmp.ge.f32.partialorder %v2311_v23, 0.0  ;;  %vm2617_vm8 = vcmp.ge.f32.partialorder %v6344_v28, 0.0  ;;  %v2873_v33 = vmul.f32 0.2, %v6344_v28  ;;  %vm2487_vm9 = vcmp.ge.f32.partialorder %v1802_v31, 0.0 }
 0x1c7   :  { %v3001_v34 = vsel %vm2489_vm6, %v6216_v27, %v2745_v30  ;;  %v2743_v35 = vmul.f32 0.2, %v1802_v31  ;;  %vm2615_vm10 = vcmp.ge.f32.partialorder %v2314_v32, 0.0  ;;  %v2871_v36 = vmul.f32 0.2, %v2314_v32 }
 0x1c8   :  { %v2998_v38 = vsel %vm2486_vm5, %v1799_v22, %v2742_v25  ;;  %v5485_v39 = vpack.c.bf16 %v3001_v34, %v3000_v29  ;;  %v3129_v40 = vsel %vm2617_vm8, %v6344_v28, %v2873_v33  ;;  %v3126_v41 = vsel %vm2614_vm7, %v2311_v23, %v2870_v26 }
 0x1c9   :  { %v5805_v42 = vpack.c.bf16 %v3129_v40, %v3128_v37  ;;  %v2999_v43 = vsel %vm2487_vm9, %v1802_v31, %v2743_v35  ;;  %v3127_v44 = vsel %vm2615_vm10, %v2314_v32, %v2871_v36  ;;  %v6219_v45 = vpop.f32.mrb[116].mxu0  ;;  %v6347_v46 = vpop.f32.mrb[116].mxu1 }
 0x1ca   :  { %5893 = vst [vmem:[%s7459_s2 + $0x1c8] sm:$0xff] %v5485_v39   ;;  %v5480_v47 = vpack.c.bf16 %v2999_v43, %v2998_v38  ;;  %v5800_v48 = vpack.c.bf16 %v3127_v44, %v3126_v41  ;;  %vm2492_vm0 = vcmp.ge.f32.partialorder %v6219_v45, 0.0  ;;  %v2748_v49 = vmul.f32 0.2, %v6219_v45  ;;  %v1815_v50 = vpop.f32.mrb[117].mxu0  ;;  %v2327_v51 = vpop.f32.mrb[117].mxu1 }
 0x1cb   :  { %5957 = vst [vmem:[%s7459_s2 + $0x3c8] sm:$0xff] %v5805_v42   ;;  %vm2620_vm11 = vcmp.ge.f32.partialorder %v6347_v46, 0.0  ;;  %v2876_v52 = vmul.f32 0.2, %v6347_v46  ;;  %v2746_v53 = vmul.f32 0.2, %v1815_v50 }
 0x1cc   :  { %5892 = vst [vmem:[%s7459_s2 + $0x1c0] sm:$0xff] %v5480_v47   ;;  %5956 = vst [vmem:[%s7459_s2 + $0x3c0] sm:$0xff] %v5800_v48   ;;  %v2874_v54 = vmul.f32 0.2, %v2327_v51  ;;  %v6220_v55 = vpop.f32.mrb[118].mxu0  ;;  %v6348_v56 = vpop.f32.mrb[118].mxu1  ;;  %v3004_v57 = vsel %vm2492_vm0, %v6219_v45, %v2748_v49 }
 0x1cd   :  { %vm2490_vm12 = vcmp.ge.f32.partialorder %v1815_v50, 0.0  ;;  %vm2493_vm13 = vcmp.ge.f32.partialorder %v6220_v55, 0.0  ;;  %v2749_v58 = vmul.f32 0.2, %v6220_v55  ;;  %v1818_v59 = vpop.f32.mrb[119].mxu0  ;;  %v2330_v60 = vpop.f32.mrb[119].mxu1  ;;  %v3132_v1 = vsel %vm2620_vm11, %v6347_v46, %v2876_v52 }
 0x1ce   :  { %vm2618_vm14 = vcmp.ge.f32.partialorder %v2327_v51, 0.0  ;;  %vm2621_vm15 = vcmp.ge.f32.partialorder %v6348_v56, 0.0  ;;  %v2877_v61 = vmul.f32 0.2, %v6348_v56  ;;  %vm2491_vm1 = vcmp.ge.f32.partialorder %v1818_v59, 0.0 }
 0x1cf   :  { %v3005_v62 = vsel %vm2493_vm13, %v6220_v55, %v2749_v58  ;;  %v2747_v63 = vmul.f32 0.2, %v1818_v59  ;;  %vm2619_vm2 = vcmp.ge.f32.partialorder %v2330_v60, 0.0  ;;  %v2875_v0 = vmul.f32 0.2, %v2330_v60 }
 0x1d0   :  { %v3002_v2 = vsel %vm2490_vm12, %v1815_v50, %v2746_v53  ;;  %v5495_v3 = vpack.c.bf16 %v3005_v62, %v3004_v57  ;;  %v3133_v4 = vsel %vm2621_vm15, %v6348_v56, %v2877_v61  ;;  %v3130_v5 = vsel %vm2618_vm14, %v2327_v51, %v2874_v54 }
 0x1d1   :  { %v5815_v6 = vpack.c.bf16 %v3133_v4, %v3132_v1  ;;  %v3003_v7 = vsel %vm2491_vm1, %v1818_v59, %v2747_v63  ;;  %v3131_v8 = vsel %vm2619_vm2, %v2330_v60, %v2875_v0  ;;  %v6223_v9 = vpop.f32.mrb[120].mxu0  ;;  %v6351_v10 = vpop.f32.mrb[120].mxu1 }
 0x1d2   :  { %5895 = vst [vmem:[%s7459_s2 + $0x1d8] sm:$0xff] %v5495_v3   ;;  %v5490_v11 = vpack.c.bf16 %v3003_v7, %v3002_v2  ;;  %v5810_v12 = vpack.c.bf16 %v3131_v8, %v3130_v5  ;;  %vm2496_vm3 = vcmp.ge.f32.partialorder %v6223_v9, 0.0  ;;  %v2752_v13 = vmul.f32 0.2, %v6223_v9  ;;  %v1831_v14 = vpop.f32.mrb[121].mxu0  ;;  %v2343_v15 = vpop.f32.mrb[121].mxu1 }
 0x1d3   :  { %5959 = vst [vmem:[%s7459_s2 + $0x3d8] sm:$0xff] %v5815_v6   ;;  %vm2624_vm4 = vcmp.ge.f32.partialorder %v6351_v10, 0.0  ;;  %v2880_v16 = vmul.f32 0.2, %v6351_v10  ;;  %v2750_v17 = vmul.f32 0.2, %v1831_v14 }
 0x1d4   :  { %5894 = vst [vmem:[%s7459_s2 + $0x1d0] sm:$0xff] %v5490_v11   ;;  %5958 = vst [vmem:[%s7459_s2 + $0x3d0] sm:$0xff] %v5810_v12   ;;  %v2878_v18 = vmul.f32 0.2, %v2343_v15  ;;  %v6224_v19 = vpop.f32.mrb[122].mxu0  ;;  %v6352_v20 = vpop.f32.mrb[122].mxu1  ;;  %v3008_v21 = vsel %vm2496_vm3, %v6223_v9, %v2752_v13 }
 0x1d5   :  { %vm2494_vm5 = vcmp.ge.f32.partialorder %v1831_v14, 0.0  ;;  %vm2497_vm6 = vcmp.ge.f32.partialorder %v6224_v19, 0.0  ;;  %v2753_v22 = vmul.f32 0.2, %v6224_v19  ;;  %v1834_v23 = vpop.f32.mrb[123].mxu0  ;;  %v2346_v24 = vpop.f32.mrb[123].mxu1  ;;  %v3136_v29 = vsel %vm2624_vm4, %v6351_v10, %v2880_v16 }
 0x1d6   :  { %vm2622_vm7 = vcmp.ge.f32.partialorder %v2343_v15, 0.0  ;;  %vm2625_vm8 = vcmp.ge.f32.partialorder %v6352_v20, 0.0  ;;  %v2881_v25 = vmul.f32 0.2, %v6352_v20  ;;  %vm2495_vm9 = vcmp.ge.f32.partialorder %v1834_v23, 0.0 }
 0x1d7   :  { %v3009_v26 = vsel %vm2497_vm6, %v6224_v19, %v2753_v22  ;;  %v2751_v27 = vmul.f32 0.2, %v1834_v23  ;;  %vm2623_vm10 = vcmp.ge.f32.partialorder %v2346_v24, 0.0  ;;  %v2879_v28 = vmul.f32 0.2, %v2346_v24 }
 0x1d8   :  { %v3006_v30 = vsel %vm2494_vm5, %v1831_v14, %v2750_v17  ;;  %v5505_v31 = vpack.c.bf16 %v3009_v26, %v3008_v21  ;;  %v3137_v32 = vsel %vm2625_vm8, %v6352_v20, %v2881_v25  ;;  %v3134_v33 = vsel %vm2622_vm7, %v2343_v15, %v2878_v18 }
 0x1d9   :  { %v5825_v34 = vpack.c.bf16 %v3137_v32, %v3136_v29  ;;  %v3007_v35 = vsel %vm2495_vm9, %v1834_v23, %v2751_v27  ;;  %v3135_v36 = vsel %vm2623_vm10, %v2346_v24, %v2879_v28  ;;  %v6227_v37 = vpop.f32.mrb[124].mxu0  ;;  %v6355_v38 = vpop.f32.mrb[124].mxu1 }
 0x1da   :  { %5897 = vst [vmem:[%s7459_s2 + $0x1e8] sm:$0xff] %v5505_v31   ;;  %v5500_v39 = vpack.c.bf16 %v3007_v35, %v3006_v30  ;;  %v5820_v40 = vpack.c.bf16 %v3135_v36, %v3134_v33  ;;  %vm2500_vm0 = vcmp.ge.f32.partialorder %v6227_v37, 0.0  ;;  %v2756_v41 = vmul.f32 0.2, %v6227_v37  ;;  %v1847_v42 = vpop.f32.mrb[125].mxu0  ;;  %v2359_v43 = vpop.f32.mrb[125].mxu1 }
 0x1db   :  { %5961 = vst [vmem:[%s7459_s2 + $0x3e8] sm:$0xff] %v5825_v34   ;;  %vm2628_vm11 = vcmp.ge.f32.partialorder %v6355_v38, 0.0  ;;  %v2884_v44 = vmul.f32 0.2, %v6355_v38  ;;  %v2754_v45 = vmul.f32 0.2, %v1847_v42 }
 0x1dc   :  { %5896 = vst [vmem:[%s7459_s2 + $0x1e0] sm:$0xff] %v5500_v39   ;;  %5960 = vst [vmem:[%s7459_s2 + $0x3e0] sm:$0xff] %v5820_v40   ;;  %v2882_v46 = vmul.f32 0.2, %v2359_v43  ;;  %v6228_v47 = vpop.f32.mrb[126].mxu0  ;;  %v6356_v48 = vpop.f32.mrb[126].mxu1  ;;  %v3012_v49 = vsel %vm2500_vm0, %v6227_v37, %v2756_v41 }
 0x1dd   :  { %vm2498_vm12 = vcmp.ge.f32.partialorder %v1847_v42, 0.0  ;;  %vm2501_vm13 = vcmp.ge.f32.partialorder %v6228_v47, 0.0  ;;  %v2757_v50 = vmul.f32 0.2, %v6228_v47  ;;  %v1850_v51 = vpop.f32.mrb[127].mxu0  ;;  %v2362_v52 = vpop.f32.mrb[127].mxu1  ;;  %v3140_v57 = vsel %vm2628_vm11, %v6355_v38, %v2884_v44 }
 0x1de   :  { %vm2626_vm14 = vcmp.ge.f32.partialorder %v2359_v43, 0.0  ;;  %vm2629_vm15 = vcmp.ge.f32.partialorder %v6356_v48, 0.0  ;;  %v2885_v53 = vmul.f32 0.2, %v6356_v48  ;;  %vm2499_vm1 = vcmp.ge.f32.partialorder %v1850_v51, 0.0 }
 0x1df   :  { %v3013_v54 = vsel %vm2501_vm13, %v6228_v47, %v2757_v50  ;;  %v2755_v55 = vmul.f32 0.2, %v1850_v51  ;;  %vm2627_vm2 = vcmp.ge.f32.partialorder %v2362_v52, 0.0  ;;  %v2883_v56 = vmul.f32 0.2, %v2362_v52 }
 0x1e0   :  { %v3010_v58 = vsel %vm2498_vm12, %v1847_v42, %v2754_v45  ;;  %v5515_v59 = vpack.c.bf16 %v3013_v54, %v3012_v49  ;;  %v3141_v60 = vsel %vm2629_vm15, %v6356_v48, %v2885_v53  ;;  %v3138_v61 = vsel %vm2626_vm14, %v2359_v43, %v2882_v46 }
 0x1e1   :  { %v5835_v62 = vpack.c.bf16 %v3141_v60, %v3140_v57  ;;  %v3011_v63 = vsel %vm2499_vm1, %v1850_v51, %v2755_v55  ;;  %v3139_v0 = vsel %vm2627_vm2, %v2362_v52, %v2883_v56 }
 0x1e2   :  { %5899 = vst [vmem:[%s7459_s2 + $0x1f8] sm:$0xff] %v5515_v59   ;;  %v5510_v1 = vpack.c.bf16 %v3011_v63, %v3010_v58  ;;  %v5830_v2 = vpack.c.bf16 %v3139_v0, %v3138_v61 }
 0x1e3   :  { %5963 = vst [vmem:[%s7459_s2 + $0x3f8] sm:$0xff] %v5835_v62  }
 0x1e4   :  { %5898 = vst [vmem:[%s7459_s2 + $0x1f0] sm:$0xff] %v5510_v1   ;;  %5962 = vst [vmem:[%s7459_s2 + $0x3f0] sm:$0xff] %v5830_v2  }

// kernel: discriminator_forward.6
= control target key start
LH: loop header
LB: loop body
LE: loop exit
PB: predicated region body
PF: predicated region fallthrough
CT: control target
= control target key end

     0   :  { %s2763_s15 = smov 0   ;;  %s2765_s16 = smov 0   ;;  %s3492_s0 = inlined_call_operand.vmem [shape: bf16[512,256], index: 0, kind: input, shape index: {}]   ;;  %s3493_s1 = inlined_call_operand.vmem [shape: bf16[256,128], index: 1, kind: input, shape index: {}]   ;;  %s3494_s2 = inlined_call_operand.vmem [shape: f32[1,128], index: 2, kind: input, shape index: {}]   ;;  %s3495_s3 = inlined_call_operand.vmem [shape: f32[1,128], index: 3, kind: input, shape index: {}]   ;;  %s3496_s4 = inlined_call_operand.vmem [shape: bf16[512,128], index: 4, kind: output, shape index: {}]  }
   0x1   :  { %s2767_s17 = smov 0  }
   0x2 LB: > { %s26_s18 = sadd.s32 1, %s2730_s16  ;;  %p2134_p0 = scmp.ge.s32.totalorder %s2734_s17, 1  ;;  %s2734_s17 = sphi %s2767_s17, %s14_s17   ;;  %s2730_s16 = sphi %s2765_s16, %s3498_s16   ;;  %s2726_s15 = sphi %s2763_s15, %s3497_s15  }
   0x3   : > { %p28_p1 = scmp.ge.s32.totalorder %s26_s18, 2  ;;  %p186_p2 = scmp.lt.s32.totalorder %s2734_s17, 3 }
   0x5   : > { %s3500_s18 = smov (%p28_p1, %s26_s18), 0  ;;  %p187_p3 = pnand %p2134_p0, %p186_p2 }
   0x6   : > { %p2135_p4 = scmp.ne.s32.totalorder (!%p187_p3), %s2726_s15, 0 }
   0x7   : > { %190 = sbr.rel (%p187_p3) target bundleno = 621 (0x26d), region = 36 }
   0xe   : > { %239 = sbr.rel (%p2135_p4) target bundleno = 496 (0x1f0), region = 40  ;;  %v2598_v0 = vld [vmem:[%s3493_s1] sm:$0xff] (!%p2135_p4)   ;;  %v2736_v1 = vmov (!%p2135_p4), 0   ;;  %v2599_v2 = vld [vmem:[%s3493_s1 + $0x8] sm:$0xff] (!%p2135_p4)   ;;  %v2600_v3 = vld [vmem:[%s3493_s1 + $0x10] sm:$0xff] (!%p2135_p4)  }
   0xf   : > { %758 = vmatprep.subr.bf16.mxu0 (!%p2135_p4), %v2736_v1  ;;  %2540 = vmatprep.subr.bf16.mxu1 (!%p2135_p4), %v2736_v1  ;;  %v2601_v4 = vld [vmem:[%s3493_s1 + $0x18] sm:$0xff] (!%p2135_p4)   ;;  %v2602_v5 = vld [vmem:[%s3493_s1 + $0x20] sm:$0xff] (!%p2135_p4)   ;;  %v2603_v7 = vld [vmem:[%s3493_s1 + $0x28] sm:$0xff] (!%p2135_p4)  }
  0x10   : > { %759 = vmatpush1.bf16.msra.mxu0 (!%p2135_p4), %v2598_v0  ;;  %2556 = vmatpush1.bf16.msra.mxu1 (!%p2135_p4), %v2598_v0  ;;  %v2616_v6 = vld [vmem:[%s3492_s0 + $0x4] ss:$8 sps:$4 sm:$0xff] (!%p2135_p4)   ;;  %v2604_v8 = vld [vmem:[%s3493_s1 + $0x30] sm:$0xff] (!%p2135_p4)   ;;  %v2605_v9 = vld [vmem:[%s3493_s1 + $0x38] sm:$0xff] (!%p2135_p4)  }
  0x11   : > { %760 = vmatprep.subr.bf16.mxu0 (!%p2135_p4), %v2736_v1  ;;  %2541 = vmatprep.subr.bf16.mxu1 (!%p2135_p4), %v2736_v1  ;;  %v2640_v10 = vld [vmem:[%s3492_s0 + $0x104] ss:$8 sps:$4 sm:$0xff] (!%p2135_p4)   ;;  %v2608_v13 = vld [vmem:[%s3493_s1 + $0x50] sm:$0xff] (!%p2135_p4)   ;;  %v2609_v14 = vld [vmem:[%s3493_s1 + $0x58] sm:$0xff] (!%p2135_p4)  }
  0x12   : > { %790 = vmatprep.mubr.bf16.mxu0 (!%p2135_p4), %v2616_v6  ;;  %918 = vmatprep.mubr.bf16.mxu1 (!%p2135_p4), %v2640_v10  ;;  %v2606_v11 = vld [vmem:[%s3493_s1 + $0x40] sm:$0xff] (!%p2135_p4)   ;;  %v2607_v12 = vld [vmem:[%s3493_s1 + $0x48] sm:$0xff] (!%p2135_p4)   ;;  %v2612_v17 = vld [vmem:[%s3493_s1 + $0x70] sm:$0xff] (!%p2135_p4)  }
  0x13   : > { %v2610_v15 = vld [vmem:[%s3493_s1 + $0x60] sm:$0xff] (!%p2135_p4)   ;;  %v2611_v16 = vld [vmem:[%s3493_s1 + $0x68] sm:$0xff] (!%p2135_p4)   ;;  %v2613_v18 = vld [vmem:[%s3493_s1 + $0x78] sm:$0xff] (!%p2135_p4)  }
  0x14   : > { %761 = vmatpush1.bf16.msra.mxu0 (!%p2135_p4), %v2599_v2  ;;  %2557 = vmatpush1.bf16.msra.mxu1 (!%p2135_p4), %v2599_v2  ;;  %v2614_v19 = vld [vmem:[%s3492_s0] ss:$8 sps:$4 sm:$0xff] (!%p2135_p4)   ;;  %v2617_v21 = vld [vmem:[%s3492_s0 + $0x14] ss:$8 sps:$4 sm:$0xff] (!%p2135_p4)   ;;  %v2619_v23 = vld [vmem:[%s3492_s0 + $0x10] ss:$8 sps:$4 sm:$0xff] (!%p2135_p4)  }
  0x15   : > { %762 = vmatprep.subr.bf16.mxu0 %v2736_v1  ;;  %2542 = vmatprep.subr.bf16.mxu1 %v2736_v1  ;;  %v2638_v20 = vld [vmem:[%s3492_s0 + $0x100] ss:$8 sps:$4 sm:$0xff]   ;;  %v2644_v22 = vld [vmem:[%s3492_s0 + $0x114] ss:$8 sps:$4 sm:$0xff]   ;;  %v2646_v24 = vld [vmem:[%s3492_s0 + $0x110] ss:$8 sps:$4 sm:$0xff]  }
  0x16   : > { %v2620_v25 = vld [vmem:[%s3492_s0 + $0x24] ss:$8 sps:$4 sm:$0xff]   ;;  %v2622_v27 = vld [vmem:[%s3492_s0 + $0x20] ss:$8 sps:$4 sm:$0xff]   ;;  %v2623_v29 = vld [vmem:[%s3492_s0 + $0x34] ss:$8 sps:$4 sm:$0xff]  }
  0x17   : > { %v2650_v26 = vld [vmem:[%s3492_s0 + $0x124] ss:$8 sps:$4 sm:$0xff]   ;;  %v2652_v28 = vld [vmem:[%s3492_s0 + $0x120] ss:$8 sps:$4 sm:$0xff]   ;;  %v2656_v30 = vld [vmem:[%s3492_s0 + $0x134] ss:$8 sps:$4 sm:$0xff]  }
  0x18   : > { %763 = vmatpush1.bf16.msra.mxu0 %v2600_v3  ;;  %2558 = vmatpush1.bf16.msra.mxu1 %v2600_v3  ;;  %v2625_v31 = vld [vmem:[%s3492_s0 + $0x30] ss:$8 sps:$4 sm:$0xff]   ;;  %v2626_v33 = vld [vmem:[%s3492_s0 + $0x44] ss:$8 sps:$4 sm:$0xff]   ;;  %v2628_v35 = vld [vmem:[%s3492_s0 + $0x40] ss:$8 sps:$4 sm:$0xff]  }
  0x19   : > { %764 = vmatprep.subr.bf16.mxu0 %v2736_v1  ;;  %2543 = vmatprep.subr.bf16.mxu1 %v2736_v1  ;;  %v2658_v32 = vld [vmem:[%s3492_s0 + $0x130] ss:$8 sps:$4 sm:$0xff]   ;;  %v2662_v34 = vld [vmem:[%s3492_s0 + $0x144] ss:$8 sps:$4 sm:$0xff]   ;;  %v2664_v36 = vld [vmem:[%s3492_s0 + $0x140] ss:$8 sps:$4 sm:$0xff]  }
  0x1a   : > { %v2629_v37 = vld [vmem:[%s3492_s0 + $0x54] ss:$8 sps:$4 sm:$0xff]   ;;  %v2631_v39 = vld [vmem:[%s3492_s0 + $0x50] ss:$8 sps:$4 sm:$0xff]   ;;  %v2632_v41 = vld [vmem:[%s3492_s0 + $0x64] ss:$8 sps:$4 sm:$0xff]  }
  0x1b   : > { %v2668_v38 = vld [vmem:[%s3492_s0 + $0x154] ss:$8 sps:$4 sm:$0xff]   ;;  %v2670_v40 = vld [vmem:[%s3492_s0 + $0x150] ss:$8 sps:$4 sm:$0xff]   ;;  %v2674_v42 = vld [vmem:[%s3492_s0 + $0x164] ss:$8 sps:$4 sm:$0xff]  }
  0x1c   : > { %765 = vmatpush1.bf16.msra.mxu0 %v2601_v4  ;;  %2559 = vmatpush1.bf16.msra.mxu1 %v2601_v4  ;;  %v2634_v43 = vld [vmem:[%s3492_s0 + $0x60] ss:$8 sps:$4 sm:$0xff]   ;;  %v2635_v45 = vld [vmem:[%s3492_s0 + $0x74] ss:$8 sps:$4 sm:$0xff]   ;;  %v2637_v47 = vld [vmem:[%s3492_s0 + $0x70] ss:$8 sps:$4 sm:$0xff]  }
  0x1d   : > { %766 = vmatprep.subr.bf16.mxu0 %v2736_v1  ;;  %2544 = vmatprep.subr.bf16.mxu1 %v2736_v1  ;;  %v2676_v44 = vld [vmem:[%s3492_s0 + $0x160] ss:$8 sps:$4 sm:$0xff]   ;;  %v2680_v46 = vld [vmem:[%s3492_s0 + $0x174] ss:$8 sps:$4 sm:$0xff]   ;;  %v2682_v48 = vld [vmem:[%s3492_s0 + $0x170] ss:$8 sps:$4 sm:$0xff]  }
  0x1e   : > { %v2641_v49 = vld [vmem:[%s3492_s0 + $0x84] ss:$8 sps:$4 sm:$0xff]   ;;  %v2643_v51 = vld [vmem:[%s3492_s0 + $0x80] ss:$8 sps:$4 sm:$0xff]   ;;  %v2647_v53 = vld [vmem:[%s3492_s0 + $0x94] ss:$8 sps:$4 sm:$0xff]  }
  0x1f   : > { %v2686_v50 = vld [vmem:[%s3492_s0 + $0x184] ss:$8 sps:$4 sm:$0xff]   ;;  %v2688_v52 = vld [vmem:[%s3492_s0 + $0x180] ss:$8 sps:$4 sm:$0xff]   ;;  %v2689_v54 = vld [vmem:[%s3492_s0 + $0x194] ss:$8 sps:$4 sm:$0xff]  }
  0x20   : > { %767 = vmatpush1.bf16.msra.mxu0 %v2602_v5  ;;  %2560 = vmatpush1.bf16.msra.mxu1 %v2602_v5  ;;  %v2649_v55 = vld [vmem:[%s3492_s0 + $0x90] ss:$8 sps:$4 sm:$0xff]   ;;  %v2653_v57 = vld [vmem:[%s3492_s0 + $0xa4] ss:$8 sps:$4 sm:$0xff]   ;;  %v2655_v59 = vld [vmem:[%s3492_s0 + $0xa0] ss:$8 sps:$4 sm:$0xff]  }
  0x21   : > { %768 = vmatprep.subr.bf16.mxu0 %v2736_v1  ;;  %2545 = vmatprep.subr.bf16.mxu1 %v2736_v1  ;;  %v2691_v56 = vld [vmem:[%s3492_s0 + $0x190] ss:$8 sps:$4 sm:$0xff]   ;;  %v2692_v58 = vld [vmem:[%s3492_s0 + $0x1a4] ss:$8 sps:$4 sm:$0xff]   ;;  %v2694_v60 = vld [vmem:[%s3492_s0 + $0x1a0] ss:$8 sps:$4 sm:$0xff]  }
  0x22   : > { %v2659_v61 = vld [vmem:[%s3492_s0 + $0xb4] ss:$8 sps:$4 sm:$0xff]   ;;  %v2661_v63 = vld [vmem:[%s3492_s0 + $0xb0] ss:$8 sps:$4 sm:$0xff]   ;;  %v2698_v2 = vld [vmem:[%s3492_s0 + $0x1c4] ss:$8 sps:$4 sm:$0xff]  }
  0x23   : > { %v2695_v62 = vld [vmem:[%s3492_s0 + $0x1b4] ss:$8 sps:$4 sm:$0xff]   ;;  %v2697_v0 = vld [vmem:[%s3492_s0 + $0x1b0] ss:$8 sps:$4 sm:$0xff]   ;;  %v2667_v3 = vld [vmem:[%s3492_s0 + $0xc0] ss:$8 sps:$4 sm:$0xff]  }
  0x24   : > { %769 = vmatpush1.bf16.msra.mxu0 %v2603_v7  ;;  %2561 = vmatpush1.bf16.msra.mxu1 %v2603_v7  ;;  %v2700_v4 = vld [vmem:[%s3492_s0 + $0x1c0] ss:$8 sps:$4 sm:$0xff]   ;;  %v2671_v5 = vld [vmem:[%s3492_s0 + $0xd4] ss:$8 sps:$4 sm:$0xff]   ;;  %v2673_v7 = vld [vmem:[%s3492_s0 + $0xd0] ss:$8 sps:$4 sm:$0xff]  }
  0x25   : > { %770 = vmatprep.subr.bf16.mxu0 %v2736_v1  ;;  %2546 = vmatprep.subr.bf16.mxu1 %v2736_v1  ;;  %v2701_v6 = vld [vmem:[%s3492_s0 + $0x1d4] ss:$8 sps:$4 sm:$0xff]   ;;  %v2704_v10 = vld [vmem:[%s3492_s0 + $0x1e4] ss:$8 sps:$4 sm:$0xff]  }
  0x28   : > { %771 = vmatpush1.bf16.msra.mxu0 %v2604_v8  ;;  %2562 = vmatpush1.bf16.msra.mxu1 %v2604_v8  ;;  %v2703_v8 = vld [vmem:[%s3492_s0 + $0x1d0] ss:$8 sps:$4 sm:$0xff]  }
  0x29   : > { %772 = vmatprep.subr.bf16.mxu0 %v2736_v1  ;;  %2547 = vmatprep.subr.bf16.mxu1 %v2736_v1 }
  0x2c   : > { %773 = vmatpush1.bf16.msra.mxu0 %v2605_v9  ;;  %2563 = vmatpush1.bf16.msra.mxu1 %v2605_v9  ;;  %v2677_v9 = vld [vmem:[%s3492_s0 + $0xe4] ss:$8 sps:$4 sm:$0xff]  }
  0x2d   : > { %774 = vmatprep.subr.bf16.mxu0 %v2736_v1  ;;  %2548 = vmatprep.subr.bf16.mxu1 %v2736_v1 }
  0x30   : > { %775 = vmatpush1.bf16.msra.mxu0 %v2606_v11  ;;  %2564 = vmatpush1.bf16.msra.mxu1 %v2606_v11  ;;  %v2679_v11 = vld [vmem:[%s3492_s0 + $0xe0] ss:$8 sps:$4 sm:$0xff]  }
  0x31   : > { %776 = vmatprep.subr.bf16.mxu0 %v2736_v1  ;;  %2549 = vmatprep.subr.bf16.mxu1 %v2736_v1 }
  0x34   : > { %777 = vmatpush1.bf16.msra.mxu0 %v2607_v12  ;;  %2565 = vmatpush1.bf16.msra.mxu1 %v2607_v12  ;;  %v2706_v12 = vld [vmem:[%s3492_s0 + $0x1e0] ss:$8 sps:$4 sm:$0xff]  }
  0x35   : > { %778 = vmatprep.subr.bf16.mxu0 %v2736_v1  ;;  %2550 = vmatprep.subr.bf16.mxu1 %v2736_v1 }
  0x38   : > { %779 = vmatpush1.bf16.msra.mxu0 %v2608_v13  ;;  %2566 = vmatpush1.bf16.msra.mxu1 %v2608_v13  ;;  %v2683_v13 = vld [vmem:[%s3492_s0 + $0xf4] ss:$8 sps:$4 sm:$0xff]  }
  0x39   : > { %780 = vmatprep.subr.bf16.mxu0 %v2736_v1  ;;  %2551 = vmatprep.subr.bf16.mxu1 %v2736_v1 }
  0x3c   : > { %781 = vmatpush1.bf16.msra.mxu0 %v2609_v14  ;;  %2567 = vmatpush1.bf16.msra.mxu1 %v2609_v14  ;;  %v2707_v14 = vld [vmem:[%s3492_s0 + $0x1f4] ss:$8 sps:$4 sm:$0xff]  }
  0x3d   : > { %782 = vmatprep.subr.bf16.mxu0 %v2736_v1  ;;  %2552 = vmatprep.subr.bf16.mxu1 %v2736_v1 }
  0x40   : > { %783 = vmatpush1.bf16.msra.mxu0 %v2610_v15  ;;  %2568 = vmatpush1.bf16.msra.mxu1 %v2610_v15  ;;  %v2685_v15 = vld [vmem:[%s3492_s0 + $0xf0] ss:$8 sps:$4 sm:$0xff]  }
  0x41   : > { %784 = vmatprep.subr.bf16.mxu0 %v2736_v1  ;;  %2553 = vmatprep.subr.bf16.mxu1 %v2736_v1 }
  0x44   : > { %785 = vmatpush1.bf16.msra.mxu0 %v2611_v16  ;;  %2569 = vmatpush1.bf16.msra.mxu1 %v2611_v16  ;;  %v2709_v16 = vld [vmem:[%s3492_s0 + $0x1f0] ss:$8 sps:$4 sm:$0xff]  }
  0x45   : > { %786 = vmatprep.subr.bf16.mxu0 %v2736_v1  ;;  %2554 = vmatprep.subr.bf16.mxu1 %v2736_v1 }
  0x48   : > { %787 = vmatpush1.bf16.msra.mxu0 %v2612_v17  ;;  %2570 = vmatpush1.bf16.msra.mxu1 %v2612_v17 }
  0x49   : > { %788 = vmatprep.subr.bf16.mxu0 %v2736_v1  ;;  %2555 = vmatprep.subr.bf16.mxu1 %v2736_v1  ;;  %v2665_v1 = vld [vmem:[%s3492_s0 + $0xc4] ss:$8 sps:$4 sm:$0xff]  }
  0x4c   : > { %789 = vmatpush1.bf16.msra.mxu0 %v2613_v18  ;;  %2571 = vmatpush1.bf16.msra.mxu1 %v2613_v18 }
  0x4f   : > { %791 = vmatmul.mubr.bf16.vlgmr.msra.gmra.mrb[0].mxu0 %v2614_v19  ;;  %919 = vmatmul.mubr.bf16.vlgmr.msra.gmra.mrb[0].mxu1 %v2638_v20 }
  0x50   : > { %798 = vmatprep.mubr.bf16.mxu0 %v2617_v21  ;;  %926 = vmatprep.mubr.bf16.mxu1 %v2644_v22 }
  0x57   : > { %799 = vmatmul.mubr.bf16.gmra.mrb[4].mxu0 %v2619_v23  ;;  %927 = vmatmul.mubr.bf16.gmra.mrb[4].mxu1 %v2646_v24 }
  0x58   : > { %806 = vmatprep.mubr.bf16.mxu0 %v2620_v25  ;;  %934 = vmatprep.mubr.bf16.mxu1 %v2650_v26 }
  0x5f   : > { %807 = vmatmul.mubr.bf16.gmra.mrb[8].mxu0 %v2622_v27  ;;  %935 = vmatmul.mubr.bf16.gmra.mrb[8].mxu1 %v2652_v28 }
  0x60   : > { %814 = vmatprep.mubr.bf16.mxu0 %v2623_v29  ;;  %942 = vmatprep.mubr.bf16.mxu1 %v2656_v30 }
  0x67   : > { %815 = vmatmul.mubr.bf16.gmra.mrb[12].mxu0 %v2625_v31  ;;  %943 = vmatmul.mubr.bf16.gmra.mrb[12].mxu1 %v2658_v32 }
  0x68   : > { %822 = vmatprep.mubr.bf16.mxu0 %v2626_v33  ;;  %950 = vmatprep.mubr.bf16.mxu1 %v2662_v34 }
  0x6f   : > { %823 = vmatmul.mubr.bf16.gmra.mrb[16].mxu0 %v2628_v35  ;;  %951 = vmatmul.mubr.bf16.gmra.mrb[16].mxu1 %v2664_v36 }
  0x70   : > { %830 = vmatprep.mubr.bf16.mxu0 %v2629_v37  ;;  %958 = vmatprep.mubr.bf16.mxu1 %v2668_v38 }
  0x77   : > { %831 = vmatmul.mubr.bf16.gmra.mrb[20].mxu0 %v2631_v39  ;;  %959 = vmatmul.mubr.bf16.gmra.mrb[20].mxu1 %v2670_v40 }
  0x78   : > { %838 = vmatprep.mubr.bf16.mxu0 %v2632_v41  ;;  %966 = vmatprep.mubr.bf16.mxu1 %v2674_v42 }
  0x7f   : > { %839 = vmatmul.mubr.bf16.gmra.mrb[24].mxu0 %v2634_v43  ;;  %967 = vmatmul.mubr.bf16.gmra.mrb[24].mxu1 %v2676_v44 }
  0x80   : > { %846 = vmatprep.mubr.bf16.mxu0 %v2635_v45  ;;  %974 = vmatprep.mubr.bf16.mxu1 %v2680_v46 }
  0x87   : > { %847 = vmatmul.mubr.bf16.gmra.mrb[28].mxu0 %v2637_v47  ;;  %975 = vmatmul.mubr.bf16.gmra.mrb[28].mxu1 %v2682_v48 }
  0x88   : > { %854 = vmatprep.mubr.bf16.mxu0 %v2641_v49  ;;  %982 = vmatprep.mubr.bf16.mxu1 %v2686_v50 }
  0x8f   : > { %855 = vmatmul.mubr.bf16.gmra.mrb[32].mxu0 %v2643_v51  ;;  %983 = vmatmul.mubr.bf16.gmra.mrb[32].mxu1 %v2688_v52 }
  0x90   : > { %862 = vmatprep.mubr.bf16.mxu0 %v2647_v53  ;;  %990 = vmatprep.mubr.bf16.mxu1 %v2689_v54 }
  0x97   : > { %863 = vmatmul.mubr.bf16.gmra.mrb[36].mxu0 %v2649_v55  ;;  %991 = vmatmul.mubr.bf16.gmra.mrb[36].mxu1 %v2691_v56 }
  0x98   : > { %870 = vmatprep.mubr.bf16.mxu0 %v2653_v57  ;;  %998 = vmatprep.mubr.bf16.mxu1 %v2692_v58 }
  0x9f   : > { %871 = vmatmul.mubr.bf16.gmra.mrb[40].mxu0 %v2655_v59  ;;  %999 = vmatmul.mubr.bf16.gmra.mrb[40].mxu1 %v2694_v60 }
  0xa0   : > { %878 = vmatprep.mubr.bf16.mxu0 %v2659_v61  ;;  %1006 = vmatprep.mubr.bf16.mxu1 %v2695_v62 }
  0xa7   : > { %879 = vmatmul.mubr.bf16.gmra.mrb[44].mxu0 %v2661_v63  ;;  %1007 = vmatmul.mubr.bf16.gmra.mrb[44].mxu1 %v2697_v0 }
  0xa8   : > { %886 = vmatprep.mubr.bf16.mxu0 %v2665_v1  ;;  %1014 = vmatprep.mubr.bf16.mxu1 %v2698_v2 }
  0xaf   : > { %887 = vmatmul.mubr.bf16.gmra.mrb[48].mxu0 %v2667_v3  ;;  %1015 = vmatmul.mubr.bf16.gmra.mrb[48].mxu1 %v2700_v4 }
  0xb0   : > { %894 = vmatprep.mubr.bf16.mxu0 %v2671_v5  ;;  %1022 = vmatprep.mubr.bf16.mxu1 %v2701_v6 }
  0xb7   : > { %895 = vmatmul.mubr.bf16.gmra.mrb[52].mxu0 %v2673_v7  ;;  %1023 = vmatmul.mubr.bf16.gmra.mrb[52].mxu1 %v2703_v8 }
  0xb8   : > { %902 = vmatprep.mubr.bf16.mxu0 %v2677_v9  ;;  %1030 = vmatprep.mubr.bf16.mxu1 %v2704_v10 }
  0xbf   : > { %903 = vmatmul.mubr.bf16.gmra.mrb[56].mxu0 %v2679_v11  ;;  %1031 = vmatmul.mubr.bf16.gmra.mrb[56].mxu1 %v2706_v12 }
  0xc0   : > { %910 = vmatprep.mubr.bf16.mxu0 %v2683_v13  ;;  %1038 = vmatprep.mubr.bf16.mxu1 %v2707_v14 }
  0xc7   : > { %911 = vmatmul.mubr.bf16.gmra.mrb[60].mxu0 %v2685_v15  ;;  %1039 = vmatmul.mubr.bf16.gmra.mrb[60].mxu1 %v2709_v16 }
 0x122   : > { %v792_v17 = vpop.f32.mrb[0].mxu0  ;;  %v3056_v18 = vpop.f32.mrb[0].mxu1 }
 0x123   : > { %1049 = vst [vmem:[#allocation2] sm:$0xff] %v792_v17  ;;  %v794_v19 = vpop.f32.mrb[1].mxu0  ;;  %1081 = vst [vmem:[#allocation2 + $0x100] sm:$0xff] %v3056_v18  ;;  %v922_v20 = vpop.f32.mrb[1].mxu1  ;;  %v1186_v23 = vmul.f32 %v792_v17, %v792_v17 }
 0x124   : > { %v795_v21 = vpop.f32.mrb[2].mxu0  ;;  %v3059_v22 = vpop.f32.mrb[2].mxu1 }
 0x125   : > { %1050 = vst [vmem:[#allocation2 + $0x8] sm:$0xff] %v795_v21  ;;  %v1114_v24 = vadd.f32 %v795_v21, %v792_v17  ;;  %v1187_v25 = vmul.f32 %v795_v21, %v795_v21  ;;  %v797_v26 = vpop.f32.mrb[3].mxu0  ;;  %1082 = vst [vmem:[#allocation2 + $0x108] sm:$0xff] %v3059_v22  ;;  %v925_v27 = vpop.f32.mrb[3].mxu1 }
 0x127   : > { %v1250_v28 = vadd.f32 %v1187_v25, %v1186_v23 }
 0x12a   : > { %v800_v29 = vpop.f32.mrb[4].mxu0  ;;  %v3062_v30 = vpop.f32.mrb[4].mxu1 }
 0x12b   : > { %1051 = vst [vmem:[#allocation2 + $0x10] sm:$0xff] %v800_v29  ;;  %v1115_v31 = vadd.f32 %v1114_v24, %v800_v29  ;;  %v1188_v32 = vmul.f32 %v800_v29, %v800_v29  ;;  %v802_v33 = vpop.f32.mrb[5].mxu0  ;;  %1083 = vst [vmem:[#allocation2 + $0x110] sm:$0xff] %v3062_v30  ;;  %v930_v34 = vpop.f32.mrb[5].mxu1 }
 0x12c   : > { %v803_v35 = vpop.f32.mrb[6].mxu0  ;;  %v3065_v36 = vpop.f32.mrb[6].mxu1 }
 0x12d   : > { %v1251_v37 = vadd.f32 %v1250_v28, %v1188_v32  ;;  %1052 = vst [vmem:[#allocation2 + $0x18] sm:$0xff] %v803_v35  ;;  %v1116_v38 = vadd.f32 %v1115_v31, %v803_v35  ;;  %v1189_v39 = vmul.f32 %v803_v35, %v803_v35  ;;  %v805_v40 = vpop.f32.mrb[7].mxu0  ;;  %1084 = vst [vmem:[#allocation2 + $0x118] sm:$0xff] %v3065_v36  ;;  %v933_v41 = vpop.f32.mrb[7].mxu1 }
 0x12f   : > { %v1252_v42 = vadd.f32 %v1251_v37, %v1189_v39 }
 0x132   : > { %v808_v43 = vpop.f32.mrb[8].mxu0  ;;  %v3068_v44 = vpop.f32.mrb[8].mxu1 }
 0x133   : > { %1053 = vst [vmem:[#allocation2 + $0x20] sm:$0xff] %v808_v43  ;;  %v1117_v45 = vadd.f32 %v1116_v38, %v808_v43  ;;  %v1190_v46 = vmul.f32 %v808_v43, %v808_v43  ;;  %v810_v47 = vpop.f32.mrb[9].mxu0  ;;  %1085 = vst [vmem:[#allocation2 + $0x120] sm:$0xff] %v3068_v44  ;;  %v938_v48 = vpop.f32.mrb[9].mxu1 }
 0x134   : > { %v811_v49 = vpop.f32.mrb[10].mxu0  ;;  %v3071_v50 = vpop.f32.mrb[10].mxu1 }
 0x135   : > { %v1253_v51 = vadd.f32 %v1252_v42, %v1190_v46  ;;  %1054 = vst [vmem:[#allocation2 + $0x28] sm:$0xff] %v811_v49  ;;  %v1118_v52 = vadd.f32 %v1117_v45, %v811_v49  ;;  %v1191_v53 = vmul.f32 %v811_v49, %v811_v49  ;;  %v813_v54 = vpop.f32.mrb[11].mxu0  ;;  %1086 = vst [vmem:[#allocation2 + $0x128] sm:$0xff] %v3071_v50  ;;  %v941_v55 = vpop.f32.mrb[11].mxu1 }
 0x137   : > { %v1254_v56 = vadd.f32 %v1253_v51, %v1191_v53 }
 0x13a   : > { %v816_v57 = vpop.f32.mrb[12].mxu0  ;;  %v3074_v58 = vpop.f32.mrb[12].mxu1 }
 0x13b   : > { %1055 = vst [vmem:[#allocation2 + $0x30] sm:$0xff] %v816_v57  ;;  %v1119_v59 = vadd.f32 %v1118_v52, %v816_v57  ;;  %v1192_v60 = vmul.f32 %v816_v57, %v816_v57  ;;  %v818_v61 = vpop.f32.mrb[13].mxu0  ;;  %1087 = vst [vmem:[#allocation2 + $0x130] sm:$0xff] %v3074_v58  ;;  %v946_v62 = vpop.f32.mrb[13].mxu1 }
 0x13c   : > { %v819_v63 = vpop.f32.mrb[14].mxu0  ;;  %v3077_v0 = vpop.f32.mrb[14].mxu1 }
 0x13d   : > { %v1255_v1 = vadd.f32 %v1254_v56, %v1192_v60  ;;  %1056 = vst [vmem:[#allocation2 + $0x38] sm:$0xff] %v819_v63  ;;  %v1120_v2 = vadd.f32 %v1119_v59, %v819_v63  ;;  %v1193_v3 = vmul.f32 %v819_v63, %v819_v63  ;;  %v821_v4 = vpop.f32.mrb[15].mxu0  ;;  %1088 = vst [vmem:[#allocation2 + $0x138] sm:$0xff] %v3077_v0  ;;  %v949_v5 = vpop.f32.mrb[15].mxu1 }
 0x13f   : > { %v1256_v6 = vadd.f32 %v1255_v1, %v1193_v3 }
 0x142   : > { %v824_v7 = vpop.f32.mrb[16].mxu0  ;;  %v3080_v8 = vpop.f32.mrb[16].mxu1 }
 0x143   : > { %1057 = vst [vmem:[#allocation2 + $0x40] sm:$0xff] %v824_v7  ;;  %v1121_v9 = vadd.f32 %v1120_v2, %v824_v7  ;;  %v1194_v10 = vmul.f32 %v824_v7, %v824_v7  ;;  %v826_v11 = vpop.f32.mrb[17].mxu0  ;;  %1089 = vst [vmem:[#allocation2 + $0x140] sm:$0xff] %v3080_v8  ;;  %v954_v12 = vpop.f32.mrb[17].mxu1  ;;  %v2737_v7 = vmov 0.0  }
 0x144   : > { %v827_v13 = vpop.f32.mrb[18].mxu0  ;;  %v3083_v14 = vpop.f32.mrb[18].mxu1  ;;  %244 = vst [vmem:[#allocation3] sm:$0x1] %v2737_v7  ;;  %245 = vst [vmem:[#allocation4] sm:$0x1] %v2737_v7 }
 0x145   : > { %v1257_v15 = vadd.f32 %v1256_v6, %v1194_v10  ;;  %1058 = vst [vmem:[#allocation2 + $0x48] sm:$0xff] %v827_v13  ;;  %v1122_v16 = vadd.f32 %v1121_v9, %v827_v13  ;;  %v1195_v17 = vmul.f32 %v827_v13, %v827_v13  ;;  %v829_v19 = vpop.f32.mrb[19].mxu0  ;;  %1090 = vst [vmem:[#allocation2 + $0x148] sm:$0xff] %v3083_v14  ;;  %v957_v20 = vpop.f32.mrb[19].mxu1 }
 0x147   : > { %v1258_v21 = vadd.f32 %v1257_v15, %v1195_v17 }
 0x14a   : > { %v832_v23 = vpop.f32.mrb[20].mxu0  ;;  %v3086_v24 = vpop.f32.mrb[20].mxu1 }
 0x14b   : > { %1059 = vst [vmem:[#allocation2 + $0x50] sm:$0xff] %v832_v23  ;;  %v1123_v25 = vadd.f32 %v1122_v16, %v832_v23  ;;  %v1196_v26 = vmul.f32 %v832_v23, %v832_v23  ;;  %v834_v27 = vpop.f32.mrb[21].mxu0  ;;  %1091 = vst [vmem:[#allocation2 + $0x150] sm:$0xff] %v3086_v24  ;;  %v962_v28 = vpop.f32.mrb[21].mxu1 }
 0x14c   : > { %v835_v29 = vpop.f32.mrb[22].mxu0  ;;  %v3089_v31 = vpop.f32.mrb[22].mxu1 }
 0x14d   : > { %v1259_v32 = vadd.f32 %v1258_v21, %v1196_v26  ;;  %1060 = vst [vmem:[#allocation2 + $0x58] sm:$0xff] %v835_v29  ;;  %v1124_v33 = vadd.f32 %v1123_v25, %v835_v29  ;;  %v1197_v34 = vmul.f32 %v835_v29, %v835_v29  ;;  %v837_v35 = vpop.f32.mrb[23].mxu0  ;;  %1092 = vst [vmem:[#allocation2 + $0x158] sm:$0xff] %v3089_v31  ;;  %v965_v37 = vpop.f32.mrb[23].mxu1 }
 0x14f   : > { %v1260_v38 = vadd.f32 %v1259_v32, %v1197_v34 }
 0x152   : > { %v840_v39 = vpop.f32.mrb[24].mxu0  ;;  %v3092_v40 = vpop.f32.mrb[24].mxu1 }
 0x153   : > { %1061 = vst [vmem:[#allocation2 + $0x60] sm:$0xff] %v840_v39  ;;  %v1125_v41 = vadd.f32 %v1124_v33, %v840_v39  ;;  %v1198_v42 = vmul.f32 %v840_v39, %v840_v39  ;;  %v842_v43 = vpop.f32.mrb[25].mxu0  ;;  %1093 = vst [vmem:[#allocation2 + $0x160] sm:$0xff] %v3092_v40  ;;  %v970_v45 = vpop.f32.mrb[25].mxu1 }
 0x154   : > { %v843_v46 = vpop.f32.mrb[26].mxu0  ;;  %v3095_v47 = vpop.f32.mrb[26].mxu1 }
 0x155   : > { %v1261_v48 = vadd.f32 %v1260_v38, %v1198_v42  ;;  %1062 = vst [vmem:[#allocation2 + $0x68] sm:$0xff] %v843_v46  ;;  %v1126_v49 = vadd.f32 %v1125_v41, %v843_v46  ;;  %v1199_v51 = vmul.f32 %v843_v46, %v843_v46  ;;  %v845_v52 = vpop.f32.mrb[27].mxu0  ;;  %1094 = vst [vmem:[#allocation2 + $0x168] sm:$0xff] %v3095_v47  ;;  %v973_v53 = vpop.f32.mrb[27].mxu1 }
 0x157   : > { %v1262_v54 = vadd.f32 %v1261_v48, %v1199_v51 }
 0x15a   : > { %v848_v55 = vpop.f32.mrb[28].mxu0  ;;  %v3098_v56 = vpop.f32.mrb[28].mxu1 }
 0x15b   : > { %1063 = vst [vmem:[#allocation2 + $0x70] sm:$0xff] %v848_v55  ;;  %v1127_v57 = vadd.f32 %v1126_v49, %v848_v55  ;;  %v1200_v59 = vmul.f32 %v848_v55, %v848_v55  ;;  %v850_v60 = vpop.f32.mrb[29].mxu0  ;;  %1095 = vst [vmem:[#allocation2 + $0x170] sm:$0xff] %v3098_v56  ;;  %v978_v61 = vpop.f32.mrb[29].mxu1 }
 0x15c   : > { %v851_v62 = vpop.f32.mrb[30].mxu0  ;;  %v3101_v63 = vpop.f32.mrb[30].mxu1 }
 0x15d   : > { %v1263_v1 = vadd.f32 %v1262_v54, %v1200_v59  ;;  %1064 = vst [vmem:[#allocation2 + $0x78] sm:$0xff] %v851_v62  ;;  %v1128_v2 = vadd.f32 %v1127_v57, %v851_v62  ;;  %v1201_v3 = vmul.f32 %v851_v62, %v851_v62  ;;  %v853_v4 = vpop.f32.mrb[31].mxu0  ;;  %1096 = vst [vmem:[#allocation2 + $0x178] sm:$0xff] %v3101_v63  ;;  %v981_v5 = vpop.f32.mrb[31].mxu1 }
 0x15f   : > { %v1264_v6 = vadd.f32 %v1263_v1, %v1201_v3 }
 0x162   : > { %v856_v9 = vpop.f32.mrb[32].mxu0  ;;  %v3104_v10 = vpop.f32.mrb[32].mxu1 }
 0x163   : > { %1065 = vst [vmem:[#allocation2 + $0x80] sm:$0xff] %v856_v9  ;;  %v1129_v11 = vadd.f32 %v1128_v2, %v856_v9  ;;  %v1202_v12 = vmul.f32 %v856_v9, %v856_v9  ;;  %v858_v13 = vpop.f32.mrb[33].mxu0  ;;  %1097 = vst [vmem:[#allocation2 + $0x180] sm:$0xff] %v3104_v10  ;;  %v986_v15 = vpop.f32.mrb[33].mxu1 }
 0x164   : > { %v859_v16 = vpop.f32.mrb[34].mxu0  ;;  %v3107_v17 = vpop.f32.mrb[34].mxu1 }
 0x165   : > { %v1265_v19 = vadd.f32 %v1264_v6, %v1202_v12  ;;  %1066 = vst [vmem:[#allocation2 + $0x88] sm:$0xff] %v859_v16  ;;  %v1130_v20 = vadd.f32 %v1129_v11, %v859_v16  ;;  %v1203_v21 = vmul.f32 %v859_v16, %v859_v16  ;;  %v861_v23 = vpop.f32.mrb[35].mxu0  ;;  %1098 = vst [vmem:[#allocation2 + $0x188] sm:$0xff] %v3107_v17  ;;  %v989_v25 = vpop.f32.mrb[35].mxu1 }
 0x167   : > { %v1266_v26 = vadd.f32 %v1265_v19, %v1203_v21 }
 0x16a   : > { %v864_v27 = vpop.f32.mrb[36].mxu0  ;;  %v3110_v28 = vpop.f32.mrb[36].mxu1 }
 0x16b   : > { %1067 = vst [vmem:[#allocation2 + $0x90] sm:$0xff] %v864_v27  ;;  %v1131_v29 = vadd.f32 %v1130_v20, %v864_v27  ;;  %v1204_v32 = vmul.f32 %v864_v27, %v864_v27  ;;  %v866_v33 = vpop.f32.mrb[37].mxu0  ;;  %1099 = vst [vmem:[#allocation2 + $0x190] sm:$0xff] %v3110_v28  ;;  %v994_v34 = vpop.f32.mrb[37].mxu1 }
 0x16c   : > { %v867_v35 = vpop.f32.mrb[38].mxu0  ;;  %v3113_v37 = vpop.f32.mrb[38].mxu1 }
 0x16d   : > { %v1267_v38 = vadd.f32 %v1266_v26, %v1204_v32  ;;  %1068 = vst [vmem:[#allocation2 + $0x98] sm:$0xff] %v867_v35  ;;  %v1132_v39 = vadd.f32 %v1131_v29, %v867_v35  ;;  %v1205_v41 = vmul.f32 %v867_v35, %v867_v35  ;;  %v869_v42 = vpop.f32.mrb[39].mxu0  ;;  %1100 = vst [vmem:[#allocation2 + $0x198] sm:$0xff] %v3113_v37  ;;  %v997_v43 = vpop.f32.mrb[39].mxu1 }
 0x16f   : > { %v1268_v45 = vadd.f32 %v1267_v38, %v1205_v41 }
 0x172   : > { %v872_v46 = vpop.f32.mrb[40].mxu0  ;;  %v3116_v48 = vpop.f32.mrb[40].mxu1 }
 0x173   : > { %1069 = vst [vmem:[#allocation2 + $0xa0] sm:$0xff] %v872_v46  ;;  %v1133_v49 = vadd.f32 %v1132_v39, %v872_v46  ;;  %v1206_v51 = vmul.f32 %v872_v46, %v872_v46  ;;  %v874_v52 = vpop.f32.mrb[41].mxu0  ;;  %1101 = vst [vmem:[#allocation2 + $0x1a0] sm:$0xff] %v3116_v48  ;;  %v1002_v53 = vpop.f32.mrb[41].mxu1 }
 0x174   : > { %v875_v54 = vpop.f32.mrb[42].mxu0  ;;  %v3119_v55 = vpop.f32.mrb[42].mxu1 }
 0x175   : > { %v1269_v57 = vadd.f32 %v1268_v45, %v1206_v51  ;;  %1070 = vst [vmem:[#allocation2 + $0xa8] sm:$0xff] %v875_v54  ;;  %v1134_v59 = vadd.f32 %v1133_v49, %v875_v54  ;;  %v1207_v60 = vmul.f32 %v875_v54, %v875_v54  ;;  %v877_v61 = vpop.f32.mrb[43].mxu0  ;;  %1102 = vst [vmem:[#allocation2 + $0x1a8] sm:$0xff] %v3119_v55  ;;  %v1005_v62 = vpop.f32.mrb[43].mxu1 }
 0x177   : > { %v1270_v1 = vadd.f32 %v1269_v57, %v1207_v60 }
 0x17a   : > { %v880_v2 = vpop.f32.mrb[44].mxu0  ;;  %v3122_v3 = vpop.f32.mrb[44].mxu1 }
 0x17b   : > { %1071 = vst [vmem:[#allocation2 + $0xb0] sm:$0xff] %v880_v2  ;;  %v1135_v4 = vadd.f32 %v1134_v59, %v880_v2  ;;  %v1208_v5 = vmul.f32 %v880_v2, %v880_v2  ;;  %v882_v6 = vpop.f32.mrb[45].mxu0  ;;  %1103 = vst [vmem:[#allocation2 + $0x1b0] sm:$0xff] %v3122_v3  ;;  %v1010_v7 = vpop.f32.mrb[45].mxu1 }
 0x17c   : > { %v883_v9 = vpop.f32.mrb[46].mxu0  ;;  %v3125_v11 = vpop.f32.mrb[46].mxu1 }
 0x17d   : > { %v1271_v12 = vadd.f32 %v1270_v1, %v1208_v5  ;;  %1072 = vst [vmem:[#allocation2 + $0xb8] sm:$0xff] %v883_v9  ;;  %v1136_v13 = vadd.f32 %v1135_v4, %v883_v9  ;;  %v1209_v15 = vmul.f32 %v883_v9, %v883_v9  ;;  %v885_v16 = vpop.f32.mrb[47].mxu0  ;;  %1104 = vst [vmem:[#allocation2 + $0x1b8] sm:$0xff] %v3125_v11  ;;  %v1013_v19 = vpop.f32.mrb[47].mxu1 }
 0x17f   : > { %v1272_v20 = vadd.f32 %v1271_v12, %v1209_v15 }
 0x182   : > { %v888_v21 = vpop.f32.mrb[48].mxu0  ;;  %v3128_v23 = vpop.f32.mrb[48].mxu1 }
 0x183   : > { %1073 = vst [vmem:[#allocation2 + $0xc0] sm:$0xff] %v888_v21  ;;  %v1137_v25 = vadd.f32 %v1136_v13, %v888_v21  ;;  %v1210_v26 = vmul.f32 %v888_v21, %v888_v21  ;;  %v890_v27 = vpop.f32.mrb[49].mxu0  ;;  %1105 = vst [vmem:[#allocation2 + $0x1c0] sm:$0xff] %v3128_v23  ;;  %v1018_v29 = vpop.f32.mrb[49].mxu1 }
 0x184   : > { %v891_v32 = vpop.f32.mrb[50].mxu0  ;;  %v3131_v33 = vpop.f32.mrb[50].mxu1 }
 0x185   : > { %v1273_v34 = vadd.f32 %v1272_v20, %v1210_v26  ;;  %1074 = vst [vmem:[#allocation2 + $0xc8] sm:$0xff] %v891_v32  ;;  %v1138_v35 = vadd.f32 %v1137_v25, %v891_v32  ;;  %v1211_v38 = vmul.f32 %v891_v32, %v891_v32  ;;  %v893_v39 = vpop.f32.mrb[51].mxu0  ;;  %1106 = vst [vmem:[#allocation2 + $0x1c8] sm:$0xff] %v3131_v33  ;;  %v1021_v41 = vpop.f32.mrb[51].mxu1 }
 0x187   : > { %v1274_v42 = vadd.f32 %v1273_v34, %v1211_v38 }
 0x18a   : > { %v896_v43 = vpop.f32.mrb[52].mxu0  ;;  %v3134_v45 = vpop.f32.mrb[52].mxu1 }
 0x18b   : > { %1075 = vst [vmem:[#allocation2 + $0xd0] sm:$0xff] %v896_v43  ;;  %v1139_v46 = vadd.f32 %v1138_v35, %v896_v43  ;;  %v1212_v49 = vmul.f32 %v896_v43, %v896_v43  ;;  %v898_v51 = vpop.f32.mrb[53].mxu0  ;;  %1107 = vst [vmem:[#allocation2 + $0x1d0] sm:$0xff] %v3134_v45  ;;  %v1026_v52 = vpop.f32.mrb[53].mxu1 }
 0x18c   : > { %v899_v53 = vpop.f32.mrb[54].mxu0  ;;  %v3137_v54 = vpop.f32.mrb[54].mxu1  ;;  %v1218_v51 = vmul.f32 %v3056_v18, %v3056_v18 }
 0x18d   : > { %v1275_v57 = vadd.f32 %v1274_v42, %v1212_v49  ;;  %1076 = vst [vmem:[#allocation2 + $0xd8] sm:$0xff] %v899_v53  ;;  %v1140_v59 = vadd.f32 %v1139_v46, %v899_v53  ;;  %v1213_v60 = vmul.f32 %v899_v53, %v899_v53  ;;  %v901_v61 = vpop.f32.mrb[55].mxu0  ;;  %1108 = vst [vmem:[#allocation2 + $0x1d8] sm:$0xff] %v3137_v54  ;;  %v1029_v62 = vpop.f32.mrb[55].mxu1 }
 0x18e   : > { %v1220_v61 = vmul.f32 %v3062_v30, %v3062_v30 }
 0x18f   : > { %v1276_v1 = vadd.f32 %v1275_v57, %v1213_v60  ;;  %v1219_v57 = vmul.f32 %v3059_v22, %v3059_v22 }
 0x192   : > { %v904_v2 = vpop.f32.mrb[56].mxu0  ;;  %v3140_v4 = vpop.f32.mrb[56].mxu1 }
 0x193   : > { %1077 = vst [vmem:[#allocation2 + $0xe0] sm:$0xff] %v904_v2  ;;  %v1141_v5 = vadd.f32 %v1140_v59, %v904_v2  ;;  %v1214_v6 = vmul.f32 %v904_v2, %v904_v2  ;;  %v906_v7 = vpop.f32.mrb[57].mxu0  ;;  %1109 = vst [vmem:[#allocation2 + $0x1e0] sm:$0xff] %v3140_v4  ;;  %v1034_v9 = vpop.f32.mrb[57].mxu1  ;;  %v1221_v2 = vmul.f32 %v3065_v36, %v3065_v36 }
 0x194   : > { %v907_v12 = vpop.f32.mrb[58].mxu0  ;;  %v3143_v13 = vpop.f32.mrb[58].mxu1 }
 0x195   : > { %v1277_v15 = vadd.f32 %v1276_v1, %v1214_v6  ;;  %1078 = vst [vmem:[#allocation2 + $0xe8] sm:$0xff] %v907_v12  ;;  %v1142_v16 = vadd.f32 %v1141_v5, %v907_v12  ;;  %v1215_v19 = vmul.f32 %v907_v12, %v907_v12  ;;  %v909_v20 = vpop.f32.mrb[59].mxu0  ;;  %1110 = vst [vmem:[#allocation2 + $0x1e8] sm:$0xff] %v3143_v13  ;;  %v1037_v21 = vpop.f32.mrb[59].mxu1 }
 0x197   : > { %v1278_v25 = vadd.f32 %v1277_v15, %v1215_v19 }
 0x19a   : > { %v912_v26 = vpop.f32.mrb[60].mxu0  ;;  %v3146_v27 = vpop.f32.mrb[60].mxu1 }
 0x19b   : > { %1079 = vst [vmem:[#allocation2 + $0xf0] sm:$0xff] %v912_v26  ;;  %v1143_v29 = vadd.f32 %v1142_v16, %v912_v26  ;;  %v1216_v32 = vmul.f32 %v912_v26, %v912_v26  ;;  %v914_v34 = vpop.f32.mrb[61].mxu0  ;;  %1111 = vst [vmem:[#allocation2 + $0x1f0] sm:$0xff] %v3146_v27  ;;  %v1042_v35 = vpop.f32.mrb[61].mxu1 }
 0x19c   : > { %v915_v38 = vpop.f32.mrb[62].mxu0  ;;  %v3149_v39 = vpop.f32.mrb[62].mxu1 }
 0x19d   : > { %v1279_v41 = vadd.f32 %v1278_v25, %v1216_v32  ;;  %1080 = vst [vmem:[#allocation2 + $0xf8] sm:$0xff] %v915_v38  ;;  %v1144_v42 = vadd.f32 %v1143_v29, %v915_v38  ;;  %v1217_v43 = vmul.f32 %v915_v38, %v915_v38  ;;  %v917_v46 = vpop.f32.mrb[63].mxu0  ;;  %1112 = vst [vmem:[#allocation2 + $0x1f8] sm:$0xff] %v3149_v39  ;;  %v1045_v49 = vpop.f32.mrb[63].mxu1 }
 0x19f   : > { %v1145_v52 = vadd.f32 %v1144_v42, %v3056_v18  ;;  %v1280_v53 = vadd.f32 %v1279_v41, %v1217_v43  ;;  %v1222_v18 = vmul.f32 %v3068_v44, %v3068_v44 }
 0x1a1   : > { %v1146_v59 = vadd.f32 %v1145_v52, %v3059_v22  ;;  %v1281_v60 = vadd.f32 %v1280_v53, %v1218_v51  ;;  %v1223_v22 = vmul.f32 %v3071_v50, %v3071_v50 }
 0x1a3   : > { %v1147_v62 = vadd.f32 %v1146_v59, %v3062_v30  ;;  %v1282_v1 = vadd.f32 %v1281_v60, %v1219_v57  ;;  %v1224_v30 = vmul.f32 %v3074_v58, %v3074_v58  ;;  %v1234_v59 = vmul.f32 %v3104_v10, %v3104_v10 }
 0x1a5   : > { %v1148_v5 = vadd.f32 %v1147_v62, %v3065_v36  ;;  %v1283_v6 = vadd.f32 %v1282_v1, %v1220_v61  ;;  %v1225_v36 = vmul.f32 %v3077_v0, %v3077_v0  ;;  %v1235_v62 = vmul.f32 %v3107_v17, %v3107_v17 }
 0x1a7   : > { %v1149_v7 = vadd.f32 %v1148_v5, %v3068_v44  ;;  %v1284_v9 = vadd.f32 %v1283_v6, %v1221_v2  ;;  %v1226_v44 = vmul.f32 %v3080_v8, %v3080_v8  ;;  %v1236_v2 = vmul.f32 %v3110_v28, %v3110_v28 }
 0x1a8   : > { %v1237_v6 = vmul.f32 %v3113_v37, %v3113_v37 }
 0x1a9   : > { %v1150_v12 = vadd.f32 %v1149_v7, %v3071_v50  ;;  %v1285_v15 = vadd.f32 %v1284_v9, %v1222_v18  ;;  %v1227_v50 = vmul.f32 %v3083_v14, %v3083_v14  ;;  %v1238_v7 = vmul.f32 %v3116_v48, %v3116_v48 }
 0x1ab   : > { %v1151_v16 = vadd.f32 %v1150_v12, %v3074_v58  ;;  %v1286_v19 = vadd.f32 %v1285_v15, %v1223_v22  ;;  %v1228_v58 = vmul.f32 %v3086_v24, %v3086_v24  ;;  %v1239_v22 = vmul.f32 %v3119_v55, %v3119_v55 }
 0x1ac   : > { %v1240_v15 = vmul.f32 %v3122_v3, %v3122_v3 }
 0x1ad   : > { %v1152_v20 = vadd.f32 %v1151_v16, %v3077_v0  ;;  %v1287_v21 = vadd.f32 %v1286_v19, %v1224_v30  ;;  %v1229_v0 = vmul.f32 %v3089_v31, %v3089_v31  ;;  %v1241_v16 = vmul.f32 %v3125_v11, %v3125_v11 }
 0x1af   : > { %v1288_v25 = vadd.f32 %v1287_v21, %v1225_v36  ;;  %v1153_v26 = vadd.f32 %v1152_v20, %v3080_v8  ;;  %v1230_v8 = vmul.f32 %v3092_v40, %v3092_v40  ;;  %v1242_v36 = vmul.f32 %v3128_v23, %v3128_v23 }
 0x1b0   : > { %v1243_v21 = vmul.f32 %v3131_v33, %v3131_v33 }
 0x1b1   : > { %v1154_v29 = vadd.f32 %v1153_v26, %v3083_v14  ;;  %v1289_v32 = vadd.f32 %v1288_v25, %v1226_v44  ;;  %v1231_v14 = vmul.f32 %v3095_v47, %v3095_v47  ;;  %v1244_v25 = vmul.f32 %v3134_v45, %v3134_v45 }
 0x1b3   : > { %v1155_v34 = vadd.f32 %v1154_v29, %v3086_v24  ;;  %v1290_v35 = vadd.f32 %v1289_v32, %v1227_v50  ;;  %v1232_v24 = vmul.f32 %v3098_v56, %v3098_v56  ;;  %v1245_v50 = vmul.f32 %v3137_v54, %v3137_v54 }
 0x1b4   : > { %v1246_v32 = vmul.f32 %v3140_v4, %v3140_v4 }
 0x1b5   : > { %v1156_v38 = vadd.f32 %v1155_v34, %v3089_v31  ;;  %v1291_v41 = vadd.f32 %v1290_v35, %v1228_v58  ;;  %v1233_v31 = vmul.f32 %v3101_v63, %v3101_v63  ;;  %v1247_v34 = vmul.f32 %v3143_v13, %v3143_v13 }
 0x1b7   : > { %v1157_v42 = vadd.f32 %v1156_v38, %v3092_v40  ;;  %v1292_v43 = vadd.f32 %v1291_v41, %v1229_v0  ;;  %v1249_v41 = vmul.f32 %v3149_v39, %v3149_v39 }
 0x1b9   : > { %v1158_v46 = vadd.f32 %v1157_v42, %v3095_v47  ;;  %v1293_v49 = vadd.f32 %v1292_v43, %v1230_v8 }
 0x1bb   : > { %v1159_v51 = vadd.f32 %v1158_v46, %v3098_v56  ;;  %v1294_v52 = vadd.f32 %v1293_v49, %v1231_v14 }
 0x1bd   : > { %v1160_v53 = vadd.f32 %v1159_v51, %v3101_v63  ;;  %v1295_v57 = vadd.f32 %v1294_v52, %v1232_v24  ;;  %v1113_v52 = vld [vmem:[#allocation3] sm:$0x1] }
 0x1bf   : > { %v1161_v40 = vadd.f32 %v1160_v53, %v3104_v10  ;;  %v1296_v60 = vadd.f32 %v1295_v57, %v1233_v31 }
 0x1c1   : > { %v1297_v47 = vadd.f32 %v1296_v60, %v1234_v59  ;;  %v1162_v61 = vadd.f32 %v1161_v40, %v3107_v17 }
 0x1c3   : > { %v1298_v56 = vadd.f32 %v1297_v47, %v1235_v62  ;;  %v1163_v1 = vadd.f32 %v1162_v61, %v3110_v28 }
 0x1c5   : > { %v1299_v63 = vadd.f32 %v1298_v56, %v1236_v2  ;;  %v1164_v5 = vadd.f32 %v1163_v1, %v3113_v37 }
 0x1c7   : > { %v1300_v10 = vadd.f32 %v1299_v63, %v1237_v6  ;;  %v1165_v18 = vadd.f32 %v1164_v5, %v3116_v48 }
 0x1c9   : > { %v1301_v9 = vadd.f32 %v1300_v10, %v1238_v7  ;;  %v1166_v17 = vadd.f32 %v1165_v18, %v3119_v55 }
 0x1cb   : > { %v1302_v12 = vadd.f32 %v1301_v9, %v1239_v22  ;;  %v1167_v28 = vadd.f32 %v1166_v17, %v3122_v3 }
 0x1cd   : > { %v1303_v30 = vadd.f32 %v1302_v12, %v1240_v15  ;;  %v1168_v37 = vadd.f32 %v1167_v28, %v3125_v11 }
 0x1cf   : > { %v1304_v19 = vadd.f32 %v1303_v30, %v1241_v16  ;;  %v1169_v48 = vadd.f32 %v1168_v37, %v3128_v23 }
 0x1d1   : > { %v1305_v20 = vadd.f32 %v1304_v19, %v1242_v36  ;;  %v1170_v55 = vadd.f32 %v1169_v48, %v3131_v33 }
 0x1d3   : > { %v1306_v44 = vadd.f32 %v1305_v20, %v1243_v21  ;;  %v1171_v3 = vadd.f32 %v1170_v55, %v3134_v45  ;;  %v1248_v45 = vmul.f32 %v3146_v27, %v3146_v27 }
 0x1d5   : > { %v1307_v26 = vadd.f32 %v1306_v44, %v1244_v25  ;;  %v1172_v11 = vadd.f32 %v1171_v3, %v3137_v54 }
 0x1d7   : > { %v1308_v29 = vadd.f32 %v1307_v26, %v1245_v50  ;;  %v1173_v23 = vadd.f32 %v1172_v11, %v3140_v4 }
 0x1d9   : > { %v1309_v58 = vadd.f32 %v1308_v29, %v1246_v32  ;;  %v1174_v33 = vadd.f32 %v1173_v23, %v3143_v13 }
 0x1db   : > { %v1310_v35 = vadd.f32 %v1309_v58, %v1247_v34  ;;  %v1175_v0 = vadd.f32 %v1174_v33, %v3146_v27  ;;  %v1185_v27 = vld [vmem:[#allocation4] sm:$0x1] }
 0x1dd   : > { %v1311_v38 = vadd.f32 %v1310_v35, %v1248_v45  ;;  %v1176_v54 = vadd.f32 %v1175_v0, %v3149_v39 }
 0x1df   : > { %v1177_v8 = vrot.slane %v1176_v54, 4  ;;  %v1312_v4 = vadd.f32 %v1311_v38, %v1249_v41 }
 0x1e1   : > { %v1178_v42 = vadd.f32 %v1177_v8, %v1176_v54  ;;  %v1313_v43 = vrot.slane %v1312_v4, 4 }
 0x1e3   : > { %v1179_v14 = vrot.slane %v1178_v42, 2  ;;  %v1314_v46 = vadd.f32 %v1313_v43, %v1312_v4 }
 0x1e5   : > { %v1180_v49 = vadd.f32 %v1179_v14, %v1178_v42  ;;  %v1315_v13 = vrot.slane %v1314_v46, 2 }
 0x1e7   : > { %v1181_v24 = vrot.slane %v1180_v49, 1  ;;  %v1316_v51 = vadd.f32 %v1315_v13, %v1314_v46 }
 0x1e9   : > { %v1182_v31 = vadd.f32 %v1181_v24, %v1180_v49  ;;  %v1317_v53 = vrot.slane %v1316_v51, 1 }
 0x1eb   : > { %v1183_v57 = vadd.f32 %v1182_v31, %v1113_v52  ;;  %v1318_v40 = vadd.f32 %v1317_v53, %v1316_v51 }
 0x1ed   : > { %1184 = vst [vmem:[#allocation3] sm:$0x1] %v1183_v57  ;;  %v1319_v59 = vadd.f32 %v1318_v40, %v1185_v27 }
 0x1ef   : > { %1320 = vst [vmem:[#allocation4] sm:$0x1] %v1319_v59 }
 0x1f0 PF: > { %p2216_p5 = scmp.ne.s32.totalorder %s2726_s15, 1 }
 0x1f1   : > { %v1406_v63 = vlaneseq (!%p2216_p5)  ;;  %v1332_v6 = vld [vmem:[%s3494_s2] sm:$0x1] (!%p2216_p5)  ;;  %v1342_v22 = vld [vmem:[#allocation2 + $0x8] sm:$0xff] (!%p2216_p5)  ;;  %v1343_v12 = vld [vmem:[#allocation2 + $0x10] sm:$0xff] (!%p2216_p5) }
 0x1f2   : > { %1324 = sbr.rel (%p2216_p5) target bundleno = 621 (0x26d), region = 48  ;;  %v1336_v9 = vld [vmem:[%s3495_s3] sm:$0x1] (!%p2216_p5)  ;;  %v1344_v28 = vld [vmem:[#allocation2 + $0x18] sm:$0xff] (!%p2216_p5)  ;;  %v1346_v16 = vld [vmem:[#allocation2 + $0x28] sm:$0xff] (!%p2216_p5) }
 0x1f3   : > { %v1407_v5 = vshrl.u32 (!%p2216_p5), %v1406_v63, 7  ;;  %v1341_v17 = vld [vmem:[#allocation2] sm:$0xff] (!%p2216_p5)  ;;  %v1347_v19 = vld [vmem:[#allocation2 + $0x30] sm:$0xff] (!%p2216_p5)  ;;  %v1348_v48 = vld [vmem:[#allocation2 + $0x38] sm:$0xff] (!%p2216_p5) }
 0x1f4   : > { %v1325_v39 = vld [vmem:[#allocation3] sm:$0x1] (!%p2216_p5)  ;;  %v1350_v20 = vld [vmem:[#allocation2 + $0x48] sm:$0xff] (!%p2216_p5)  ;;  %v1351_v55 = vld [vmem:[#allocation2 + $0x50] sm:$0xff] (!%p2216_p5) }
 0x1f5   : > { %v1326_v47 = vmul.f32 (!%p2216_p5), 0.001953125, %v1325_v39  ;;  %v1408_v10 = vsub.s32 (!%p2216_p5), 0, %v1407_v5  ;;  %v1345_v15 = vld [vmem:[#allocation2 + $0x20] sm:$0xff] (!%p2216_p5)  ;;  %v1352_v26 = vld [vmem:[#allocation2 + $0x58] sm:$0xff] (!%p2216_p5)  ;;  %v1354_v50 = vld [vmem:[#allocation2 + $0x68] sm:$0xff] (!%p2216_p5) }
 0x1f6   : > { %v1327_v60 = vld [vmem:[#allocation4] sm:$0x1] (!%p2216_p5) }
 0x1f7   : > { %v1328_v61 = vmul.f32 (!%p2216_p5), 0.001953125, %v1327_v60  ;;  %v1329_v62 = vmul.f32 (!%p2216_p5), %v1326_v47, %v1326_v47  ;;  %v1349_v36 = vld [vmem:[#allocation2 + $0x40] sm:$0xff] (!%p2216_p5) }
 0x1f8   : > { %v1353_v11 = vld [vmem:[#allocation2 + $0x60] sm:$0xff] (!%p2216_p5) }
 0x1f9   : > { %v1330_v56 = vsub.f32 %v1328_v61, %v1329_v62 }
 0x1fb   : > { %v1331_v1 = vmax.f32 %v1330_v56, 0.0 }
 0x1fd   : > { %v1333_v2 = vadd.f32 1e-05, %v1331_v1 }
 0x1ff   : > { %2710 = vrsqrt.f32 %v1333_v2 }
 0x209   : > { %v2711_v18 = vpop.eup %2710 }
 0x20a   : > { %v1335_v7 = vmul.f32 %v2711_v18, %v1332_v6 }
 0x20c   : > { %v1337_v30 = vmul.f32 %v1335_v7, %v1326_v47  ;;  %v3255_v37 = vrot.slane %v1335_v7, %v1408_v10 }
 0x20e   : > { %v1338_v21 = vsub.f32 %v1336_v9, %v1337_v30  ;;  %v1411_v44 = vmul.f32 %v3255_v37, %v1341_v17  ;;  %v1412_v3 = vmul.f32 %v3255_v37, %v1342_v22  ;;  %v1413_v25 = vmul.f32 %v3255_v37, %v1343_v12  ;;  %v1355_v12 = vld [vmem:[#allocation2 + $0x70] sm:$0xff] }
 0x20f   : > { %v1414_v29 = vmul.f32 %v3255_v37, %v1344_v28  ;;  %v1415_v23 = vmul.f32 %v3255_v37, %v1345_v15  ;;  %v1416_v32 = vmul.f32 %v3255_v37, %v1346_v16  ;;  %v1417_v58 = vmul.f32 %v3255_v37, %v1347_v19 }
 0x210   : > { %v3264_v33 = vrot.slane %v1338_v21, %v1408_v10  ;;  %v1418_v34 = vmul.f32 %v3255_v37, %v1348_v48  ;;  %v1419_v45 = vmul.f32 %v3255_v37, %v1349_v36  ;;  %v1420_v35 = vmul.f32 %v3255_v37, %v1350_v20  ;;  %v1356_v36 = vld [vmem:[#allocation2 + $0x78] sm:$0xff]  ;;  %v1357_v20 = vld [vmem:[#allocation2 + $0x80] sm:$0xff] }
 0x211   : > { %v1421_v0 = vmul.f32 %v3255_v37, %v1351_v55  ;;  %v1422_v38 = vmul.f32 %v3255_v37, %v1352_v26  ;;  %v1423_v54 = vmul.f32 %v3255_v37, %v1353_v11  ;;  %v1424_v41 = vmul.f32 %v3255_v37, %v1354_v50  ;;  %v1359_v26 = vld [vmem:[#allocation2 + $0x90] sm:$0xff]  ;;  %v1360_v11 = vld [vmem:[#allocation2 + $0x98] sm:$0xff] }
 0x212   : > { %v1481_v8 = vadd.f32 %v3264_v33, %v1411_v44  ;;  %v1482_v4 = vadd.f32 %v3264_v33, %v1412_v3  ;;  %v1483_v42 = vadd.f32 %v3264_v33, %v1413_v25  ;;  %v1484_v43 = vadd.f32 %v3264_v33, %v1414_v29  ;;  %v1358_v25 = vld [vmem:[#allocation2 + $0x88] sm:$0xff] }
 0x213   : > { %v1485_v14 = vadd.f32 %v3264_v33, %v1415_v23  ;;  %v1486_v46 = vadd.f32 %v3264_v33, %v1416_v32  ;;  %v1487_v49 = vadd.f32 %v3264_v33, %v1417_v58  ;;  %v1488_v13 = vadd.f32 %v3264_v33, %v1418_v34 }
 0x214   : > { %vm1545_vm0 = vcmp.ge.f32.partialorder %v1481_v8, 0.0  ;;  %vm1546_vm1 = vcmp.ge.f32.partialorder %v1482_v4, 0.0  ;;  %v1609_v24 = vmul.f32 0.2, %v1481_v8  ;;  %v1610_v51 = vmul.f32 0.2, %v1482_v4 }
 0x215   : > { %vm1547_vm2 = vcmp.ge.f32.partialorder %v1483_v42, 0.0  ;;  %vm1548_vm3 = vcmp.ge.f32.partialorder %v1484_v43, 0.0  ;;  %v1611_v52 = vmul.f32 0.2, %v1483_v42  ;;  %v1612_v31 = vmul.f32 0.2, %v1484_v43 }
 0x216   : > { %v1673_v53 = vsel %vm1545_vm0, %v1481_v8, %v1609_v24  ;;  %v1674_v27 = vsel %vm1546_vm1, %v1482_v4, %v1610_v51  ;;  %vm1549_vm4 = vcmp.ge.f32.partialorder %v1485_v14, 0.0  ;;  %vm1550_vm5 = vcmp.ge.f32.partialorder %v1486_v46, 0.0  ;;  %v1361_v24 = vld [vmem:[#allocation2 + $0xa0] sm:$0xff]  ;;  %v1362_v51 = vld [vmem:[#allocation2 + $0xa8] sm:$0xff] }
 0x217   : > { %v2352_v57 = vpack.c.bf16 %v1674_v27, %v1673_v53  ;;  %v1675_v40 = vsel %vm1547_vm2, %v1483_v42, %v1611_v52  ;;  %v1676_v59 = vsel %vm1548_vm3, %v1484_v43, %v1612_v31  ;;  %v1613_v39 = vmul.f32 0.2, %v1485_v14  ;;  %v1363_v52 = vld [vmem:[#allocation2 + $0xb0] sm:$0xff] }
 0x218   : > { %v2357_v60 = vpack.c.bf16 %v1676_v59, %v1675_v40  ;;  %v1614_v47 = vmul.f32 0.2, %v1486_v46  ;;  %vm1551_vm6 = vcmp.ge.f32.partialorder %v1487_v49, 0.0  ;;  %vm1552_vm7 = vcmp.ge.f32.partialorder %v1488_v13, 0.0  ;;  %v1364_v40 = vld [vmem:[#allocation2 + $0xb8] sm:$0xff]  ;;  %v1365_v59 = vld [vmem:[#allocation2 + $0xc0] sm:$0xff] }
 0x219   : > { %2353 = vst [vmem:[%s3496_s4] sm:$0xff] %v2352_v57   ;;  %v1677_v61 = vsel %vm1549_vm4, %v1485_v14, %v1613_v39  ;;  %v1615_v62 = vmul.f32 0.2, %v1487_v49  ;;  %v1616_v56 = vmul.f32 0.2, %v1488_v13  ;;  %v1489_v1 = vadd.f32 %v3264_v33, %v1419_v45 }
 0x21a   : > { %2509 = vst [vmem:[%s3496_s4 + $0x8] sm:$0xff] %v2357_v60   ;;  %v1678_v2 = vsel %vm1550_vm5, %v1486_v46, %v1614_v47  ;;  %v1490_v63 = vadd.f32 %v3264_v33, %v1420_v35  ;;  %v1491_v5 = vadd.f32 %v3264_v33, %v1421_v0  ;;  %v1492_v6 = vadd.f32 %v3264_v33, %v1422_v38 }
 0x21b   : > { %v2362_v10 = vpack.c.bf16 %v1678_v2, %v1677_v61  ;;  %v1679_v18 = vsel %vm1551_vm6, %v1487_v49, %v1615_v62  ;;  %v1680_v7 = vsel %vm1552_vm7, %v1488_v13, %v1616_v56  ;;  %vm1553_vm8 = vcmp.ge.f32.partialorder %v1489_v1, 0.0  ;;  %v1366_v62 = vld [vmem:[#allocation2 + $0xc8] sm:$0xff] }
 0x21c   : > { %v2367_v9 = vpack.c.bf16 %v1680_v7, %v1679_v18  ;;  %vm1554_vm9 = vcmp.ge.f32.partialorder %v1490_v63, 0.0  ;;  %v1617_v17 = vmul.f32 0.2, %v1489_v1  ;;  %v1618_v22 = vmul.f32 0.2, %v1490_v63 }
 0x21d   : > { %2510 = vst [vmem:[%s3496_s4 + $0x10] sm:$0xff] %v2362_v10   ;;  %vm1555_vm10 = vcmp.ge.f32.partialorder %v1491_v5, 0.0  ;;  %vm1556_vm11 = vcmp.ge.f32.partialorder %v1492_v6, 0.0  ;;  %v1619_v28 = vmul.f32 0.2, %v1491_v5  ;;  %v1493_v19 = vadd.f32 %v3264_v33, %v1423_v54 }
 0x21e   : > { %v1620_v15 = vmul.f32 0.2, %v1492_v6  ;;  %2511 = vst [vmem:[%s3496_s4 + $0x18] sm:$0xff] %v2367_v9   ;;  %v1681_v30 = vsel %vm1553_vm8, %v1489_v1, %v1617_v17  ;;  %v1682_v16 = vsel %vm1554_vm9, %v1490_v63, %v1618_v22  ;;  %v1494_v48 = vadd.f32 %v3264_v33, %v1424_v41 }
 0x21f   : > { %v2372_v55 = vpack.c.bf16 %v1682_v16, %v1681_v30  ;;  %v1683_v21 = vsel %vm1555_vm10, %v1491_v5, %v1619_v28  ;;  %v1425_v3 = vmul.f32 %v3255_v37, %v1355_v12  ;;  %vm1557_vm12 = vcmp.ge.f32.partialorder %v1493_v19, 0.0  ;;  %v1367_v5 = vld [vmem:[#allocation2 + $0xd0] sm:$0xff]  ;;  %v1368_v16 = vld [vmem:[#allocation2 + $0xd8] sm:$0xff] }
 0x220   : > { %v1684_v44 = vsel %vm1556_vm11, %v1492_v6, %v1620_v15  ;;  %vm1558_vm13 = vcmp.ge.f32.partialorder %v1494_v48, 0.0  ;;  %v1621_v29 = vmul.f32 0.2, %v1493_v19  ;;  %v1622_v23 = vmul.f32 0.2, %v1494_v48 }
 0x221   : > { %v2377_v50 = vpack.c.bf16 %v1684_v44, %v1683_v21  ;;  %2512 = vst [vmem:[%s3496_s4 + $0x20] sm:$0xff] %v2372_v55   ;;  %v1426_v32 = vmul.f32 %v3255_v37, %v1356_v36  ;;  %v1495_v58 = vadd.f32 %v3264_v33, %v1425_v3  ;;  %v1427_v34 = vmul.f32 %v3255_v37, %v1357_v20 }
 0x222   : > { %v1685_v45 = vsel %vm1557_vm12, %v1493_v19, %v1621_v29  ;;  %v1428_v35 = vmul.f32 %v3255_v37, %v1358_v25  ;;  %v1429_v0 = vmul.f32 %v3255_v37, %v1359_v26  ;;  %v1430_v38 = vmul.f32 %v3255_v37, %v1360_v11  ;;  %v1369_v25 = vld [vmem:[#allocation2 + $0xe0] sm:$0xff]  ;;  %v1370_v26 = vld [vmem:[#allocation2 + $0xe8] sm:$0xff] }
 0x223   : > { %2513 = vst [vmem:[%s3496_s4 + $0x28] sm:$0xff] %v2377_v50   ;;  %v1686_v54 = vsel %vm1558_vm13, %v1494_v48, %v1622_v23  ;;  %v1496_v41 = vadd.f32 %v3264_v33, %v1426_v32  ;;  %vm1559_vm14 = vcmp.ge.f32.partialorder %v1495_v58, 0.0  ;;  %v1623_v8 = vmul.f32 0.2, %v1495_v58  ;;  %v1371_v32 = vld [vmem:[#allocation2 + $0xf0] sm:$0xff] }
 0x224   : > { %v2382_v4 = vpack.c.bf16 %v1686_v54, %v1685_v45  ;;  %v1497_v42 = vadd.f32 %v3264_v33, %v1427_v34  ;;  %v1498_v43 = vadd.f32 %v3264_v33, %v1428_v35  ;;  %v1499_v14 = vadd.f32 %v3264_v33, %v1429_v0 }
 0x225   : > { %vm1560_vm15 = vcmp.ge.f32.partialorder %v1496_v41, 0.0  ;;  %v1624_v46 = vmul.f32 0.2, %v1496_v41  ;;  %v1687_v49 = vsel %vm1559_vm14, %v1495_v58, %v1623_v8  ;;  %v1500_v13 = vadd.f32 %v3264_v33, %v1430_v38  ;;  %v1372_v58 = vld [vmem:[#allocation2 + $0xf8] sm:$0xff] }
 0x226   : > { %2514 = vst [vmem:[%s3496_s4 + $0x30] sm:$0xff] %v2382_v4   ;;  %vm1561_vm0 = vcmp.ge.f32.partialorder %v1497_v42, 0.0  ;;  %vm1562_vm1 = vcmp.ge.f32.partialorder %v1498_v43, 0.0  ;;  %v1625_v31 = vmul.f32 0.2, %v1497_v42  ;;  %vm1563_vm2 = vcmp.ge.f32.partialorder %v1499_v14, 0.0 }
 0x227   : > { %v1626_v53 = vmul.f32 0.2, %v1498_v43  ;;  %v1688_v27 = vsel %vm1560_vm15, %v1496_v41, %v1624_v46  ;;  %vm1564_vm3 = vcmp.ge.f32.partialorder %v1500_v13, 0.0  ;;  %v1627_v57 = vmul.f32 0.2, %v1499_v14 }
 0x228   : > { %v2387_v39 = vpack.c.bf16 %v1688_v27, %v1687_v49  ;;  %v1689_v60 = vsel %vm1561_vm0, %v1497_v42, %v1625_v31  ;;  %v1628_v61 = vmul.f32 0.2, %v1500_v13  ;;  %v1431_v2 = vmul.f32 %v3255_v37, %v1361_v24  ;;  %v1373_v27 = vld [vmem:[#allocation2 + $0x100] sm:$0xff] }
 0x229   : > { %v1690_v47 = vsel %vm1562_vm1, %v1498_v43, %v1626_v53  ;;  %v1691_v1 = vsel %vm1563_vm2, %v1499_v14, %v1627_v57  ;;  %v1432_v63 = vmul.f32 %v3255_v37, %v1362_v51  ;;  %v1433_v10 = vmul.f32 %v3255_v37, %v1363_v52  ;;  %v1374_v57 = vld [vmem:[#allocation2 + $0x108] sm:$0xff] }
 0x22a   : > { %v2392_v56 = vpack.c.bf16 %v1690_v47, %v1689_v60  ;;  %2515 = vst [vmem:[%s3496_s4 + $0x38] sm:$0xff] %v2387_v39   ;;  %v1692_v6 = vsel %vm1564_vm3, %v1500_v13, %v1628_v61  ;;  %v1434_v18 = vmul.f32 %v3255_v37, %v1364_v40  ;;  %v1435_v7 = vmul.f32 %v3255_v37, %v1365_v59  ;;  %v1375_v39 = vld [vmem:[#allocation2 + $0x110] sm:$0xff]  ;;  %v1376_v60 = vld [vmem:[#allocation2 + $0x118] sm:$0xff] }
 0x22b   : > { %v2397_v9 = vpack.c.bf16 %v1692_v6, %v1691_v1  ;;  %v1501_v17 = vadd.f32 %v3264_v33, %v1431_v2  ;;  %v1502_v22 = vadd.f32 %v3264_v33, %v1432_v63  ;;  %v1436_v12 = vmul.f32 %v3255_v37, %v1366_v62  ;;  %v1378_v6 = vld [vmem:[#allocation2 + $0x128] sm:$0xff] }
 0x22c   : > { %2516 = vst [vmem:[%s3496_s4 + $0x40] sm:$0xff] %v2392_v56   ;;  %v1503_v28 = vadd.f32 %v3264_v33, %v1433_v10  ;;  %v1504_v15 = vadd.f32 %v3264_v33, %v1434_v18  ;;  %v1505_v30 = vadd.f32 %v3264_v33, %v1435_v7  ;;  %v1437_v19 = vmul.f32 %v3255_v37, %v1367_v5  ;;  %v1377_v56 = vld [vmem:[#allocation2 + $0x120] sm:$0xff] }
 0x22d   : > { %2517 = vst [vmem:[%s3496_s4 + $0x48] sm:$0xff] %v2397_v9   ;;  %vm1565_vm4 = vcmp.ge.f32.partialorder %v1501_v17, 0.0  ;;  %vm1566_vm5 = vcmp.ge.f32.partialorder %v1502_v22, 0.0  ;;  %v1629_v48 = vmul.f32 0.2, %v1501_v17  ;;  %v1506_v3 = vadd.f32 %v3264_v33, %v1436_v12 }
 0x22e   : > { %v1630_v36 = vmul.f32 0.2, %v1502_v22  ;;  %vm1567_vm6 = vcmp.ge.f32.partialorder %v1503_v28, 0.0  ;;  %vm1568_vm7 = vcmp.ge.f32.partialorder %v1504_v15, 0.0  ;;  %v1631_v20 = vmul.f32 0.2, %v1503_v28 }
 0x22f   : > { %v1632_v55 = vmul.f32 0.2, %v1504_v15  ;;  %v1693_v21 = vsel %vm1565_vm4, %v1501_v17, %v1629_v48  ;;  %vm1569_vm8 = vcmp.ge.f32.partialorder %v1505_v30, 0.0  ;;  %v1633_v23 = vmul.f32 0.2, %v1505_v30  ;;  %v1379_v48 = vld [vmem:[#allocation2 + $0x130] sm:$0xff] }
 0x230   : > { %v1694_v44 = vsel %vm1566_vm5, %v1502_v22, %v1630_v36  ;;  %v1695_v50 = vsel %vm1567_vm6, %v1503_v28, %v1631_v20  ;;  %vm1570_vm9 = vcmp.ge.f32.partialorder %v1506_v3, 0.0  ;;  %v1634_v45 = vmul.f32 0.2, %v1506_v3 }
 0x231   : > { %v2402_v11 = vpack.c.bf16 %v1694_v44, %v1693_v21  ;;  %v1696_v29 = vsel %vm1568_vm7, %v1504_v15, %v1632_v55  ;;  %v1438_v35 = vmul.f32 %v3255_v37, %v1368_v16  ;;  %v1697_v0 = vsel %vm1569_vm8, %v1505_v30, %v1633_v23 }
 0x232   : > { %v2407_v34 = vpack.c.bf16 %v1696_v29, %v1695_v50  ;;  %v1507_v38 = vadd.f32 %v3264_v33, %v1437_v19  ;;  %v1439_v54 = vmul.f32 %v3255_v37, %v1369_v25  ;;  %v1440_v41 = vmul.f32 %v3255_v37, %v1370_v26  ;;  %v1381_v50 = vld [vmem:[#allocation2 + $0x140] sm:$0xff] }
 0x233   : > { %2518 = vst [vmem:[%s3496_s4 + $0x50] sm:$0xff] %v2402_v11   ;;  %v1698_v8 = vsel %vm1570_vm9, %v1506_v3, %v1634_v45  ;;  %v1508_v4 = vadd.f32 %v3264_v33, %v1438_v35  ;;  %v1441_v42 = vmul.f32 %v3255_v37, %v1371_v32  ;;  %v1442_v43 = vmul.f32 %v3255_v37, %v1372_v58  ;;  %v1380_v11 = vld [vmem:[#allocation2 + $0x138] sm:$0xff]  ;;  %v1383_v45 = vld [vmem:[#allocation2 + $0x150] sm:$0xff] }
 0x234   : > { %2519 = vst [vmem:[%s3496_s4 + $0x58] sm:$0xff] %v2407_v34   ;;  %v2412_v14 = vpack.c.bf16 %v1698_v8, %v1697_v0  ;;  %vm1571_vm10 = vcmp.ge.f32.partialorder %v1507_v38, 0.0  ;;  %v1635_v46 = vmul.f32 0.2, %v1507_v38  ;;  %v1509_v49 = vadd.f32 %v3264_v33, %v1439_v54  ;;  %v1382_v34 = vld [vmem:[#allocation2 + $0x148] sm:$0xff]  ;;  %v1384_v35 = vld [vmem:[#allocation2 + $0x158] sm:$0xff] }
 0x235   : > { %vm1572_vm11 = vcmp.ge.f32.partialorder %v1508_v4, 0.0  ;;  %v1636_v13 = vmul.f32 0.2, %v1508_v4  ;;  %v1510_v24 = vadd.f32 %v3264_v33, %v1440_v41  ;;  %v1511_v51 = vadd.f32 %v3264_v33, %v1441_v42 }
 0x236   : > { %2520 = vst [vmem:[%s3496_s4 + $0x60] sm:$0xff] %v2412_v14   ;;  %v1699_v52 = vsel %vm1571_vm10, %v1507_v38, %v1635_v46  ;;  %vm1573_vm12 = vcmp.ge.f32.partialorder %v1509_v49, 0.0  ;;  %v1637_v31 = vmul.f32 0.2, %v1509_v49  ;;  %v1512_v53 = vadd.f32 %v3264_v33, %v1442_v43 }
 0x237   : > { %v1700_v40 = vsel %vm1572_vm11, %v1508_v4, %v1636_v13  ;;  %vm1574_vm13 = vcmp.ge.f32.partialorder %v1510_v24, 0.0  ;;  %v1638_v59 = vmul.f32 0.2, %v1510_v24  ;;  %vm1575_vm14 = vcmp.ge.f32.partialorder %v1511_v51, 0.0 }
 0x238   : > { %v2417_v47 = vpack.c.bf16 %v1700_v40, %v1699_v52  ;;  %v1701_v61 = vsel %vm1573_vm12, %v1509_v49, %v1637_v31  ;;  %vm1576_vm15 = vcmp.ge.f32.partialorder %v1512_v53, 0.0  ;;  %v1639_v62 = vmul.f32 0.2, %v1511_v51 }
 0x239   : > { %v1702_v1 = vsel %vm1574_vm13, %v1510_v24, %v1638_v59  ;;  %v1640_v2 = vmul.f32 0.2, %v1512_v53  ;;  %v1443_v63 = vmul.f32 %v3255_v37, %v1373_v27  ;;  %v1444_v5 = vmul.f32 %v3255_v37, %v1374_v57  ;;  %v1385_v59 = vld [vmem:[#allocation2 + $0x160] sm:$0xff] }
 0x23a   : > { %2521 = vst [vmem:[%s3496_s4 + $0x68] sm:$0xff] %v2417_v47   ;;  %v2422_v10 = vpack.c.bf16 %v1702_v1, %v1701_v61  ;;  %v1703_v18 = vsel %vm1575_vm14, %v1511_v51, %v1639_v62  ;;  %v1445_v7 = vmul.f32 %v3255_v37, %v1375_v39  ;;  %v1446_v9 = vmul.f32 %v3255_v37, %v1376_v60  ;;  %v1386_v39 = vld [vmem:[#allocation2 + $0x168] sm:$0xff]  ;;  %v1387_v60 = vld [vmem:[#allocation2 + $0x170] sm:$0xff]  ;;  %v1388_v1 = vld [vmem:[#allocation2 + $0x178] sm:$0xff] }
 0x23b   : > { %v1704_v17 = vsel %vm1576_vm15, %v1512_v53, %v1640_v2  ;;  %v1513_v22 = vadd.f32 %v3264_v33, %v1443_v63  ;;  %v1514_v12 = vadd.f32 %v3264_v33, %v1444_v5  ;;  %v1447_v28 = vmul.f32 %v3255_v37, %v1377_v56  ;;  %v1389_v2 = vld [vmem:[#allocation2 + $0x180] sm:$0xff] }
 0x23c   : > { %2522 = vst [vmem:[%s3496_s4 + $0x70] sm:$0xff] %v2422_v10   ;;  %v2427_v15 = vpack.c.bf16 %v1704_v17, %v1703_v18  ;;  %v1515_v30 = vadd.f32 %v3264_v33, %v1445_v7  ;;  %v1516_v16 = vadd.f32 %v3264_v33, %v1446_v9  ;;  %v1448_v19 = vmul.f32 %v3255_v37, %v1378_v6  ;;  %v1390_v18 = vld [vmem:[#allocation2 + $0x188] sm:$0xff] }
 0x23d   : > { %vm1577_vm0 = vcmp.ge.f32.partialorder %v1513_v22, 0.0  ;;  %vm1578_vm1 = vcmp.ge.f32.partialorder %v1514_v12, 0.0  ;;  %v1641_v36 = vmul.f32 0.2, %v1513_v22  ;;  %v1642_v20 = vmul.f32 0.2, %v1514_v12 }
 0x23e   : > { %2523 = vst [vmem:[%s3496_s4 + $0x78] sm:$0xff] %v2427_v15   ;;  %vm1579_vm2 = vcmp.ge.f32.partialorder %v1515_v30, 0.0  ;;  %vm1580_vm3 = vcmp.ge.f32.partialorder %v1516_v16, 0.0  ;;  %v1643_v55 = vmul.f32 0.2, %v1515_v30  ;;  %v1517_v25 = vadd.f32 %v3264_v33, %v1447_v28 }
 0x23f   : > { %v1644_v21 = vmul.f32 0.2, %v1516_v16  ;;  %v1705_v44 = vsel %vm1577_vm0, %v1513_v22, %v1641_v36  ;;  %v1706_v3 = vsel %vm1578_vm1, %v1514_v12, %v1642_v20  ;;  %v1518_v26 = vadd.f32 %v3264_v33, %v1448_v19  ;;  %v1391_v12 = vld [vmem:[#allocation2 + $0x190] sm:$0xff] }
 0x240   : > { %v2432_v29 = vpack.c.bf16 %v1706_v3, %v1705_v44  ;;  %v1707_v23 = vsel %vm1579_vm2, %v1515_v30, %v1643_v55  ;;  %v1449_v58 = vmul.f32 %v3255_v37, %v1379_v48  ;;  %vm1581_vm4 = vcmp.ge.f32.partialorder %v1517_v25, 0.0  ;;  %v1392_v3 = vld [vmem:[#allocation2 + $0x198] sm:$0xff] }
 0x241   : > { %v1708_v32 = vsel %vm1580_vm3, %v1516_v16, %v1644_v21  ;;  %vm1582_vm5 = vcmp.ge.f32.partialorder %v1518_v26, 0.0  ;;  %v1645_v38 = vmul.f32 0.2, %v1517_v25  ;;  %v1646_v54 = vmul.f32 0.2, %v1518_v26 }
 0x242   : > { %v2437_v0 = vpack.c.bf16 %v1708_v32, %v1707_v23  ;;  %2524 = vst [vmem:[%s3496_s4 + $0x80] sm:$0xff] %v2432_v29   ;;  %v1450_v41 = vmul.f32 %v3255_v37, %v1380_v11  ;;  %v1519_v8 = vadd.f32 %v3264_v33, %v1449_v58  ;;  %v1451_v4 = vmul.f32 %v3255_v37, %v1381_v50 }
 0x243   : > { %v1709_v42 = vsel %vm1581_vm4, %v1517_v25, %v1645_v38  ;;  %v1452_v43 = vmul.f32 %v3255_v37, %v1382_v34  ;;  %v1453_v14 = vmul.f32 %v3255_v37, %v1383_v45  ;;  %v1454_v46 = vmul.f32 %v3255_v37, %v1384_v35  ;;  %v1393_v34 = vld [vmem:[#allocation2 + $0x1a0] sm:$0xff]  ;;  %v1394_v45 = vld [vmem:[#allocation2 + $0x1a8] sm:$0xff] }
 0x244   : > { %2525 = vst [vmem:[%s3496_s4 + $0x88] sm:$0xff] %v2437_v0   ;;  %v1710_v49 = vsel %vm1582_vm5, %v1518_v26, %v1646_v54  ;;  %v1520_v13 = vadd.f32 %v3264_v33, %v1450_v41  ;;  %vm1583_vm6 = vcmp.ge.f32.partialorder %v1519_v8, 0.0  ;;  %v1647_v24 = vmul.f32 0.2, %v1519_v8  ;;  %v1395_v41 = vld [vmem:[#allocation2 + $0x1b0] sm:$0xff] }
 0x245   : > { %v2442_v51 = vpack.c.bf16 %v1710_v49, %v1709_v42  ;;  %v1521_v52 = vadd.f32 %v3264_v33, %v1451_v4  ;;  %v1522_v31 = vadd.f32 %v3264_v33, %v1452_v43  ;;  %v1523_v53 = vadd.f32 %v3264_v33, %v1453_v14 }
 0x246   : > { %vm1584_vm7 = vcmp.ge.f32.partialorder %v1520_v13, 0.0  ;;  %v1648_v27 = vmul.f32 0.2, %v1520_v13  ;;  %v1711_v57 = vsel %vm1583_vm6, %v1519_v8, %v1647_v24  ;;  %v1524_v40 = vadd.f32 %v3264_v33, %v1454_v46  ;;  %v1396_v8 = vld [vmem:[#allocation2 + $0x1b8] sm:$0xff] }
 0x247   : > { %2526 = vst [vmem:[%s3496_s4 + $0x90] sm:$0xff] %v2442_v51   ;;  %vm1585_vm8 = vcmp.ge.f32.partialorder %v1521_v52, 0.0  ;;  %vm1586_vm9 = vcmp.ge.f32.partialorder %v1522_v31, 0.0  ;;  %v1649_v47 = vmul.f32 0.2, %v1521_v52  ;;  %vm1587_vm10 = vcmp.ge.f32.partialorder %v1523_v53, 0.0 }
 0x248   : > { %v1650_v61 = vmul.f32 0.2, %v1522_v31  ;;  %v1712_v62 = vsel %vm1584_vm7, %v1520_v13, %v1648_v27  ;;  %vm1588_vm11 = vcmp.ge.f32.partialorder %v1524_v40, 0.0  ;;  %v1651_v56 = vmul.f32 0.2, %v1523_v53 }
 0x249   : > { %v2447_v63 = vpack.c.bf16 %v1712_v62, %v1711_v57  ;;  %v1713_v5 = vsel %vm1585_vm8, %v1521_v52, %v1649_v47  ;;  %v1652_v10 = vmul.f32 0.2, %v1524_v40  ;;  %v1455_v17 = vmul.f32 %v3255_v37, %v1385_v59  ;;  %v1397_v62 = vld [vmem:[#allocation2 + $0x1c0] sm:$0xff] }
 0x24a   : > { %v1714_v6 = vsel %vm1586_vm9, %v1522_v31, %v1650_v61  ;;  %v1715_v9 = vsel %vm1587_vm10, %v1523_v53, %v1651_v56  ;;  %v1456_v22 = vmul.f32 %v3255_v37, %v1386_v39  ;;  %v1457_v15 = vmul.f32 %v3255_v37, %v1387_v60  ;;  %v1398_v56 = vld [vmem:[#allocation2 + $0x1c8] sm:$0xff] }
 0x24b   : > { %v2452_v7 = vpack.c.bf16 %v1714_v6, %v1713_v5  ;;  %2527 = vst [vmem:[%s3496_s4 + $0x98] sm:$0xff] %v2447_v63   ;;  %v1716_v28 = vsel %vm1588_vm11, %v1524_v40, %v1652_v10  ;;  %v1458_v30 = vmul.f32 %v3255_v37, %v1388_v1  ;;  %v1459_v16 = vmul.f32 %v3255_v37, %v1389_v2  ;;  %v1399_v63 = vld [vmem:[#allocation2 + $0x1d0] sm:$0xff]  ;;  %v1400_v5 = vld [vmem:[#allocation2 + $0x1d8] sm:$0xff] }
 0x24c   : > { %v2457_v19 = vpack.c.bf16 %v1716_v28, %v1715_v9  ;;  %v1525_v48 = vadd.f32 %v3264_v33, %v1455_v17  ;;  %v1526_v36 = vadd.f32 %v3264_v33, %v1456_v22  ;;  %v1460_v20 = vmul.f32 %v3255_v37, %v1390_v18  ;;  %v1402_v28 = vld [vmem:[#allocation2 + $0x1e8] sm:$0xff] }
 0x24d   : > { %2528 = vst [vmem:[%s3496_s4 + $0xa0] sm:$0xff] %v2452_v7   ;;  %v1527_v55 = vadd.f32 %v3264_v33, %v1457_v15  ;;  %v1528_v21 = vadd.f32 %v3264_v33, %v1458_v30  ;;  %v1529_v44 = vadd.f32 %v3264_v33, %v1459_v16  ;;  %v1461_v25 = vmul.f32 %v3255_v37, %v1391_v12  ;;  %v1401_v7 = vld [vmem:[#allocation2 + $0x1e0] sm:$0xff] }
 0x24e   : > { %2529 = vst [vmem:[%s3496_s4 + $0xa8] sm:$0xff] %v2457_v19   ;;  %vm1589_vm12 = vcmp.ge.f32.partialorder %v1525_v48, 0.0  ;;  %vm1590_vm13 = vcmp.ge.f32.partialorder %v1526_v36, 0.0  ;;  %v1653_v26 = vmul.f32 0.2, %v1525_v48  ;;  %v1530_v58 = vadd.f32 %v3264_v33, %v1460_v20 }
 0x24f   : > { %v1654_v11 = vmul.f32 0.2, %v1526_v36  ;;  %vm1591_vm14 = vcmp.ge.f32.partialorder %v1527_v55, 0.0  ;;  %vm1592_vm15 = vcmp.ge.f32.partialorder %v1528_v21, 0.0  ;;  %v1655_v50 = vmul.f32 0.2, %v1527_v55 }
 0x250   : > { %v1656_v29 = vmul.f32 0.2, %v1528_v21  ;;  %v1717_v23 = vsel %vm1589_vm12, %v1525_v48, %v1653_v26  ;;  %vm1593_vm0 = vcmp.ge.f32.partialorder %v1529_v44, 0.0  ;;  %v1657_v54 = vmul.f32 0.2, %v1529_v44  ;;  %v1403_v26 = vld [vmem:[#allocation2 + $0x1f0] sm:$0xff] }
 0x251   : > { %v1718_v32 = vsel %vm1590_vm13, %v1526_v36, %v1654_v11  ;;  %v1719_v0 = vsel %vm1591_vm14, %v1527_v55, %v1655_v50  ;;  %vm1594_vm1 = vcmp.ge.f32.partialorder %v1530_v58, 0.0  ;;  %v1658_v42 = vmul.f32 0.2, %v1530_v58 }
 0x252   : > { %v2462_v35 = vpack.c.bf16 %v1718_v32, %v1717_v23  ;;  %v1720_v38 = vsel %vm1592_vm15, %v1528_v21, %v1656_v29  ;;  %v1462_v43 = vmul.f32 %v3255_v37, %v1392_v3  ;;  %v1721_v14 = vsel %vm1593_vm0, %v1529_v44, %v1657_v54 }
 0x253   : > { %v2467_v4 = vpack.c.bf16 %v1720_v38, %v1719_v0  ;;  %v1531_v46 = vadd.f32 %v3264_v33, %v1461_v25  ;;  %v1463_v49 = vmul.f32 %v3255_v37, %v1393_v34  ;;  %v1464_v13 = vmul.f32 %v3255_v37, %v1394_v45 }
 0x254   : > { %2530 = vst [vmem:[%s3496_s4 + $0xb0] sm:$0xff] %v2462_v35   ;;  %v1722_v24 = vsel %vm1594_vm1, %v1530_v58, %v1658_v42  ;;  %v1532_v51 = vadd.f32 %v3264_v33, %v1462_v43  ;;  %v1465_v52 = vmul.f32 %v3255_v37, %v1395_v41  ;;  %v1466_v31 = vmul.f32 %v3255_v37, %v1396_v8  ;;  %v1404_v35 = vld [vmem:[#allocation2 + $0x1f8] sm:$0xff] }
 0x255   : > { %2531 = vst [vmem:[%s3496_s4 + $0xb8] sm:$0xff] %v2467_v4   ;;  %v2472_v53 = vpack.c.bf16 %v1722_v24, %v1721_v14  ;;  %vm1595_vm2 = vcmp.ge.f32.partialorder %v1531_v46, 0.0  ;;  %v1659_v27 = vmul.f32 0.2, %v1531_v46  ;;  %v1533_v57 = vadd.f32 %v3264_v33, %v1463_v49 }
 0x256   : > { %vm1596_vm3 = vcmp.ge.f32.partialorder %v1532_v51, 0.0  ;;  %v1660_v40 = vmul.f32 0.2, %v1532_v51  ;;  %v1534_v59 = vadd.f32 %v3264_v33, %v1464_v13  ;;  %v1535_v39 = vadd.f32 %v3264_v33, %v1465_v52 }
 0x257   : > { %2532 = vst [vmem:[%s3496_s4 + $0xc0] sm:$0xff] %v2472_v53   ;;  %v1723_v60 = vsel %vm1595_vm2, %v1531_v46, %v1659_v27  ;;  %vm1597_vm4 = vcmp.ge.f32.partialorder %v1533_v57, 0.0  ;;  %v1661_v47 = vmul.f32 0.2, %v1533_v57  ;;  %v1536_v61 = vadd.f32 %v3264_v33, %v1466_v31 }
 0x258   : > { %v1724_v1 = vsel %vm1596_vm3, %v1532_v51, %v1660_v40  ;;  %vm1598_vm5 = vcmp.ge.f32.partialorder %v1534_v59, 0.0  ;;  %v1662_v2 = vmul.f32 0.2, %v1534_v59  ;;  %vm1599_vm6 = vcmp.ge.f32.partialorder %v1535_v39, 0.0 }
 0x259   : > { %v2477_v6 = vpack.c.bf16 %v1724_v1, %v1723_v60  ;;  %v1725_v10 = vsel %vm1597_vm4, %v1533_v57, %v1661_v47  ;;  %vm1600_vm7 = vcmp.ge.f32.partialorder %v1536_v61, 0.0  ;;  %v1663_v18 = vmul.f32 0.2, %v1535_v39 }
 0x25a   : > { %v1726_v9 = vsel %vm1598_vm5, %v1534_v59, %v1662_v2  ;;  %v1664_v17 = vmul.f32 0.2, %v1536_v61  ;;  %v1467_v22 = vmul.f32 %v3255_v37, %v1397_v62  ;;  %v1468_v12 = vmul.f32 %v3255_v37, %v1398_v56 }
 0x25b   : > { %2533 = vst [vmem:[%s3496_s4 + $0xc8] sm:$0xff] %v2477_v6   ;;  %v2482_v15 = vpack.c.bf16 %v1726_v9, %v1725_v10  ;;  %v1727_v30 = vsel %vm1599_vm6, %v1535_v39, %v1663_v18  ;;  %v1469_v16 = vmul.f32 %v3255_v37, %v1399_v63  ;;  %v1470_v19 = vmul.f32 %v3255_v37, %v1400_v5 }
 0x25c   : > { %v1728_v48 = vsel %vm1600_vm7, %v1536_v61, %v1664_v17  ;;  %v1537_v36 = vadd.f32 %v3264_v33, %v1467_v22  ;;  %v1538_v20 = vadd.f32 %v3264_v33, %v1468_v12  ;;  %v1471_v55 = vmul.f32 %v3255_v37, %v1401_v7 }
 0x25d   : > { %2534 = vst [vmem:[%s3496_s4 + $0xd0] sm:$0xff] %v2482_v15   ;;  %v2487_v21 = vpack.c.bf16 %v1728_v48, %v1727_v30  ;;  %v1539_v44 = vadd.f32 %v3264_v33, %v1469_v16  ;;  %v1540_v3 = vadd.f32 %v3264_v33, %v1470_v19  ;;  %v1472_v25 = vmul.f32 %v3255_v37, %v1402_v28 }
 0x25e   : > { %vm1601_vm8 = vcmp.ge.f32.partialorder %v1537_v36, 0.0  ;;  %vm1602_vm9 = vcmp.ge.f32.partialorder %v1538_v20, 0.0  ;;  %v1665_v11 = vmul.f32 0.2, %v1537_v36  ;;  %v1666_v50 = vmul.f32 0.2, %v1538_v20 }
 0x25f   : > { %2535 = vst [vmem:[%s3496_s4 + $0xd8] sm:$0xff] %v2487_v21   ;;  %vm1603_vm10 = vcmp.ge.f32.partialorder %v1539_v44, 0.0  ;;  %vm1604_vm11 = vcmp.ge.f32.partialorder %v1540_v3, 0.0  ;;  %v1667_v29 = vmul.f32 0.2, %v1539_v44  ;;  %v1541_v34 = vadd.f32 %v3264_v33, %v1471_v55 }
 0x260   : > { %v1668_v23 = vmul.f32 0.2, %v1540_v3  ;;  %v1729_v32 = vsel %vm1601_vm8, %v1537_v36, %v1665_v11  ;;  %v1730_v58 = vsel %vm1602_vm9, %v1538_v20, %v1666_v50  ;;  %v1542_v45 = vadd.f32 %v3264_v33, %v1472_v25 }
 0x261   : > { %v2492_v0 = vpack.c.bf16 %v1730_v58, %v1729_v32  ;;  %v1731_v38 = vsel %vm1603_vm10, %v1539_v44, %v1667_v29  ;;  %v1473_v41 = vmul.f32 %v3255_v37, %v1403_v26  ;;  %vm1605_vm12 = vcmp.ge.f32.partialorder %v1541_v34, 0.0 }
 0x262   : > { %v1732_v54 = vsel %vm1604_vm11, %v1540_v3, %v1668_v23  ;;  %vm1606_vm13 = vcmp.ge.f32.partialorder %v1542_v45, 0.0  ;;  %v1669_v4 = vmul.f32 0.2, %v1541_v34  ;;  %v1670_v42 = vmul.f32 0.2, %v1542_v45 }
 0x263   : > { %v2497_v8 = vpack.c.bf16 %v1732_v54, %v1731_v38  ;;  %2536 = vst [vmem:[%s3496_s4 + $0xe0] sm:$0xff] %v2492_v0   ;;  %v1474_v43 = vmul.f32 %v3255_v37, %v1404_v35  ;;  %v1543_v14 = vadd.f32 %v3264_v33, %v1473_v41 }
 0x264   : > { %v1733_v46 = vsel %vm1605_vm12, %v1541_v34, %v1669_v4  ;;  %v1734_v49 = vsel %vm1606_vm13, %v1542_v45, %v1670_v42 }
 0x265   : > { %2537 = vst [vmem:[%s3496_s4 + $0xe8] sm:$0xff] %v2497_v8   ;;  %v1544_v13 = vadd.f32 %v3264_v33, %v1474_v43  ;;  %vm1607_vm14 = vcmp.ge.f32.partialorder %v1543_v14, 0.0  ;;  %v1671_v24 = vmul.f32 0.2, %v1543_v14  ;;  %v2502_v51 = vpack.c.bf16 %v1734_v49, %v1733_v46 }
 0x267   : > { %vm1608_vm15 = vcmp.ge.f32.partialorder %v1544_v13, 0.0  ;;  %v1672_v52 = vmul.f32 0.2, %v1544_v13  ;;  %v1735_v31 = vsel %vm1607_vm14, %v1543_v14, %v1671_v24  ;;  %2538 = vst [vmem:[%s3496_s4 + $0xf0] sm:$0xff] %v2502_v51  }
 0x269   : > { %v1736_v37 = vsel %vm1608_vm15, %v1544_v13, %v1672_v52 }
 0x26a   : > { %v2507_v53 = vpack.c.bf16 %v1736_v37, %v1735_v31 }
 0x26c   : > { %2539 = vst [vmem:[%s3496_s4 + $0xf8] sm:$0xff] %v2507_v53  }
 0x26d PF: > { %s14_s17 = sadd.s32 1, %s2734_s17   ;;  %s3497_s15 = smov %s2730_s16 }
 0x26e   : > { %p11_p6 = scmp.ge.s32.totalorder %s14_s17, 4   ;;  %s3498_s16 = smov %s3500_s18 }
 0x270   :  { %13 = sbr.rel (!%p11_p6) target bundleno = 2 (0x2), region = 80 }

// kernel: discriminator_forward.7
= control target key start
LH: loop header
LB: loop body
LE: loop exit
PB: predicated region body
PF: predicated region fallthrough
CT: control target
= control target key end

     0   :  { %s1690_s15 = smov 0   ;;  %s1692_s16 = smov 0   ;;  %s1979_s0 = inlined_call_operand.vmem [shape: bf16[128,512], index: 0, kind: input, shape index: {}]   ;;  %s1980_s1 = inlined_call_operand.vmem [shape: bf16[512,128], index: 1, kind: input, shape index: {}]   ;;  %s1981_s2 = inlined_call_operand.vmem [shape: f32[1,128], index: 2, kind: input, shape index: {}]   ;;  %s1982_s3 = inlined_call_operand.vmem [shape: f32[1,128], index: 3, kind: input, shape index: {}]   ;;  %s1983_s4 = inlined_call_operand.vmem [shape: bf16[128,128], index: 4, kind: output, shape index: {}]  }
   0x1   :  { %s1694_s17 = smov 0  }
   0x2 LB: > { %s26_s18 = sadd.s32 1, %s1658_s16  ;;  %p1255_p0 = scmp.ge.s32.totalorder %s1662_s17, 1  ;;  %s1662_s17 = sphi %s1694_s17, %s14_s17   ;;  %s1658_s16 = sphi %s1692_s16, %s1985_s16   ;;  %s1654_s15 = sphi %s1690_s15, %s1984_s15  }
   0x3   : > { %p28_p1 = scmp.ge.s32.totalorder %s26_s18, 2  ;;  %p186_p2 = scmp.lt.s32.totalorder %s1662_s17, 3 }
   0x5   : > { %s1987_s18 = smov (%p28_p1, %s26_s18), 0  ;;  %p187_p3 = pnand %p1255_p0, %p186_p2 }
   0x6   : > { %p1256_p4 = scmp.ne.s32.totalorder (!%p187_p3), %s1654_s15, 0 }
   0x7   : > { %190 = sbr.rel (%p187_p3) target bundleno = 402 (0x192), region = 36 }
   0xe   : > { %239 = sbr.rel (%p1256_p4) target bundleno = 343 (0x157), region = 40  ;;  %v1558_v0 = vld [vmem:[%s1980_s1 + $0x40] sm:$0xff] (!%p1256_p4)   ;;  %v1562_v4 = vld [vmem:[%s1980_s1 + $0x48] sm:$0xff] (!%p1256_p4)   ;;  %v1566_v8 = vld [vmem:[%s1980_s1 + $0x50] sm:$0xff] (!%p1256_p4)  }
   0xf   : > { %v1559_v1 = vld [vmem:[%s1980_s1 + $0xc0] sm:$0xff] (!%p1256_p4)   ;;  %1405 = vmatprep.subr.bf16.mxu0 (!%p1256_p4), %v1558_v0  ;;  %v1563_v5 = vld [vmem:[%s1980_s1 + $0xc8] sm:$0xff] (!%p1256_p4)   ;;  %v1567_v9 = vld [vmem:[%s1980_s1 + $0xd0] sm:$0xff] (!%p1256_p4)   ;;  %v1664_v0 = vmov (!%p1256_p4), 0.0  }
  0x10   : > { %v1560_v2 = vld [vmem:[%s1980_s1] sm:$0xff] (!%p1256_p4)   ;;  %1469 = vmatprep.subr.bf16.mxu1 (!%p1256_p4), %v1559_v1  ;;  %v1564_v6 = vld [vmem:[%s1980_s1 + $0x8] sm:$0xff] (!%p1256_p4)   ;;  %v1568_v10 = vld [vmem:[%s1980_s1 + $0x10] sm:$0xff] (!%p1256_p4)   ;;  %244 = vst [vmem:[#allocation3] sm:$0x1] (!%p1256_p4), %v1664_v0 }
  0x11   : > { %v1561_v3 = vld [vmem:[%s1980_s1 + $0x80] sm:$0xff] (!%p1256_p4)   ;;  %1406 = vmatpush3.bf16.msra.mxu0 (!%p1256_p4), %v1560_v2  ;;  %v1565_v7 = vld [vmem:[%s1980_s1 + $0x88] sm:$0xff] (!%p1256_p4)   ;;  %v1569_v11 = vld [vmem:[%s1980_s1 + $0x90] sm:$0xff] (!%p1256_p4)   ;;  %245 = vst [vmem:[#allocation4] sm:$0x1] (!%p1256_p4), %v1664_v0 }
  0x12   : > { %1470 = vmatpush3.bf16.msra.mxu1 (!%p1256_p4), %v1561_v3  ;;  %1407 = vmatprep.subr.bf16.mxu0 (!%p1256_p4), %v1562_v4  ;;  %v1570_v12 = vld [vmem:[%s1980_s1 + $0x58] sm:$0xff] (!%p1256_p4)   ;;  %v1574_v16 = vld [vmem:[%s1980_s1 + $0x60] sm:$0xff] (!%p1256_p4)   ;;  %v1578_v20 = vld [vmem:[%s1980_s1 + $0x68] sm:$0xff] (!%p1256_p4)  }
  0x13   : > { %1471 = vmatprep.subr.bf16.mxu1 (!%p1256_p4), %v1563_v5  ;;  %v1571_v13 = vld [vmem:[%s1980_s1 + $0xd8] sm:$0xff] (!%p1256_p4)   ;;  %v1575_v17 = vld [vmem:[%s1980_s1 + $0xe0] sm:$0xff] (!%p1256_p4)   ;;  %v1579_v21 = vld [vmem:[%s1980_s1 + $0xe8] sm:$0xff] (!%p1256_p4)  }
  0x14   : > { %v1572_v14 = vld [vmem:[%s1980_s1 + $0x18] sm:$0xff] (!%p1256_p4)   ;;  %v1576_v18 = vld [vmem:[%s1980_s1 + $0x20] sm:$0xff] (!%p1256_p4)   ;;  %v1580_v22 = vld [vmem:[%s1980_s1 + $0x28] sm:$0xff] (!%p1256_p4)  }
  0x15   : > { %1408 = vmatpush3.bf16.msra.mxu0 %v1564_v6  ;;  %v1573_v15 = vld [vmem:[%s1980_s1 + $0x98] sm:$0xff]   ;;  %v1577_v19 = vld [vmem:[%s1980_s1 + $0xa0] sm:$0xff]   ;;  %v1581_v23 = vld [vmem:[%s1980_s1 + $0xa8] sm:$0xff]  }
  0x16   : > { %1472 = vmatpush3.bf16.msra.mxu1 %v1565_v7  ;;  %1409 = vmatprep.subr.bf16.mxu0 %v1566_v8  ;;  %v1582_v24 = vld [vmem:[%s1980_s1 + $0x70] sm:$0xff]   ;;  %v1586_v28 = vld [vmem:[%s1980_s1 + $0x78] sm:$0xff]  }
  0x17   : > { %1473 = vmatprep.subr.bf16.mxu1 %v1567_v9  ;;  %v1583_v25 = vld [vmem:[%s1980_s1 + $0xf0] sm:$0xff]   ;;  %v1587_v29 = vld [vmem:[%s1980_s1 + $0xf8] sm:$0xff]  }
  0x18   : > { %v1584_v26 = vld [vmem:[%s1980_s1 + $0x30] sm:$0xff]   ;;  %v1588_v30 = vld [vmem:[%s1980_s1 + $0x38] sm:$0xff]  }
  0x19   : > { %1410 = vmatpush3.bf16.msra.mxu0 %v1568_v10  ;;  %v1585_v27 = vld [vmem:[%s1980_s1 + $0xb0] sm:$0xff]   ;;  %v1589_v31 = vld [vmem:[%s1980_s1 + $0xb8] sm:$0xff]  }
  0x1a   : > { %1474 = vmatpush3.bf16.msra.mxu1 %v1569_v11  ;;  %1411 = vmatprep.subr.bf16.mxu0 %v1570_v12  ;;  %v1590_v32 = vld [vmem:[%s1979_s0] ss:$16 sps:$4 sm:$0xff]   ;;  %v1592_v33 = vld [vmem:[%s1979_s0 + $0x4] ss:$16 sps:$4 sm:$0xff]   ;;  %v1593_v34 = vld [vmem:[%s1979_s0 + $0x8] ss:$16 sps:$4 sm:$0xff]  }
  0x1b   : > { %1475 = vmatprep.subr.bf16.mxu1 %v1571_v13  ;;  %v1595_v35 = vld [vmem:[%s1979_s0 + $0xc] ss:$16 sps:$4 sm:$0xff]   ;;  %726 = vmatprep.mubr.bf16.mxu0 %v1592_v33  ;;  %v1596_v36 = vld [vmem:[%s1979_s0 + $0x24] ss:$16 sps:$4 sm:$0xff]   ;;  %v1600_v38 = vld [vmem:[%s1979_s0 + $0x20] ss:$16 sps:$4 sm:$0xff]  }
  0x1c   : > { %823 = vmatprep.mubr.bf16.mxu1 %v1595_v35  ;;  %v1598_v37 = vld [vmem:[%s1979_s0 + $0x2c] ss:$16 sps:$4 sm:$0xff]   ;;  %v1601_v39 = vld [vmem:[%s1979_s0 + $0x28] ss:$16 sps:$4 sm:$0xff]   ;;  %v1602_v40 = vld [vmem:[%s1979_s0 + $0x44] ss:$16 sps:$4 sm:$0xff]  }
  0x1d   : > { %1412 = vmatpush3.bf16.msra.mxu0 %v1572_v14  ;;  %v1604_v41 = vld [vmem:[%s1979_s0 + $0x4c] ss:$16 sps:$4 sm:$0xff]   ;;  %v1606_v42 = vld [vmem:[%s1979_s0 + $0x40] ss:$16 sps:$4 sm:$0xff]   ;;  %v1607_v43 = vld [vmem:[%s1979_s0 + $0x48] ss:$16 sps:$4 sm:$0xff]  }
  0x1e   : > { %1476 = vmatpush3.bf16.msra.mxu1 %v1573_v15  ;;  %1413 = vmatprep.subr.bf16.mxu0 %v1574_v16  ;;  %v1608_v44 = vld [vmem:[%s1979_s0 + $0x64] ss:$16 sps:$4 sm:$0xff]   ;;  %v1610_v45 = vld [vmem:[%s1979_s0 + $0x6c] ss:$16 sps:$4 sm:$0xff]   ;;  %v1612_v46 = vld [vmem:[%s1979_s0 + $0x60] ss:$16 sps:$4 sm:$0xff]  }
  0x1f   : > { %1477 = vmatprep.subr.bf16.mxu1 %v1575_v17  ;;  %v1613_v47 = vld [vmem:[%s1979_s0 + $0x68] ss:$16 sps:$4 sm:$0xff]   ;;  %v1614_v48 = vld [vmem:[%s1979_s0 + $0x84] ss:$16 sps:$4 sm:$0xff]   ;;  %v1616_v49 = vld [vmem:[%s1979_s0 + $0x8c] ss:$16 sps:$4 sm:$0xff]  }
  0x20   : > { %v1618_v50 = vld [vmem:[%s1979_s0 + $0x80] ss:$16 sps:$4 sm:$0xff]   ;;  %v1619_v51 = vld [vmem:[%s1979_s0 + $0x88] ss:$16 sps:$4 sm:$0xff]   ;;  %v1620_v52 = vld [vmem:[%s1979_s0 + $0xa4] ss:$16 sps:$4 sm:$0xff]  }
  0x21   : > { %1414 = vmatpush3.bf16.msra.mxu0 %v1576_v18  ;;  %v1622_v53 = vld [vmem:[%s1979_s0 + $0xac] ss:$16 sps:$4 sm:$0xff]   ;;  %v1624_v54 = vld [vmem:[%s1979_s0 + $0xa0] ss:$16 sps:$4 sm:$0xff]   ;;  %v1625_v55 = vld [vmem:[%s1979_s0 + $0xa8] ss:$16 sps:$4 sm:$0xff]  }
  0x22   : > { %1478 = vmatpush3.bf16.msra.mxu1 %v1577_v19  ;;  %1415 = vmatprep.subr.bf16.mxu0 %v1578_v20  ;;  %v1626_v56 = vld [vmem:[%s1979_s0 + $0xc4] ss:$16 sps:$4 sm:$0xff]   ;;  %v1628_v57 = vld [vmem:[%s1979_s0 + $0xcc] ss:$16 sps:$4 sm:$0xff]   ;;  %v1630_v58 = vld [vmem:[%s1979_s0 + $0xc0] ss:$16 sps:$4 sm:$0xff]  }
  0x23   : > { %1479 = vmatprep.subr.bf16.mxu1 %v1579_v21  ;;  %v1631_v59 = vld [vmem:[%s1979_s0 + $0xc8] ss:$16 sps:$4 sm:$0xff]   ;;  %v1632_v60 = vld [vmem:[%s1979_s0 + $0xe4] ss:$16 sps:$4 sm:$0xff]   ;;  %v1634_v61 = vld [vmem:[%s1979_s0 + $0xec] ss:$16 sps:$4 sm:$0xff]  }
  0x24   : > { %v1636_v62 = vld [vmem:[%s1979_s0 + $0xe0] ss:$16 sps:$4 sm:$0xff]   ;;  %v1637_v63 = vld [vmem:[%s1979_s0 + $0xe8] ss:$16 sps:$4 sm:$0xff]  }
  0x25   : > { %1416 = vmatpush3.bf16.msra.mxu0 %v1580_v22 }
  0x26   : > { %1480 = vmatpush3.bf16.msra.mxu1 %v1581_v23  ;;  %1417 = vmatprep.subr.bf16.mxu0 %v1582_v24 }
  0x27   : > { %1481 = vmatprep.subr.bf16.mxu1 %v1583_v25 }
  0x29   : > { %1418 = vmatpush3.bf16.msra.mxu0 %v1584_v26 }
  0x2a   : > { %1482 = vmatpush3.bf16.msra.mxu1 %v1585_v27  ;;  %1419 = vmatprep.subr.bf16.mxu0 %v1586_v28 }
  0x2b   : > { %1483 = vmatprep.subr.bf16.mxu1 %v1587_v29 }
  0x2d   : > { %1420 = vmatpush3.bf16.msra.mxu0 %v1588_v30 }
  0x2e   : > { %1484 = vmatpush3.bf16.msra.mxu1 %v1589_v31 }
  0x30   : > { %727 = vmatmul.mubr.bf16.vlgmr.msra.gmra.mrb[0].mxu0 %v1590_v32 }
  0x31   : > { %824 = vmatmul.mubr.bf16.vlgmr.msra.gmra.mrb[0].mxu1 %v1593_v34  ;;  %734 = vmatprep.mubr.bf16.mxu0 %v1596_v36 }
  0x32   : > { %831 = vmatprep.mubr.bf16.mxu1 %v1598_v37 }
  0x38   : > { %735 = vmatmul.mubr.bf16.gmra.mrb[4].mxu0 %v1600_v38 }
  0x39   : > { %832 = vmatmul.mubr.bf16.gmra.mrb[4].mxu1 %v1601_v39  ;;  %742 = vmatprep.mubr.bf16.mxu0 %v1602_v40 }
  0x3a   : > { %839 = vmatprep.mubr.bf16.mxu1 %v1604_v41 }
  0x40   : > { %743 = vmatmul.mubr.bf16.gmra.mrb[8].mxu0 %v1606_v42 }
  0x41   : > { %840 = vmatmul.mubr.bf16.gmra.mrb[8].mxu1 %v1607_v43  ;;  %750 = vmatprep.mubr.bf16.mxu0 %v1608_v44 }
  0x42   : > { %847 = vmatprep.mubr.bf16.mxu1 %v1610_v45 }
  0x48   : > { %751 = vmatmul.mubr.bf16.gmra.mrb[12].mxu0 %v1612_v46 }
  0x49   : > { %848 = vmatmul.mubr.bf16.gmra.mrb[12].mxu1 %v1613_v47  ;;  %758 = vmatprep.mubr.bf16.mxu0 %v1614_v48 }
  0x4a   : > { %855 = vmatprep.mubr.bf16.mxu1 %v1616_v49 }
  0x50   : > { %759 = vmatmul.mubr.bf16.gmra.mrb[16].mxu0 %v1618_v50 }
  0x51   : > { %856 = vmatmul.mubr.bf16.gmra.mrb[16].mxu1 %v1619_v51  ;;  %766 = vmatprep.mubr.bf16.mxu0 %v1620_v52 }
  0x52   : > { %863 = vmatprep.mubr.bf16.mxu1 %v1622_v53 }
  0x58   : > { %767 = vmatmul.mubr.bf16.gmra.mrb[20].mxu0 %v1624_v54 }
  0x59   : > { %864 = vmatmul.mubr.bf16.gmra.mrb[20].mxu1 %v1625_v55  ;;  %774 = vmatprep.mubr.bf16.mxu0 %v1626_v56 }
  0x5a   : > { %871 = vmatprep.mubr.bf16.mxu1 %v1628_v57 }
  0x60   : > { %775 = vmatmul.mubr.bf16.gmra.mrb[24].mxu0 %v1630_v58 }
  0x61   : > { %872 = vmatmul.mubr.bf16.gmra.mrb[24].mxu1 %v1631_v59  ;;  %782 = vmatprep.mubr.bf16.mxu0 %v1632_v60 }
  0x62   : > { %879 = vmatprep.mubr.bf16.mxu1 %v1634_v61 }
  0x68   : > { %783 = vmatmul.mubr.bf16.gmra.mrb[28].mxu0 %v1636_v62 }
  0x69   : > { %880 = vmatmul.mubr.bf16.gmra.mrb[28].mxu1 %v1637_v63 }
 0x103   : > { %v1421_v1 = vpop.f32.mrb[0].mxu0 }
 0x104   : > { %v1485_v2 = vpop.f32.mrb[0].mxu1  ;;  %v1422_v3 = vpop.f32.mrb[1].mxu0 }
 0x105   : > { %v1423_v4 = vadd.f32 %v1422_v3, %v1421_v1  ;;  %v1486_v5 = vpop.f32.mrb[1].mxu1  ;;  %v1424_v6 = vpop.f32.mrb[2].mxu0 }
 0x106   : > { %v1487_v7 = vadd.f32 %v1486_v5, %v1485_v2  ;;  %v1488_v8 = vpop.f32.mrb[2].mxu1  ;;  %v1425_v9 = vpop.f32.mrb[3].mxu0 }
 0x107   : > { %v1426_v10 = vadd.f32 %v1425_v9, %v1424_v6  ;;  %v1489_v11 = vpop.f32.mrb[3].mxu1 }
 0x108   : > { %v826_v12 = vadd.f32 %v1487_v7, %v1423_v4  ;;  %v1490_v13 = vadd.f32 %v1489_v11, %v1488_v8 }
 0x10a   : > { %890 = vst [vmem:[#allocation2] sm:$0xff] %v826_v12  ;;  %v829_v14 = vadd.f32 %v1490_v13, %v1426_v10  ;;  %v931_v16 = vmul.f32 %v826_v12, %v826_v12 }
 0x10b   : > { %v1427_v15 = vpop.f32.mrb[4].mxu0 }
 0x10c   : > { %891 = vst [vmem:[#allocation2 + $0x8] sm:$0xff] %v829_v14  ;;  %v907_v17 = vadd.f32 %v829_v14, %v826_v12  ;;  %v932_v18 = vmul.f32 %v829_v14, %v829_v14  ;;  %v1491_v19 = vpop.f32.mrb[4].mxu1  ;;  %v1428_v20 = vpop.f32.mrb[5].mxu0 }
 0x10d   : > { %v1429_v21 = vadd.f32 %v1428_v20, %v1427_v15  ;;  %v1492_v22 = vpop.f32.mrb[5].mxu1  ;;  %v1430_v23 = vpop.f32.mrb[6].mxu0 }
 0x10e   : > { %v947_v24 = vadd.f32 %v932_v18, %v931_v16  ;;  %v1493_v25 = vadd.f32 %v1492_v22, %v1491_v19  ;;  %v1494_v26 = vpop.f32.mrb[6].mxu1  ;;  %v1431_v27 = vpop.f32.mrb[7].mxu0 }
 0x10f   : > { %v1432_v28 = vadd.f32 %v1431_v27, %v1430_v23  ;;  %v1495_v29 = vpop.f32.mrb[7].mxu1 }
 0x110   : > { %v834_v30 = vadd.f32 %v1493_v25, %v1429_v21  ;;  %v1496_v31 = vadd.f32 %v1495_v29, %v1494_v26 }
 0x112   : > { %892 = vst [vmem:[#allocation2 + $0x10] sm:$0xff] %v834_v30  ;;  %v908_v32 = vadd.f32 %v907_v17, %v834_v30  ;;  %v933_v33 = vmul.f32 %v834_v30, %v834_v30  ;;  %v837_v34 = vadd.f32 %v1496_v31, %v1432_v28 }
 0x113   : > { %v1433_v35 = vpop.f32.mrb[8].mxu0 }
 0x114   : > { %v948_v36 = vadd.f32 %v947_v24, %v933_v33  ;;  %893 = vst [vmem:[#allocation2 + $0x18] sm:$0xff] %v837_v34  ;;  %v909_v37 = vadd.f32 %v908_v32, %v837_v34  ;;  %v934_v38 = vmul.f32 %v837_v34, %v837_v34  ;;  %v1497_v39 = vpop.f32.mrb[8].mxu1  ;;  %v1434_v40 = vpop.f32.mrb[9].mxu0 }
 0x115   : > { %v1435_v41 = vadd.f32 %v1434_v40, %v1433_v35  ;;  %v1498_v42 = vpop.f32.mrb[9].mxu1  ;;  %v1436_v43 = vpop.f32.mrb[10].mxu0 }
 0x116   : > { %v949_v44 = vadd.f32 %v948_v36, %v934_v38  ;;  %v1499_v45 = vadd.f32 %v1498_v42, %v1497_v39  ;;  %v1500_v46 = vpop.f32.mrb[10].mxu1  ;;  %v1437_v47 = vpop.f32.mrb[11].mxu0 }
 0x117   : > { %v1438_v48 = vadd.f32 %v1437_v47, %v1436_v43  ;;  %v1501_v49 = vpop.f32.mrb[11].mxu1 }
 0x118   : > { %v842_v50 = vadd.f32 %v1499_v45, %v1435_v41  ;;  %v1502_v51 = vadd.f32 %v1501_v49, %v1500_v46 }
 0x11a   : > { %894 = vst [vmem:[#allocation2 + $0x20] sm:$0xff] %v842_v50  ;;  %v910_v52 = vadd.f32 %v909_v37, %v842_v50  ;;  %v935_v53 = vmul.f32 %v842_v50, %v842_v50  ;;  %v845_v54 = vadd.f32 %v1502_v51, %v1438_v48 }
 0x11b   : > { %v1439_v55 = vpop.f32.mrb[12].mxu0 }
 0x11c   : > { %v950_v56 = vadd.f32 %v949_v44, %v935_v53  ;;  %895 = vst [vmem:[#allocation2 + $0x28] sm:$0xff] %v845_v54  ;;  %v911_v57 = vadd.f32 %v910_v52, %v845_v54  ;;  %v936_v58 = vmul.f32 %v845_v54, %v845_v54  ;;  %v1503_v59 = vpop.f32.mrb[12].mxu1  ;;  %v1440_v60 = vpop.f32.mrb[13].mxu0 }
 0x11d   : > { %v1441_v61 = vadd.f32 %v1440_v60, %v1439_v55  ;;  %v1504_v62 = vpop.f32.mrb[13].mxu1  ;;  %v1442_v63 = vpop.f32.mrb[14].mxu0 }
 0x11e   : > { %v951_v0 = vadd.f32 %v950_v56, %v936_v58  ;;  %v1505_v1 = vadd.f32 %v1504_v62, %v1503_v59  ;;  %v1506_v2 = vpop.f32.mrb[14].mxu1  ;;  %v1443_v3 = vpop.f32.mrb[15].mxu0 }
 0x11f   : > { %v1444_v4 = vadd.f32 %v1443_v3, %v1442_v63  ;;  %v1507_v5 = vpop.f32.mrb[15].mxu1 }
 0x120   : > { %v850_v6 = vadd.f32 %v1505_v1, %v1441_v61  ;;  %v1508_v7 = vadd.f32 %v1507_v5, %v1506_v2 }
 0x122   : > { %896 = vst [vmem:[#allocation2 + $0x30] sm:$0xff] %v850_v6  ;;  %v912_v8 = vadd.f32 %v911_v57, %v850_v6  ;;  %v937_v9 = vmul.f32 %v850_v6, %v850_v6  ;;  %v853_v10 = vadd.f32 %v1508_v7, %v1444_v4 }
 0x123   : > { %v1445_v11 = vpop.f32.mrb[16].mxu0 }
 0x124   : > { %v952_v12 = vadd.f32 %v951_v0, %v937_v9  ;;  %897 = vst [vmem:[#allocation2 + $0x38] sm:$0xff] %v853_v10  ;;  %v913_v13 = vadd.f32 %v912_v8, %v853_v10  ;;  %v938_v14 = vmul.f32 %v853_v10, %v853_v10  ;;  %v1509_v15 = vpop.f32.mrb[16].mxu1  ;;  %v1446_v16 = vpop.f32.mrb[17].mxu0 }
 0x125   : > { %v1447_v17 = vadd.f32 %v1446_v16, %v1445_v11  ;;  %v1510_v18 = vpop.f32.mrb[17].mxu1  ;;  %v1448_v19 = vpop.f32.mrb[18].mxu0 }
 0x126   : > { %v953_v20 = vadd.f32 %v952_v12, %v938_v14  ;;  %v1511_v21 = vadd.f32 %v1510_v18, %v1509_v15  ;;  %v1512_v22 = vpop.f32.mrb[18].mxu1  ;;  %v1449_v23 = vpop.f32.mrb[19].mxu0 }
 0x127   : > { %v1450_v24 = vadd.f32 %v1449_v23, %v1448_v19  ;;  %v1513_v25 = vpop.f32.mrb[19].mxu1 }
 0x128   : > { %v858_v26 = vadd.f32 %v1511_v21, %v1447_v17  ;;  %v1514_v27 = vadd.f32 %v1513_v25, %v1512_v22 }
 0x12a   : > { %898 = vst [vmem:[#allocation2 + $0x40] sm:$0xff] %v858_v26  ;;  %v914_v28 = vadd.f32 %v913_v13, %v858_v26  ;;  %v939_v29 = vmul.f32 %v858_v26, %v858_v26  ;;  %v861_v30 = vadd.f32 %v1514_v27, %v1450_v24 }
 0x12b   : > { %v1451_v31 = vpop.f32.mrb[20].mxu0 }
 0x12c   : > { %v954_v32 = vadd.f32 %v953_v20, %v939_v29  ;;  %899 = vst [vmem:[#allocation2 + $0x48] sm:$0xff] %v861_v30  ;;  %v915_v33 = vadd.f32 %v914_v28, %v861_v30  ;;  %v940_v34 = vmul.f32 %v861_v30, %v861_v30  ;;  %v1515_v35 = vpop.f32.mrb[20].mxu1  ;;  %v1452_v36 = vpop.f32.mrb[21].mxu0 }
 0x12d   : > { %v1453_v37 = vadd.f32 %v1452_v36, %v1451_v31  ;;  %v1516_v38 = vpop.f32.mrb[21].mxu1  ;;  %v1454_v39 = vpop.f32.mrb[22].mxu0 }
 0x12e   : > { %v955_v40 = vadd.f32 %v954_v32, %v940_v34  ;;  %v1517_v41 = vadd.f32 %v1516_v38, %v1515_v35  ;;  %v1518_v42 = vpop.f32.mrb[22].mxu1  ;;  %v1455_v43 = vpop.f32.mrb[23].mxu0 }
 0x12f   : > { %v1456_v44 = vadd.f32 %v1455_v43, %v1454_v39  ;;  %v1519_v45 = vpop.f32.mrb[23].mxu1  ;;  %v930_v43 = vld [vmem:[#allocation4] sm:$0x1] }
 0x130   : > { %v866_v46 = vadd.f32 %v1517_v41, %v1453_v37  ;;  %v1520_v47 = vadd.f32 %v1519_v45, %v1518_v42 }
 0x132   : > { %900 = vst [vmem:[#allocation2 + $0x50] sm:$0xff] %v866_v46  ;;  %v916_v48 = vadd.f32 %v915_v33, %v866_v46  ;;  %v941_v49 = vmul.f32 %v866_v46, %v866_v46  ;;  %v869_v50 = vadd.f32 %v1520_v47, %v1456_v44 }
 0x133   : > { %v1457_v51 = vpop.f32.mrb[24].mxu0 }
 0x134   : > { %v956_v52 = vadd.f32 %v955_v40, %v941_v49  ;;  %901 = vst [vmem:[#allocation2 + $0x58] sm:$0xff] %v869_v50  ;;  %v917_v53 = vadd.f32 %v916_v48, %v869_v50  ;;  %v942_v54 = vmul.f32 %v869_v50, %v869_v50  ;;  %v1521_v55 = vpop.f32.mrb[24].mxu1  ;;  %v1458_v56 = vpop.f32.mrb[25].mxu0  ;;  %v906_v40 = vld [vmem:[#allocation3] sm:$0x1] }
 0x135   : > { %v1459_v57 = vadd.f32 %v1458_v56, %v1457_v51  ;;  %v1522_v58 = vpop.f32.mrb[25].mxu1  ;;  %v1460_v59 = vpop.f32.mrb[26].mxu0 }
 0x136   : > { %v957_v60 = vadd.f32 %v956_v52, %v942_v54  ;;  %v1523_v61 = vadd.f32 %v1522_v58, %v1521_v55  ;;  %v1524_v62 = vpop.f32.mrb[26].mxu1  ;;  %v1461_v63 = vpop.f32.mrb[27].mxu0 }
 0x137   : > { %v1462_v0 = vadd.f32 %v1461_v63, %v1460_v59  ;;  %v1525_v1 = vpop.f32.mrb[27].mxu1 }
 0x138   : > { %v874_v2 = vadd.f32 %v1523_v61, %v1459_v57  ;;  %v1526_v3 = vadd.f32 %v1525_v1, %v1524_v62 }
 0x13a   : > { %902 = vst [vmem:[#allocation2 + $0x60] sm:$0xff] %v874_v2  ;;  %v918_v4 = vadd.f32 %v917_v53, %v874_v2  ;;  %v943_v5 = vmul.f32 %v874_v2, %v874_v2  ;;  %v877_v6 = vadd.f32 %v1526_v3, %v1462_v0 }
 0x13b   : > { %v1463_v7 = vpop.f32.mrb[28].mxu0 }
 0x13c   : > { %v958_v8 = vadd.f32 %v957_v60, %v943_v5  ;;  %903 = vst [vmem:[#allocation2 + $0x68] sm:$0xff] %v877_v6  ;;  %v919_v9 = vadd.f32 %v918_v4, %v877_v6  ;;  %v944_v10 = vmul.f32 %v877_v6, %v877_v6  ;;  %v1527_v11 = vpop.f32.mrb[28].mxu1  ;;  %v1464_v12 = vpop.f32.mrb[29].mxu0 }
 0x13d   : > { %v1465_v13 = vadd.f32 %v1464_v12, %v1463_v7  ;;  %v1528_v14 = vpop.f32.mrb[29].mxu1  ;;  %v1466_v15 = vpop.f32.mrb[30].mxu0 }
 0x13e   : > { %v959_v16 = vadd.f32 %v958_v8, %v944_v10  ;;  %v1529_v17 = vadd.f32 %v1528_v14, %v1527_v11  ;;  %v1530_v18 = vpop.f32.mrb[30].mxu1  ;;  %v1467_v19 = vpop.f32.mrb[31].mxu0 }
 0x13f   : > { %v1468_v20 = vadd.f32 %v1467_v19, %v1466_v15  ;;  %v1531_v21 = vpop.f32.mrb[31].mxu1 }
 0x140   : > { %v882_v22 = vadd.f32 %v1529_v17, %v1465_v13  ;;  %v1532_v23 = vadd.f32 %v1531_v21, %v1530_v18 }
 0x142   : > { %904 = vst [vmem:[#allocation2 + $0x70] sm:$0xff] %v882_v22  ;;  %v920_v24 = vadd.f32 %v919_v9, %v882_v22  ;;  %v945_v25 = vmul.f32 %v882_v22, %v882_v22  ;;  %v885_v26 = vadd.f32 %v1532_v23, %v1468_v20 }
 0x144   : > { %v960_v27 = vadd.f32 %v959_v16, %v945_v25  ;;  %905 = vst [vmem:[#allocation2 + $0x78] sm:$0xff] %v885_v26  ;;  %v921_v28 = vadd.f32 %v920_v24, %v885_v26  ;;  %v946_v29 = vmul.f32 %v885_v26, %v885_v26 }
 0x146   : > { %v922_v30 = vrot.slane %v921_v28, 4  ;;  %v961_v31 = vadd.f32 %v960_v27, %v946_v29 }
 0x148   : > { %v923_v32 = vadd.f32 %v922_v30, %v921_v28  ;;  %v962_v33 = vrot.slane %v961_v31, 4 }
 0x14a   : > { %v924_v34 = vrot.slane %v923_v32, 2  ;;  %v963_v35 = vadd.f32 %v962_v33, %v961_v31 }
 0x14c   : > { %v925_v36 = vadd.f32 %v924_v34, %v923_v32  ;;  %v964_v37 = vrot.slane %v963_v35, 2 }
 0x14e   : > { %v926_v38 = vrot.slane %v925_v36, 1  ;;  %v965_v39 = vadd.f32 %v964_v37, %v963_v35 }
 0x150   : > { %v927_v41 = vadd.f32 %v926_v38, %v925_v36  ;;  %v966_v42 = vrot.slane %v965_v39, 1 }
 0x152   : > { %v928_v44 = vadd.f32 %v927_v41, %v906_v40  ;;  %v967_v45 = vadd.f32 %v966_v42, %v965_v39 }
 0x154   : > { %929 = vst [vmem:[#allocation3] sm:$0x1] %v928_v44  ;;  %v968_v46 = vadd.f32 %v967_v45, %v930_v43 }
 0x156   : > { %969 = vst [vmem:[#allocation4] sm:$0x1] %v968_v46 }
 0x157 PF: > { %p1321_p5 = scmp.ne.s32.totalorder %s1654_s15, 1 }
 0x158   : > { %v1007_v55 = vlaneseq (!%p1321_p5)  ;;  %v981_v57 = vld [vmem:[%s1981_s2] sm:$0x1] (!%p1321_p5)  ;;  %v991_v63 = vld [vmem:[#allocation2 + $0x8] sm:$0xff] (!%p1321_p5)  ;;  %v992_v0 = vld [vmem:[#allocation2 + $0x10] sm:$0xff] (!%p1321_p5) }
 0x159   : > { %973 = sbr.rel (%p1321_p5) target bundleno = 402 (0x192), region = 48  ;;  %v985_v61 = vld [vmem:[%s1982_s3] sm:$0x1] (!%p1321_p5)  ;;  %v993_v1 = vld [vmem:[#allocation2 + $0x18] sm:$0xff] (!%p1321_p5)  ;;  %v995_v5 = vld [vmem:[#allocation2 + $0x28] sm:$0xff] (!%p1321_p5) }
 0x15a   : > { %v1008_v56 = vshrl.u32 (!%p1321_p5), %v1007_v55, 7  ;;  %v990_v62 = vld [vmem:[#allocation2] sm:$0xff] (!%p1321_p5)  ;;  %v996_v6 = vld [vmem:[#allocation2 + $0x30] sm:$0xff] (!%p1321_p5)  ;;  %v997_v7 = vld [vmem:[#allocation2 + $0x38] sm:$0xff] (!%p1321_p5) }
 0x15b   : > { %v974_v47 = vld [vmem:[#allocation3] sm:$0x1] (!%p1321_p5)  ;;  %v999_v9 = vld [vmem:[#allocation2 + $0x48] sm:$0xff] (!%p1321_p5)  ;;  %v1000_v10 = vld [vmem:[#allocation2 + $0x50] sm:$0xff] (!%p1321_p5) }
 0x15c   : > { %v975_v49 = vmul.f32 (!%p1321_p5), 0.0078125, %v974_v47  ;;  %v1009_v58 = vsub.s32 (!%p1321_p5), 0, %v1008_v56  ;;  %v994_v2 = vld [vmem:[#allocation2 + $0x20] sm:$0xff] (!%p1321_p5)  ;;  %v1001_v15 = vld [vmem:[#allocation2 + $0x58] sm:$0xff] (!%p1321_p5)  ;;  %v1003_v17 = vld [vmem:[#allocation2 + $0x68] sm:$0xff] (!%p1321_p5) }
 0x15d   : > { %v976_v48 = vld [vmem:[#allocation4] sm:$0x1] (!%p1321_p5) }
 0x15e   : > { %v977_v50 = vmul.f32 (!%p1321_p5), 0.0078125, %v976_v48  ;;  %v978_v51 = vmul.f32 (!%p1321_p5), %v975_v49, %v975_v49  ;;  %v998_v8 = vld [vmem:[#allocation2 + $0x40] sm:$0xff] (!%p1321_p5) }
 0x15f   : > { %v1002_v16 = vld [vmem:[#allocation2 + $0x60] sm:$0xff] (!%p1321_p5) }
 0x160   : > { %v979_v52 = vsub.f32 %v977_v50, %v978_v51 }
 0x162   : > { %v980_v53 = vmax.f32 %v979_v52, 0.0 }
 0x164   : > { %v982_v54 = vadd.f32 1e-05, %v980_v53 }
 0x166   : > { %1638 = vrsqrt.f32 %v982_v54 }
 0x170   : > { %v1639_v59 = vpop.eup %1638 }
 0x171   : > { %v984_v60 = vmul.f32 %v1639_v59, %v981_v57 }
 0x173   : > { %v986_v3 = vmul.f32 %v984_v60, %v975_v49  ;;  %v1910_v4 = vrot.slane %v984_v60, %v1009_v58 }
 0x175   : > { %v987_v11 = vsub.f32 %v985_v61, %v986_v3  ;;  %v1012_v12 = vmul.f32 %v1910_v4, %v990_v62  ;;  %v1013_v13 = vmul.f32 %v1910_v4, %v991_v63  ;;  %v1014_v14 = vmul.f32 %v1910_v4, %v992_v0  ;;  %v1004_v0 = vld [vmem:[#allocation2 + $0x70] sm:$0xff] }
 0x176   : > { %v1015_v18 = vmul.f32 %v1910_v4, %v993_v1  ;;  %v1016_v19 = vmul.f32 %v1910_v4, %v994_v2  ;;  %v1017_v20 = vmul.f32 %v1910_v4, %v995_v5  ;;  %v1018_v21 = vmul.f32 %v1910_v4, %v996_v6 }
 0x177   : > { %v1919_v22 = vrot.slane %v987_v11, %v1009_v58  ;;  %v1019_v23 = vmul.f32 %v1910_v4, %v997_v7  ;;  %v1020_v24 = vmul.f32 %v1910_v4, %v998_v8  ;;  %v1021_v25 = vmul.f32 %v1910_v4, %v999_v9  ;;  %v1005_v8 = vld [vmem:[#allocation2 + $0x78] sm:$0xff] }
 0x178   : > { %v1022_v26 = vmul.f32 %v1910_v4, %v1000_v10  ;;  %v1023_v27 = vmul.f32 %v1910_v4, %v1001_v15  ;;  %v1024_v28 = vmul.f32 %v1910_v4, %v1002_v16  ;;  %v1025_v29 = vmul.f32 %v1910_v4, %v1003_v17 }
 0x179   : > { %v1034_v30 = vadd.f32 %v1919_v22, %v1012_v12  ;;  %v1035_v31 = vadd.f32 %v1919_v22, %v1013_v13  ;;  %v1036_v32 = vadd.f32 %v1919_v22, %v1014_v14  ;;  %v1037_v33 = vadd.f32 %v1919_v22, %v1015_v18 }
 0x17a   : > { %v1038_v34 = vadd.f32 %v1919_v22, %v1016_v19  ;;  %v1039_v35 = vadd.f32 %v1919_v22, %v1017_v20  ;;  %v1040_v36 = vadd.f32 %v1919_v22, %v1018_v21  ;;  %v1041_v37 = vadd.f32 %v1919_v22, %v1019_v23 }
 0x17b   : > { %vm1050_vm0 = vcmp.ge.f32.partialorder %v1034_v30, 0.0  ;;  %vm1051_vm1 = vcmp.ge.f32.partialorder %v1035_v31, 0.0  ;;  %v1066_v38 = vmul.f32 0.2, %v1034_v30  ;;  %v1067_v39 = vmul.f32 0.2, %v1035_v31 }
 0x17c   : > { %vm1052_vm2 = vcmp.ge.f32.partialorder %v1036_v32, 0.0  ;;  %vm1053_vm3 = vcmp.ge.f32.partialorder %v1037_v33, 0.0  ;;  %v1068_v40 = vmul.f32 0.2, %v1036_v32  ;;  %v1069_v41 = vmul.f32 0.2, %v1037_v33 }
 0x17d   : > { %v1082_v42 = vsel %vm1050_vm0, %v1034_v30, %v1066_v38  ;;  %v1083_v43 = vsel %vm1051_vm1, %v1035_v31, %v1067_v39  ;;  %vm1054_vm4 = vcmp.ge.f32.partialorder %v1038_v34, 0.0  ;;  %vm1055_vm5 = vcmp.ge.f32.partialorder %v1039_v35, 0.0 }
 0x17e   : > { %v1361_v44 = vpack.c.bf16 %v1083_v43, %v1082_v42  ;;  %v1084_v45 = vsel %vm1052_vm2, %v1036_v32, %v1068_v40  ;;  %v1085_v46 = vsel %vm1053_vm3, %v1037_v33, %v1069_v41  ;;  %v1070_v47 = vmul.f32 0.2, %v1038_v34 }
 0x17f   : > { %v1366_v48 = vpack.c.bf16 %v1085_v46, %v1084_v45  ;;  %v1071_v49 = vmul.f32 0.2, %v1039_v35  ;;  %vm1056_vm6 = vcmp.ge.f32.partialorder %v1040_v36, 0.0  ;;  %vm1057_vm7 = vcmp.ge.f32.partialorder %v1041_v37, 0.0 }
 0x180   : > { %1362 = vst [vmem:[%s1983_s4] sm:$0xff] %v1361_v44   ;;  %v1086_v50 = vsel %vm1054_vm4, %v1038_v34, %v1070_v47  ;;  %v1072_v51 = vmul.f32 0.2, %v1040_v36  ;;  %v1073_v52 = vmul.f32 0.2, %v1041_v37  ;;  %v1042_v53 = vadd.f32 %v1919_v22, %v1020_v24 }
 0x181   : > { %1398 = vst [vmem:[%s1983_s4 + $0x8] sm:$0xff] %v1366_v48   ;;  %v1087_v54 = vsel %vm1055_vm5, %v1039_v35, %v1071_v49  ;;  %v1043_v55 = vadd.f32 %v1919_v22, %v1021_v25  ;;  %v1044_v56 = vadd.f32 %v1919_v22, %v1022_v26  ;;  %v1045_v57 = vadd.f32 %v1919_v22, %v1023_v27 }
 0x182   : > { %v1371_v58 = vpack.c.bf16 %v1087_v54, %v1086_v50  ;;  %v1088_v59 = vsel %vm1056_vm6, %v1040_v36, %v1072_v51  ;;  %v1089_v60 = vsel %vm1057_vm7, %v1041_v37, %v1073_v52  ;;  %vm1058_vm8 = vcmp.ge.f32.partialorder %v1042_v53, 0.0 }
 0x183   : > { %v1376_v61 = vpack.c.bf16 %v1089_v60, %v1088_v59  ;;  %vm1059_vm9 = vcmp.ge.f32.partialorder %v1043_v55, 0.0  ;;  %v1074_v62 = vmul.f32 0.2, %v1042_v53  ;;  %v1075_v63 = vmul.f32 0.2, %v1043_v55 }
 0x184   : > { %1399 = vst [vmem:[%s1983_s4 + $0x10] sm:$0xff] %v1371_v58   ;;  %vm1060_vm10 = vcmp.ge.f32.partialorder %v1044_v56, 0.0  ;;  %vm1061_vm11 = vcmp.ge.f32.partialorder %v1045_v57, 0.0  ;;  %v1076_v1 = vmul.f32 0.2, %v1044_v56  ;;  %v1046_v6 = vadd.f32 %v1919_v22, %v1024_v28 }
 0x185   : > { %v1077_v2 = vmul.f32 0.2, %v1045_v57  ;;  %1400 = vst [vmem:[%s1983_s4 + $0x18] sm:$0xff] %v1376_v61   ;;  %v1090_v3 = vsel %vm1058_vm8, %v1042_v53, %v1074_v62  ;;  %v1091_v5 = vsel %vm1059_vm9, %v1043_v55, %v1075_v63  ;;  %v1047_v7 = vadd.f32 %v1919_v22, %v1025_v29 }
 0x186   : > { %v1381_v9 = vpack.c.bf16 %v1091_v5, %v1090_v3  ;;  %v1092_v10 = vsel %vm1060_vm10, %v1044_v56, %v1076_v1  ;;  %v1026_v12 = vmul.f32 %v1910_v4, %v1004_v0  ;;  %vm1062_vm12 = vcmp.ge.f32.partialorder %v1046_v6, 0.0 }
 0x187   : > { %v1093_v11 = vsel %vm1061_vm11, %v1045_v57, %v1077_v2  ;;  %vm1063_vm13 = vcmp.ge.f32.partialorder %v1047_v7, 0.0  ;;  %v1078_v14 = vmul.f32 0.2, %v1046_v6  ;;  %v1079_v15 = vmul.f32 0.2, %v1047_v7 }
 0x188   : > { %v1386_v13 = vpack.c.bf16 %v1093_v11, %v1092_v10  ;;  %1401 = vst [vmem:[%s1983_s4 + $0x20] sm:$0xff] %v1381_v9   ;;  %v1027_v16 = vmul.f32 %v1910_v4, %v1005_v8  ;;  %v1048_v17 = vadd.f32 %v1919_v22, %v1026_v12 }
 0x189   : > { %v1094_v18 = vsel %vm1062_vm12, %v1046_v6, %v1078_v14  ;;  %v1095_v19 = vsel %vm1063_vm13, %v1047_v7, %v1079_v15 }
 0x18a   : > { %1402 = vst [vmem:[%s1983_s4 + $0x28] sm:$0xff] %v1386_v13   ;;  %v1049_v20 = vadd.f32 %v1919_v22, %v1027_v16  ;;  %vm1064_vm14 = vcmp.ge.f32.partialorder %v1048_v17, 0.0  ;;  %v1080_v21 = vmul.f32 0.2, %v1048_v17  ;;  %v1391_v23 = vpack.c.bf16 %v1095_v19, %v1094_v18 }
 0x18c   : > { %vm1065_vm15 = vcmp.ge.f32.partialorder %v1049_v20, 0.0  ;;  %v1081_v24 = vmul.f32 0.2, %v1049_v20  ;;  %v1096_v25 = vsel %vm1064_vm14, %v1048_v17, %v1080_v21  ;;  %1403 = vst [vmem:[%s1983_s4 + $0x30] sm:$0xff] %v1391_v23  }
 0x18e   : > { %v1097_v4 = vsel %vm1065_vm15, %v1049_v20, %v1081_v24 }
 0x18f   : > { %v1396_v26 = vpack.c.bf16 %v1097_v4, %v1096_v25 }
 0x191   : > { %1404 = vst [vmem:[%s1983_s4 + $0x38] sm:$0xff] %v1396_v26  }
 0x192 PF: > { %s14_s17 = sadd.s32 1, %s1662_s17   ;;  %s1984_s15 = smov %s1658_s16 }
 0x193   : > { %p11_p6 = scmp.ge.s32.totalorder %s14_s17, 4   ;;  %s1985_s16 = smov %s1987_s18 }
 0x195   :  { %13 = sbr.rel (!%p11_p6) target bundleno = 2 (0x2), region = 80 }

// kernel: discriminator_forward.9
= control target key start
LH: loop header
LB: loop body
LE: loop exit
PB: predicated region body
PF: predicated region fallthrough
CT: control target
= control target key end

     0   :  { %v27_v0 = vlaneseq  ;;  %v403_v3 = vmov 1983009808   ;;  %vm351_vm0 = vcmask 1041408   ;;  %vm391_vm1 = vcmask 1024   ;;  %s468_s1 = inlined_call_operand.vmem [shape: bf16[1,2048], index: 1, kind: input, shape index: {}]   ;;  %s469_s0 = inlined_call_operand.vmem [shape: bf16[2,2048], index: 0, kind: input, shape index: {}]   ;;  %s470_s2 = inlined_call_operand.vmem [shape: f32[2,1], index: 2, kind: output, shape index: {}]  }
   0x1   :  { %v17_v1 = vld [vmem:[%s468_s1] sm:$0xff]  ;;  %v18_v2 = vld [vmem:[%s468_s1 + $0x8] sm:$0xff]  ;;  %v190_v4 = vunpack.c.l.s4 %v403_v3 }
   0x2   :  { %v19_v5 = vunpack.c.l.bf16 %v17_v1  ;;  %v28_v6 = vshrl.u32 %v27_v0, 7  ;;  %v20_v7 = vunpack.c.h.bf16 %v17_v1  ;;  %v21_v8 = vunpack.c.l.bf16 %v18_v2  ;;  %v11_v28 = vld [vmem:[%s469_s0] sm:$0xff]  ;;  %v12_v1 = vld [vmem:[%s469_s0 + $0x8] sm:$0xff] }
   0x3   :  { %v191_v13 = vunpack.c.0.s8 %v190_v4  ;;  %v22_v26 = vunpack.c.h.bf16 %v18_v2  ;;  %v13_v41 = vunpack.c.l.bf16 %v11_v28  ;;  %v14_v42 = vunpack.c.h.bf16 %v11_v28 }
   0x4   :  { %v29_v9 = vsub.s32 0, %v28_v6  ;;  %v33_v10 = vsub.s32 2, %v28_v6  ;;  %v37_v11 = vsub.s32 4, %v28_v6  ;;  %v41_v12 = vsub.s32 6, %v28_v6 }
   0x5   :  { %v425_v27 = vsub.s32 %v191_v13, %v28_v6  ;;  %v15_v6 = vunpack.c.l.bf16 %v12_v1  ;;  %v16_v28 = vunpack.c.h.bf16 %v12_v1 }
   0x6   :  { %v30_v14 = vrot.slane %v19_v5, %v29_v9  ;;  %v34_v15 = vrot.slane %v19_v5, %v33_v10  ;;  %v38_v16 = vrot.slane %v19_v5, %v37_v11  ;;  %v42_v17 = vrot.slane %v19_v5, %v41_v12 }
   0x7   :  { %v46_v18 = vrot.slane %v20_v7, %v29_v9  ;;  %v50_v19 = vrot.slane %v20_v7, %v33_v10  ;;  %v54_v20 = vrot.slane %v20_v7, %v37_v11  ;;  %v58_v21 = vrot.slane %v20_v7, %v41_v12 }
   0x8   :  { %v62_v22 = vrot.slane %v21_v8, %v29_v9  ;;  %v66_v23 = vrot.slane %v21_v8, %v33_v10  ;;  %v70_v24 = vrot.slane %v21_v8, %v37_v11  ;;  %v74_v25 = vrot.slane %v21_v8, %v41_v12 }
   0x9   :  { %v110_v29 = vrot.slane %v30_v14, %v29_v9  ;;  %v114_v30 = vrot.slane %v34_v15, %v29_v9  ;;  %v118_v31 = vrot.slane %v38_v16, %v29_v9  ;;  %v122_v32 = vrot.slane %v42_v17, %v29_v9 }
   0xa   :  { %v126_v33 = vrot.slane %v46_v18, %v29_v9  ;;  %v130_v34 = vrot.slane %v50_v19, %v29_v9  ;;  %v134_v35 = vrot.slane %v54_v20, %v29_v9  ;;  %v138_v36 = vrot.slane %v58_v21, %v29_v9 }
   0xb   :  { %v142_v37 = vrot.slane %v62_v22, %v29_v9  ;;  %v146_v38 = vrot.slane %v66_v23, %v29_v9  ;;  %v150_v39 = vrot.slane %v70_v24, %v29_v9  ;;  %v154_v40 = vrot.slane %v74_v25, %v29_v9 }
   0xc   :  { %v78_v43 = vrot.slane %v22_v26, %v29_v9  ;;  %v82_v44 = vrot.slane %v22_v26, %v33_v10  ;;  %v187_v45 = vcombine.low %v110_v29, %v114_v30  ;;  %v188_v46 = vcombine.low %v118_v31, %v122_v32 }
   0xd   :  { %v204_v47 = vcombine.low %v126_v33, %v130_v34  ;;  %v205_v48 = vcombine.low %v134_v35, %v138_v36  ;;  %v86_v49 = vrot.slane %v22_v26, %v37_v11  ;;  %v90_v50 = vrot.slane %v22_v26, %v41_v12 }
   0xe   :  { %v221_v51 = vcombine.low %v142_v37, %v146_v38  ;;  %v222_v52 = vcombine.low %v150_v39, %v154_v40  ;;  %v195_v53 = vrot.slane %v187_v45, %v425_v27  ;;  %v202_v54 = vrot.slane %v188_v46, %v425_v27 }
   0xf   :  { %v212_v55 = vrot.slane %v204_v47, %v425_v27  ;;  %v219_v56 = vrot.slane %v205_v48, %v425_v27  ;;  %v158_v57 = vrot.slane %v78_v43, %v29_v9  ;;  %v162_v58 = vrot.slane %v82_v44, %v29_v9 }
  0x10   :  { %v203_v59 = vcombine.low %v195_v53, %v202_v54  ;;  %v166_v61 = vrot.slane %v86_v49, %v29_v9  ;;  %v170_v62 = vrot.slane %v90_v50, %v29_v9  ;;  %v229_v63 = vrot.slane %v221_v51, %v425_v27 }
  0x11   :  { %v220_v60 = vcombine.low %v212_v55, %v219_v56  ;;  %v236_v0 = vrot.slane %v222_v52, %v425_v27  ;;  %v238_v8 = vcombine.low %v158_v57, %v162_v58 }
  0x12   :  { %v259_v2 = vmul.f32 %v203_v59, %v13_v41  ;;  %v239_v10 = vcombine.low %v166_v61, %v170_v62 }
  0x13   :  { %v260_v3 = vmul.f32 %v220_v60, %v14_v42  ;;  %v237_v7 = vcombine.low %v229_v63, %v236_v0  ;;  %v246_v17 = vrot.slane %v238_v8, %v425_v27 }
  0x14   :  { %v267_v4 = vcombine.high %v259_v2, %v259_v2  ;;  %v274_v5 = vrot.slane %v259_v2, %v425_v27  ;;  %v253_v18 = vrot.slane %v239_v10, %v425_v27 }
  0x15   :  { %v284_v12 = vcombine.high %v260_v3, %v260_v3  ;;  %v291_v13 = vrot.slane %v260_v3, %v425_v27  ;;  %v261_v21 = vmul.f32 %v237_v7, %v15_v6 }
  0x16   :  { %v281_v9 = vrot.slane %v267_v4, %v425_v27  ;;  %v282_v11 = vcombine.high %v274_v5, %v274_v5  ;;  %v352_v15 = vsel %vm351_vm0, %v274_v5, 0.0  ;;  %v254_v29 = vcombine.low %v246_v17, %v253_v18 }
  0x17   :  { %v298_v22 = vrot.slane %v284_v12, %v425_v27  ;;  %v299_v23 = vcombine.high %v291_v13, %v291_v13  ;;  %v359_v26 = vsel %vm351_vm0, %v291_v13, 0.0  ;;  %v301_v32 = vcombine.high %v261_v21, %v261_v21 }
  0x18   :  { %v283_v14 = vcombine.high %v281_v9, %v281_v9  ;;  %v353_v16 = vsel %vm351_vm0, %v282_v11, 0.0  ;;  %v355_v20 = vsel %vm351_vm0, %v281_v9, 0.0  ;;  %v308_v33 = vrot.slane %v261_v21, %v425_v27 }
  0x19   :  { %v354_v19 = vadd.f32 %v353_v16, %v352_v15  ;;  %v300_v31 = vcombine.high %v298_v22, %v298_v22  ;;  %v361_v34 = vsel %vm351_vm0, %v299_v23, 0.0  ;;  %v363_v36 = vsel %vm351_vm0, %v298_v22, 0.0 }
  0x1a   :  { %v357_v24 = vsel %vm351_vm0, %v283_v14, 0.0  ;;  %v262_v38 = vmul.f32 %v254_v29, %v16_v28  ;;  %v315_v39 = vrot.slane %v301_v32, %v425_v27  ;;  %v316_v40 = vcombine.high %v308_v33, %v308_v33 }
  0x1b   :  { %v356_v25 = vadd.f32 %v355_v20, %v354_v19  ;;  %v365_v41 = vsel %vm351_vm0, %v300_v31, 0.0  ;;  %v367_v43 = vsel %vm351_vm0, %v308_v33, 0.0 }
  0x1c   :  { %v317_v45 = vcombine.high %v315_v39, %v315_v39  ;;  %v318_v46 = vcombine.high %v262_v38, %v262_v38  ;;  %v325_v47 = vrot.slane %v262_v38, %v425_v27  ;;  %v369_v48 = vsel %vm351_vm0, %v316_v40, 0.0 }
  0x1d   :  { %v358_v30 = vadd.f32 %v357_v24, %v356_v25  ;;  %v371_v50 = vsel %vm351_vm0, %v315_v39, 0.0 }
  0x1e   :  { %v332_v52 = vrot.slane %v318_v46, %v425_v27  ;;  %v333_v53 = vcombine.high %v325_v47, %v325_v47  ;;  %v373_v54 = vsel %vm351_vm0, %v317_v45, 0.0  ;;  %v375_v56 = vsel %vm351_vm0, %v325_v47, 0.0 }
  0x1f   :  { %v360_v35 = vadd.f32 %v359_v26, %v358_v30 }
  0x20   :  { %v334_v58 = vcombine.high %v332_v52, %v332_v52  ;;  %v377_v59 = vsel %vm351_vm0, %v333_v53, 0.0  ;;  %v379_v61 = vsel %vm351_vm0, %v332_v52, 0.0 }
  0x21   :  { %v362_v37 = vadd.f32 %v361_v34, %v360_v35 }
  0x22   :  { %v381_v63 = vsel %vm351_vm0, %v334_v58, 0.0 }
  0x23   :  { %v364_v42 = vadd.f32 %v363_v36, %v362_v37 }
  0x25   :  { %v366_v44 = vadd.f32 %v365_v41, %v364_v42 }
  0x27   :  { %v368_v49 = vadd.f32 %v367_v43, %v366_v44 }
  0x29   :  { %v370_v51 = vadd.f32 %v369_v48, %v368_v49 }
  0x2b   :  { %v372_v55 = vadd.f32 %v371_v50, %v370_v51 }
  0x2d   :  { %v374_v57 = vadd.f32 %v373_v54, %v372_v55 }
  0x2f   :  { %v376_v60 = vadd.f32 %v375_v56, %v374_v57 }
  0x31   :  { %v378_v62 = vadd.f32 %v377_v59, %v376_v60 }
  0x33   :  { %v380_v0 = vadd.f32 %v379_v61, %v378_v62 }
  0x35   :  { %v382_v1 = vadd.f32 %v381_v63, %v380_v0 }
  0x37   :  { %383 = vadd.xlane.f32.xlu0 %v382_v1 }
  0xc4   :  { %v384_v27 = vpop.xlane.xlu0 %383 }
  0xc5   :  { %v397_v2 = vmul.f32 -1.442695, %v384_v27 }
  0xc7   :  { %399 = vpow2.f32 %v397_v2 }
  0xd1   :  { %v400_v3 = vpop.eup %399 }
  0xd2   :  { %v388_v4 = vadd.f32 1.0, %v400_v3 }
  0xd4   :  { %401 = vrcp.f32 %v388_v4 }
  0xde   :  { %v402_v5 = vpop.eup %401 }
  0xdf   :  { %392 = vst.msk [vmem:[%s470_s2] sm:$0x3] %vm391_vm1, %v402_v5 }

// kernel: discriminator_forward.8
= control target key start
LH: loop header
LB: loop body
LE: loop exit
PB: predicated region body
PF: predicated region fallthrough
CT: control target
= control target key end

     0   :  { %s1596_s15 = smov 0   ;;  %s1598_s16 = smov 0   ;;  %s1879_s0 = inlined_call_operand.vmem [shape: bf16[32,1024], index: 0, kind: input, shape index: {}]   ;;  %s1880_s1 = inlined_call_operand.vmem [shape: bf16[1024,128], index: 1, kind: input, shape index: {}]   ;;  %s1881_s2 = inlined_call_operand.vmem [shape: f32[1,128], index: 2, kind: input, shape index: {}]   ;;  %s1882_s3 = inlined_call_operand.vmem [shape: f32[1,128], index: 3, kind: input, shape index: {}]   ;;  %s1883_s4 = inlined_call_operand.vmem [shape: bf16[32,128], index: 4, kind: output, shape index: {}]  }
   0x1   :  { %s1600_s17 = smov 0  }
   0x2 LB: > { %s26_s18 = sadd.s32 1, %s1564_s16  ;;  %p1237_p0 = scmp.ge.s32.totalorder %s1568_s17, 1  ;;  %s1568_s17 = sphi %s1600_s17, %s14_s17   ;;  %s1564_s16 = sphi %s1598_s16, %s1885_s16   ;;  %s1560_s15 = sphi %s1596_s15, %s1884_s15  }
   0x3   : > { %p28_p1 = scmp.ge.s32.totalorder %s26_s18, 2  ;;  %p186_p2 = scmp.lt.s32.totalorder %s1568_s17, 3 }
   0x5   : > { %s1887_s18 = smov (%p28_p1, %s26_s18), 0  ;;  %p187_p3 = pnand %p1237_p0, %p186_p2 }
   0x6   : > { %p1238_p4 = scmp.ne.s32.totalorder (!%p187_p3), %s1560_s15, 0 }
   0x7   : > { %190 = sbr.rel (%p187_p3) target bundleno = 371 (0x173), region = 36 }
   0xe   : > { %239 = sbr.rel (%p1238_p4) target bundleno = 328 (0x148), region = 40  ;;  %v1480_v0 = vld [vmem:[%s1880_s1 + $0x40] sm:$0xff] (!%p1238_p4)   ;;  %v1484_v4 = vld [vmem:[%s1880_s1 + $0x48] sm:$0xff] (!%p1238_p4)   ;;  %v1488_v8 = vld [vmem:[%s1880_s1 + $0x50] sm:$0xff] (!%p1238_p4)  }
   0xf   : > { %v1481_v1 = vld [vmem:[%s1880_s1 + $0xc0] sm:$0xff] (!%p1238_p4)   ;;  %1343 = vmatprep.subr.bf16.mxu0 (!%p1238_p4), %v1480_v0  ;;  %v1485_v5 = vld [vmem:[%s1880_s1 + $0xc8] sm:$0xff] (!%p1238_p4)   ;;  %v1489_v9 = vld [vmem:[%s1880_s1 + $0xd0] sm:$0xff] (!%p1238_p4)  }
  0x10   : > { %v1482_v2 = vld [vmem:[%s1880_s1] sm:$0xff] (!%p1238_p4)   ;;  %1371 = vmatprep.subr.bf16.mxu1 (!%p1238_p4), %v1481_v1  ;;  %v1486_v6 = vld [vmem:[%s1880_s1 + $0x8] sm:$0xff] (!%p1238_p4)   ;;  %v1490_v10 = vld [vmem:[%s1880_s1 + $0x10] sm:$0xff] (!%p1238_p4)  }
  0x11   : > { %v1483_v3 = vld [vmem:[%s1880_s1 + $0x80] sm:$0xff] (!%p1238_p4)   ;;  %1344 = vmatpush3.bf16.msra.mxu0 (!%p1238_p4), %v1482_v2  ;;  %v1487_v7 = vld [vmem:[%s1880_s1 + $0x88] sm:$0xff] (!%p1238_p4)   ;;  %v1491_v11 = vld [vmem:[%s1880_s1 + $0x90] sm:$0xff] (!%p1238_p4)  }
  0x12   : > { %1372 = vmatpush3.bf16.msra.mxu1 (!%p1238_p4), %v1483_v3  ;;  %1345 = vmatprep.subr.bf16.mxu0 (!%p1238_p4), %v1484_v4  ;;  %v1492_v12 = vld [vmem:[%s1880_s1 + $0x58] sm:$0xff] (!%p1238_p4)   ;;  %v1496_v16 = vld [vmem:[%s1880_s1 + $0x60] sm:$0xff] (!%p1238_p4)   ;;  %v1500_v20 = vld [vmem:[%s1880_s1 + $0x68] sm:$0xff] (!%p1238_p4)  }
  0x13   : > { %1373 = vmatprep.subr.bf16.mxu1 (!%p1238_p4), %v1485_v5  ;;  %v1493_v13 = vld [vmem:[%s1880_s1 + $0xd8] sm:$0xff] (!%p1238_p4)   ;;  %v1497_v17 = vld [vmem:[%s1880_s1 + $0xe0] sm:$0xff] (!%p1238_p4)   ;;  %v1501_v21 = vld [vmem:[%s1880_s1 + $0xe8] sm:$0xff] (!%p1238_p4)  }
  0x14   : > { %v1494_v14 = vld [vmem:[%s1880_s1 + $0x18] sm:$0xff] (!%p1238_p4)   ;;  %v1498_v18 = vld [vmem:[%s1880_s1 + $0x20] sm:$0xff] (!%p1238_p4)   ;;  %v1502_v22 = vld [vmem:[%s1880_s1 + $0x28] sm:$0xff] (!%p1238_p4)  }
  0x15   : > { %1346 = vmatpush3.bf16.msra.mxu0 %v1486_v6  ;;  %v1495_v15 = vld [vmem:[%s1880_s1 + $0x98] sm:$0xff]   ;;  %v1499_v19 = vld [vmem:[%s1880_s1 + $0xa0] sm:$0xff]   ;;  %v1503_v23 = vld [vmem:[%s1880_s1 + $0xa8] sm:$0xff]  }
  0x16   : > { %1374 = vmatpush3.bf16.msra.mxu1 %v1487_v7  ;;  %1347 = vmatprep.subr.bf16.mxu0 %v1488_v8  ;;  %v1504_v24 = vld [vmem:[%s1880_s1 + $0x70] sm:$0xff]   ;;  %v1508_v28 = vld [vmem:[%s1880_s1 + $0x78] sm:$0xff]   ;;  %v246_v32 = vld [vmem:[%s1879_s0] sm:$0xff] }
  0x17   : > { %1375 = vmatprep.subr.bf16.mxu1 %v1489_v9  ;;  %v1505_v25 = vld [vmem:[%s1880_s1 + $0xf0] sm:$0xff]   ;;  %v1509_v29 = vld [vmem:[%s1880_s1 + $0xf8] sm:$0xff]   ;;  %v250_v33 = vld [vmem:[%s1879_s0 + $0x20] sm:$0xff] }
  0x18   : > { %v1506_v26 = vld [vmem:[%s1880_s1 + $0x30] sm:$0xff]   ;;  %v1510_v30 = vld [vmem:[%s1880_s1 + $0x38] sm:$0xff]   ;;  %v247_v34 = vld [vmem:[%s1879_s0 + $0x8] sm:$0xff]  ;;  %v1239_v35 = vcombine.low %v246_v32, %v250_v33  ;;  %v1240_v36 = vcombine.high %v246_v32, %v250_v33  ;;  %v1570_v32 = vmov 0.0  }
  0x19   : > { %1348 = vmatpush3.bf16.msra.mxu0 %v1490_v10  ;;  %v1507_v27 = vld [vmem:[%s1880_s1 + $0xb0] sm:$0xff]   ;;  %v1511_v31 = vld [vmem:[%s1880_s1 + $0xb8] sm:$0xff]   ;;  %v251_v37 = vld [vmem:[%s1879_s0 + $0x28] sm:$0xff]  ;;  %244 = vst [vmem:[#allocation3] sm:$0x1] %v1570_v32 }
  0x1a   : > { %1376 = vmatpush3.bf16.msra.mxu1 %v1491_v11  ;;  %1349 = vmatprep.subr.bf16.mxu0 %v1492_v12  ;;  %v1241_v38 = vcombine.low %v247_v34, %v251_v37  ;;  %v1242_v39 = vcombine.high %v247_v34, %v251_v37  ;;  %v1512_v40 = vld [vmem:[%s1880_s1 + $0x140] sm:$0xff]   ;;  %v1516_v44 = vld [vmem:[%s1880_s1 + $0x148] sm:$0xff]   ;;  %v1520_v48 = vld [vmem:[%s1880_s1 + $0x150] sm:$0xff]   ;;  %245 = vst [vmem:[#allocation4] sm:$0x1] %v1570_v32 }
  0x1b   : > { %1377 = vmatprep.subr.bf16.mxu1 %v1493_v13  ;;  %886 = vmatprep.mubr.bf16.mxu0 %v1240_v36  ;;  %v1513_v41 = vld [vmem:[%s1880_s1 + $0x1c0] sm:$0xff]   ;;  %v1517_v45 = vld [vmem:[%s1880_s1 + $0x1c8] sm:$0xff]   ;;  %v1521_v49 = vld [vmem:[%s1880_s1 + $0x1d0] sm:$0xff]  }
  0x1c   : > { %935 = vmatprep.mubr.bf16.mxu1 %v1242_v39  ;;  %v1514_v42 = vld [vmem:[%s1880_s1 + $0x100] sm:$0xff]   ;;  %v1518_v46 = vld [vmem:[%s1880_s1 + $0x108] sm:$0xff]   ;;  %v1522_v50 = vld [vmem:[%s1880_s1 + $0x110] sm:$0xff]  }
  0x1d   : > { %1350 = vmatpush3.bf16.msra.mxu0 %v1494_v14  ;;  %v1515_v43 = vld [vmem:[%s1880_s1 + $0x180] sm:$0xff]   ;;  %v1519_v47 = vld [vmem:[%s1880_s1 + $0x188] sm:$0xff]   ;;  %v1523_v51 = vld [vmem:[%s1880_s1 + $0x190] sm:$0xff]  }
  0x1e   : > { %1378 = vmatpush3.bf16.msra.mxu1 %v1495_v15  ;;  %1351 = vmatprep.subr.bf16.mxu0 %v1496_v16  ;;  %v1524_v52 = vld [vmem:[%s1880_s1 + $0x158] sm:$0xff]   ;;  %v1528_v56 = vld [vmem:[%s1880_s1 + $0x160] sm:$0xff]   ;;  %v255_v63 = vld [vmem:[%s1879_s0 + $0x48] sm:$0xff] }
  0x1f   : > { %1379 = vmatprep.subr.bf16.mxu1 %v1497_v17  ;;  %v1525_v53 = vld [vmem:[%s1880_s1 + $0x1d8] sm:$0xff]   ;;  %v1529_v57 = vld [vmem:[%s1880_s1 + $0x1e0] sm:$0xff]   ;;  %v259_v0 = vld [vmem:[%s1879_s0 + $0x68] sm:$0xff] }
  0x20   : > { %v1526_v54 = vld [vmem:[%s1880_s1 + $0x118] sm:$0xff]   ;;  %v1530_v58 = vld [vmem:[%s1880_s1 + $0x120] sm:$0xff]   ;;  %v1250_v2 = vcombine.high %v255_v63, %v259_v0  ;;  %v1532_v3 = vld [vmem:[%s1880_s1 + $0x168] sm:$0xff]   ;;  %v1249_v4 = vcombine.low %v255_v63, %v259_v0 }
  0x21   : > { %1352 = vmatpush3.bf16.msra.mxu0 %v1498_v18  ;;  %v1527_v55 = vld [vmem:[%s1880_s1 + $0x198] sm:$0xff]   ;;  %v1531_v59 = vld [vmem:[%s1880_s1 + $0x1a0] sm:$0xff]   ;;  %v1533_v5 = vld [vmem:[%s1880_s1 + $0x1e8] sm:$0xff]  }
  0x22   : > { %1380 = vmatpush3.bf16.msra.mxu1 %v1499_v19  ;;  %1353 = vmatprep.subr.bf16.mxu0 %v1500_v20  ;;  %v254_v60 = vld [vmem:[%s1879_s0 + $0x40] sm:$0xff]  ;;  %v1534_v6 = vld [vmem:[%s1880_s1 + $0x128] sm:$0xff]   ;;  %v1536_v8 = vld [vmem:[%s1880_s1 + $0x170] sm:$0xff]  }
  0x23   : > { %1381 = vmatprep.subr.bf16.mxu1 %v1501_v21  ;;  %v258_v61 = vld [vmem:[%s1879_s0 + $0x60] sm:$0xff]  ;;  %v1535_v7 = vld [vmem:[%s1880_s1 + $0x1a8] sm:$0xff]   ;;  %v1537_v9 = vld [vmem:[%s1880_s1 + $0x1f0] sm:$0xff]  }
  0x24   : > { %v1248_v62 = vcombine.high %v254_v60, %v258_v61  ;;  %v1247_v1 = vcombine.low %v254_v60, %v258_v61  ;;  %v1538_v10 = vld [vmem:[%s1880_s1 + $0x130] sm:$0xff]   ;;  %v1540_v12 = vld [vmem:[%s1880_s1 + $0x178] sm:$0xff]  }
  0x25   : > { %1354 = vmatpush3.bf16.msra.mxu0 %v1502_v22  ;;  %v1539_v11 = vld [vmem:[%s1880_s1 + $0x1b0] sm:$0xff]   ;;  %v1541_v13 = vld [vmem:[%s1880_s1 + $0x1f8] sm:$0xff]  }
  0x26   : > { %1382 = vmatpush3.bf16.msra.mxu1 %v1503_v23  ;;  %1355 = vmatprep.subr.bf16.mxu0 %v1504_v24  ;;  %v1542_v14 = vld [vmem:[%s1880_s1 + $0x138] sm:$0xff]   ;;  %v248_v16 = vld [vmem:[%s1879_s0 + $0x10] sm:$0xff] }
  0x27   : > { %1383 = vmatprep.subr.bf16.mxu1 %v1505_v25  ;;  %v1543_v15 = vld [vmem:[%s1880_s1 + $0x1b8] sm:$0xff]   ;;  %v252_v17 = vld [vmem:[%s1879_s0 + $0x30] sm:$0xff] }
  0x28   : > { %v249_v18 = vld [vmem:[%s1879_s0 + $0x18] sm:$0xff]  ;;  %v1243_v20 = vcombine.low %v248_v16, %v252_v17  ;;  %v1244_v21 = vcombine.high %v248_v16, %v252_v17  ;;  %v256_v24 = vld [vmem:[%s1879_s0 + $0x50] sm:$0xff] }
  0x29   : > { %1356 = vmatpush3.bf16.msra.mxu0 %v1506_v26  ;;  %v253_v19 = vld [vmem:[%s1879_s0 + $0x38] sm:$0xff]  ;;  %v260_v25 = vld [vmem:[%s1879_s0 + $0x70] sm:$0xff] }
  0x2a   : > { %1384 = vmatpush3.bf16.msra.mxu1 %v1507_v27  ;;  %1357 = vmatprep.subr.bf16.mxu0 %v1508_v28  ;;  %v1245_v22 = vcombine.low %v249_v18, %v253_v19  ;;  %v1246_v23 = vcombine.high %v249_v18, %v253_v19  ;;  %v257_v26 = vld [vmem:[%s1879_s0 + $0x58] sm:$0xff]  ;;  %v1252_v27 = vcombine.high %v256_v24, %v260_v25 }
  0x2b   : > { %1385 = vmatprep.subr.bf16.mxu1 %v1509_v29  ;;  %v261_v28 = vld [vmem:[%s1879_s0 + $0x78] sm:$0xff] }
  0x2c   : > { %v1254_v29 = vcombine.high %v257_v26, %v261_v28 }
  0x2d   : > { %1358 = vmatpush3.bf16.msra.mxu0 %v1510_v30  ;;  %v1251_v30 = vcombine.low %v256_v24, %v260_v25 }
  0x2e   : > { %1386 = vmatpush3.bf16.msra.mxu1 %v1511_v31  ;;  %1399 = vmatprep.subr.bf16.mxu0 %v1512_v40  ;;  %v1253_v31 = vcombine.low %v257_v26, %v261_v28 }
  0x2f   : > { %1427 = vmatprep.subr.bf16.mxu1 %v1513_v41 }
  0x30   : > { %887 = vmatmul.mubr.bf16.vlgmr.msra.gmra.mrb[0].mxu0 %v1239_v35 }
  0x31   : > { %936 = vmatmul.mubr.bf16.vlgmr.msra.gmra.mrb[0].mxu1 %v1241_v38  ;;  %1400 = vmatpush3.bf16.msra.mxu0 %v1514_v42 }
  0x32   : > { %1428 = vmatpush3.bf16.msra.mxu1 %v1515_v43  ;;  %1401 = vmatprep.subr.bf16.mxu0 %v1516_v44 }
  0x33   : > { %1429 = vmatprep.subr.bf16.mxu1 %v1517_v45  ;;  %894 = vmatprep.mubr.bf16.mxu0 %v1248_v62 }
  0x34   : > { %943 = vmatprep.mubr.bf16.mxu1 %v1250_v2 }
  0x35   : > { %1402 = vmatpush3.bf16.msra.mxu0 %v1518_v46 }
  0x36   : > { %1430 = vmatpush3.bf16.msra.mxu1 %v1519_v47  ;;  %1403 = vmatprep.subr.bf16.mxu0 %v1520_v48 }
  0x37   : > { %1431 = vmatprep.subr.bf16.mxu1 %v1521_v49 }
  0x38   : > { %895 = vmatmul.mubr.bf16.gmra.mrb[4].mxu0 %v1247_v1 }
  0x39   : > { %1404 = vmatpush3.bf16.msra.mxu0 %v1522_v50  ;;  %944 = vmatmul.mubr.bf16.gmra.mrb[4].mxu1 %v1249_v4 }
  0x3a   : > { %1432 = vmatpush3.bf16.msra.mxu1 %v1523_v51  ;;  %1405 = vmatprep.subr.bf16.mxu0 %v1524_v52 }
  0x3b   : > { %1433 = vmatprep.subr.bf16.mxu1 %v1525_v53  ;;  %984 = vmatprep.mubr.bf16.mxu0 %v1244_v21 }
  0x3c   : > { %1033 = vmatprep.mubr.bf16.mxu1 %v1246_v23 }
  0x3d   : > { %1406 = vmatpush3.bf16.msra.mxu0 %v1526_v54 }
  0x3e   : > { %1434 = vmatpush3.bf16.msra.mxu1 %v1527_v55  ;;  %1407 = vmatprep.subr.bf16.mxu0 %v1528_v56 }
  0x3f   : > { %1435 = vmatprep.subr.bf16.mxu1 %v1529_v57 }
  0x41   : > { %1408 = vmatpush3.bf16.msra.mxu0 %v1530_v58 }
  0x42   : > { %1436 = vmatpush3.bf16.msra.mxu1 %v1531_v59  ;;  %1409 = vmatprep.subr.bf16.mxu0 %v1532_v3 }
  0x43   : > { %1437 = vmatprep.subr.bf16.mxu1 %v1533_v5 }
  0x45   : > { %1410 = vmatpush3.bf16.msra.mxu0 %v1534_v6 }
  0x46   : > { %1438 = vmatpush3.bf16.msra.mxu1 %v1535_v7  ;;  %1411 = vmatprep.subr.bf16.mxu0 %v1536_v8 }
  0x47   : > { %1439 = vmatprep.subr.bf16.mxu1 %v1537_v9 }
  0x49   : > { %1412 = vmatpush3.bf16.msra.mxu0 %v1538_v10 }
  0x4a   : > { %1440 = vmatpush3.bf16.msra.mxu1 %v1539_v11  ;;  %1413 = vmatprep.subr.bf16.mxu0 %v1540_v12 }
  0x4b   : > { %1441 = vmatprep.subr.bf16.mxu1 %v1541_v13 }
  0x4d   : > { %1414 = vmatpush3.bf16.msra.mxu0 %v1542_v14 }
  0x4e   : > { %1442 = vmatpush3.bf16.msra.mxu1 %v1543_v15 }
  0x50   : > { %985 = vmatmul.mubr.bf16.vlgmr.msra.gmra.mrb[8].mxu0 %v1243_v20 }
  0x51   : > { %1034 = vmatmul.mubr.bf16.vlgmr.msra.gmra.mrb[8].mxu1 %v1245_v22  ;;  %992 = vmatprep.mubr.bf16.mxu0 %v1252_v27 }
  0x52   : > { %1041 = vmatprep.mubr.bf16.mxu1 %v1254_v29 }
  0x58   : > { %993 = vmatmul.mubr.bf16.gmra.mrb[12].mxu0 %v1251_v30 }
  0x59   : > { %1042 = vmatmul.mubr.bf16.gmra.mrb[12].mxu1 %v1253_v31 }
 0x103   : > { %v1359_v33 = vpop.f32.mrb[0].mxu0 }
 0x104   : > { %v1387_v34 = vpop.f32.mrb[0].mxu1  ;;  %v1360_v35 = vpop.f32.mrb[1].mxu0 }
 0x105   : > { %v1361_v36 = vadd.f32 %v1360_v35, %v1359_v33  ;;  %v1388_v37 = vpop.f32.mrb[1].mxu1  ;;  %v1362_v38 = vpop.f32.mrb[2].mxu0 }
 0x106   : > { %v1389_v39 = vadd.f32 %v1388_v37, %v1387_v34  ;;  %v1390_v40 = vpop.f32.mrb[2].mxu1  ;;  %v1363_v41 = vpop.f32.mrb[3].mxu0 }
 0x107   : > { %v1364_v42 = vadd.f32 %v1363_v41, %v1362_v38  ;;  %v1391_v43 = vpop.f32.mrb[3].mxu1 }
 0x108   : > { %v938_v44 = vadd.f32 %v1389_v39, %v1361_v36  ;;  %v1392_v45 = vadd.f32 %v1391_v43, %v1390_v40 }
 0x10a   : > { %v941_v46 = vadd.f32 %v1392_v45, %v1364_v42 }
 0x10b   : > { %v1365_v47 = vpop.f32.mrb[4].mxu0 }
 0x10c   : > { %v1393_v48 = vpop.f32.mrb[4].mxu1  ;;  %v1366_v49 = vpop.f32.mrb[5].mxu0 }
 0x10d   : > { %v1367_v50 = vadd.f32 %v1366_v49, %v1365_v47  ;;  %v1394_v51 = vpop.f32.mrb[5].mxu1  ;;  %v1368_v52 = vpop.f32.mrb[6].mxu0 }
 0x10e   : > { %v1395_v53 = vadd.f32 %v1394_v51, %v1393_v48  ;;  %v1396_v54 = vpop.f32.mrb[6].mxu1  ;;  %v1369_v55 = vpop.f32.mrb[7].mxu0  ;;  %v1056_v48 = vld [vmem:[#allocation3] sm:$0x1]  ;;  %v1068_v51 = vld [vmem:[#allocation4] sm:$0x1] }
 0x10f   : > { %v1370_v56 = vadd.f32 %v1369_v55, %v1368_v52  ;;  %v1397_v57 = vpop.f32.mrb[7].mxu1 }
 0x110   : > { %v946_v58 = vadd.f32 %v1395_v53, %v1367_v50  ;;  %v1398_v59 = vadd.f32 %v1397_v57, %v1396_v54 }
 0x112   : > { %v949_v60 = vadd.f32 %v1398_v59, %v1370_v56 }
 0x123   : > { %v1415_v61 = vpop.f32.mrb[8].mxu0 }
 0x124   : > { %v1443_v62 = vpop.f32.mrb[8].mxu1  ;;  %v1416_v63 = vpop.f32.mrb[9].mxu0 }
 0x125   : > { %v1444_v0 = vpop.f32.mrb[9].mxu1  ;;  %v1417_v1 = vadd.f32 %v1416_v63, %v1415_v61  ;;  %v1418_v3 = vpop.f32.mrb[10].mxu0 }
 0x126   : > { %v1445_v2 = vadd.f32 %v1444_v0, %v1443_v62  ;;  %v1446_v4 = vpop.f32.mrb[10].mxu1  ;;  %v1419_v5 = vpop.f32.mrb[11].mxu0 }
 0x127   : > { %v1447_v6 = vpop.f32.mrb[11].mxu1  ;;  %v987_v7 = vadd.f32 %v1417_v1, %v938_v44  ;;  %v1420_v8 = vadd.f32 %v1419_v5, %v1418_v3 }
 0x128   : > { %v1448_v9 = vadd.f32 %v1447_v6, %v1446_v4 }
 0x129   : > { %v1036_v10 = vadd.f32 %v1445_v2, %v987_v7  ;;  %v990_v11 = vadd.f32 %v1420_v8, %v941_v46 }
 0x12b   : > { %1052 = vst [vmem:[#allocation2] sm:$0xff] %v1036_v10  ;;  %v1039_v12 = vadd.f32 %v1448_v9, %v990_v11  ;;  %v1421_v13 = vpop.f32.mrb[12].mxu0  ;;  %v1069_v15 = vmul.f32 %v1036_v10, %v1036_v10 }
 0x12c   : > { %v1449_v14 = vpop.f32.mrb[12].mxu1  ;;  %v1422_v16 = vpop.f32.mrb[13].mxu0 }
 0x12d   : > { %v1450_v17 = vpop.f32.mrb[13].mxu1  ;;  %1053 = vst [vmem:[#allocation2 + $0x8] sm:$0xff] %v1039_v12  ;;  %v1057_v18 = vadd.f32 %v1039_v12, %v1036_v10  ;;  %v1070_v19 = vmul.f32 %v1039_v12, %v1039_v12  ;;  %v1423_v20 = vadd.f32 %v1422_v16, %v1421_v13  ;;  %v1424_v22 = vpop.f32.mrb[14].mxu0 }
 0x12e   : > { %v1451_v21 = vadd.f32 %v1450_v17, %v1449_v14  ;;  %v1452_v23 = vpop.f32.mrb[14].mxu1  ;;  %v1425_v24 = vpop.f32.mrb[15].mxu0 }
 0x12f   : > { %v1453_v25 = vpop.f32.mrb[15].mxu1  ;;  %v1073_v26 = vadd.f32 %v1070_v19, %v1069_v15  ;;  %v995_v27 = vadd.f32 %v1423_v20, %v946_v58  ;;  %v1426_v28 = vadd.f32 %v1425_v24, %v1424_v22 }
 0x130   : > { %v1454_v29 = vadd.f32 %v1453_v25, %v1452_v23 }
 0x131   : > { %v1044_v30 = vadd.f32 %v1451_v21, %v995_v27  ;;  %v998_v31 = vadd.f32 %v1426_v28, %v949_v60 }
 0x133   : > { %1054 = vst [vmem:[#allocation2 + $0x10] sm:$0xff] %v1044_v30  ;;  %v1058_v32 = vadd.f32 %v1057_v18, %v1044_v30  ;;  %v1071_v33 = vmul.f32 %v1044_v30, %v1044_v30  ;;  %v1047_v34 = vadd.f32 %v1454_v29, %v998_v31 }
 0x135   : > { %v1074_v35 = vadd.f32 %v1073_v26, %v1071_v33  ;;  %1055 = vst [vmem:[#allocation2 + $0x18] sm:$0xff] %v1047_v34  ;;  %v1059_v36 = vadd.f32 %v1058_v32, %v1047_v34  ;;  %v1072_v37 = vmul.f32 %v1047_v34, %v1047_v34 }
 0x137   : > { %v1060_v38 = vrot.slane %v1059_v36, 4  ;;  %v1075_v39 = vadd.f32 %v1074_v35, %v1072_v37 }
 0x139   : > { %v1061_v40 = vadd.f32 %v1060_v38, %v1059_v36  ;;  %v1076_v41 = vrot.slane %v1075_v39, 4 }
 0x13b   : > { %v1062_v42 = vrot.slane %v1061_v40, 2  ;;  %v1077_v43 = vadd.f32 %v1076_v41, %v1075_v39 }
 0x13d   : > { %v1063_v44 = vadd.f32 %v1062_v42, %v1061_v40  ;;  %v1078_v45 = vrot.slane %v1077_v43, 2 }
 0x13f   : > { %v1064_v46 = vrot.slane %v1063_v44, 1  ;;  %v1079_v47 = vadd.f32 %v1078_v45, %v1077_v43 }
 0x141   : > { %v1065_v49 = vadd.f32 %v1064_v46, %v1063_v44  ;;  %v1080_v50 = vrot.slane %v1079_v47, 1 }
 0x143   : > { %v1066_v52 = vadd.f32 %v1065_v49, %v1056_v48  ;;  %v1081_v53 = vadd.f32 %v1080_v50, %v1079_v47 }
 0x145   : > { %1067 = vst [vmem:[#allocation3] sm:$0x1] %v1066_v52  ;;  %v1082_v54 = vadd.f32 %v1081_v53, %v1068_v51 }
 0x147   : > { %1083 = vst [vmem:[#allocation4] sm:$0x1] %v1082_v54 }
 0x148 PF: > { %p1319_p5 = scmp.ne.s32.totalorder %s1560_s15, 1 }
 0x149   : > { %v1109_v63 = vlaneseq (!%p1319_p5)  ;;  %v1095_v1 = vld [vmem:[%s1881_s2] sm:$0x1] (!%p1319_p5)  ;;  %v1105_v7 = vld [vmem:[#allocation2 + $0x8] sm:$0xff] (!%p1319_p5)  ;;  %v1106_v8 = vld [vmem:[#allocation2 + $0x10] sm:$0xff] (!%p1319_p5) }
 0x14a   : > { %1087 = sbr.rel (%p1319_p5) target bundleno = 371 (0x173), region = 48  ;;  %v1099_v5 = vld [vmem:[%s1882_s3] sm:$0x1] (!%p1319_p5)  ;;  %v1107_v11 = vld [vmem:[#allocation2 + $0x18] sm:$0xff] (!%p1319_p5) }
 0x14b   : > { %v1110_v0 = vshrl.u32 (!%p1319_p5), %v1109_v63, 7  ;;  %v1104_v6 = vld [vmem:[#allocation2] sm:$0xff] (!%p1319_p5) }
 0x14c   : > { %v1088_v55 = vld [vmem:[#allocation3] sm:$0x1] (!%p1319_p5) }
 0x14d   : > { %v1089_v57 = vmul.f32 (!%p1319_p5), 0.03125, %v1088_v55  ;;  %v1111_v2 = vsub.s32 (!%p1319_p5), 0, %v1110_v0 }
 0x14e   : > { %v1090_v56 = vld [vmem:[#allocation4] sm:$0x1] (!%p1319_p5) }
 0x14f   : > { %v1091_v58 = vmul.f32 (!%p1319_p5), 0.03125, %v1090_v56  ;;  %v1092_v59 = vmul.f32 (!%p1319_p5), %v1089_v57, %v1089_v57 }
 0x151   : > { %v1093_v60 = vsub.f32 %v1091_v58, %v1092_v59 }
 0x153   : > { %v1094_v61 = vmax.f32 %v1093_v60, 0.0 }
 0x155   : > { %v1096_v62 = vadd.f32 1e-05, %v1094_v61 }
 0x157   : > { %1544 = vrsqrt.f32 %v1096_v62 }
 0x161   : > { %v1545_v3 = vpop.eup %1544 }
 0x162   : > { %v1098_v4 = vmul.f32 %v1545_v3, %v1095_v1 }
 0x164   : > { %v1100_v9 = vmul.f32 %v1098_v4, %v1089_v57  ;;  %v1112_v10 = vrot.slane %v1098_v4, %v1111_v2 }
 0x166   : > { %v1101_v12 = vsub.f32 %v1099_v5, %v1100_v9  ;;  %v1114_v13 = vmul.f32 %v1112_v10, %v1104_v6  ;;  %v1115_v14 = vmul.f32 %v1112_v10, %v1105_v7  ;;  %v1116_v15 = vmul.f32 %v1112_v10, %v1106_v8 }
 0x167   : > { %v1117_v16 = vmul.f32 %v1112_v10, %v1107_v11 }
 0x168   : > { %v1122_v17 = vrot.slane %v1101_v12, %v1111_v2 }
 0x16a   : > { %v1124_v18 = vadd.f32 %v1122_v17, %v1114_v13  ;;  %v1125_v19 = vadd.f32 %v1122_v17, %v1115_v14  ;;  %v1126_v20 = vadd.f32 %v1122_v17, %v1116_v15  ;;  %v1127_v21 = vadd.f32 %v1122_v17, %v1117_v16 }
 0x16c   : > { %vm1128_vm0 = vcmp.ge.f32.partialorder %v1124_v18, 0.0  ;;  %vm1129_vm1 = vcmp.ge.f32.partialorder %v1125_v19, 0.0  ;;  %v1132_v22 = vmul.f32 0.2, %v1124_v18  ;;  %v1133_v23 = vmul.f32 0.2, %v1125_v19 }
 0x16d   : > { %vm1130_vm2 = vcmp.ge.f32.partialorder %v1126_v20, 0.0  ;;  %vm1131_vm3 = vcmp.ge.f32.partialorder %v1127_v21, 0.0  ;;  %v1134_v24 = vmul.f32 0.2, %v1126_v20  ;;  %v1135_v25 = vmul.f32 0.2, %v1127_v21 }
 0x16e   : > { %v1136_v26 = vsel %vm1128_vm0, %v1124_v18, %v1132_v22  ;;  %v1137_v27 = vsel %vm1129_vm1, %v1125_v19, %v1133_v23 }
 0x16f   : > { %v1335_v28 = vpack.c.bf16 %v1137_v27, %v1136_v26  ;;  %v1138_v29 = vsel %vm1130_vm2, %v1126_v20, %v1134_v24  ;;  %v1139_v30 = vsel %vm1131_vm3, %v1127_v21, %v1135_v25 }
 0x170   : > { %v1340_v31 = vpack.c.bf16 %v1139_v30, %v1138_v29 }
 0x171   : > { %1336 = vst [vmem:[%s1883_s4] sm:$0xff] %v1335_v28  }
 0x172   : > { %1342 = vst [vmem:[%s1883_s4 + $0x8] sm:$0xff] %v1340_v31  }
 0x173 PF: > { %s14_s17 = sadd.s32 1, %s1568_s17   ;;  %s1884_s15 = smov %s1564_s16 }
 0x174   : > { %p11_p6 = scmp.ge.s32.totalorder %s14_s17, 4   ;;  %s1885_s16 = smov %s1887_s18 }
 0x176   :  { %13 = sbr.rel (!%p11_p6) target bundleno = 2 (0x2), region = 80 }

</bundles_post_ra>
